<compile_context>
chip_gen: v7x
topology: tpu7x:2x2x1
jax: 0.10.0
libtpu: 0.0.40
codegen_flags: <defaults>
</compile_context>

<pallas_src>
import functools

import jax
import jax.numpy as jnp
from jax.experimental import pallas as pl
from jax.experimental.pallas import tpu as pltpu

EPS = 1e-5   # BatchNorm1d default eps
K = 5        # Conv1d kernel size used throughout HarCNN


# ----------------------------------------------------------------------------------
# Kernel 1: one full IMU branch per grid step
# ----------------------------------------------------------------------------------
def _imu_feature_kernel(x_ref,
                        w1, b1, g1, be1,
                        w2, b2, g2, be2,
                        w3, b3, g3, be3,
                        w4, b4, g4, be4,
                        wl, bl,
                        o_ref,
                        cols_ref, act2_ref, act4_ref, flat_ref,
                        *, B, T):
    def bn_relu(y, n, g_ref, be_ref):
        # BatchNorm1d(momentum=None, track_running_stats=False): batch stats over
        # (batch, length) == rows of y, biased variance, then affine + ReLU.
        inv_n = 1.0 / float(n)
        mean = jnp.sum(y, axis=0, keepdims=True) * inv_n
        d = y - mean
        var = jnp.sum(d * d, axis=0, keepdims=True) * inv_n
        scale = jax.lax.rsqrt(var + EPS) * g_ref[0]
        return jnp.maximum(d * scale + be_ref[0], 0.0)

    def conv_layer(h_prev, l_in, w_ref, b_ref, g_ref, be_ref):
        # h_prev: (B*l_in, cin) batch-major rows.  Build the (B*Lout, K*cin) im2col tile
        # in VMEM scratch with static slice stores, then one MXU matmul.
        cin = w_ref.shape[1] // K
        l_out = l_in - K + 1
        for b in range(B):
            for k in range(K):
                cols_ref[b * l_out:(b + 1) * l_out, k * cin:(k + 1) * cin] = \
                    h_prev[b * l_in + k:b * l_in + k + l_out, :]
        cols = cols_ref[0:B * l_out, 0:K * cin]
        y = jnp.dot(cols, w_ref[0], preferred_element_type=jnp.float32) + b_ref[0]
        return bn_relu(y, B * l_out, g_ref, be_ref), l_out

    # --- layer 1: Conv1d(1, C1, 5) + BN + ReLU (im2col gathered from the raw signal) ---
    L1 = T - K + 1
    for b in range(B):
        for k in range(K):
            cols_ref[b * L1:(b + 1) * L1, k:k + 1] = x_ref[0, k:k + L1, b:b + 1]
    cols = cols_ref[0:B * L1, 0:K]                                       # (B*L1, 5)
    h = bn_relu(jnp.dot(cols, w1[0], preferred_element_type=jnp.float32) + b1[0],
                B * L1, g1, be1)

    # --- layer 2 ------------------------------------------------------------------
    h, L2 = conv_layer(h, L1, w2, b2, g2, be2)

    # --- MaxPool1d(2): store once, read even/odd rows back with stride 2 -----------
    act2_ref[...] = h
    L2p = L2 // 2
    h = jnp.maximum(act2_ref[pl.ds(0, B * L2p, stride=2), :],
                    act2_ref[pl.ds(1, B * L2p, stride=2), :])

    # --- layers 3 and 4 -------------------------------------------------------------
    h, L3 = conv_layer(h, L2p, w3, b3, g3, be3)
    h, L4 = conv_layer(h, L3, w4, b4, g4, be4)

    # --- MaxPool1d(2) + flatten + Linear(26*C4, 512) + ReLU --------------------------
    # Flatten is length-major; wl rows were pre-permuted at pack time so this matches
    # PyTorch's channel-major out.view(B, -1).
    act4_ref[...] = h
    L4p = L4 // 2
    C4 = w4.shape[2]
    for l in range(L4p):
        ev = act4_ref[pl.ds(2 * l, B, stride=L4), :]          # rows (b*L4 + 2l), all b
        od = act4_ref[pl.ds(2 * l + 1, B, stride=L4), :]
        flat_ref[:, l * C4:(l + 1) * C4] = jnp.maximum(ev, od)
    o_ref[0] = jnp.maximum(
        jnp.dot(flat_ref[...], wl[0], preferred_element_type=jnp.float32) + bl[0], 0.0)


_FEAT_KEYS = ("w1", "b1", "g1", "be1", "w2", "b2", "g2", "be2",
              "w3", "b3", "g3", "be3", "w4", "b4", "g4", "be4", "wl", "bl")


def _imu_features_call(x_imu, p):
    IMU, T, B = x_imu.shape
    C = [p[f"w{j}"].shape[2] for j in (1, 2, 3, 4)]
    L1 = T - K + 1
    L2 = L1 - K + 1
    L2p = L2 // 2
    L3 = L2p - K + 1
    L4 = L3 - K + 1
    L4p = L4 // 2
    assert L4p * C[3] == p["wl"].shape[1], "input length inconsistent with Linear(26*cfg, 512)"
    cmax = max(C[0], C[1], C[2])

    def per_imu_spec(a):
        return pl.BlockSpec((1,) + tuple(a.shape[1:]), lambda i: (i, 0, 0))

    flops = 2 * B * IMU * (L1 * K * C[0] + L2 * K * C[0] * C[1] + L3 * K * C[1] * C[2]
                           + L4 * K * C[2] * C[3] + L4p * C[3] * 512)
    bytes_accessed = 4 * (int(x_imu.size) + sum(int(p[k].size) for k in _FEAT_KEYS)
                          + IMU * B * 512)

    return pl.pallas_call(
        functools.partial(_imu_feature_kernel, B=B, T=T),
        out_shape=jax.ShapeDtypeStruct((IMU, B, 512), jnp.float32),
        grid=(IMU,),
        in_specs=[per_imu_spec(x_imu)] + [per_imu_spec(p[k]) for k in _FEAT_KEYS],
        out_specs=pl.BlockSpec((1, B, 512), lambda i: (i, 0, 0)),
        scratch_shapes=[pltpu.VMEM((B * L1, K * cmax), jnp.float32),   # im2col staging
                        pltpu.VMEM((B * L2, C[1]), jnp.float32),       # pool-1 source
                        pltpu.VMEM((B * L4, C[3]), jnp.float32),       # pool-2 source
                        pltpu.VMEM((B, L4p * C[3]), jnp.float32)],     # flatten staging
        compiler_params=pltpu.CompilerParams(dimension_semantics=("parallel",)),
        cost_estimate=pl.CostEstimate(flops=int(flops), transcendentals=0,
                                      bytes_accessed=int(bytes_accessed)),
    )(x_imu, *[p[k] for k in _FEAT_KEYS])


# ----------------------------------------------------------------------------------
# Kernel 2: classifier1 (+ReLU) + classifier2, with classifier1 accumulated per IMU block
# ----------------------------------------------------------------------------------
def _cls_kernel(h_ref, w1_ref, b1_ref, w2_ref, b2_ref, out_ref, x1_ref, acc_ref):
    i = pl.program_id(0)

    @pl.when(i == 0)
    def _():
        acc_ref[...] = jnp.zeros_like(acc_ref)

    acc_ref[...] += jnp.dot(h_ref[0], w1_ref[0], preferred_element_type=jnp.float32)

    @pl.when(i == pl.num_programs(0) - 1)
    def _():
        x1 = jnp.maximum(acc_ref[...] + b1_ref[...], 0.0)
        x1_ref[...] = x1
        out_ref[...] = jnp.dot(x1, w2_ref[...], preferred_element_type=jnp.float32) + b2_ref[...]


def _classifier_call(h, p):
    IMU, B, H = h.shape
    NC = p["w2c"].shape[1]
    flops = 2 * B * (IMU * H * H + H * NC)
    bytes_accessed = 4 * (int(h.size) + int(p["w1c"].size) + int(p["w2c"].size) + B * (H + NC))
    return pl.pallas_call(
        _cls_kernel,
        out_shape=(jax.ShapeDtypeStruct((B, NC), jnp.float32),
                   jax.ShapeDtypeStruct((B, H), jnp.float32)),
        grid=(IMU,),
        in_specs=[pl.BlockSpec((1, B, H), lambda i: (i, 0, 0)),
                  pl.BlockSpec((1, H, H), lambda i: (i, 0, 0)),
                  pl.BlockSpec((1, H), lambda i: (0, 0)),
                  pl.BlockSpec((H, NC), lambda i: (0, 0)),
                  pl.BlockSpec((1, NC), lambda i: (0, 0))],
        out_specs=(pl.BlockSpec((B, NC), lambda i: (0, 0)),
                   pl.BlockSpec((B, H), lambda i: (0, 0))),
        scratch_shapes=[pltpu.VMEM((B, H), jnp.float32)],
        compiler_params=pltpu.CompilerParams(dimension_semantics=("arbitrary",)),
        cost_estimate=pl.CostEstimate(flops=int(flops), transcendentals=0,
                                      bytes_accessed=int(bytes_accessed)),
    )(h, p["w1c"], p["b1c"], p["w2c"], p["b2c"])


# ----------------------------------------------------------------------------------
# Parameters (canonical layout, same convention as the pure-JAX reference)
# ----------------------------------------------------------------------------------
def init_params(key, imu_num, cfg, num_classes):
    def nrm(k, shape, scale):
        return (scale * jax.random.normal(k, shape, jnp.float32)).astype(jnp.float32)

    params = {"features": [], "imu_cls": []}
    k = key
    for i in range(imu_num):
        chans = [1] + [cfg[i * 4 + j] for j in range(4)]
        layers = []
        for j in range(4):
            cin, cout = chans[j], chans[j + 1]
            k, k1, k2 = jax.random.split(k, 3)
            w = nrm(k1, (K, cin, cout), (float(K) * cin) ** -0.5)   # Conv1d weight (K, Cin, Cout)
            b = nrm(k2, (cout,), 0.02)                              # Conv1d bias
            gamma = jnp.ones((cout,), jnp.float32)                  # BN affine init
            beta = jnp.zeros((cout,), jnp.float32)
            layers.append((w, b, gamma, beta))
        params["features"].append(layers)
        din = 26 * cfg[i * 4 + 3]
        k, k1, k2 = jax.random.split(k, 3)
        params["imu_cls"].append((nrm(k1, (din, 512), din ** -0.5), nrm(k2, (512,), 0.02)))
    k, k1, k2, k3, k4 = jax.random.split(k, 5)
    params["cls1"] = (nrm(k1, (512 * imu_num, 512), (512.0 * imu_num) ** -0.5),
                      nrm(k2, (512,), 0.02))
    params["cls2"] = (nrm(k3, (512, num_classes), 512.0 ** -0.5),
                      nrm(k4, (num_classes,), 0.02))
    return params


def pack_params(params, IMU_num):
    """One-time repack of canonical params into the stacked, kernel-friendly layout."""
    # TODO(synk): the fused per-IMU kernel stacks weights across IMUs and therefore
    # requires a uniform cfg (same channel widths for every IMU branch), which matches
    # the module's default cfg=[64]*4*IMU_num.
    packed = {}
    feats = params["features"]
    for j in range(4):
        w0 = feats[0][j][0]
        assert all(feats[i][j][0].shape == w0.shape for i in range(IMU_num)), \
            "fused Pallas path requires uniform cfg across IMU branches"
        kk, cin, cout = w0.shape
        packed[f"w{j + 1}"] = jnp.stack([feats[i][j][0].reshape(kk * cin, cout)
                                         for i in range(IMU_num)])
        packed[f"b{j + 1}"] = jnp.stack([feats[i][j][1].reshape(1, cout) for i in range(IMU_num)])
        packed[f"g{j + 1}"] = jnp.stack([feats[i][j][2].reshape(1, cout) for i in range(IMU_num)])
        packed[f"be{j + 1}"] = jnp.stack([feats[i][j][3].reshape(1, cout) for i in range(IMU_num)])
    wl_list, bl_list = [], []
    for i in range(IMU_num):
        w, b = params["imu_cls"][i]                      # (26*C4, 512), rows channel-major
        c4 = w.shape[0] // 26
        # Permute rows to length-major so the kernel can flatten [B, 26, C4] length-major
        # with no transpose and still match PyTorch's channel-major .view() flatten.
        wl_list.append(w.reshape(c4, 26, w.shape[1]).transpose(1, 0, 2).reshape(26 * c4, w.shape[1]))
        bl_list.append(b.reshape(1, -1))
    packed["wl"] = jnp.stack(wl_list)
    packed["bl"] = jnp.stack(bl_list)
    w1, b1 = params["cls1"]
    packed["w1c"] = w1.reshape(IMU_num, 512, 512)        # per-IMU 512x512 blocks of classifier1
    packed["b1c"] = b1.reshape(1, 512)
    w2, b2 = params["cls2"]
    packed["w2c"] = w2
    packed["b2c"] = b2.reshape(1, -1)
    return packed


def har_forward(packed, x, IMU_num):
    # x: [B, T, IMU_num]  (the PyTorch forward slices x[:, :, i] per IMU branch)
    assert x.shape[2] == IMU_num
    x_imu = jnp.transpose(x, (2, 1, 0)).astype(jnp.float32)   # (IMU, T, B): time on sublanes
    h = _imu_features_call(x_imu, packed)                     # (IMU, B, 512)
    return _classifier_call(h, packed)                        # (out, x1)


# ----------------------------------------------------------------------------------
# Pure-JAX reference (numerical verification of the Pallas path)
# ----------------------------------------------------------------------------------
def _conv_bn_relu_ref(x, w, b, g, beta):
    kk = w.shape[0]
    lout = x.shape[1] - kk + 1
    acc = jnp.zeros((x.shape[0], lout, w.shape[2]), jnp.float32)
    for k in range(kk):
        acc = acc + jnp.einsum("blc,cd->bld", x[:, k:k + lout, :], w[k],
                               precision=jax.lax.Precision.HIGHEST)
    acc = acc + b
    mean = acc.mean(axis=(0, 1), keepdims=True)
    var = ((acc - mean) ** 2).mean(axis=(0, 1), keepdims=True)
    y = (acc - mean) * jax.lax.rsqrt(var + EPS) * g + beta
    return jnp.maximum(y, 0.0)


def _maxpool2_ref(x):
    B, L, C = x.shape
    return x[:, :(L // 2) * 2, :].reshape(B, L // 2, 2, C).max(axis=2)


def _linear_ref(x, w, b, relu):
    y = jnp.dot(x, w, precision=jax.lax.Precision.HIGHEST) + b
    return jnp.maximum(y, 0.0) if relu else y


def har_forward_ref(params, x, IMU_num):
    outs = []
    for i in range(IMU_num):
        h = x[:, :, i][:, :, None]
        l0, l1, l2, l3 = params["features"][i]
        h = _conv_bn_relu_ref(h, *l0)
        h = _conv_bn_relu_ref(h, *l1)
        h = _maxpool2_ref(h)
        h = _conv_bn_relu_ref(h, *l2)
        h = _conv_bn_relu_ref(h, *l3)
        h = _maxpool2_ref(h)
        B = h.shape[0]
        hf = jnp.transpose(h, (0, 2, 1)).reshape(B, -1)
        w, b = params["imu_cls"][i]
        outs.append(_linear_ref(hf, w, b, True))
    cat = jnp.concatenate(outs, axis=1)
    w1, b1 = params["cls1"]
    x1 = _linear_ref(cat, w1, b1, True)
    w2, b2 = params["cls2"]
    return _linear_ref(x1, w2, b2, False), x1


if __name__ == "__main__":
    IMU_NUM = 2                       # small instance (module default is 9)
    CFG = [16] * (4 * IMU_NUM)        # small channel widths (module default is 64)
    NUM_CLASSES = 6
    B, T = 2, 128                     # T=128 is implied by the hard-coded 26*cfg flatten size

    key = jax.random.PRNGKey(0)
    kp, kx = jax.random.split(key)
    params = init_params(kp, IMU_NUM, CFG, NUM_CLASSES)
    packed = pack_params(params, IMU_NUM)
    x = jax.random.normal(kx, (B, T, IMU_NUM), jnp.float32)

    fwd = jax.jit(functools.partial(har_forward, IMU_num=IMU_NUM))
    out, x1 = fwd(packed, x)
    jax.block_until_ready((out, x1))

    assert out.shape == (B, NUM_CLASSES) and x1.shape == (B, 512)

    out_r, x1_r = har_forward_ref(params, x, IMU_NUM)
    err_out = float(jnp.max(jnp.abs(out - out_r)))
    err_x1 = float(jnp.max(jnp.abs(x1 - x1_r)))
    assert err_out < 5e-2 and err_x1 < 5e-2, (err_out, err_x1)

    print("KERNEL_OK")
</pallas_src>

<mosaic_0001>
module attributes {stable_mosaic.version = 11 : i64} {
  func.func @_imu_feature_kernel(%arg0: i32, %arg1: memref<1x128x2xf32, #tpu.memory_space<vmem>>, %arg2: memref<1x5x16xf32, #tpu.memory_space<vmem>>, %arg3: memref<1x1x16xf32, #tpu.memory_space<vmem>>, %arg4: memref<1x1x16xf32, #tpu.memory_space<vmem>>, %arg5: memref<1x1x16xf32, #tpu.memory_space<vmem>>, %arg6: memref<1x80x16xf32, #tpu.memory_space<vmem>>, %arg7: memref<1x1x16xf32, #tpu.memory_space<vmem>>, %arg8: memref<1x1x16xf32, #tpu.memory_space<vmem>>, %arg9: memref<1x1x16xf32, #tpu.memory_space<vmem>>, %arg10: memref<1x80x16xf32, #tpu.memory_space<vmem>>, %arg11: memref<1x1x16xf32, #tpu.memory_space<vmem>>, %arg12: memref<1x1x16xf32, #tpu.memory_space<vmem>>, %arg13: memref<1x1x16xf32, #tpu.memory_space<vmem>>, %arg14: memref<1x80x16xf32, #tpu.memory_space<vmem>>, %arg15: memref<1x1x16xf32, #tpu.memory_space<vmem>>, %arg16: memref<1x1x16xf32, #tpu.memory_space<vmem>>, %arg17: memref<1x1x16xf32, #tpu.memory_space<vmem>>, %arg18: memref<1x416x512xf32, #tpu.memory_space<vmem>>, %arg19: memref<1x1x512xf32, #tpu.memory_space<vmem>>, %arg20: memref<1x2x512xf32, #tpu.memory_space<vmem>>, %arg21: memref<248x80xf32, #tpu.memory_space<vmem>>, %arg22: memref<240x16xf32, #tpu.memory_space<vmem>>, %arg23: memref<104x16xf32, #tpu.memory_space<vmem>>, %arg24: memref<2x416xf32, #tpu.memory_space<vmem>>) attributes {dimension_semantics = [#tpu.dimension_semantics<parallel>], iteration_bounds = array<i64: 2>, scalar_prefetch = 0 : i64, scratch_operands = 4 : i64, tpu.core_type = #tpu.core_type<tc>, window_params = [{transform_indices = @transform_0, window_bounds = array<i64: 1, 128, 2>}, {transform_indices = @transform_1, window_bounds = array<i64: 1, 5, 16>}, {transform_indices = @transform_2, window_bounds = array<i64: 1, 1, 16>}, {transform_indices = @transform_3, window_bounds = array<i64: 1, 1, 16>}, {transform_indices = @transform_4, window_bounds = array<i64: 1, 1, 16>}, {transform_indices = @transform_5, window_bounds = array<i64: 1, 80, 16>}, {transform_indices = @transform_6, window_bounds = array<i64: 1, 1, 16>}, {transform_indices = @transform_7, window_bounds = array<i64: 1, 1, 16>}, {transform_indices = @transform_8, window_bounds = array<i64: 1, 1, 16>}, {transform_indices = @transform_9, window_bounds = array<i64: 1, 80, 16>}, {transform_indices = @transform_10, window_bounds = array<i64: 1, 1, 16>}, {transform_indices = @transform_11, window_bounds = array<i64: 1, 1, 16>}, {transform_indices = @transform_12, window_bounds = array<i64: 1, 1, 16>}, {transform_indices = @transform_13, window_bounds = array<i64: 1, 80, 16>}, {transform_indices = @transform_14, window_bounds = array<i64: 1, 1, 16>}, {transform_indices = @transform_15, window_bounds = array<i64: 1, 1, 16>}, {transform_indices = @transform_16, window_bounds = array<i64: 1, 1, 16>}, {transform_indices = @transform_17, window_bounds = array<i64: 1, 416, 512>}, {transform_indices = @transform_18, window_bounds = array<i64: 1, 1, 512>}, {transform_indices = @transform_19, window_bounds = array<i64: 1, 2, 512>}]} {
    %c0 = arith.constant 0 : index
    %c0_0 = arith.constant 0 : index
    %c0_1 = arith.constant 0 : index
    %0 = vector.load %arg1[%c0, %c0_0, %c0_1] : memref<1x128x2xf32, #tpu.memory_space<vmem>>, vector<1x124x1xf32>
    %1 = vector.shape_cast %0 : vector<1x124x1xf32> to vector<124x1xf32>
    %c0_2 = arith.constant 0 : index
    %c0_3 = arith.constant 0 : index
    %2 = vector.load %arg21[%c0_2, %c0_3] : memref<248x80xf32, #tpu.memory_space<vmem>>, vector<124x1xf32>
    tpu.vector_store %arg21[%c0_2, %c0_3], %1 {strides = array<i32>} : memref<248x80xf32, #tpu.memory_space<vmem>>, vector<124x1xf32>,
    %c0_4 = arith.constant 0 : index
    %c1 = arith.constant 1 : index
    %c0_5 = arith.constant 0 : index
    %3 = vector.load %arg1[%c0_4, %c1, %c0_5] : memref<1x128x2xf32, #tpu.memory_space<vmem>>, vector<1x124x1xf32>
    %4 = vector.shape_cast %3 : vector<1x124x1xf32> to vector<124x1xf32>
    %c0_6 = arith.constant 0 : index
    %c1_7 = arith.constant 1 : index
    %5 = vector.load %arg21[%c0_6, %c1_7] : memref<248x80xf32, #tpu.memory_space<vmem>>, vector<124x1xf32>
    tpu.vector_store %arg21[%c0_6, %c1_7], %4 {strides = array<i32>} : memref<248x80xf32, #tpu.memory_space<vmem>>, vector<124x1xf32>,
    %c0_8 = arith.constant 0 : index
    %c2 = arith.constant 2 : index
    %c0_9 = arith.constant 0 : index
    %6 = vector.load %arg1[%c0_8, %c2, %c0_9] : memref<1x128x2xf32, #tpu.memory_space<vmem>>, vector<1x124x1xf32>
    %7 = vector.shape_cast %6 : vector<1x124x1xf32> to vector<124x1xf32>
    %c0_10 = arith.constant 0 : index
    %c2_11 = arith.constant 2 : index
    %8 = vector.load %arg21[%c0_10, %c2_11] : memref<248x80xf32, #tpu.memory_space<vmem>>, vector<124x1xf32>
    tpu.vector_store %arg21[%c0_10, %c2_11], %7 {strides = array<i32>} : memref<248x80xf32, #tpu.memory_space<vmem>>, vector<124x1xf32>,
    %c0_12 = arith.constant 0 : index
    %c3 = arith.constant 3 : index
    %c0_13 = arith.constant 0 : index
    %9 = vector.load %arg1[%c0_12, %c3, %c0_13] : memref<1x128x2xf32, #tpu.memory_space<vmem>>, vector<1x124x1xf32>
    %10 = vector.shape_cast %9 : vector<1x124x1xf32> to vector<124x1xf32>
    %c0_14 = arith.constant 0 : index
    %c3_15 = arith.constant 3 : index
    %11 = vector.load %arg21[%c0_14, %c3_15] : memref<248x80xf32, #tpu.memory_space<vmem>>, vector<124x1xf32>
    tpu.vector_store %arg21[%c0_14, %c3_15], %10 {strides = array<i32>} : memref<248x80xf32, #tpu.memory_space<vmem>>, vector<124x1xf32>,
    %c0_16 = arith.constant 0 : index
    %c4 = arith.constant 4 : index
    %c0_17 = arith.constant 0 : index
    %12 = vector.load %arg1[%c0_16, %c4, %c0_17] : memref<1x128x2xf32, #tpu.memory_space<vmem>>, vector<1x124x1xf32>
    %13 = vector.shape_cast %12 : vector<1x124x1xf32> to vector<124x1xf32>
    %c0_18 = arith.constant 0 : index
    %c4_19 = arith.constant 4 : index
    %14 = vector.load %arg21[%c0_18, %c4_19] : memref<248x80xf32, #tpu.memory_space<vmem>>, vector<124x1xf32>
    tpu.vector_store %arg21[%c0_18, %c4_19], %13 {strides = array<i32>} : memref<248x80xf32, #tpu.memory_space<vmem>>, vector<124x1xf32>,
    %c0_20 = arith.constant 0 : index
    %c0_21 = arith.constant 0 : index
    %c1_22 = arith.constant 1 : index
    %15 = vector.load %arg1[%c0_20, %c0_21, %c1_22] : memref<1x128x2xf32, #tpu.memory_space<vmem>>, vector<1x124x1xf32>
    %16 = vector.shape_cast %15 : vector<1x124x1xf32> to vector<124x1xf32>
    %c124 = arith.constant 124 : index
    %c0_23 = arith.constant 0 : index
    %17 = vector.load %arg21[%c124, %c0_23] : memref<248x80xf32, #tpu.memory_space<vmem>>, vector<124x1xf32>
    tpu.vector_store %arg21[%c124, %c0_23], %16 {strides = array<i32>} : memref<248x80xf32, #tpu.memory_space<vmem>>, vector<124x1xf32>,
    %c0_24 = arith.constant 0 : index
    %c1_25 = arith.constant 1 : index
    %c1_26 = arith.constant 1 : index
    %18 = vector.load %arg1[%c0_24, %c1_25, %c1_26] : memref<1x128x2xf32, #tpu.memory_space<vmem>>, vector<1x124x1xf32>
    %19 = vector.shape_cast %18 : vector<1x124x1xf32> to vector<124x1xf32>
    %c124_27 = arith.constant 124 : index
    %c1_28 = arith.constant 1 : index
    %20 = vector.load %arg21[%c124_27, %c1_28] : memref<248x80xf32, #tpu.memory_space<vmem>>, vector<124x1xf32>
    tpu.vector_store %arg21[%c124_27, %c1_28], %19 {strides = array<i32>} : memref<248x80xf32, #tpu.memory_space<vmem>>, vector<124x1xf32>,
    %c0_29 = arith.constant 0 : index
    %c2_30 = arith.constant 2 : index
    %c1_31 = arith.constant 1 : index
    %21 = vector.load %arg1[%c0_29, %c2_30, %c1_31] : memref<1x128x2xf32, #tpu.memory_space<vmem>>, vector<1x124x1xf32>
    %22 = vector.shape_cast %21 : vector<1x124x1xf32> to vector<124x1xf32>
    %c124_32 = arith.constant 124 : index
    %c2_33 = arith.constant 2 : index
    %23 = vector.load %arg21[%c124_32, %c2_33] : memref<248x80xf32, #tpu.memory_space<vmem>>, vector<124x1xf32>
    tpu.vector_store %arg21[%c124_32, %c2_33], %22 {strides = array<i32>} : memref<248x80xf32, #tpu.memory_space<vmem>>, vector<124x1xf32>,
    %c0_34 = arith.constant 0 : index
    %c3_35 = arith.constant 3 : index
    %c1_36 = arith.constant 1 : index
    %24 = vector.load %arg1[%c0_34, %c3_35, %c1_36] : memref<1x128x2xf32, #tpu.memory_space<vmem>>, vector<1x124x1xf32>
    %25 = vector.shape_cast %24 : vector<1x124x1xf32> to vector<124x1xf32>
    %c124_37 = arith.constant 124 : index
    %c3_38 = arith.constant 3 : index
    %26 = vector.load %arg21[%c124_37, %c3_38] : memref<248x80xf32, #tpu.memory_space<vmem>>, vector<124x1xf32>
    tpu.vector_store %arg21[%c124_37, %c3_38], %25 {strides = array<i32>} : memref<248x80xf32, #tpu.memory_space<vmem>>, vector<124x1xf32>,
    %c0_39 = arith.constant 0 : index
    %c4_40 = arith.constant 4 : index
    %c1_41 = arith.constant 1 : index
    %27 = vector.load %arg1[%c0_39, %c4_40, %c1_41] : memref<1x128x2xf32, #tpu.memory_space<vmem>>, vector<1x124x1xf32>
    %28 = vector.shape_cast %27 : vector<1x124x1xf32> to vector<124x1xf32>
    %c124_42 = arith.constant 124 : index
    %c4_43 = arith.constant 4 : index
    %29 = vector.load %arg21[%c124_42, %c4_43] : memref<248x80xf32, #tpu.memory_space<vmem>>, vector<124x1xf32>
    tpu.vector_store %arg21[%c124_42, %c4_43], %28 {strides = array<i32>} : memref<248x80xf32, #tpu.memory_space<vmem>>, vector<124x1xf32>,
    %c0_44 = arith.constant 0 : index
    %c0_45 = arith.constant 0 : index
    %30 = vector.load %arg21[%c0_44, %c0_45] : memref<248x80xf32, #tpu.memory_space<vmem>>, vector<248x5xf32>
    %c0_46 = arith.constant 0 : index
    %c0_47 = arith.constant 0 : index
    %c0_48 = arith.constant 0 : index
    %31 = vector.load %arg2[%c0_46, %c0_47, %c0_48] : memref<1x5x16xf32, #tpu.memory_space<vmem>>, vector<1x5x16xf32>
    %32 = vector.shape_cast %31 : vector<1x5x16xf32> to vector<5x16xf32>
    %cst = arith.constant dense<0.000000e+00> : vector<248x16xf32>
    %33 = tpu.matmul %30, %32, %cst {dimension_numbers = #tpu.dot_dimension_numbers<[1], [0], [0], [1], [0, 0, 1, 1], [], []>} : vector<248x5xf32>, vector<5x16xf32>, vector<248x16xf32> -> vector<248x16xf32>
    %c0_49 = arith.constant 0 : index
    %c0_50 = arith.constant 0 : index
    %c0_51 = arith.constant 0 : index
    %34 = vector.load %arg3[%c0_49, %c0_50, %c0_51] : memref<1x1x16xf32, #tpu.memory_space<vmem>>, vector<1x1x16xf32>
    %35 = vector.shape_cast %34 : vector<1x1x16xf32> to vector<1x16xf32>
    %36 = vector.broadcast %35 : vector<1x16xf32> to vector<248x16xf32>
    %37 = arith.addf %33, %36 : vector<248x16xf32>
    %cst_52 = arith.constant dense<0.000000e+00> : vector<16xf32>
    %38 = vector.multi_reduction <add>, %37, %cst_52 [0] : vector<248x16xf32> to vector<16xf32>
    %39 = vector.shape_cast %38 : vector<16xf32> to vector<1x16xf32>
    %cst_53 = arith.constant 0.00403225794 : f32
    %40 = vector.broadcast %cst_53 : f32 to vector<1x16xf32>
    %41 = arith.mulf %39, %40 : vector<1x16xf32>
    %42 = vector.broadcast %41 : vector<1x16xf32> to vector<248x16xf32>
    %43 = arith.subf %37, %42 : vector<248x16xf32>
    %44 = arith.mulf %43, %43 : vector<248x16xf32>
    %cst_54 = arith.constant dense<0.000000e+00> : vector<16xf32>
    %45 = vector.multi_reduction <add>, %44, %cst_54 [0] : vector<248x16xf32> to vector<16xf32>
    %46 = vector.shape_cast %45 : vector<16xf32> to vector<1x16xf32>
    %cst_55 = arith.constant 0.00403225794 : f32
    %47 = vector.broadcast %cst_55 : f32 to vector<1x16xf32>
    %48 = arith.mulf %46, %47 : vector<1x16xf32>
    %cst_56 = arith.constant 9.99999974E-6 : f32
    %49 = vector.broadcast %cst_56 : f32 to vector<1x16xf32>
    %50 = arith.addf %48, %49 : vector<1x16xf32>
    %51 = math.rsqrt %50 : vector<1x16xf32>
    %c0_57 = arith.constant 0 : index
    %c0_58 = arith.constant 0 : index
    %c0_59 = arith.constant 0 : index
    %52 = vector.load %arg4[%c0_57, %c0_58, %c0_59] : memref<1x1x16xf32, #tpu.memory_space<vmem>>, vector<1x1x16xf32>
    %53 = vector.shape_cast %52 : vector<1x1x16xf32> to vector<1x16xf32>
    %54 = arith.mulf %51, %53 : vector<1x16xf32>
    %55 = vector.broadcast %54 : vector<1x16xf32> to vector<248x16xf32>
    %56 = arith.mulf %43, %55 : vector<248x16xf32>
    %c0_60 = arith.constant 0 : index
    %c0_61 = arith.constant 0 : index
    %c0_62 = arith.constant 0 : index
    %57 = vector.load %arg5[%c0_60, %c0_61, %c0_62] : memref<1x1x16xf32, #tpu.memory_space<vmem>>, vector<1x1x16xf32>
    %58 = vector.shape_cast %57 : vector<1x1x16xf32> to vector<1x16xf32>
    %59 = vector.broadcast %58 : vector<1x16xf32> to vector<248x16xf32>
    %60 = arith.addf %56, %59 : vector<248x16xf32>
    %cst_63 = arith.constant 0.000000e+00 : f32
    %61 = vector.broadcast %cst_63 : f32 to vector<248x16xf32>
    %62 = arith.maximumf %60, %61 : vector<248x16xf32>
    %63 = vector.extract_strided_slice %62 {offsets = [0, 0], sizes = [120, 16], strides = [1, 1]} : vector<248x16xf32> to vector<120x16xf32>
    %c0_64 = arith.constant 0 : index
    %c0_65 = arith.constant 0 : index
    %64 = vector.load %arg21[%c0_64, %c0_65] : memref<248x80xf32, #tpu.memory_space<vmem>>, vector<120x16xf32>
    tpu.vector_store %arg21[%c0_64, %c0_65], %63 {strides = array<i32>} : memref<248x80xf32, #tpu.memory_space<vmem>>, vector<120x16xf32>,
    %65 = vector.extract_strided_slice %62 {offsets = [1, 0], sizes = [120, 16], strides = [1, 1]} : vector<248x16xf32> to vector<120x16xf32>
    %c0_66 = arith.constant 0 : index
    %c16 = arith.constant 16 : index
    %66 = vector.load %arg21[%c0_66, %c16] : memref<248x80xf32, #tpu.memory_space<vmem>>, vector<120x16xf32>
    tpu.vector_store %arg21[%c0_66, %c16], %65 {strides = array<i32>} : memref<248x80xf32, #tpu.memory_space<vmem>>, vector<120x16xf32>,
    %67 = vector.extract_strided_slice %62 {offsets = [2, 0], sizes = [120, 16], strides = [1, 1]} : vector<248x16xf32> to vector<120x16xf32>
    %c0_67 = arith.constant 0 : index
    %c32 = arith.constant 32 : index
    %68 = vector.load %arg21[%c0_67, %c32] : memref<248x80xf32, #tpu.memory_space<vmem>>, vector<120x16xf32>
    tpu.vector_store %arg21[%c0_67, %c32], %67 {strides = array<i32>} : memref<248x80xf32, #tpu.memory_space<vmem>>, vector<120x16xf32>,
    %69 = vector.extract_strided_slice %62 {offsets = [3, 0], sizes = [120, 16], strides = [1, 1]} : vector<248x16xf32> to vector<120x16xf32>
    %c0_68 = arith.constant 0 : index
    %c48 = arith.constant 48 : index
    %70 = vector.load %arg21[%c0_68, %c48] : memref<248x80xf32, #tpu.memory_space<vmem>>, vector<120x16xf32>
    tpu.vector_store %arg21[%c0_68, %c48], %69 {strides = array<i32>} : memref<248x80xf32, #tpu.memory_space<vmem>>, vector<120x16xf32>,
    %71 = vector.extract_strided_slice %62 {offsets = [4, 0], sizes = [120, 16], strides = [1, 1]} : vector<248x16xf32> to vector<120x16xf32>
    %c0_69 = arith.constant 0 : index
    %c64 = arith.constant 64 : index
    %72 = vector.load %arg21[%c0_69, %c64] : memref<248x80xf32, #tpu.memory_space<vmem>>, vector<120x16xf32>
    tpu.vector_store %arg21[%c0_69, %c64], %71 {strides = array<i32>} : memref<248x80xf32, #tpu.memory_space<vmem>>, vector<120x16xf32>,
    %73 = vector.extract_strided_slice %62 {offsets = [124, 0], sizes = [120, 16], strides = [1, 1]} : vector<248x16xf32> to vector<120x16xf32>
    %c120 = arith.constant 120 : index
    %c0_70 = arith.constant 0 : index
    %74 = vector.load %arg21[%c120, %c0_70] : memref<248x80xf32, #tpu.memory_space<vmem>>, vector<120x16xf32>
    tpu.vector_store %arg21[%c120, %c0_70], %73 {strides = array<i32>} : memref<248x80xf32, #tpu.memory_space<vmem>>, vector<120x16xf32>,
    %75 = vector.extract_strided_slice %62 {offsets = [125, 0], sizes = [120, 16], strides = [1, 1]} : vector<248x16xf32> to vector<120x16xf32>
    %c120_71 = arith.constant 120 : index
    %c16_72 = arith.constant 16 : index
    %76 = vector.load %arg21[%c120_71, %c16_72] : memref<248x80xf32, #tpu.memory_space<vmem>>, vector<120x16xf32>
    tpu.vector_store %arg21[%c120_71, %c16_72], %75 {strides = array<i32>} : memref<248x80xf32, #tpu.memory_space<vmem>>, vector<120x16xf32>,
    %77 = vector.extract_strided_slice %62 {offsets = [126, 0], sizes = [120, 16], strides = [1, 1]} : vector<248x16xf32> to vector<120x16xf32>
    %c120_73 = arith.constant 120 : index
    %c32_74 = arith.constant 32 : index
    %78 = vector.load %arg21[%c120_73, %c32_74] : memref<248x80xf32, #tpu.memory_space<vmem>>, vector<120x16xf32>
    tpu.vector_store %arg21[%c120_73, %c32_74], %77 {strides = array<i32>} : memref<248x80xf32, #tpu.memory_space<vmem>>, vector<120x16xf32>,
    %79 = vector.extract_strided_slice %62 {offsets = [127, 0], sizes = [120, 16], strides = [1, 1]} : vector<248x16xf32> to vector<120x16xf32>
    %c120_75 = arith.constant 120 : index
    %c48_76 = arith.constant 48 : index
    %80 = vector.load %arg21[%c120_75, %c48_76] : memref<248x80xf32, #tpu.memory_space<vmem>>, vector<120x16xf32>
    tpu.vector_store %arg21[%c120_75, %c48_76], %79 {strides = array<i32>} : memref<248x80xf32, #tpu.memory_space<vmem>>, vector<120x16xf32>,
    %81 = vector.extract_strided_slice %62 {offsets = [128, 0], sizes = [120, 16], strides = [1, 1]} : vector<248x16xf32> to vector<120x16xf32>
    %c120_77 = arith.constant 120 : index
    %c64_78 = arith.constant 64 : index
    %82 = vector.load %arg21[%c120_77, %c64_78] : memref<248x80xf32, #tpu.memory_space<vmem>>, vector<120x16xf32>
    tpu.vector_store %arg21[%c120_77, %c64_78], %81 {strides = array<i32>} : memref<248x80xf32, #tpu.memory_space<vmem>>, vector<120x16xf32>,
    %c0_79 = arith.constant 0 : index
    %c0_80 = arith.constant 0 : index
    %83 = vector.load %arg21[%c0_79, %c0_80] : memref<248x80xf32, #tpu.memory_space<vmem>>, vector<240x80xf32>
    %c0_81 = arith.constant 0 : index
    %c0_82 = arith.constant 0 : index
    %c0_83 = arith.constant 0 : index
    %84 = vector.load %arg6[%c0_81, %c0_82, %c0_83] : memref<1x80x16xf32, #tpu.memory_space<vmem>>, vector<1x80x16xf32>
    %85 = vector.shape_cast %84 : vector<1x80x16xf32> to vector<80x16xf32>
    %cst_84 = arith.constant dense<0.000000e+00> : vector<240x16xf32>
    %86 = tpu.matmul %83, %85, %cst_84 {dimension_numbers = #tpu.dot_dimension_numbers<[1], [0], [0], [1], [0, 0, 1, 1], [], []>} : vector<240x80xf32>, vector<80x16xf32>, vector<240x16xf32> -> vector<240x16xf32>
    %c0_85 = arith.constant 0 : index
    %c0_86 = arith.constant 0 : index
    %c0_87 = arith.constant 0 : index
    %87 = vector.load %arg7[%c0_85, %c0_86, %c0_87] : memref<1x1x16xf32, #tpu.memory_space<vmem>>, vector<1x1x16xf32>
    %88 = vector.shape_cast %87 : vector<1x1x16xf32> to vector<1x16xf32>
    %89 = vector.broadcast %88 : vector<1x16xf32> to vector<240x16xf32>
    %90 = arith.addf %86, %89 : vector<240x16xf32>
    %cst_88 = arith.constant dense<0.000000e+00> : vector<16xf32>
    %91 = vector.multi_reduction <add>, %90, %cst_88 [0] : vector<240x16xf32> to vector<16xf32>
    %92 = vector.shape_cast %91 : vector<16xf32> to vector<1x16xf32>
    %cst_89 = arith.constant 0.00416666688 : f32
    %93 = vector.broadcast %cst_89 : f32 to vector<1x16xf32>
    %94 = arith.mulf %92, %93 : vector<1x16xf32>
    %95 = vector.broadcast %94 : vector<1x16xf32> to vector<240x16xf32>
    %96 = arith.subf %90, %95 : vector<240x16xf32>
    %97 = arith.mulf %96, %96 : vector<240x16xf32>
    %cst_90 = arith.constant dense<0.000000e+00> : vector<16xf32>
    %98 = vector.multi_reduction <add>, %97, %cst_90 [0] : vector<240x16xf32> to vector<16xf32>
    %99 = vector.shape_cast %98 : vector<16xf32> to vector<1x16xf32>
    %cst_91 = arith.constant 0.00416666688 : f32
    %100 = vector.broadcast %cst_91 : f32 to vector<1x16xf32>
    %101 = arith.mulf %99, %100 : vector<1x16xf32>
    %cst_92 = arith.constant 9.99999974E-6 : f32
    %102 = vector.broadcast %cst_92 : f32 to vector<1x16xf32>
    %103 = arith.addf %101, %102 : vector<1x16xf32>
    %104 = math.rsqrt %103 : vector<1x16xf32>
    %c0_93 = arith.constant 0 : index
    %c0_94 = arith.constant 0 : index
    %c0_95 = arith.constant 0 : index
    %105 = vector.load %arg8[%c0_93, %c0_94, %c0_95] : memref<1x1x16xf32, #tpu.memory_space<vmem>>, vector<1x1x16xf32>
    %106 = vector.shape_cast %105 : vector<1x1x16xf32> to vector<1x16xf32>
    %107 = arith.mulf %104, %106 : vector<1x16xf32>
    %108 = vector.broadcast %107 : vector<1x16xf32> to vector<240x16xf32>
    %109 = arith.mulf %96, %108 : vector<240x16xf32>
    %c0_96 = arith.constant 0 : index
    %c0_97 = arith.constant 0 : index
    %c0_98 = arith.constant 0 : index
    %110 = vector.load %arg9[%c0_96, %c0_97, %c0_98] : memref<1x1x16xf32, #tpu.memory_space<vmem>>, vector<1x1x16xf32>
    %111 = vector.shape_cast %110 : vector<1x1x16xf32> to vector<1x16xf32>
    %112 = vector.broadcast %111 : vector<1x16xf32> to vector<240x16xf32>
    %113 = arith.addf %109, %112 : vector<240x16xf32>
    %cst_99 = arith.constant 0.000000e+00 : f32
    %114 = vector.broadcast %cst_99 : f32 to vector<240x16xf32>
    %115 = arith.maximumf %113, %114 : vector<240x16xf32>
    %c0_100 = arith.constant 0 : index
    %c0_101 = arith.constant 0 : index
    %116 = vector.load %arg22[%c0_100, %c0_101] : memref<240x16xf32, #tpu.memory_space<vmem>>, vector<240x16xf32>
    tpu.vector_store %arg22[%c0_100, %c0_101], %115 {strides = array<i32>} : memref<240x16xf32, #tpu.memory_space<vmem>>, vector<240x16xf32>,
    %c0_102 = arith.constant 0 : index
    %c0_103 = arith.constant 0 : index
    %117 = tpu.strided_load %arg22[%c0_102, %c0_103] {strides = array<i32: 2, 1>} : memref<240x16xf32, #tpu.memory_space<vmem>>, vector<120x16xf32>
    %c1_104 = arith.constant 1 : index
    %c0_105 = arith.constant 0 : index
    %118 = tpu.strided_load %arg22[%c1_104, %c0_105] {strides = array<i32: 2, 1>} : memref<240x16xf32, #tpu.memory_space<vmem>>, vector<120x16xf32>
    %119 = arith.maximumf %117, %118 : vector<120x16xf32>
    %120 = vector.extract_strided_slice %119 {offsets = [0, 0], sizes = [56, 16], strides = [1, 1]} : vector<120x16xf32> to vector<56x16xf32>
    %c0_106 = arith.constant 0 : index
    %c0_107 = arith.constant 0 : index
    %121 = vector.load %arg21[%c0_106, %c0_107] : memref<248x80xf32, #tpu.memory_space<vmem>>, vector<56x16xf32>
    tpu.vector_store %arg21[%c0_106, %c0_107], %120 {strides = array<i32>} : memref<248x80xf32, #tpu.memory_space<vmem>>, vector<56x16xf32>,
    %122 = vector.extract_strided_slice %119 {offsets = [1, 0], sizes = [56, 16], strides = [1, 1]} : vector<120x16xf32> to vector<56x16xf32>
    %c0_108 = arith.constant 0 : index
    %c16_109 = arith.constant 16 : index
    %123 = vector.load %arg21[%c0_108, %c16_109] : memref<248x80xf32, #tpu.memory_space<vmem>>, vector<56x16xf32>
    tpu.vector_store %arg21[%c0_108, %c16_109], %122 {strides = array<i32>} : memref<248x80xf32, #tpu.memory_space<vmem>>, vector<56x16xf32>,
    %124 = vector.extract_strided_slice %119 {offsets = [2, 0], sizes = [56, 16], strides = [1, 1]} : vector<120x16xf32> to vector<56x16xf32>
    %c0_110 = arith.constant 0 : index
    %c32_111 = arith.constant 32 : index
    %125 = vector.load %arg21[%c0_110, %c32_111] : memref<248x80xf32, #tpu.memory_space<vmem>>, vector<56x16xf32>
    tpu.vector_store %arg21[%c0_110, %c32_111], %124 {strides = array<i32>} : memref<248x80xf32, #tpu.memory_space<vmem>>, vector<56x16xf32>,
    %126 = vector.extract_strided_slice %119 {offsets = [3, 0], sizes = [56, 16], strides = [1, 1]} : vector<120x16xf32> to vector<56x16xf32>
    %c0_112 = arith.constant 0 : index
    %c48_113 = arith.constant 48 : index
    %127 = vector.load %arg21[%c0_112, %c48_113] : memref<248x80xf32, #tpu.memory_space<vmem>>, vector<56x16xf32>
    tpu.vector_store %arg21[%c0_112, %c48_113], %126 {strides = array<i32>} : memref<248x80xf32, #tpu.memory_space<vmem>>, vector<56x16xf32>,
    %128 = vector.extract_strided_slice %119 {offsets = [4, 0], sizes = [56, 16], strides = [1, 1]} : vector<120x16xf32> to vector<56x16xf32>
    %c0_114 = arith.constant 0 : index
    %c64_115 = arith.constant 64 : index
    %129 = vector.load %arg21[%c0_114, %c64_115] : memref<248x80xf32, #tpu.memory_space<vmem>>, vector<56x16xf32>
    tpu.vector_store %arg21[%c0_114, %c64_115], %128 {strides = array<i32>} : memref<248x80xf32, #tpu.memory_space<vmem>>, vector<56x16xf32>,
    %130 = vector.extract_strided_slice %119 {offsets = [60, 0], sizes = [56, 16], strides = [1, 1]} : vector<120x16xf32> to vector<56x16xf32>
    %c56 = arith.constant 56 : index
    %c0_116 = arith.constant 0 : index
    %131 = vector.load %arg21[%c56, %c0_116] : memref<248x80xf32, #tpu.memory_space<vmem>>, vector<56x16xf32>
    tpu.vector_store %arg21[%c56, %c0_116], %130 {strides = array<i32>} : memref<248x80xf32, #tpu.memory_space<vmem>>, vector<56x16xf32>,
    %132 = vector.extract_strided_slice %119 {offsets = [61, 0], sizes = [56, 16], strides = [1, 1]} : vector<120x16xf32> to vector<56x16xf32>
    %c56_117 = arith.constant 56 : index
    %c16_118 = arith.constant 16 : index
    %133 = vector.load %arg21[%c56_117, %c16_118] : memref<248x80xf32, #tpu.memory_space<vmem>>, vector<56x16xf32>
    tpu.vector_store %arg21[%c56_117, %c16_118], %132 {strides = array<i32>} : memref<248x80xf32, #tpu.memory_space<vmem>>, vector<56x16xf32>,
    %134 = vector.extract_strided_slice %119 {offsets = [62, 0], sizes = [56, 16], strides = [1, 1]} : vector<120x16xf32> to vector<56x16xf32>
    %c56_119 = arith.constant 56 : index
    %c32_120 = arith.constant 32 : index
    %135 = vector.load %arg21[%c56_119, %c32_120] : memref<248x80xf32, #tpu.memory_space<vmem>>, vector<56x16xf32>
    tpu.vector_store %arg21[%c56_119, %c32_120], %134 {strides = array<i32>} : memref<248x80xf32, #tpu.memory_space<vmem>>, vector<56x16xf32>,
    %136 = vector.extract_strided_slice %119 {offsets = [63, 0], sizes = [56, 16], strides = [1, 1]} : vector<120x16xf32> to vector<56x16xf32>
    %c56_121 = arith.constant 56 : index
    %c48_122 = arith.constant 48 : index
    %137 = vector.load %arg21[%c56_121, %c48_122] : memref<248x80xf32, #tpu.memory_space<vmem>>, vector<56x16xf32>
    tpu.vector_store %arg21[%c56_121, %c48_122], %136 {strides = array<i32>} : memref<248x80xf32, #tpu.memory_space<vmem>>, vector<56x16xf32>,
    %138 = vector.extract_strided_slice %119 {offsets = [64, 0], sizes = [56, 16], strides = [1, 1]} : vector<120x16xf32> to vector<56x16xf32>
    %c56_123 = arith.constant 56 : index
    %c64_124 = arith.constant 64 : index
    %139 = vector.load %arg21[%c56_123, %c64_124] : memref<248x80xf32, #tpu.memory_space<vmem>>, vector<56x16xf32>
    tpu.vector_store %arg21[%c56_123, %c64_124], %138 {strides = array<i32>} : memref<248x80xf32, #tpu.memory_space<vmem>>, vector<56x16xf32>,
    %c0_125 = arith.constant 0 : index
    %c0_126 = arith.constant 0 : index
    %140 = vector.load %arg21[%c0_125, %c0_126] : memref<248x80xf32, #tpu.memory_space<vmem>>, vector<112x80xf32>
    %c0_127 = arith.constant 0 : index
    %c0_128 = arith.constant 0 : index
    %c0_129 = arith.constant 0 : index
    %141 = vector.load %arg10[%c0_127, %c0_128, %c0_129] : memref<1x80x16xf32, #tpu.memory_space<vmem>>, vector<1x80x16xf32>
    %142 = vector.shape_cast %141 : vector<1x80x16xf32> to vector<80x16xf32>
    %cst_130 = arith.constant dense<0.000000e+00> : vector<112x16xf32>
    %143 = tpu.matmul %140, %142, %cst_130 {dimension_numbers = #tpu.dot_dimension_numbers<[1], [0], [0], [1], [0, 0, 1, 1], [], []>} : vector<112x80xf32>, vector<80x16xf32>, vector<112x16xf32> -> vector<112x16xf32>
    %c0_131 = arith.constant 0 : index
    %c0_132 = arith.constant 0 : index
    %c0_133 = arith.constant 0 : index
    %144 = vector.load %arg11[%c0_131, %c0_132, %c0_133] : memref<1x1x16xf32, #tpu.memory_space<vmem>>, vector<1x1x16xf32>
    %145 = vector.shape_cast %144 : vector<1x1x16xf32> to vector<1x16xf32>
    %146 = vector.broadcast %145 : vector<1x16xf32> to vector<112x16xf32>
    %147 = arith.addf %143, %146 : vector<112x16xf32>
    %cst_134 = arith.constant dense<0.000000e+00> : vector<16xf32>
    %148 = vector.multi_reduction <add>, %147, %cst_134 [0] : vector<112x16xf32> to vector<16xf32>
    %149 = vector.shape_cast %148 : vector<16xf32> to vector<1x16xf32>
    %cst_135 = arith.constant 0.00892857183 : f32
    %150 = vector.broadcast %cst_135 : f32 to vector<1x16xf32>
    %151 = arith.mulf %149, %150 : vector<1x16xf32>
    %152 = vector.broadcast %151 : vector<1x16xf32> to vector<112x16xf32>
    %153 = arith.subf %147, %152 : vector<112x16xf32>
    %154 = arith.mulf %153, %153 : vector<112x16xf32>
    %cst_136 = arith.constant dense<0.000000e+00> : vector<16xf32>
    %155 = vector.multi_reduction <add>, %154, %cst_136 [0] : vector<112x16xf32> to vector<16xf32>
    %156 = vector.shape_cast %155 : vector<16xf32> to vector<1x16xf32>
    %cst_137 = arith.constant 0.00892857183 : f32
    %157 = vector.broadcast %cst_137 : f32 to vector<1x16xf32>
    %158 = arith.mulf %156, %157 : vector<1x16xf32>
    %cst_138 = arith.constant 9.99999974E-6 : f32
    %159 = vector.broadcast %cst_138 : f32 to vector<1x16xf32>
    %160 = arith.addf %158, %159 : vector<1x16xf32>
    %161 = math.rsqrt %160 : vector<1x16xf32>
    %c0_139 = arith.constant 0 : index
    %c0_140 = arith.constant 0 : index
    %c0_141 = arith.constant 0 : index
    %162 = vector.load %arg12[%c0_139, %c0_140, %c0_141] : memref<1x1x16xf32, #tpu.memory_space<vmem>>, vector<1x1x16xf32>
    %163 = vector.shape_cast %162 : vector<1x1x16xf32> to vector<1x16xf32>
    %164 = arith.mulf %161, %163 : vector<1x16xf32>
    %165 = vector.broadcast %164 : vector<1x16xf32> to vector<112x16xf32>
    %166 = arith.mulf %153, %165 : vector<112x16xf32>
    %c0_142 = arith.constant 0 : index
    %c0_143 = arith.constant 0 : index
    %c0_144 = arith.constant 0 : index
    %167 = vector.load %arg13[%c0_142, %c0_143, %c0_144] : memref<1x1x16xf32, #tpu.memory_space<vmem>>, vector<1x1x16xf32>
    %168 = vector.shape_cast %167 : vector<1x1x16xf32> to vector<1x16xf32>
    %169 = vector.broadcast %168 : vector<1x16xf32> to vector<112x16xf32>
    %170 = arith.addf %166, %169 : vector<112x16xf32>
    %cst_145 = arith.constant 0.000000e+00 : f32
    %171 = vector.broadcast %cst_145 : f32 to vector<112x16xf32>
    %172 = arith.maximumf %170, %171 : vector<112x16xf32>
    %173 = vector.extract_strided_slice %172 {offsets = [0, 0], sizes = [52, 16], strides = [1, 1]} : vector<112x16xf32> to vector<52x16xf32>
    %c0_146 = arith.constant 0 : index
    %c0_147 = arith.constant 0 : index
    %174 = vector.load %arg21[%c0_146, %c0_147] : memref<248x80xf32, #tpu.memory_space<vmem>>, vector<52x16xf32>
    tpu.vector_store %arg21[%c0_146, %c0_147], %173 {strides = array<i32>} : memref<248x80xf32, #tpu.memory_space<vmem>>, vector<52x16xf32>,
    %175 = vector.extract_strided_slice %172 {offsets = [1, 0], sizes = [52, 16], strides = [1, 1]} : vector<112x16xf32> to vector<52x16xf32>
    %c0_148 = arith.constant 0 : index
    %c16_149 = arith.constant 16 : index
    %176 = vector.load %arg21[%c0_148, %c16_149] : memref<248x80xf32, #tpu.memory_space<vmem>>, vector<52x16xf32>
    tpu.vector_store %arg21[%c0_148, %c16_149], %175 {strides = array<i32>} : memref<248x80xf32, #tpu.memory_space<vmem>>, vector<52x16xf32>,
    %177 = vector.extract_strided_slice %172 {offsets = [2, 0], sizes = [52, 16], strides = [1, 1]} : vector<112x16xf32> to vector<52x16xf32>
    %c0_150 = arith.constant 0 : index
    %c32_151 = arith.constant 32 : index
    %178 = vector.load %arg21[%c0_150, %c32_151] : memref<248x80xf32, #tpu.memory_space<vmem>>, vector<52x16xf32>
    tpu.vector_store %arg21[%c0_150, %c32_151], %177 {strides = array<i32>} : memref<248x80xf32, #tpu.memory_space<vmem>>, vector<52x16xf32>,
    %179 = vector.extract_strided_slice %172 {offsets = [3, 0], sizes = [52, 16], strides = [1, 1]} : vector<112x16xf32> to vector<52x16xf32>
    %c0_152 = arith.constant 0 : index
    %c48_153 = arith.constant 48 : index
    %180 = vector.load %arg21[%c0_152, %c48_153] : memref<248x80xf32, #tpu.memory_space<vmem>>, vector<52x16xf32>
    tpu.vector_store %arg21[%c0_152, %c48_153], %179 {strides = array<i32>} : memref<248x80xf32, #tpu.memory_space<vmem>>, vector<52x16xf32>,
    %181 = vector.extract_strided_slice %172 {offsets = [4, 0], sizes = [52, 16], strides = [1, 1]} : vector<112x16xf32> to vector<52x16xf32>
    %c0_154 = arith.constant 0 : index
    %c64_155 = arith.constant 64 : index
    %182 = vector.load %arg21[%c0_154, %c64_155] : memref<248x80xf32, #tpu.memory_space<vmem>>, vector<52x16xf32>
    tpu.vector_store %arg21[%c0_154, %c64_155], %181 {strides = array<i32>} : memref<248x80xf32, #tpu.memory_space<vmem>>, vector<52x16xf32>,
    %183 = vector.extract_strided_slice %172 {offsets = [56, 0], sizes = [52, 16], strides = [1, 1]} : vector<112x16xf32> to vector<52x16xf32>
    %c52 = arith.constant 52 : index
    %c0_156 = arith.constant 0 : index
    %184 = vector.load %arg21[%c52, %c0_156] : memref<248x80xf32, #tpu.memory_space<vmem>>, vector<52x16xf32>
    tpu.vector_store %arg21[%c52, %c0_156], %183 {strides = array<i32>} : memref<248x80xf32, #tpu.memory_space<vmem>>, vector<52x16xf32>,
    %185 = vector.extract_strided_slice %172 {offsets = [57, 0], sizes = [52, 16], strides = [1, 1]} : vector<112x16xf32> to vector<52x16xf32>
    %c52_157 = arith.constant 52 : index
    %c16_158 = arith.constant 16 : index
    %186 = vector.load %arg21[%c52_157, %c16_158] : memref<248x80xf32, #tpu.memory_space<vmem>>, vector<52x16xf32>
    tpu.vector_store %arg21[%c52_157, %c16_158], %185 {strides = array<i32>} : memref<248x80xf32, #tpu.memory_space<vmem>>, vector<52x16xf32>,
    %187 = vector.extract_strided_slice %172 {offsets = [58, 0], sizes = [52, 16], strides = [1, 1]} : vector<112x16xf32> to vector<52x16xf32>
    %c52_159 = arith.constant 52 : index
    %c32_160 = arith.constant 32 : index
    %188 = vector.load %arg21[%c52_159, %c32_160] : memref<248x80xf32, #tpu.memory_space<vmem>>, vector<52x16xf32>
    tpu.vector_store %arg21[%c52_159, %c32_160], %187 {strides = array<i32>} : memref<248x80xf32, #tpu.memory_space<vmem>>, vector<52x16xf32>,
    %189 = vector.extract_strided_slice %172 {offsets = [59, 0], sizes = [52, 16], strides = [1, 1]} : vector<112x16xf32> to vector<52x16xf32>
    %c52_161 = arith.constant 52 : index
    %c48_162 = arith.constant 48 : index
    %190 = vector.load %arg21[%c52_161, %c48_162] : memref<248x80xf32, #tpu.memory_space<vmem>>, vector<52x16xf32>
    tpu.vector_store %arg21[%c52_161, %c48_162], %189 {strides = array<i32>} : memref<248x80xf32, #tpu.memory_space<vmem>>, vector<52x16xf32>,
    %191 = vector.extract_strided_slice %172 {offsets = [60, 0], sizes = [52, 16], strides = [1, 1]} : vector<112x16xf32> to vector<52x16xf32>
    %c52_163 = arith.constant 52 : index
    %c64_164 = arith.constant 64 : index
    %192 = vector.load %arg21[%c52_163, %c64_164] : memref<248x80xf32, #tpu.memory_space<vmem>>, vector<52x16xf32>
    tpu.vector_store %arg21[%c52_163, %c64_164], %191 {strides = array<i32>} : memref<248x80xf32, #tpu.memory_space<vmem>>, vector<52x16xf32>,
    %c0_165 = arith.constant 0 : index
    %c0_166 = arith.constant 0 : index
    %193 = vector.load %arg21[%c0_165, %c0_166] : memref<248x80xf32, #tpu.memory_space<vmem>>, vector<104x80xf32>
    %c0_167 = arith.constant 0 : index
    %c0_168 = arith.constant 0 : index
    %c0_169 = arith.constant 0 : index
    %194 = vector.load %arg14[%c0_167, %c0_168, %c0_169] : memref<1x80x16xf32, #tpu.memory_space<vmem>>, vector<1x80x16xf32>
    %195 = vector.shape_cast %194 : vector<1x80x16xf32> to vector<80x16xf32>
    %cst_170 = arith.constant dense<0.000000e+00> : vector<104x16xf32>
    %196 = tpu.matmul %193, %195, %cst_170 {dimension_numbers = #tpu.dot_dimension_numbers<[1], [0], [0], [1], [0, 0, 1, 1], [], []>} : vector<104x80xf32>, vector<80x16xf32>, vector<104x16xf32> -> vector<104x16xf32>
    %c0_171 = arith.constant 0 : index
    %c0_172 = arith.constant 0 : index
    %c0_173 = arith.constant 0 : index
    %197 = vector.load %arg15[%c0_171, %c0_172, %c0_173] : memref<1x1x16xf32, #tpu.memory_space<vmem>>, vector<1x1x16xf32>
    %198 = vector.shape_cast %197 : vector<1x1x16xf32> to vector<1x16xf32>
    %199 = vector.broadcast %198 : vector<1x16xf32> to vector<104x16xf32>
    %200 = arith.addf %196, %199 : vector<104x16xf32>
    %cst_174 = arith.constant dense<0.000000e+00> : vector<16xf32>
    %201 = vector.multi_reduction <add>, %200, %cst_174 [0] : vector<104x16xf32> to vector<16xf32>
    %202 = vector.shape_cast %201 : vector<16xf32> to vector<1x16xf32>
    %cst_175 = arith.constant 0.00961538497 : f32
    %203 = vector.broadcast %cst_175 : f32 to vector<1x16xf32>
    %204 = arith.mulf %202, %203 : vector<1x16xf32>
    %205 = vector.broadcast %204 : vector<1x16xf32> to vector<104x16xf32>
    %206 = arith.subf %200, %205 : vector<104x16xf32>
    %207 = arith.mulf %206, %206 : vector<104x16xf32>
    %cst_176 = arith.constant dense<0.000000e+00> : vector<16xf32>
    %208 = vector.multi_reduction <add>, %207, %cst_176 [0] : vector<104x16xf32> to vector<16xf32>
    %209 = vector.shape_cast %208 : vector<16xf32> to vector<1x16xf32>
    %cst_177 = arith.constant 0.00961538497 : f32
    %210 = vector.broadcast %cst_177 : f32 to vector<1x16xf32>
    %211 = arith.mulf %209, %210 : vector<1x16xf32>
    %cst_178 = arith.constant 9.99999974E-6 : f32
    %212 = vector.broadcast %cst_178 : f32 to vector<1x16xf32>
    %213 = arith.addf %211, %212 : vector<1x16xf32>
    %214 = math.rsqrt %213 : vector<1x16xf32>
    %c0_179 = arith.constant 0 : index
    %c0_180 = arith.constant 0 : index
    %c0_181 = arith.constant 0 : index
    %215 = vector.load %arg16[%c0_179, %c0_180, %c0_181] : memref<1x1x16xf32, #tpu.memory_space<vmem>>, vector<1x1x16xf32>
    %216 = vector.shape_cast %215 : vector<1x1x16xf32> to vector<1x16xf32>
    %217 = arith.mulf %214, %216 : vector<1x16xf32>
    %218 = vector.broadcast %217 : vector<1x16xf32> to vector<104x16xf32>
    %219 = arith.mulf %206, %218 : vector<104x16xf32>
    %c0_182 = arith.constant 0 : index
    %c0_183 = arith.constant 0 : index
    %c0_184 = arith.constant 0 : index
    %220 = vector.load %arg17[%c0_182, %c0_183, %c0_184] : memref<1x1x16xf32, #tpu.memory_space<vmem>>, vector<1x1x16xf32>
    %221 = vector.shape_cast %220 : vector<1x1x16xf32> to vector<1x16xf32>
    %222 = vector.broadcast %221 : vector<1x16xf32> to vector<104x16xf32>
    %223 = arith.addf %219, %222 : vector<104x16xf32>
    %cst_185 = arith.constant 0.000000e+00 : f32
    %224 = vector.broadcast %cst_185 : f32 to vector<104x16xf32>
    %225 = arith.maximumf %223, %224 : vector<104x16xf32>
    %c0_186 = arith.constant 0 : index
    %c0_187 = arith.constant 0 : index
    %226 = vector.load %arg23[%c0_186, %c0_187] : memref<104x16xf32, #tpu.memory_space<vmem>>, vector<104x16xf32>
    tpu.vector_store %arg23[%c0_186, %c0_187], %225 {strides = array<i32>} : memref<104x16xf32, #tpu.memory_space<vmem>>, vector<104x16xf32>,
    %c0_188 = arith.constant 0 : index
    %c0_189 = arith.constant 0 : index
    %227 = tpu.strided_load %arg23[%c0_188, %c0_189] {strides = array<i32: 52, 1>} : memref<104x16xf32, #tpu.memory_space<vmem>>, vector<2x16xf32>
    %c1_190 = arith.constant 1 : index
    %c0_191 = arith.constant 0 : index
    %228 = tpu.strided_load %arg23[%c1_190, %c0_191] {strides = array<i32: 52, 1>} : memref<104x16xf32, #tpu.memory_space<vmem>>, vector<2x16xf32>
    %229 = arith.maximumf %227, %228 : vector<2x16xf32>
    %c0_192 = arith.constant 0 : index
    %c0_193 = arith.constant 0 : index
    %230 = vector.load %arg24[%c0_192, %c0_193] : memref<2x416xf32, #tpu.memory_space<vmem>>, vector<2x16xf32>
    tpu.vector_store %arg24[%c0_192, %c0_193], %229 {strides = array<i32>} : memref<2x416xf32, #tpu.memory_space<vmem>>, vector<2x16xf32>,
    %c2_194 = arith.constant 2 : index
    %c0_195 = arith.constant 0 : index
    %231 = tpu.strided_load %arg23[%c2_194, %c0_195] {strides = array<i32: 52, 1>} : memref<104x16xf32, #tpu.memory_space<vmem>>, vector<2x16xf32>
    %c3_196 = arith.constant 3 : index
    %c0_197 = arith.constant 0 : index
    %232 = tpu.strided_load %arg23[%c3_196, %c0_197] {strides = array<i32: 52, 1>} : memref<104x16xf32, #tpu.memory_space<vmem>>, vector<2x16xf32>
    %233 = arith.maximumf %231, %232 : vector<2x16xf32>
    %c0_198 = arith.constant 0 : index
    %c16_199 = arith.constant 16 : index
    %234 = vector.load %arg24[%c0_198, %c16_199] : memref<2x416xf32, #tpu.memory_space<vmem>>, vector<2x16xf32>
    tpu.vector_store %arg24[%c0_198, %c16_199], %233 {strides = array<i32>} : memref<2x416xf32, #tpu.memory_space<vmem>>, vector<2x16xf32>,
    %c4_200 = arith.constant 4 : index
    %c0_201 = arith.constant 0 : index
    %235 = tpu.strided_load %arg23[%c4_200, %c0_201] {strides = array<i32: 52, 1>} : memref<104x16xf32, #tpu.memory_space<vmem>>, vector<2x16xf32>
    %c5 = arith.constant 5 : index
    %c0_202 = arith.constant 0 : index
    %236 = tpu.strided_load %arg23[%c5, %c0_202] {strides = array<i32: 52, 1>} : memref<104x16xf32, #tpu.memory_space<vmem>>, vector<2x16xf32>
    %237 = arith.maximumf %235, %236 : vector<2x16xf32>
    %c0_203 = arith.constant 0 : index
    %c32_204 = arith.constant 32 : index
    %238 = vector.load %arg24[%c0_203, %c32_204] : memref<2x416xf32, #tpu.memory_space<vmem>>, vector<2x16xf32>
    tpu.vector_store %arg24[%c0_203, %c32_204], %237 {strides = array<i32>} : memref<2x416xf32, #tpu.memory_space<vmem>>, vector<2x16xf32>,
    %c6 = arith.constant 6 : index
    %c0_205 = arith.constant 0 : index
    %239 = tpu.strided_load %arg23[%c6, %c0_205] {strides = array<i32: 52, 1>} : memref<104x16xf32, #tpu.memory_space<vmem>>, vector<2x16xf32>
    %c7 = arith.constant 7 : index
    %c0_206 = arith.constant 0 : index
    %240 = tpu.strided_load %arg23[%c7, %c0_206] {strides = array<i32: 52, 1>} : memref<104x16xf32, #tpu.memory_space<vmem>>, vector<2x16xf32>
    %241 = arith.maximumf %239, %240 : vector<2x16xf32>
    %c0_207 = arith.constant 0 : index
    %c48_208 = arith.constant 48 : index
    %242 = vector.load %arg24[%c0_207, %c48_208] : memref<2x416xf32, #tpu.memory_space<vmem>>, vector<2x16xf32>
    tpu.vector_store %arg24[%c0_207, %c48_208], %241 {strides = array<i32>} : memref<2x416xf32, #tpu.memory_space<vmem>>, vector<2x16xf32>,
    %c8 = arith.constant 8 : index
    %c0_209 = arith.constant 0 : index
    %243 = tpu.strided_load %arg23[%c8, %c0_209] {strides = array<i32: 52, 1>} : memref<104x16xf32, #tpu.memory_space<vmem>>, vector<2x16xf32>
    %c9 = arith.constant 9 : index
    %c0_210 = arith.constant 0 : index
    %244 = tpu.strided_load %arg23[%c9, %c0_210] {strides = array<i32: 52, 1>} : memref<104x16xf32, #tpu.memory_space<vmem>>, vector<2x16xf32>
    %245 = arith.maximumf %243, %244 : vector<2x16xf32>
    %c0_211 = arith.constant 0 : index
    %c64_212 = arith.constant 64 : index
    %246 = vector.load %arg24[%c0_211, %c64_212] : memref<2x416xf32, #tpu.memory_space<vmem>>, vector<2x16xf32>
    tpu.vector_store %arg24[%c0_211, %c64_212], %245 {strides = array<i32>} : memref<2x416xf32, #tpu.memory_space<vmem>>, vector<2x16xf32>,
    %c10 = arith.constant 10 : index
    %c0_213 = arith.constant 0 : index
    %247 = tpu.strided_load %arg23[%c10, %c0_213] {strides = array<i32: 52, 1>} : memref<104x16xf32, #tpu.memory_space<vmem>>, vector<2x16xf32>
    %c11 = arith.constant 11 : index
    %c0_214 = arith.constant 0 : index
    %248 = tpu.strided_load %arg23[%c11, %c0_214] {strides = array<i32: 52, 1>} : memref<104x16xf32, #tpu.memory_space<vmem>>, vector<2x16xf32>
    %249 = arith.maximumf %247, %248 : vector<2x16xf32>
    %c0_215 = arith.constant 0 : index
    %c80 = arith.constant 80 : index
    %250 = vector.load %arg24[%c0_215, %c80] : memref<2x416xf32, #tpu.memory_space<vmem>>, vector<2x16xf32>
    tpu.vector_store %arg24[%c0_215, %c80], %249 {strides = array<i32>} : memref<2x416xf32, #tpu.memory_space<vmem>>, vector<2x16xf32>,
    %c12 = arith.constant 12 : index
    %c0_216 = arith.constant 0 : index
    %251 = tpu.strided_load %arg23[%c12, %c0_216] {strides = array<i32: 52, 1>} : memref<104x16xf32, #tpu.memory_space<vmem>>, vector<2x16xf32>
    %c13 = arith.constant 13 : index
    %c0_217 = arith.constant 0 : index
    %252 = tpu.strided_load %arg23[%c13, %c0_217] {strides = array<i32: 52, 1>} : memref<104x16xf32, #tpu.memory_space<vmem>>, vector<2x16xf32>
    %253 = arith.maximumf %251, %252 : vector<2x16xf32>
    %c0_218 = arith.constant 0 : index
    %c96 = arith.constant 96 : index
    %254 = vector.load %arg24[%c0_218, %c96] : memref<2x416xf32, #tpu.memory_space<vmem>>, vector<2x16xf32>
    tpu.vector_store %arg24[%c0_218, %c96], %253 {strides = array<i32>} : memref<2x416xf32, #tpu.memory_space<vmem>>, vector<2x16xf32>,
    %c14 = arith.constant 14 : index
    %c0_219 = arith.constant 0 : index
    %255 = tpu.strided_load %arg23[%c14, %c0_219] {strides = array<i32: 52, 1>} : memref<104x16xf32, #tpu.memory_space<vmem>>, vector<2x16xf32>
    %c15 = arith.constant 15 : index
    %c0_220 = arith.constant 0 : index
    %256 = tpu.strided_load %arg23[%c15, %c0_220] {strides = array<i32: 52, 1>} : memref<104x16xf32, #tpu.memory_space<vmem>>, vector<2x16xf32>
    %257 = arith.maximumf %255, %256 : vector<2x16xf32>
    %c0_221 = arith.constant 0 : index
    %c112 = arith.constant 112 : index
    %258 = vector.load %arg24[%c0_221, %c112] : memref<2x416xf32, #tpu.memory_space<vmem>>, vector<2x16xf32>
    tpu.vector_store %arg24[%c0_221, %c112], %257 {strides = array<i32>} : memref<2x416xf32, #tpu.memory_space<vmem>>, vector<2x16xf32>,
    %c16_222 = arith.constant 16 : index
    %c0_223 = arith.constant 0 : index
    %259 = tpu.strided_load %arg23[%c16_222, %c0_223] {strides = array<i32: 52, 1>} : memref<104x16xf32, #tpu.memory_space<vmem>>, vector<2x16xf32>
    %c17 = arith.constant 17 : index
    %c0_224 = arith.constant 0 : index
    %260 = tpu.strided_load %arg23[%c17, %c0_224] {strides = array<i32: 52, 1>} : memref<104x16xf32, #tpu.memory_space<vmem>>, vector<2x16xf32>
    %261 = arith.maximumf %259, %260 : vector<2x16xf32>
    %c0_225 = arith.constant 0 : index
    %c128 = arith.constant 128 : index
    %262 = vector.load %arg24[%c0_225, %c128] : memref<2x416xf32, #tpu.memory_space<vmem>>, vector<2x16xf32>
    tpu.vector_store %arg24[%c0_225, %c128], %261 {strides = array<i32>} : memref<2x416xf32, #tpu.memory_space<vmem>>, vector<2x16xf32>,
    %c18 = arith.constant 18 : index
    %c0_226 = arith.constant 0 : index
    %263 = tpu.strided_load %arg23[%c18, %c0_226] {strides = array<i32: 52, 1>} : memref<104x16xf32, #tpu.memory_space<vmem>>, vector<2x16xf32>
    %c19 = arith.constant 19 : index
    %c0_227 = arith.constant 0 : index
    %264 = tpu.strided_load %arg23[%c19, %c0_227] {strides = array<i32: 52, 1>} : memref<104x16xf32, #tpu.memory_space<vmem>>, vector<2x16xf32>
    %265 = arith.maximumf %263, %264 : vector<2x16xf32>
    %c0_228 = arith.constant 0 : index
    %c144 = arith.constant 144 : index
    %266 = vector.load %arg24[%c0_228, %c144] : memref<2x416xf32, #tpu.memory_space<vmem>>, vector<2x16xf32>
    tpu.vector_store %arg24[%c0_228, %c144], %265 {strides = array<i32>} : memref<2x416xf32, #tpu.memory_space<vmem>>, vector<2x16xf32>,
    %c20 = arith.constant 20 : index
    %c0_229 = arith.constant 0 : index
    %267 = tpu.strided_load %arg23[%c20, %c0_229] {strides = array<i32: 52, 1>} : memref<104x16xf32, #tpu.memory_space<vmem>>, vector<2x16xf32>
    %c21 = arith.constant 21 : index
    %c0_230 = arith.constant 0 : index
    %268 = tpu.strided_load %arg23[%c21, %c0_230] {strides = array<i32: 52, 1>} : memref<104x16xf32, #tpu.memory_space<vmem>>, vector<2x16xf32>
    %269 = arith.maximumf %267, %268 : vector<2x16xf32>
    %c0_231 = arith.constant 0 : index
    %c160 = arith.constant 160 : index
    %270 = vector.load %arg24[%c0_231, %c160] : memref<2x416xf32, #tpu.memory_space<vmem>>, vector<2x16xf32>
    tpu.vector_store %arg24[%c0_231, %c160], %269 {strides = array<i32>} : memref<2x416xf32, #tpu.memory_space<vmem>>, vector<2x16xf32>,
    %c22 = arith.constant 22 : index
    %c0_232 = arith.constant 0 : index
    %271 = tpu.strided_load %arg23[%c22, %c0_232] {strides = array<i32: 52, 1>} : memref<104x16xf32, #tpu.memory_space<vmem>>, vector<2x16xf32>
    %c23 = arith.constant 23 : index
    %c0_233 = arith.constant 0 : index
    %272 = tpu.strided_load %arg23[%c23, %c0_233] {strides = array<i32: 52, 1>} : memref<104x16xf32, #tpu.memory_space<vmem>>, vector<2x16xf32>
    %273 = arith.maximumf %271, %272 : vector<2x16xf32>
    %c0_234 = arith.constant 0 : index
    %c176 = arith.constant 176 : index
    %274 = vector.load %arg24[%c0_234, %c176] : memref<2x416xf32, #tpu.memory_space<vmem>>, vector<2x16xf32>
    tpu.vector_store %arg24[%c0_234, %c176], %273 {strides = array<i32>} : memref<2x416xf32, #tpu.memory_space<vmem>>, vector<2x16xf32>,
    %c24 = arith.constant 24 : index
    %c0_235 = arith.constant 0 : index
    %275 = tpu.strided_load %arg23[%c24, %c0_235] {strides = array<i32: 52, 1>} : memref<104x16xf32, #tpu.memory_space<vmem>>, vector<2x16xf32>
    %c25 = arith.constant 25 : index
    %c0_236 = arith.constant 0 : index
    %276 = tpu.strided_load %arg23[%c25, %c0_236] {strides = array<i32: 52, 1>} : memref<104x16xf32, #tpu.memory_space<vmem>>, vector<2x16xf32>
    %277 = arith.maximumf %275, %276 : vector<2x16xf32>
    %c0_237 = arith.constant 0 : index
    %c192 = arith.constant 192 : index
    %278 = vector.load %arg24[%c0_237, %c192] : memref<2x416xf32, #tpu.memory_space<vmem>>, vector<2x16xf32>
    tpu.vector_store %arg24[%c0_237, %c192], %277 {strides = array<i32>} : memref<2x416xf32, #tpu.memory_space<vmem>>, vector<2x16xf32>,
    %c26 = arith.constant 26 : index
    %c0_238 = arith.constant 0 : index
    %279 = tpu.strided_load %arg23[%c26, %c0_238] {strides = array<i32: 52, 1>} : memref<104x16xf32, #tpu.memory_space<vmem>>, vector<2x16xf32>
    %c27 = arith.constant 27 : index
    %c0_239 = arith.constant 0 : index
    %280 = tpu.strided_load %arg23[%c27, %c0_239] {strides = array<i32: 52, 1>} : memref<104x16xf32, #tpu.memory_space<vmem>>, vector<2x16xf32>
    %281 = arith.maximumf %279, %280 : vector<2x16xf32>
    %c0_240 = arith.constant 0 : index
    %c208 = arith.constant 208 : index
    %282 = vector.load %arg24[%c0_240, %c208] : memref<2x416xf32, #tpu.memory_space<vmem>>, vector<2x16xf32>
    tpu.vector_store %arg24[%c0_240, %c208], %281 {strides = array<i32>} : memref<2x416xf32, #tpu.memory_space<vmem>>, vector<2x16xf32>,
    %c28 = arith.constant 28 : index
    %c0_241 = arith.constant 0 : index
    %283 = tpu.strided_load %arg23[%c28, %c0_241] {strides = array<i32: 52, 1>} : memref<104x16xf32, #tpu.memory_space<vmem>>, vector<2x16xf32>
    %c29 = arith.constant 29 : index
    %c0_242 = arith.constant 0 : index
    %284 = tpu.strided_load %arg23[%c29, %c0_242] {strides = array<i32: 52, 1>} : memref<104x16xf32, #tpu.memory_space<vmem>>, vector<2x16xf32>
    %285 = arith.maximumf %283, %284 : vector<2x16xf32>
    %c0_243 = arith.constant 0 : index
    %c224 = arith.constant 224 : index
    %286 = vector.load %arg24[%c0_243, %c224] : memref<2x416xf32, #tpu.memory_space<vmem>>, vector<2x16xf32>
    tpu.vector_store %arg24[%c0_243, %c224], %285 {strides = array<i32>} : memref<2x416xf32, #tpu.memory_space<vmem>>, vector<2x16xf32>,
    %c30 = arith.constant 30 : index
    %c0_244 = arith.constant 0 : index
    %287 = tpu.strided_load %arg23[%c30, %c0_244] {strides = array<i32: 52, 1>} : memref<104x16xf32, #tpu.memory_space<vmem>>, vector<2x16xf32>
    %c31 = arith.constant 31 : index
    %c0_245 = arith.constant 0 : index
    %288 = tpu.strided_load %arg23[%c31, %c0_245] {strides = array<i32: 52, 1>} : memref<104x16xf32, #tpu.memory_space<vmem>>, vector<2x16xf32>
    %289 = arith.maximumf %287, %288 : vector<2x16xf32>
    %c0_246 = arith.constant 0 : index
    %c240 = arith.constant 240 : index
    %290 = vector.load %arg24[%c0_246, %c240] : memref<2x416xf32, #tpu.memory_space<vmem>>, vector<2x16xf32>
    tpu.vector_store %arg24[%c0_246, %c240], %289 {strides = array<i32>} : memref<2x416xf32, #tpu.memory_space<vmem>>, vector<2x16xf32>,
    %c32_247 = arith.constant 32 : index
    %c0_248 = arith.constant 0 : index
    %291 = tpu.strided_load %arg23[%c32_247, %c0_248] {strides = array<i32: 52, 1>} : memref<104x16xf32, #tpu.memory_space<vmem>>, vector<2x16xf32>
    %c33 = arith.constant 33 : index
    %c0_249 = arith.constant 0 : index
    %292 = tpu.strided_load %arg23[%c33, %c0_249] {strides = array<i32: 52, 1>} : memref<104x16xf32, #tpu.memory_space<vmem>>, vector<2x16xf32>
    %293 = arith.maximumf %291, %292 : vector<2x16xf32>
    %c0_250 = arith.constant 0 : index
    %c256 = arith.constant 256 : index
    %294 = vector.load %arg24[%c0_250, %c256] : memref<2x416xf32, #tpu.memory_space<vmem>>, vector<2x16xf32>
    tpu.vector_store %arg24[%c0_250, %c256], %293 {strides = array<i32>} : memref<2x416xf32, #tpu.memory_space<vmem>>, vector<2x16xf32>,
    %c34 = arith.constant 34 : index
    %c0_251 = arith.constant 0 : index
    %295 = tpu.strided_load %arg23[%c34, %c0_251] {strides = array<i32: 52, 1>} : memref<104x16xf32, #tpu.memory_space<vmem>>, vector<2x16xf32>
    %c35 = arith.constant 35 : index
    %c0_252 = arith.constant 0 : index
    %296 = tpu.strided_load %arg23[%c35, %c0_252] {strides = array<i32: 52, 1>} : memref<104x16xf32, #tpu.memory_space<vmem>>, vector<2x16xf32>
    %297 = arith.maximumf %295, %296 : vector<2x16xf32>
    %c0_253 = arith.constant 0 : index
    %c272 = arith.constant 272 : index
    %298 = vector.load %arg24[%c0_253, %c272] : memref<2x416xf32, #tpu.memory_space<vmem>>, vector<2x16xf32>
    tpu.vector_store %arg24[%c0_253, %c272], %297 {strides = array<i32>} : memref<2x416xf32, #tpu.memory_space<vmem>>, vector<2x16xf32>,
    %c36 = arith.constant 36 : index
    %c0_254 = arith.constant 0 : index
    %299 = tpu.strided_load %arg23[%c36, %c0_254] {strides = array<i32: 52, 1>} : memref<104x16xf32, #tpu.memory_space<vmem>>, vector<2x16xf32>
    %c37 = arith.constant 37 : index
    %c0_255 = arith.constant 0 : index
    %300 = tpu.strided_load %arg23[%c37, %c0_255] {strides = array<i32: 52, 1>} : memref<104x16xf32, #tpu.memory_space<vmem>>, vector<2x16xf32>
    %301 = arith.maximumf %299, %300 : vector<2x16xf32>
    %c0_256 = arith.constant 0 : index
    %c288 = arith.constant 288 : index
    %302 = vector.load %arg24[%c0_256, %c288] : memref<2x416xf32, #tpu.memory_space<vmem>>, vector<2x16xf32>
    tpu.vector_store %arg24[%c0_256, %c288], %301 {strides = array<i32>} : memref<2x416xf32, #tpu.memory_space<vmem>>, vector<2x16xf32>,
    %c38 = arith.constant 38 : index
    %c0_257 = arith.constant 0 : index
    %303 = tpu.strided_load %arg23[%c38, %c0_257] {strides = array<i32: 52, 1>} : memref<104x16xf32, #tpu.memory_space<vmem>>, vector<2x16xf32>
    %c39 = arith.constant 39 : index
    %c0_258 = arith.constant 0 : index
    %304 = tpu.strided_load %arg23[%c39, %c0_258] {strides = array<i32: 52, 1>} : memref<104x16xf32, #tpu.memory_space<vmem>>, vector<2x16xf32>
    %305 = arith.maximumf %303, %304 : vector<2x16xf32>
    %c0_259 = arith.constant 0 : index
    %c304 = arith.constant 304 : index
    %306 = vector.load %arg24[%c0_259, %c304] : memref<2x416xf32, #tpu.memory_space<vmem>>, vector<2x16xf32>
    tpu.vector_store %arg24[%c0_259, %c304], %305 {strides = array<i32>} : memref<2x416xf32, #tpu.memory_space<vmem>>, vector<2x16xf32>,
    %c40 = arith.constant 40 : index
    %c0_260 = arith.constant 0 : index
    %307 = tpu.strided_load %arg23[%c40, %c0_260] {strides = array<i32: 52, 1>} : memref<104x16xf32, #tpu.memory_space<vmem>>, vector<2x16xf32>
    %c41 = arith.constant 41 : index
    %c0_261 = arith.constant 0 : index
    %308 = tpu.strided_load %arg23[%c41, %c0_261] {strides = array<i32: 52, 1>} : memref<104x16xf32, #tpu.memory_space<vmem>>, vector<2x16xf32>
    %309 = arith.maximumf %307, %308 : vector<2x16xf32>
    %c0_262 = arith.constant 0 : index
    %c320 = arith.constant 320 : index
    %310 = vector.load %arg24[%c0_262, %c320] : memref<2x416xf32, #tpu.memory_space<vmem>>, vector<2x16xf32>
    tpu.vector_store %arg24[%c0_262, %c320], %309 {strides = array<i32>} : memref<2x416xf32, #tpu.memory_space<vmem>>, vector<2x16xf32>,
    %c42 = arith.constant 42 : index
    %c0_263 = arith.constant 0 : index
    %311 = tpu.strided_load %arg23[%c42, %c0_263] {strides = array<i32: 52, 1>} : memref<104x16xf32, #tpu.memory_space<vmem>>, vector<2x16xf32>
    %c43 = arith.constant 43 : index
    %c0_264 = arith.constant 0 : index
    %312 = tpu.strided_load %arg23[%c43, %c0_264] {strides = array<i32: 52, 1>} : memref<104x16xf32, #tpu.memory_space<vmem>>, vector<2x16xf32>
    %313 = arith.maximumf %311, %312 : vector<2x16xf32>
    %c0_265 = arith.constant 0 : index
    %c336 = arith.constant 336 : index
    %314 = vector.load %arg24[%c0_265, %c336] : memref<2x416xf32, #tpu.memory_space<vmem>>, vector<2x16xf32>
    tpu.vector_store %arg24[%c0_265, %c336], %313 {strides = array<i32>} : memref<2x416xf32, #tpu.memory_space<vmem>>, vector<2x16xf32>,
    %c44 = arith.constant 44 : index
    %c0_266 = arith.constant 0 : index
    %315 = tpu.strided_load %arg23[%c44, %c0_266] {strides = array<i32: 52, 1>} : memref<104x16xf32, #tpu.memory_space<vmem>>, vector<2x16xf32>
    %c45 = arith.constant 45 : index
    %c0_267 = arith.constant 0 : index
    %316 = tpu.strided_load %arg23[%c45, %c0_267] {strides = array<i32: 52, 1>} : memref<104x16xf32, #tpu.memory_space<vmem>>, vector<2x16xf32>
    %317 = arith.maximumf %315, %316 : vector<2x16xf32>
    %c0_268 = arith.constant 0 : index
    %c352 = arith.constant 352 : index
    %318 = vector.load %arg24[%c0_268, %c352] : memref<2x416xf32, #tpu.memory_space<vmem>>, vector<2x16xf32>
    tpu.vector_store %arg24[%c0_268, %c352], %317 {strides = array<i32>} : memref<2x416xf32, #tpu.memory_space<vmem>>, vector<2x16xf32>,
    %c46 = arith.constant 46 : index
    %c0_269 = arith.constant 0 : index
    %319 = tpu.strided_load %arg23[%c46, %c0_269] {strides = array<i32: 52, 1>} : memref<104x16xf32, #tpu.memory_space<vmem>>, vector<2x16xf32>
    %c47 = arith.constant 47 : index
    %c0_270 = arith.constant 0 : index
    %320 = tpu.strided_load %arg23[%c47, %c0_270] {strides = array<i32: 52, 1>} : memref<104x16xf32, #tpu.memory_space<vmem>>, vector<2x16xf32>
    %321 = arith.maximumf %319, %320 : vector<2x16xf32>
    %c0_271 = arith.constant 0 : index
    %c368 = arith.constant 368 : index
    %322 = vector.load %arg24[%c0_271, %c368] : memref<2x416xf32, #tpu.memory_space<vmem>>, vector<2x16xf32>
    tpu.vector_store %arg24[%c0_271, %c368], %321 {strides = array<i32>} : memref<2x416xf32, #tpu.memory_space<vmem>>, vector<2x16xf32>,
    %c48_272 = arith.constant 48 : index
    %c0_273 = arith.constant 0 : index
    %323 = tpu.strided_load %arg23[%c48_272, %c0_273] {strides = array<i32: 52, 1>} : memref<104x16xf32, #tpu.memory_space<vmem>>, vector<2x16xf32>
    %c49 = arith.constant 49 : index
    %c0_274 = arith.constant 0 : index
    %324 = tpu.strided_load %arg23[%c49, %c0_274] {strides = array<i32: 52, 1>} : memref<104x16xf32, #tpu.memory_space<vmem>>, vector<2x16xf32>
    %325 = arith.maximumf %323, %324 : vector<2x16xf32>
    %c0_275 = arith.constant 0 : index
    %c384 = arith.constant 384 : index
    %326 = vector.load %arg24[%c0_275, %c384] : memref<2x416xf32, #tpu.memory_space<vmem>>, vector<2x16xf32>
    tpu.vector_store %arg24[%c0_275, %c384], %325 {strides = array<i32>} : memref<2x416xf32, #tpu.memory_space<vmem>>, vector<2x16xf32>,
    %c50 = arith.constant 50 : index
    %c0_276 = arith.constant 0 : index
    %327 = tpu.strided_load %arg23[%c50, %c0_276] {strides = array<i32: 52, 1>} : memref<104x16xf32, #tpu.memory_space<vmem>>, vector<2x16xf32>
    %c51 = arith.constant 51 : index
    %c0_277 = arith.constant 0 : index
    %328 = tpu.strided_load %arg23[%c51, %c0_277] {strides = array<i32: 52, 1>} : memref<104x16xf32, #tpu.memory_space<vmem>>, vector<2x16xf32>
    %329 = arith.maximumf %327, %328 : vector<2x16xf32>
    %c0_278 = arith.constant 0 : index
    %c400 = arith.constant 400 : index
    %330 = vector.load %arg24[%c0_278, %c400] : memref<2x416xf32, #tpu.memory_space<vmem>>, vector<2x16xf32>
    tpu.vector_store %arg24[%c0_278, %c400], %329 {strides = array<i32>} : memref<2x416xf32, #tpu.memory_space<vmem>>, vector<2x16xf32>,
    %c0_279 = arith.constant 0 : index
    %c0_280 = arith.constant 0 : index
    %331 = vector.load %arg24[%c0_279, %c0_280] : memref<2x416xf32, #tpu.memory_space<vmem>>, vector<2x416xf32>
    %c0_281 = arith.constant 0 : index
    %c0_282 = arith.constant 0 : index
    %c0_283 = arith.constant 0 : index
    %332 = vector.load %arg18[%c0_281, %c0_282, %c0_283] : memref<1x416x512xf32, #tpu.memory_space<vmem>>, vector<1x416x512xf32>
    %333 = vector.shape_cast %332 : vector<1x416x512xf32> to vector<416x512xf32>
    %cst_284 = arith.constant dense<0.000000e+00> : vector<2x512xf32>
    %334 = tpu.matmul %331, %333, %cst_284 {dimension_numbers = #tpu.dot_dimension_numbers<[1], [0], [0], [1], [0, 0, 1, 1], [], []>} : vector<2x416xf32>, vector<416x512xf32>, vector<2x512xf32> -> vector<2x512xf32>
    %c0_285 = arith.constant 0 : index
    %c0_286 = arith.constant 0 : index
    %c0_287 = arith.constant 0 : index
    %335 = vector.load %arg19[%c0_285, %c0_286, %c0_287] : memref<1x1x512xf32, #tpu.memory_space<vmem>>, vector<1x1x512xf32>
    %336 = vector.shape_cast %335 : vector<1x1x512xf32> to vector<1x512xf32>
    %337 = vector.broadcast %336 : vector<1x512xf32> to vector<2x512xf32>
    %338 = arith.addf %334, %337 : vector<2x512xf32>
    %cst_288 = arith.constant 0.000000e+00 : f32
    %339 = vector.broadcast %cst_288 : f32 to vector<2x512xf32>
    %340 = arith.maximumf %338, %339 : vector<2x512xf32>
    %c0_289 = arith.constant 0 : index
    %c0_290 = arith.constant 0 : index
    %c0_291 = arith.constant 0 : index
    %341 = vector.load %arg20[%c0_289, %c0_290, %c0_291] : memref<1x2x512xf32, #tpu.memory_space<vmem>>, vector<1x2x512xf32>
    %342 = vector.shape_cast %341 : vector<1x2x512xf32> to vector<2x512xf32>
    %343 = vector.shape_cast %340 : vector<2x512xf32> to vector<1x2x512xf32>
    tpu.vector_store %arg20[%c0_289, %c0_290, %c0_291], %343 {strides = array<i32>} : memref<1x2x512xf32, #tpu.memory_space<vmem>>, vector<1x2x512xf32>,
    return
  }
  func.func @transform_0(%arg0: i32) -> (i32, i32, i32) {
    %c0_i32 = arith.constant 0 : i32
    %c0_i32_0 = arith.constant 0 : i32
    %c0_i32_1 = arith.constant 0 : i32
    return %arg0, %c0_i32, %c0_i32_0 : i32, i32, i32
  }
  func.func @transform_1(%arg0: i32) -> (i32, i32, i32) {
    %c0_i32 = arith.constant 0 : i32
    %c0_i32_0 = arith.constant 0 : i32
    %c0_i32_1 = arith.constant 0 : i32
    return %arg0, %c0_i32, %c0_i32_0 : i32, i32, i32
  }
  func.func @transform_2(%arg0: i32) -> (i32, i32, i32) {
    %c0_i32 = arith.constant 0 : i32
    %c0_i32_0 = arith.constant 0 : i32
    %c0_i32_1 = arith.constant 0 : i32
    return %arg0, %c0_i32, %c0_i32_0 : i32, i32, i32
  }
  func.func @transform_3(%arg0: i32) -> (i32, i32, i32) {
    %c0_i32 = arith.constant 0 : i32
    %c0_i32_0 = arith.constant 0 : i32
    %c0_i32_1 = arith.constant 0 : i32
    return %arg0, %c0_i32, %c0_i32_0 : i32, i32, i32
  }
  func.func @transform_4(%arg0: i32) -> (i32, i32, i32) {
    %c0_i32 = arith.constant 0 : i32
    %c0_i32_0 = arith.constant 0 : i32
    %c0_i32_1 = arith.constant 0 : i32
    return %arg0, %c0_i32, %c0_i32_0 : i32, i32, i32
  }
  func.func @transform_5(%arg0: i32) -> (i32, i32, i32) {
    %c0_i32 = arith.constant 0 : i32
    %c0_i32_0 = arith.constant 0 : i32
    %c0_i32_1 = arith.constant 0 : i32
    return %arg0, %c0_i32, %c0_i32_0 : i32, i32, i32
  }
  func.func @transform_6(%arg0: i32) -> (i32, i32, i32) {
    %c0_i32 = arith.constant 0 : i32
    %c0_i32_0 = arith.constant 0 : i32
    %c0_i32_1 = arith.constant 0 : i32
    return %arg0, %c0_i32, %c0_i32_0 : i32, i32, i32
  }
  func.func @transform_7(%arg0: i32) -> (i32, i32, i32) {
    %c0_i32 = arith.constant 0 : i32
    %c0_i32_0 = arith.constant 0 : i32
    %c0_i32_1 = arith.constant 0 : i32
    return %arg0, %c0_i32, %c0_i32_0 : i32, i32, i32
  }
  func.func @transform_8(%arg0: i32) -> (i32, i32, i32) {
    %c0_i32 = arith.constant 0 : i32
    %c0_i32_0 = arith.constant 0 : i32
    %c0_i32_1 = arith.constant 0 : i32
    return %arg0, %c0_i32, %c0_i32_0 : i32, i32, i32
  }
  func.func @transform_9(%arg0: i32) -> (i32, i32, i32) {
    %c0_i32 = arith.constant 0 : i32
    %c0_i32_0 = arith.constant 0 : i32
    %c0_i32_1 = arith.constant 0 : i32
    return %arg0, %c0_i32, %c0_i32_0 : i32, i32, i32
  }
  func.func @transform_10(%arg0: i32) -> (i32, i32, i32) {
    %c0_i32 = arith.constant 0 : i32
    %c0_i32_0 = arith.constant 0 : i32
    %c0_i32_1 = arith.constant 0 : i32
    return %arg0, %c0_i32, %c0_i32_0 : i32, i32, i32
  }
  func.func @transform_11(%arg0: i32) -> (i32, i32, i32) {
    %c0_i32 = arith.constant 0 : i32
    %c0_i32_0 = arith.constant 0 : i32
    %c0_i32_1 = arith.constant 0 : i32
    return %arg0, %c0_i32, %c0_i32_0 : i32, i32, i32
  }
  func.func @transform_12(%arg0: i32) -> (i32, i32, i32) {
    %c0_i32 = arith.constant 0 : i32
    %c0_i32_0 = arith.constant 0 : i32
    %c0_i32_1 = arith.constant 0 : i32
    return %arg0, %c0_i32, %c0_i32_0 : i32, i32, i32
  }
  func.func @transform_13(%arg0: i32) -> (i32, i32, i32) {
    %c0_i32 = arith.constant 0 : i32
    %c0_i32_0 = arith.constant 0 : i32
    %c0_i32_1 = arith.constant 0 : i32
    return %arg0, %c0_i32, %c0_i32_0 : i32, i32, i32
  }
  func.func @transform_14(%arg0: i32) -> (i32, i32, i32) {
    %c0_i32 = arith.constant 0 : i32
    %c0_i32_0 = arith.constant 0 : i32
    %c0_i32_1 = arith.constant 0 : i32
    return %arg0, %c0_i32, %c0_i32_0 : i32, i32, i32
  }
  func.func @transform_15(%arg0: i32) -> (i32, i32, i32) {
    %c0_i32 = arith.constant 0 : i32
    %c0_i32_0 = arith.constant 0 : i32
    %c0_i32_1 = arith.constant 0 : i32
    return %arg0, %c0_i32, %c0_i32_0 : i32, i32, i32
  }
  func.func @transform_16(%arg0: i32) -> (i32, i32, i32) {
    %c0_i32 = arith.constant 0 : i32
    %c0_i32_0 = arith.constant 0 : i32
    %c0_i32_1 = arith.constant 0 : i32
    return %arg0, %c0_i32, %c0_i32_0 : i32, i32, i32
  }
  func.func @transform_17(%arg0: i32) -> (i32, i32, i32) {
    %c0_i32 = arith.constant 0 : i32
    %c0_i32_0 = arith.constant 0 : i32
    %c0_i32_1 = arith.constant 0 : i32
    return %arg0, %c0_i32, %c0_i32_0 : i32, i32, i32
  }
  func.func @transform_18(%arg0: i32) -> (i32, i32, i32) {
    %c0_i32 = arith.constant 0 : i32
    %c0_i32_0 = arith.constant 0 : i32
    %c0_i32_1 = arith.constant 0 : i32
    return %arg0, %c0_i32, %c0_i32_0 : i32, i32, i32
  }
  func.func @transform_19(%arg0: i32) -> (i32, i32, i32) {
    %c0_i32 = arith.constant 0 : i32
    %c0_i32_0 = arith.constant 0 : i32
    %c0_i32_1 = arith.constant 0 : i32
    return %arg0, %c0_i32, %c0_i32_0 : i32, i32, i32
  }
}

module attributes {stable_mosaic.version = 11 : i64} {
  func.func @_cls_kernel(%arg0: i32, %arg1: memref<1x2x512xf32, #tpu.memory_space<vmem>>, %arg2: memref<1x512x512xf32, #tpu.memory_space<vmem>>, %arg3: memref<1x512xf32, #tpu.memory_space<vmem>>, %arg4: memref<512x6xf32, #tpu.memory_space<vmem>>, %arg5: memref<1x6xf32, #tpu.memory_space<vmem>>, %arg6: memref<2x6xf32, #tpu.memory_space<vmem>>, %arg7: memref<2x512xf32, #tpu.memory_space<vmem>>, %arg8: memref<2x512xf32, #tpu.memory_space<vmem>>) attributes {dimension_semantics = [#tpu.dimension_semantics<arbitrary>], iteration_bounds = array<i64: 2>, scalar_prefetch = 0 : i64, scratch_operands = 1 : i64, tpu.core_type = #tpu.core_type<tc>, window_params = [{transform_indices = @transform_0, window_bounds = array<i64: 1, 2, 512>}, {transform_indices = @transform_1, window_bounds = array<i64: 1, 512, 512>}, {pipeline_mode = #tpu.pipeline_mode<synchronous>, transform_indices = @transform_2, window_bounds = array<i64: 1, 512>}, {pipeline_mode = #tpu.pipeline_mode<synchronous>, transform_indices = @transform_3, window_bounds = array<i64: 512, 6>}, {pipeline_mode = #tpu.pipeline_mode<synchronous>, transform_indices = @transform_4, window_bounds = array<i64: 1, 6>}, {pipeline_mode = #tpu.pipeline_mode<synchronous>, transform_indices = @transform_5, window_bounds = array<i64: 2, 6>}, {pipeline_mode = #tpu.pipeline_mode<synchronous>, transform_indices = @transform_6, window_bounds = array<i64: 2, 512>}]} {
    %c0_i32 = arith.constant 0 : i32
    %0 = arith.cmpi eq, %arg0, %c0_i32 : i32
    %1 = arith.extui %0 : i1 to i32
    %c0_i32_0 = arith.constant 0 : i32
    %2 = arith.cmpi ne, %1, %c0_i32_0 : i32
    scf.if %2 {
      %cst_11 = arith.constant 0.000000e+00 : f32
      %14 = vector.broadcast %cst_11 : f32 to vector<2x512xf32>
      %c0_12 = arith.constant 0 : index
      %c0_13 = arith.constant 0 : index
      %15 = vector.load %arg8[%c0_12, %c0_13] : memref<2x512xf32, #tpu.memory_space<vmem>>, vector<2x512xf32>
      tpu.vector_store %arg8[%c0_12, %c0_13], %14 {strides = array<i32>} : memref<2x512xf32, #tpu.memory_space<vmem>>, vector<2x512xf32>,
    } else {
    }
    %c0 = arith.constant 0 : index
    %c0_1 = arith.constant 0 : index
    %3 = vector.load %arg8[%c0, %c0_1] : memref<2x512xf32, #tpu.memory_space<vmem>>, vector<2x512xf32>
    %c0_2 = arith.constant 0 : index
    %c0_3 = arith.constant 0 : index
    %c0_4 = arith.constant 0 : index
    %4 = vector.load %arg1[%c0_2, %c0_3, %c0_4] : memref<1x2x512xf32, #tpu.memory_space<vmem>>, vector<1x2x512xf32>
    %5 = vector.shape_cast %4 : vector<1x2x512xf32> to vector<2x512xf32>
    %c0_5 = arith.constant 0 : index
    %c0_6 = arith.constant 0 : index
    %c0_7 = arith.constant 0 : index
    %6 = vector.load %arg2[%c0_5, %c0_6, %c0_7] : memref<1x512x512xf32, #tpu.memory_space<vmem>>, vector<1x512x512xf32>
    %7 = vector.shape_cast %6 : vector<1x512x512xf32> to vector<512x512xf32>
    %cst = arith.constant dense<0.000000e+00> : vector<2x512xf32>
    %8 = tpu.matmul %5, %7, %cst {dimension_numbers = #tpu.dot_dimension_numbers<[1], [0], [0], [1], [0, 0, 1, 1], [], []>} : vector<2x512xf32>, vector<512x512xf32>, vector<2x512xf32> -> vector<2x512xf32>
    %9 = arith.addf %3, %8 : vector<2x512xf32>
    %c0_8 = arith.constant 0 : index
    %c0_9 = arith.constant 0 : index
    %10 = vector.load %arg8[%c0_8, %c0_9] : memref<2x512xf32, #tpu.memory_space<vmem>>, vector<2x512xf32>
    tpu.vector_store %arg8[%c0_8, %c0_9], %9 {strides = array<i32>} : memref<2x512xf32, #tpu.memory_space<vmem>>, vector<2x512xf32>,
    %c1_i32 = arith.constant 1 : i32
    %11 = arith.cmpi eq, %arg0, %c1_i32 : i32
    %12 = arith.extui %11 : i1 to i32
    %c0_i32_10 = arith.constant 0 : i32
    %13 = arith.cmpi ne, %12, %c0_i32_10 : i32
    scf.if %13 {
      %c0_11 = arith.constant 0 : index
      %c0_12 = arith.constant 0 : index
      %14 = vector.load %arg8[%c0_11, %c0_12] : memref<2x512xf32, #tpu.memory_space<vmem>>, vector<2x512xf32>
      %c0_13 = arith.constant 0 : index
      %c0_14 = arith.constant 0 : index
      %15 = vector.load %arg3[%c0_13, %c0_14] : memref<1x512xf32, #tpu.memory_space<vmem>>, vector<1x512xf32>
      %16 = vector.broadcast %15 : vector<1x512xf32> to vector<2x512xf32>
      %17 = arith.addf %14, %16 : vector<2x512xf32>
      %cst_15 = arith.constant 0.000000e+00 : f32
      %18 = vector.broadcast %cst_15 : f32 to vector<2x512xf32>
      %19 = arith.maximumf %17, %18 : vector<2x512xf32>
      %c0_16 = arith.constant 0 : index
      %c0_17 = arith.constant 0 : index
      %20 = vector.load %arg7[%c0_16, %c0_17] : memref<2x512xf32, #tpu.memory_space<vmem>>, vector<2x512xf32>
      tpu.vector_store %arg7[%c0_16, %c0_17], %19 {strides = array<i32>} : memref<2x512xf32, #tpu.memory_space<vmem>>, vector<2x512xf32>,
      %c0_18 = arith.constant 0 : index
      %c0_19 = arith.constant 0 : index
      %21 = vector.load %arg4[%c0_18, %c0_19] : memref<512x6xf32, #tpu.memory_space<vmem>>, vector<512x6xf32>
      %cst_20 = arith.constant dense<0.000000e+00> : vector<2x6xf32>
      %22 = tpu.matmul %19, %21, %cst_20 {dimension_numbers = #tpu.dot_dimension_numbers<[1], [0], [0], [1], [0, 0, 1, 1], [], []>} : vector<2x512xf32>, vector<512x6xf32>, vector<2x6xf32> -> vector<2x6xf32>
      %c0_21 = arith.constant 0 : index
      %c0_22 = arith.constant 0 : index
      %23 = vector.load %arg5[%c0_21, %c0_22] : memref<1x6xf32, #tpu.memory_space<vmem>>, vector<1x6xf32>
      %24 = vector.broadcast %23 : vector<1x6xf32> to vector<2x6xf32>
      %25 = arith.addf %22, %24 : vector<2x6xf32>
      %c0_23 = arith.constant 0 : index
      %c0_24 = arith.constant 0 : index
      %26 = vector.load %arg6[%c0_23, %c0_24] : memref<2x6xf32, #tpu.memory_space<vmem>>, vector<2x6xf32>
      tpu.vector_store %arg6[%c0_23, %c0_24], %25 {strides = array<i32>} : memref<2x6xf32, #tpu.memory_space<vmem>>, vector<2x6xf32>,
    } else {
    }
    return
  }
  func.func @transform_0(%arg0: i32) -> (i32, i32, i32) {
    %c0_i32 = arith.constant 0 : i32
    %c0_i32_0 = arith.constant 0 : i32
    %c0_i32_1 = arith.constant 0 : i32
    return %arg0, %c0_i32, %c0_i32_0 : i32, i32, i32
  }
  func.func @transform_1(%arg0: i32) -> (i32, i32, i32) {
    %c0_i32 = arith.constant 0 : i32
    %c0_i32_0 = arith.constant 0 : i32
    %c0_i32_1 = arith.constant 0 : i32
    return %arg0, %c0_i32, %c0_i32_0 : i32, i32, i32
  }
  func.func @transform_2(%arg0: i32) -> (i32, i32) {
    %c0_i32 = arith.constant 0 : i32
    %c0_i32_0 = arith.constant 0 : i32
    %c0_i32_1 = arith.constant 0 : i32
    return %c0_i32, %c0_i32_0 : i32, i32
  }
  func.func @transform_3(%arg0: i32) -> (i32, i32) {
    %c0_i32 = arith.constant 0 : i32
    %c0_i32_0 = arith.constant 0 : i32
    %c0_i32_1 = arith.constant 0 : i32
    return %c0_i32, %c0_i32_0 : i32, i32
  }
  func.func @transform_4(%arg0: i32) -> (i32, i32) {
    %c0_i32 = arith.constant 0 : i32
    %c0_i32_0 = arith.constant 0 : i32
    %c0_i32_1 = arith.constant 0 : i32
    return %c0_i32, %c0_i32_0 : i32, i32
  }
  func.func @transform_5(%arg0: i32) -> (i32, i32) {
    %c0_i32 = arith.constant 0 : i32
    %c0_i32_0 = arith.constant 0 : i32
    %c0_i32_1 = arith.constant 0 : i32
    return %c0_i32, %c0_i32_0 : i32, i32
  }
  func.func @transform_6(%arg0: i32) -> (i32, i32) {
    %c0_i32 = arith.constant 0 : i32
    %c0_i32_0 = arith.constant 0 : i32
    %c0_i32_1 = arith.constant 0 : i32
    return %c0_i32, %c0_i32_0 : i32, i32
  }
}

</mosaic_0001>

<bundles_post_ra>
// kernel: har_forward.3
= control target key start
LH: loop header
LB: loop body
LE: loop exit
PB: predicated region body
PF: predicated region fallthrough
CT: control target
= control target key end

     0   :  { %12 = vsyncpa [#allocation4], 0  ;;  %s2315_s0 = inlined_call_operand.vmem [shape: f32[2,2,512], index: 0, kind: input, shape index: {}]   ;;  %s2316_s1 = inlined_call_operand.vmem [shape: f32[2,512,512], index: 1, kind: input, shape index: {}]   ;;  %s2317_s2 = inlined_call_operand.vmem [shape: f32[1,512], index: 2, kind: input, shape index: {}]   ;;  %s2318_s3 = inlined_call_operand.vmem [shape: f32[512,6], index: 3, kind: input, shape index: {}]   ;;  %s2319_s4 = inlined_call_operand.vmem [shape: f32[1,6], index: 4, kind: input, shape index: {}]   ;;  %s2320_s5 = inlined_call_operand.hbm [shape: f32[2,6], index: 5, kind: output, shape index: {0}]   ;;  %s2321_s6 = inlined_call_operand.hbm [shape: f32[2,512], index: 6, kind: output, shape index: {1}]  }
   0x1   :  { %13 = vsyncpa [#allocation6], 0  ;;  %s1754_s21 = smov 0  }
   0x2 LB: > { %s1760_s22 = sadd.s32 4294967295, %s1713_s21   ;;  %p1212_p0 = scmp.ge.s32.totalorder %s1713_s21, 1  ;;  %s1713_s21 = sphi %s1754_s21, %s19_s21  }
   0x3   : > { %p217_p1 = scmp.lt.s32.totalorder %s1713_s21, 3 }
   0x5   : > { %p218_p2 = pnand %p1212_p0, %p217_p1 }
   0x6   : > { %p247_p3 = scmp.lt.s32.totalorder (!%p218_p2), %s1760_s22, 1  ;;  %p1217_p4 = scmp.ne.s32.totalorder (!%p218_p2), %s1760_s22, 0 }
   0x7   : > { %221 = sbr.rel (%p218_p2) target bundleno = 661 (0x295), region = 40 }
   0xe   : > { %s248_s23 = scalar_select %p247_p3, %s1760_s22, 1 }
   0xf   : > { %260 = sbr.rel (%p1217_p4) target bundleno = 22 (0x16), region = 44  ;;  %v1715_v0 = vmov (!%p1217_p4), 0.0  }
  0x10   : > { %s1226_s24 = sshll.u32 %s248_s23, 3  ;;  %s1227_s25 = sshll.u32 %s248_s23, 11  ;;  %261 = vst [vmem:[#allocation2] sm:$0xff] (!%p1217_p4), %v1715_v0 }
  0x11   : > { %s1769_s28 = scalar_lea.vmem %s2315_s0, %s1226_s24  ;;  %s1774_s7 = scalar_lea.vmem %s2316_s1, %s1227_s25 }
  0x16 PF: > { %v265_v1 = vld [vmem:[%s1774_s7 + $0x8] sm:$0xff]  ;;  %v267_v3 = vld [vmem:[%s1774_s7 + $0x18] sm:$0xff]  ;;  %v264_v6 = vld [vmem:[%s1774_s7] sm:$0xff]  ;;  %p1218_p5 = scmp.ne.s32.totalorder %s1760_s22, 1 }
  0x17   : > { %v269_v2 = vld [vmem:[%s1774_s7 + $0x28] sm:$0xff]  ;;  %v271_v5 = vld [vmem:[%s1774_s7 + $0x38] sm:$0xff]  ;;  %v268_v7 = vld [vmem:[%s1774_s7 + $0x20] sm:$0xff]  ;;  %vm1127_vm0 = vcmask (!%p1218_p5), 41984  }
  0x18   : > { %v1298_v4 = vpack.c.bf16 %v269_v2, %v265_v1  ;;  %v1426_v8 = vpack.c.bf16 %v271_v5, %v267_v3  ;;  %v1300_v9 = vpack.c.bf16 %v268_v7, %v264_v6  ;;  %v266_v10 = vld [vmem:[%s1774_s7 + $0x10] sm:$0xff]  ;;  %v273_v12 = vld [vmem:[%s1774_s7 + $0x48] sm:$0xff]  ;;  %v275_v15 = vld [vmem:[%s1774_s7 + $0x58] sm:$0xff] }
  0x19   : > { %v270_v11 = vld [vmem:[%s1774_s7 + $0x30] sm:$0xff]  ;;  %v277_v14 = vld [vmem:[%s1774_s7 + $0x68] sm:$0xff]  ;;  %v279_v16 = vld [vmem:[%s1774_s7 + $0x78] sm:$0xff] }
  0x1a   : > { %1299 = vmatprep.subr.bf16.mxu0 %v1298_v4  ;;  %v1428_v13 = vpack.c.bf16 %v270_v11, %v266_v10  ;;  %1427 = vmatprep.subr.bf16.mxu1 %v1426_v8  ;;  %v1302_v17 = vpack.c.bf16 %v277_v14, %v273_v12  ;;  %v1430_v18 = vpack.c.bf16 %v279_v16, %v275_v15  ;;  %v272_v19 = vld [vmem:[%s1774_s7 + $0x40] sm:$0xff]  ;;  %v274_v21 = vld [vmem:[%s1774_s7 + $0x50] sm:$0xff]  ;;  %v281_v24 = vld [vmem:[%s1774_s7 + $0x88] sm:$0xff] }
  0x1b   : > { %1301 = vmatpush1.bf16.msra.mxu0 %v1300_v9  ;;  %v276_v20 = vld [vmem:[%s1774_s7 + $0x60] sm:$0xff]  ;;  %v278_v23 = vld [vmem:[%s1774_s7 + $0x70] sm:$0xff]  ;;  %v285_v25 = vld [vmem:[%s1774_s7 + $0xa8] sm:$0xff] }
  0x1c   : > { %1429 = vmatpush1.bf16.msra.mxu1 %v1428_v13  ;;  %v1304_v22 = vpack.c.bf16 %v276_v20, %v272_v19  ;;  %1303 = vmatprep.subr.bf16.mxu0 %v1302_v17  ;;  %v1432_v26 = vpack.c.bf16 %v278_v23, %v274_v21  ;;  %v1306_v27 = vpack.c.bf16 %v285_v25, %v281_v24  ;;  %v283_v28 = vld [vmem:[%s1774_s7 + $0x98] sm:$0xff]  ;;  %v280_v30 = vld [vmem:[%s1774_s7 + $0x80] sm:$0xff]  ;;  %v282_v33 = vld [vmem:[%s1774_s7 + $0x90] sm:$0xff] }
  0x1d   : > { %1431 = vmatprep.subr.bf16.mxu1 %v1430_v18  ;;  %v287_v29 = vld [vmem:[%s1774_s7 + $0xb8] sm:$0xff]  ;;  %v284_v32 = vld [vmem:[%s1774_s7 + $0xa0] sm:$0xff]  ;;  %v286_v34 = vld [vmem:[%s1774_s7 + $0xb0] sm:$0xff] }
  0x1e   : > { %v1434_v31 = vpack.c.bf16 %v287_v29, %v283_v28  ;;  %v1308_v35 = vpack.c.bf16 %v284_v32, %v280_v30  ;;  %v289_v36 = vld [vmem:[%s1774_s7 + $0xc8] sm:$0xff]  ;;  %v291_v38 = vld [vmem:[%s1774_s7 + $0xd8] sm:$0xff]  ;;  %v1436_v39 = vpack.c.bf16 %v286_v34, %v282_v33  ;;  %v288_v42 = vld [vmem:[%s1774_s7 + $0xc0] sm:$0xff] }
  0x1f   : > { %1305 = vmatpush1.bf16.msra.mxu0 %v1304_v22  ;;  %v293_v37 = vld [vmem:[%s1774_s7 + $0xe8] sm:$0xff]  ;;  %v295_v41 = vld [vmem:[%s1774_s7 + $0xf8] sm:$0xff]  ;;  %v292_v43 = vld [vmem:[%s1774_s7 + $0xe0] sm:$0xff] }
  0x20   : > { %1433 = vmatpush1.bf16.msra.mxu1 %v1432_v26  ;;  %1307 = vmatprep.subr.bf16.mxu0 %v1306_v27  ;;  %v1310_v40 = vpack.c.bf16 %v293_v37, %v289_v36  ;;  %v1438_v44 = vpack.c.bf16 %v295_v41, %v291_v38  ;;  %v290_v45 = vld [vmem:[%s1774_s7 + $0xd0] sm:$0xff]  ;;  %v297_v47 = vld [vmem:[%s1774_s7 + $0x108] sm:$0xff]  ;;  %v299_v49 = vld [vmem:[%s1774_s7 + $0x118] sm:$0xff]  ;;  %v1312_v51 = vpack.c.bf16 %v292_v43, %v288_v42 }
  0x21   : > { %1435 = vmatprep.subr.bf16.mxu1 %v1434_v31  ;;  %v294_v46 = vld [vmem:[%s1774_s7 + $0xf0] sm:$0xff]  ;;  %v301_v48 = vld [vmem:[%s1774_s7 + $0x128] sm:$0xff]  ;;  %v303_v50 = vld [vmem:[%s1774_s7 + $0x138] sm:$0xff] }
  0x22   : > { %v1440_v52 = vpack.c.bf16 %v294_v46, %v290_v45  ;;  %v1314_v53 = vpack.c.bf16 %v301_v48, %v297_v47  ;;  %v296_v54 = vld [vmem:[%s1774_s7 + $0x100] sm:$0xff]  ;;  %v298_v56 = vld [vmem:[%s1774_s7 + $0x110] sm:$0xff]  ;;  %v1442_v57 = vpack.c.bf16 %v303_v50, %v299_v49  ;;  %v305_v59 = vld [vmem:[%s1774_s7 + $0x148] sm:$0xff]  ;;  %v1716_v47 = vmov 1983009808  }
  0x23   : > { %1309 = vmatpush1.bf16.msra.mxu0 %v1308_v35  ;;  %v300_v55 = vld [vmem:[%s1774_s7 + $0x120] sm:$0xff]  ;;  %v302_v58 = vld [vmem:[%s1774_s7 + $0x130] sm:$0xff]  ;;  %v309_v60 = vld [vmem:[%s1774_s7 + $0x168] sm:$0xff]  ;;  %v523_v48 = vunpack.c.l.s4 %v1716_v47  ;;  %v525_v49 = vlaneseq }
  0x24   : > { %1437 = vmatpush1.bf16.msra.mxu1 %v1436_v39  ;;  %1311 = vmatprep.subr.bf16.mxu0 %v1310_v40  ;;  %v307_v61 = vld [vmem:[%s1774_s7 + $0x158] sm:$0xff]  ;;  %v1316_v63 = vpack.c.bf16 %v300_v55, %v296_v54  ;;  %v1444_v0 = vpack.c.bf16 %v302_v58, %v298_v56  ;;  %v1318_v1 = vpack.c.bf16 %v309_v60, %v305_v59  ;;  %v304_v2 = vld [vmem:[%s1774_s7 + $0x140] sm:$0xff]  ;;  %v306_v4 = vld [vmem:[%s1774_s7 + $0x150] sm:$0xff] }
  0x25   : > { %1439 = vmatprep.subr.bf16.mxu1 %v1438_v44  ;;  %v311_v62 = vld [vmem:[%s1774_s7 + $0x178] sm:$0xff]  ;;  %v308_v3 = vld [vmem:[%s1774_s7 + $0x160] sm:$0xff]  ;;  %v310_v6 = vld [vmem:[%s1774_s7 + $0x170] sm:$0xff] }
  0x26   : > { %v1446_v5 = vpack.c.bf16 %v311_v62, %v307_v61  ;;  %v313_v7 = vld [vmem:[%s1774_s7 + $0x188] sm:$0xff]  ;;  %v315_v9 = vld [vmem:[%s1774_s7 + $0x198] sm:$0xff]  ;;  %v1320_v11 = vpack.c.bf16 %v308_v3, %v304_v2  ;;  %v1448_v12 = vpack.c.bf16 %v310_v6, %v306_v4  ;;  %v312_v14 = vld [vmem:[%s1774_s7 + $0x180] sm:$0xff]  ;;  %v524_v62 = vunpack.c.0.s8 %v523_v48 }
  0x27   : > { %1313 = vmatpush1.bf16.msra.mxu0 %v1312_v51  ;;  %v317_v8 = vld [vmem:[%s1774_s7 + $0x1a8] sm:$0xff]  ;;  %v319_v10 = vld [vmem:[%s1774_s7 + $0x1b8] sm:$0xff]  ;;  %v316_v15 = vld [vmem:[%s1774_s7 + $0x1a0] sm:$0xff] }
  0x28   : > { %1441 = vmatpush1.bf16.msra.mxu1 %v1440_v52  ;;  %1315 = vmatprep.subr.bf16.mxu0 %v1314_v53  ;;  %v1322_v13 = vpack.c.bf16 %v317_v8, %v313_v7  ;;  %v314_v16 = vld [vmem:[%s1774_s7 + $0x190] sm:$0xff]  ;;  %v1450_v17 = vpack.c.bf16 %v319_v10, %v315_v9  ;;  %v321_v19 = vld [vmem:[%s1774_s7 + $0x1c8] sm:$0xff]  ;;  %v323_v21 = vld [vmem:[%s1774_s7 + $0x1d8] sm:$0xff]  ;;  %v1324_v23 = vpack.c.bf16 %v316_v15, %v312_v14 }
  0x29   : > { %1443 = vmatprep.subr.bf16.mxu1 %v1442_v57  ;;  %v318_v18 = vld [vmem:[%s1774_s7 + $0x1b0] sm:$0xff]  ;;  %v325_v20 = vld [vmem:[%s1774_s7 + $0x1e8] sm:$0xff]  ;;  %v327_v22 = vld [vmem:[%s1774_s7 + $0x1f8] sm:$0xff] }
  0x2a   : > { %v1452_v24 = vpack.c.bf16 %v318_v18, %v314_v16  ;;  %v1326_v25 = vpack.c.bf16 %v325_v20, %v321_v19  ;;  %v320_v26 = vld [vmem:[%s1774_s7 + $0x1c0] sm:$0xff]  ;;  %v322_v28 = vld [vmem:[%s1774_s7 + $0x1d0] sm:$0xff]  ;;  %v1454_v29 = vpack.c.bf16 %v327_v22, %v323_v21  ;;  %v329_v31 = vld [vmem:[%s1774_s7 + $0x208] sm:$0xff] }
  0x2b   : > { %1317 = vmatpush1.bf16.msra.mxu0 %v1316_v63  ;;  %v324_v27 = vld [vmem:[%s1774_s7 + $0x1e0] sm:$0xff]  ;;  %v326_v30 = vld [vmem:[%s1774_s7 + $0x1f0] sm:$0xff]  ;;  %v333_v32 = vld [vmem:[%s1774_s7 + $0x228] sm:$0xff]  ;;  %v1861_v63 = vshrl.u32 %v525_v49, 7 }
  0x2c   : > { %1445 = vmatpush1.bf16.msra.mxu1 %v1444_v0  ;;  %1319 = vmatprep.subr.bf16.mxu0 %v1318_v1  ;;  %v331_v33 = vld [vmem:[%s1774_s7 + $0x218] sm:$0xff]  ;;  %v1328_v35 = vpack.c.bf16 %v324_v27, %v320_v26  ;;  %v1456_v36 = vpack.c.bf16 %v326_v30, %v322_v28  ;;  %v1330_v37 = vpack.c.bf16 %v333_v32, %v329_v31  ;;  %v328_v38 = vld [vmem:[%s1774_s7 + $0x200] sm:$0xff]  ;;  %v330_v40 = vld [vmem:[%s1774_s7 + $0x210] sm:$0xff] }
  0x2d   : > { %1447 = vmatprep.subr.bf16.mxu1 %v1446_v5  ;;  %v335_v34 = vld [vmem:[%s1774_s7 + $0x238] sm:$0xff]  ;;  %v332_v39 = vld [vmem:[%s1774_s7 + $0x220] sm:$0xff]  ;;  %v334_v42 = vld [vmem:[%s1774_s7 + $0x230] sm:$0xff] }
  0x2e   : > { %v1458_v41 = vpack.c.bf16 %v335_v34, %v331_v33  ;;  %v337_v43 = vld [vmem:[%s1774_s7 + $0x248] sm:$0xff]  ;;  %v339_v45 = vld [vmem:[%s1774_s7 + $0x258] sm:$0xff]  ;;  %v1332_v50 = vpack.c.bf16 %v332_v39, %v328_v38  ;;  %v1460_v51 = vpack.c.bf16 %v334_v42, %v330_v40  ;;  %v336_v53 = vld [vmem:[%s1774_s7 + $0x240] sm:$0xff] }
  0x2f   : > { %1321 = vmatpush1.bf16.msra.mxu0 %v1320_v11  ;;  %v341_v44 = vld [vmem:[%s1774_s7 + $0x268] sm:$0xff]  ;;  %v343_v46 = vld [vmem:[%s1774_s7 + $0x278] sm:$0xff]  ;;  %v340_v54 = vld [vmem:[%s1774_s7 + $0x260] sm:$0xff] }
  0x30   : > { %1449 = vmatpush1.bf16.msra.mxu1 %v1448_v12  ;;  %1323 = vmatprep.subr.bf16.mxu0 %v1322_v13  ;;  %v1334_v52 = vpack.c.bf16 %v341_v44, %v337_v43  ;;  %v338_v55 = vld [vmem:[%s1774_s7 + $0x250] sm:$0xff]  ;;  %v1462_v56 = vpack.c.bf16 %v343_v46, %v339_v45  ;;  %v345_v58 = vld [vmem:[%s1774_s7 + $0x288] sm:$0xff]  ;;  %v347_v60 = vld [vmem:[%s1774_s7 + $0x298] sm:$0xff]  ;;  %v1336_v0 = vpack.c.bf16 %v340_v54, %v336_v53 }
  0x31   : > { %1451 = vmatprep.subr.bf16.mxu1 %v1450_v17  ;;  %v342_v57 = vld [vmem:[%s1774_s7 + $0x270] sm:$0xff]  ;;  %v349_v59 = vld [vmem:[%s1774_s7 + $0x2a8] sm:$0xff]  ;;  %v351_v61 = vld [vmem:[%s1774_s7 + $0x2b8] sm:$0xff]  ;;  %v1872_v12 = vsub.s32 %v524_v62, %v1861_v63 }
  0x32   : > { %v1464_v1 = vpack.c.bf16 %v342_v57, %v338_v55  ;;  %v1338_v2 = vpack.c.bf16 %v349_v59, %v345_v58  ;;  %v344_v3 = vld [vmem:[%s1774_s7 + $0x280] sm:$0xff]  ;;  %v346_v5 = vld [vmem:[%s1774_s7 + $0x290] sm:$0xff]  ;;  %v1466_v6 = vpack.c.bf16 %v351_v61, %v347_v60  ;;  %v353_v8 = vld [vmem:[%s1774_s7 + $0x2c8] sm:$0xff] }
  0x33   : > { %1325 = vmatpush1.bf16.msra.mxu0 %v1324_v23  ;;  %v348_v4 = vld [vmem:[%s1774_s7 + $0x2a0] sm:$0xff]  ;;  %v350_v7 = vld [vmem:[%s1774_s7 + $0x2b0] sm:$0xff]  ;;  %v357_v9 = vld [vmem:[%s1774_s7 + $0x2e8] sm:$0xff] }
  0x34   : > { %1453 = vmatpush1.bf16.msra.mxu1 %v1452_v24  ;;  %1327 = vmatprep.subr.bf16.mxu0 %v1326_v25  ;;  %v355_v10 = vld [vmem:[%s1774_s7 + $0x2d8] sm:$0xff]  ;;  %v1340_v13 = vpack.c.bf16 %v348_v4, %v344_v3  ;;  %v352_v14 = vld [vmem:[%s1774_s7 + $0x2c0] sm:$0xff]  ;;  %v1468_v15 = vpack.c.bf16 %v350_v7, %v346_v5  ;;  %v1342_v16 = vpack.c.bf16 %v357_v9, %v353_v8  ;;  %v354_v18 = vld [vmem:[%s1774_s7 + $0x2d0] sm:$0xff] }
  0x35   : > { %1455 = vmatprep.subr.bf16.mxu1 %v1454_v29  ;;  %v359_v11 = vld [vmem:[%s1774_s7 + $0x2f8] sm:$0xff]  ;;  %v356_v17 = vld [vmem:[%s1774_s7 + $0x2e0] sm:$0xff]  ;;  %v358_v19 = vld [vmem:[%s1774_s7 + $0x2f0] sm:$0xff] }
  0x36   : > { %v1470_v20 = vpack.c.bf16 %v359_v11, %v355_v10  ;;  %v361_v21 = vld [vmem:[%s1774_s7 + $0x308] sm:$0xff]  ;;  %v1881_v23 = vld [vmem:[%s1769_s28] sm:$0xff]  ;;  %v363_v24 = vld [vmem:[%s1774_s7 + $0x318] sm:$0xff]  ;;  %v1344_v27 = vpack.c.bf16 %v356_v17, %v352_v14  ;;  %v1472_v28 = vpack.c.bf16 %v358_v19, %v354_v18 }
  0x37   : > { %1329 = vmatpush1.bf16.msra.mxu0 %v1328_v35  ;;  %v365_v22 = vld [vmem:[%s1774_s7 + $0x328] sm:$0xff]  ;;  %v367_v25 = vld [vmem:[%s1774_s7 + $0x338] sm:$0xff]  ;;  %v1887_v26 = vrot.slane %v1881_v23, %v1872_v12  ;;  %v360_v30 = vld [vmem:[%s1774_s7 + $0x300] sm:$0xff]  ;;  %v521_v9 = vcombine.high %v1881_v23, %v1881_v23 }
  0x38   : > { %1457 = vmatpush1.bf16.msra.mxu1 %v1456_v36  ;;  %1331 = vmatprep.subr.bf16.mxu0 %v1330_v37  ;;  %v1346_v29 = vpack.c.bf16 %v365_v22, %v361_v21  ;;  %v364_v31 = vld [vmem:[%s1774_s7 + $0x320] sm:$0xff]  ;;  %v362_v32 = vld [vmem:[%s1774_s7 + $0x310] sm:$0xff]  ;;  %v1474_v34 = vpack.c.bf16 %v367_v25, %v363_v24  ;;  %v369_v36 = vld [vmem:[%s1774_s7 + $0x348] sm:$0xff] }
  0x39   : > { %1459 = vmatprep.subr.bf16.mxu1 %v1458_v41  ;;  %v536_v33 = vcombine.high %v1887_v26, %v1887_v26  ;;  %v366_v35 = vld [vmem:[%s1774_s7 + $0x330] sm:$0xff]  ;;  %v373_v37 = vld [vmem:[%s1774_s7 + $0x368] sm:$0xff]  ;;  %v371_v38 = vld [vmem:[%s1774_s7 + $0x358] sm:$0xff]  ;;  %v1348_v40 = vpack.c.bf16 %v364_v31, %v360_v30  ;;  %v1932_v25 = vrot.slane %v521_v9, %v1872_v12 }
  0x3a   : > { %v375_v39 = vld [vmem:[%s1774_s7 + $0x378] sm:$0xff]  ;;  %v1476_v41 = vpack.c.bf16 %v366_v35, %v362_v32  ;;  %v1350_v42 = vpack.c.bf16 %v373_v37, %v369_v36  ;;  %v368_v43 = vld [vmem:[%s1774_s7 + $0x340] sm:$0xff]  ;;  %v370_v45 = vld [vmem:[%s1774_s7 + $0x350] sm:$0xff] }
  0x3b   : > { %1333 = vmatpush1.bf16.msra.mxu0 %v1332_v50  ;;  %606 = vmatprep.mubr.f32.mxu0 %v536_v33  ;;  %v372_v44 = vld [vmem:[%s1774_s7 + $0x360] sm:$0xff]  ;;  %v1478_v46 = vpack.c.bf16 %v375_v39, %v371_v38  ;;  %v374_v47 = vld [vmem:[%s1774_s7 + $0x370] sm:$0xff]  ;;  %v377_v48 = vld [vmem:[%s1774_s7 + $0x388] sm:$0xff]  ;;  %v537_v39 = vcombine.high %v1932_v25, %v1932_v25 }
  0x3c   : > { %1461 = vmatpush1.bf16.msra.mxu1 %v1460_v51  ;;  %1335 = vmatprep.subr.bf16.mxu0 %v1334_v52  ;;  %v381_v49 = vld [vmem:[%s1774_s7 + $0x3a8] sm:$0xff]  ;;  %v379_v50 = vld [vmem:[%s1774_s7 + $0x398] sm:$0xff]  ;;  %v1352_v52 = vpack.c.bf16 %v372_v44, %v368_v43  ;;  %v1480_v53 = vpack.c.bf16 %v374_v47, %v370_v45  ;;  %v376_v55 = vld [vmem:[%s1774_s7 + $0x380] sm:$0xff] }
  0x3d   : > { %1463 = vmatprep.subr.bf16.mxu1 %v1462_v56  ;;  %748 = vmatprep.mubr.f32.mxu1 %v536_v33  ;;  %v383_v51 = vld [vmem:[%s1774_s7 + $0x3b8] sm:$0xff]  ;;  %v1354_v54 = vpack.c.bf16 %v381_v49, %v377_v48  ;;  %v380_v56 = vld [vmem:[%s1774_s7 + $0x3a0] sm:$0xff]  ;;  %v378_v57 = vld [vmem:[%s1774_s7 + $0x390] sm:$0xff] }
  0x3e   : > { %v1482_v58 = vpack.c.bf16 %v383_v51, %v379_v50  ;;  %v382_v59 = vld [vmem:[%s1774_s7 + $0x3b0] sm:$0xff]  ;;  %v385_v60 = vld [vmem:[%s1774_s7 + $0x3c8] sm:$0xff]  ;;  %v387_v62 = vld [vmem:[%s1774_s7 + $0x3d8] sm:$0xff] }
  0x3f   : > { %1337 = vmatpush1.bf16.msra.mxu0 %v1336_v0  ;;  %v389_v61 = vld [vmem:[%s1774_s7 + $0x3e8] sm:$0xff]  ;;  %v391_v0 = vld [vmem:[%s1774_s7 + $0x3f8] sm:$0xff]  ;;  %v384_v4 = vld [vmem:[%s1774_s7 + $0x3c0] sm:$0xff] }
  0x40   : > { %1465 = vmatpush1.bf16.msra.mxu1 %v1464_v1  ;;  %1339 = vmatprep.subr.bf16.mxu0 %v1338_v2  ;;  %v1356_v1 = vpack.c.bf16 %v380_v56, %v376_v55  ;;  %v1484_v2 = vpack.c.bf16 %v382_v59, %v378_v57  ;;  %v1358_v3 = vpack.c.bf16 %v389_v61, %v385_v60  ;;  %v388_v5 = vld [vmem:[%s1774_s7 + $0x3e0] sm:$0xff]  ;;  %v390_v8 = vld [vmem:[%s1774_s7 + $0x3f0] sm:$0xff]  ;;  %v393_v10 = vld [vmem:[%s1774_s7 + $0x408] sm:$0xff] }
  0x41   : > { %1467 = vmatprep.subr.bf16.mxu1 %v1466_v6  ;;  %v386_v6 = vld [vmem:[%s1774_s7 + $0x3d0] sm:$0xff]  ;;  %v1486_v7 = vpack.c.bf16 %v391_v0, %v387_v62  ;;  %v397_v11 = vld [vmem:[%s1774_s7 + $0x428] sm:$0xff]  ;;  %v399_v14 = vld [vmem:[%s1774_s7 + $0x438] sm:$0xff] }
  0x42   : > { %v1362_v17 = vpack.c.bf16 %v397_v11, %v393_v10  ;;  %v392_v18 = vld [vmem:[%s1774_s7 + $0x400] sm:$0xff]  ;;  %v398_v22 = vld [vmem:[%s1774_s7 + $0x430] sm:$0xff]  ;;  %v401_v23 = vld [vmem:[%s1774_s7 + $0x448] sm:$0xff] }
  0x43   : > { %1341 = vmatpush1.bf16.msra.mxu0 %v1340_v13  ;;  %v395_v13 = vld [vmem:[%s1774_s7 + $0x418] sm:$0xff]  ;;  %v396_v19 = vld [vmem:[%s1774_s7 + $0x420] sm:$0xff]  ;;  %v405_v24 = vld [vmem:[%s1774_s7 + $0x468] sm:$0xff] }
  0x44   : > { %1469 = vmatpush1.bf16.msra.mxu1 %v1468_v15  ;;  %1343 = vmatprep.subr.bf16.mxu0 %v1342_v16  ;;  %v1360_v15 = vpack.c.bf16 %v388_v5, %v384_v4  ;;  %v1488_v16 = vpack.c.bf16 %v390_v8, %v386_v6  ;;  %v1490_v21 = vpack.c.bf16 %v399_v14, %v395_v13  ;;  %v400_v32 = vld [vmem:[%s1774_s7 + $0x440] sm:$0xff]  ;;  %v406_v36 = vld [vmem:[%s1774_s7 + $0x470] sm:$0xff]  ;;  %v409_v37 = vld [vmem:[%s1774_s7 + $0x488] sm:$0xff] }
  0x45   : > { %1471 = vmatprep.subr.bf16.mxu1 %v1470_v20  ;;  %v394_v20 = vld [vmem:[%s1774_s7 + $0x410] sm:$0xff]  ;;  %v1366_v31 = vpack.c.bf16 %v405_v24, %v401_v23  ;;  %v404_v33 = vld [vmem:[%s1774_s7 + $0x460] sm:$0xff]  ;;  %v413_v38 = vld [vmem:[%s1774_s7 + $0x4a8] sm:$0xff] }
  0x46   : > { %v1492_v30 = vpack.c.bf16 %v398_v22, %v394_v20  ;;  %v1370_v44 = vpack.c.bf16 %v413_v38, %v409_v37  ;;  %v408_v45 = vld [vmem:[%s1774_s7 + $0x480] sm:$0xff]  ;;  %v410_v47 = vld [vmem:[%s1774_s7 + $0x490] sm:$0xff]  ;;  %v417_v50 = vld [vmem:[%s1774_s7 + $0x4c8] sm:$0xff] }
  0x47   : > { %1345 = vmatpush1.bf16.msra.mxu0 %v1344_v27  ;;  %v403_v27 = vld [vmem:[%s1774_s7 + $0x458] sm:$0xff]  ;;  %v414_v49 = vld [vmem:[%s1774_s7 + $0x4b0] sm:$0xff]  ;;  %v421_v51 = vld [vmem:[%s1774_s7 + $0x4e8] sm:$0xff] }
  0x48   : > { %1473 = vmatpush1.bf16.msra.mxu1 %v1472_v28  ;;  %1347 = vmatprep.subr.bf16.mxu0 %v1346_v29  ;;  %v407_v28 = vld [vmem:[%s1774_s7 + $0x478] sm:$0xff]  ;;  %v1364_v29 = vpack.c.bf16 %v396_v19, %v392_v18  ;;  %v1374_v55 = vpack.c.bf16 %v421_v51, %v417_v50  ;;  %v416_v56 = vld [vmem:[%s1774_s7 + $0x4c0] sm:$0xff]  ;;  %v422_v60 = vld [vmem:[%s1774_s7 + $0x4f0] sm:$0xff] }
  0x49   : > { %1475 = vmatprep.subr.bf16.mxu1 %v1474_v34  ;;  %v402_v34 = vld [vmem:[%s1774_s7 + $0x450] sm:$0xff]  ;;  %v1494_v35 = vpack.c.bf16 %v407_v28, %v403_v27  ;;  %v420_v57 = vld [vmem:[%s1774_s7 + $0x4e0] sm:$0xff]  ;;  %v425_v61 = vld [vmem:[%s1774_s7 + $0x508] sm:$0xff] }
  0x4a   : > { %v1496_v43 = vpack.c.bf16 %v406_v36, %v402_v34  ;;  %v429_v62 = vld [vmem:[%s1774_s7 + $0x528] sm:$0xff]  ;;  %v427_v0 = vld [vmem:[%s1774_s7 + $0x518] sm:$0xff]  ;;  %v424_v5 = vld [vmem:[%s1774_s7 + $0x500] sm:$0xff] }
  0x4b   : > { %1349 = vmatpush1.bf16.msra.mxu0 %v1348_v40  ;;  %v411_v40 = vld [vmem:[%s1774_s7 + $0x498] sm:$0xff]  ;;  %v1378_v4 = vpack.c.bf16 %v429_v62, %v425_v61  ;;  %v428_v6 = vld [vmem:[%s1774_s7 + $0x520] sm:$0xff]  ;;  %v430_v9 = vld [vmem:[%s1774_s7 + $0x530] sm:$0xff] }
  0x4c   : > { %1477 = vmatpush1.bf16.msra.mxu1 %v1476_v41  ;;  %1351 = vmatprep.subr.bf16.mxu0 %v1350_v42  ;;  %v415_v41 = vld [vmem:[%s1774_s7 + $0x4b8] sm:$0xff]  ;;  %v1368_v42 = vpack.c.bf16 %v404_v33, %v400_v32  ;;  %v433_v10 = vld [vmem:[%s1774_s7 + $0x548] sm:$0xff]  ;;  %v432_v18 = vld [vmem:[%s1774_s7 + $0x540] sm:$0xff] }
  0x4d   : > { %1479 = vmatprep.subr.bf16.mxu1 %v1478_v46  ;;  %v412_v46 = vld [vmem:[%s1774_s7 + $0x4a0] sm:$0xff]  ;;  %v1498_v48 = vpack.c.bf16 %v415_v41, %v411_v40  ;;  %v437_v11 = vld [vmem:[%s1774_s7 + $0x568] sm:$0xff]  ;;  %v435_v13 = vld [vmem:[%s1774_s7 + $0x558] sm:$0xff] }
  0x4e   : > { %v439_v14 = vld [vmem:[%s1774_s7 + $0x578] sm:$0xff]  ;;  %v436_v19 = vld [vmem:[%s1774_s7 + $0x560] sm:$0xff]  ;;  %v434_v20 = vld [vmem:[%s1774_s7 + $0x550] sm:$0xff] }
  0x4f   : > { %1353 = vmatpush1.bf16.msra.mxu0 %v1352_v52  ;;  %v423_v52 = vld [vmem:[%s1774_s7 + $0x4f8] sm:$0xff]  ;;  %v438_v22 = vld [vmem:[%s1774_s7 + $0x570] sm:$0xff]  ;;  %v441_v23 = vld [vmem:[%s1774_s7 + $0x588] sm:$0xff] }
  0x50   : > { %1481 = vmatpush1.bf16.msra.mxu1 %v1480_v53  ;;  %1355 = vmatprep.subr.bf16.mxu0 %v1354_v54  ;;  %v1372_v53 = vpack.c.bf16 %v412_v46, %v408_v45  ;;  %v1500_v54 = vpack.c.bf16 %v414_v49, %v410_v47  ;;  %v445_v24 = vld [vmem:[%s1774_s7 + $0x5a8] sm:$0xff]  ;;  %v443_v27 = vld [vmem:[%s1774_s7 + $0x598] sm:$0xff]  ;;  %v440_v32 = vld [vmem:[%s1774_s7 + $0x580] sm:$0xff] }
  0x51   : > { %1483 = vmatprep.subr.bf16.mxu1 %v1482_v58  ;;  %v418_v58 = vld [vmem:[%s1774_s7 + $0x4d0] sm:$0xff]  ;;  %v447_v28 = vld [vmem:[%s1774_s7 + $0x5b8] sm:$0xff]  ;;  %v444_v33 = vld [vmem:[%s1774_s7 + $0x5a0] sm:$0xff] }
  0x52   : > { %v442_v34 = vld [vmem:[%s1774_s7 + $0x590] sm:$0xff]  ;;  %v449_v37 = vld [vmem:[%s1774_s7 + $0x5c8] sm:$0xff]  ;;  %v455_v40 = vld [vmem:[%s1774_s7 + $0x5f8] sm:$0xff]  ;;  %v1388_v41 = vpack.c.bf16 %v444_v33, %v440_v32 }
  0x53   : > { %1357 = vmatpush1.bf16.msra.mxu0 %v1356_v1  ;;  %v431_v1 = vld [vmem:[%s1774_s7 + $0x538] sm:$0xff]  ;;  %v446_v36 = vld [vmem:[%s1774_s7 + $0x5b0] sm:$0xff]  ;;  %v453_v38 = vld [vmem:[%s1774_s7 + $0x5e8] sm:$0xff] }
  0x54   : > { %1485 = vmatpush1.bf16.msra.mxu1 %v1484_v2  ;;  %1359 = vmatprep.subr.bf16.mxu0 %v1358_v3  ;;  %v1376_v2 = vpack.c.bf16 %v420_v57, %v416_v56  ;;  %v1504_v3 = vpack.c.bf16 %v422_v60, %v418_v58  ;;  %v1506_v8 = vpack.c.bf16 %v431_v1, %v427_v0  ;;  %v452_v45 = vld [vmem:[%s1774_s7 + $0x5e0] sm:$0xff]  ;;  %v450_v46 = vld [vmem:[%s1774_s7 + $0x5d0] sm:$0xff]  ;;  %v457_v49 = vld [vmem:[%s1774_s7 + $0x608] sm:$0xff] }
  0x55   : > { %1487 = vmatprep.subr.bf16.mxu1 %v1486_v7  ;;  %v426_v7 = vld [vmem:[%s1774_s7 + $0x510] sm:$0xff]  ;;  %v461_v50 = vld [vmem:[%s1774_s7 + $0x628] sm:$0xff]  ;;  %v459_v51 = vld [vmem:[%s1774_s7 + $0x618] sm:$0xff] }
  0x56   : > { %v460_v56 = vld [vmem:[%s1774_s7 + $0x620] sm:$0xff]  ;;  %v458_v57 = vld [vmem:[%s1774_s7 + $0x610] sm:$0xff]  ;;  %v465_v60 = vld [vmem:[%s1774_s7 + $0x648] sm:$0xff] }
  0x57   : > { %1361 = vmatpush1.bf16.msra.mxu0 %v1360_v15  ;;  %v1380_v15 = vpack.c.bf16 %v428_v6, %v424_v5  ;;  %v469_v61 = vld [vmem:[%s1774_s7 + $0x668] sm:$0xff]  ;;  %v467_v62 = vld [vmem:[%s1774_s7 + $0x658] sm:$0xff]  ;;  %v468_v5 = vld [vmem:[%s1774_s7 + $0x660] sm:$0xff] }
  0x58   : > { %1489 = vmatpush1.bf16.msra.mxu1 %v1488_v16  ;;  %1363 = vmatprep.subr.bf16.mxu0 %v1362_v17  ;;  %v1508_v16 = vpack.c.bf16 %v430_v9, %v426_v7  ;;  %v1382_v17 = vpack.c.bf16 %v437_v11, %v433_v10  ;;  %v471_v0 = vld [vmem:[%s1774_s7 + $0x678] sm:$0xff]  ;;  %v466_v6 = vld [vmem:[%s1774_s7 + $0x650] sm:$0xff]  ;;  %v473_v9 = vld [vmem:[%s1774_s7 + $0x688] sm:$0xff] }
  0x59   : > { %1491 = vmatprep.subr.bf16.mxu1 %v1490_v21  ;;  %v1510_v21 = vpack.c.bf16 %v439_v14, %v435_v13  ;;  %v1526_v7 = vpack.c.bf16 %v471_v0, %v467_v62  ;;  %v477_v10 = vld [vmem:[%s1774_s7 + $0x6a8] sm:$0xff]  ;;  %v475_v11 = vld [vmem:[%s1774_s7 + $0x698] sm:$0xff]  ;;  %v484_v32 = vld [vmem:[%s1774_s7 + $0x6e0] sm:$0xff] }
  0x5a   : > { %607 = vmatmul.mubr.f32.vlgmr.msra.gmra.mrb[0].mxu0 %v1887_v26  ;;  %v479_v13 = vld [vmem:[%s1774_s7 + $0x6b8] sm:$0xff]  ;;  %v482_v33 = vld [vmem:[%s1774_s7 + $0x6d0] sm:$0xff] }
  0x5b   : > { %1365 = vmatpush1.bf16.msra.mxu0 %v1364_v29  ;;  %749 = vmatmul.mubr.f32.vlgmr.msra.gmra.mrb[0].mxu1 %v1887_v26  ;;  %v419_v26 = vld [vmem:[%s1774_s7 + $0x4d8] sm:$0xff]  ;;  %v1384_v29 = vpack.c.bf16 %v436_v19, %v432_v18  ;;  %v476_v18 = vld [vmem:[%s1774_s7 + $0x6a0] sm:$0xff]  ;;  %v474_v19 = vld [vmem:[%s1774_s7 + $0x690] sm:$0xff] }
  0x5c   : > { %1493 = vmatpush1.bf16.msra.mxu1 %v1492_v30  ;;  %1367 = vmatprep.subr.bf16.mxu0 %v1366_v31  ;;  %v1502_v59 = vpack.c.bf16 %v423_v52, %v419_v26  ;;  %v1512_v30 = vpack.c.bf16 %v438_v22, %v434_v20  ;;  %v1386_v31 = vpack.c.bf16 %v445_v24, %v441_v23  ;;  %v463_v26 = vld [vmem:[%s1774_s7 + $0x638] sm:$0xff]  ;;  %v481_v22 = vld [vmem:[%s1774_s7 + $0x6c8] sm:$0xff] }
  0x5d   : > { %1495 = vmatprep.subr.bf16.mxu1 %v1494_v35  ;;  %677 = vmatprep.mubr.f32.mxu0 %v537_v39  ;;  %v1514_v35 = vpack.c.bf16 %v447_v28, %v443_v27  ;;  %v1522_v58 = vpack.c.bf16 %v463_v26, %v459_v51  ;;  %v1530_v20 = vpack.c.bf16 %v479_v13, %v475_v11  ;;  %v485_v23 = vld [vmem:[%s1774_s7 + $0x6e8] sm:$0xff]  ;;  %v483_v24 = vld [vmem:[%s1774_s7 + $0x6d8] sm:$0xff] }
  0x5e   : > { %819 = vmatprep.mubr.f32.mxu1 %v537_v39  ;;  %v451_v39 = vld [vmem:[%s1774_s7 + $0x5d8] sm:$0xff] }
  0x5f   : > { %1369 = vmatpush1.bf16.msra.mxu0 %v1368_v42  ;;  %v1516_v42 = vpack.c.bf16 %v446_v36, %v442_v34  ;;  %v1518_v47 = vpack.c.bf16 %v455_v40, %v451_v39  ;;  %v487_v27 = vld [vmem:[%s1774_s7 + $0x6f8] sm:$0xff]  ;;  %v489_v36 = vld [vmem:[%s1774_s7 + $0x708] sm:$0xff] }
  0x60   : > { %1497 = vmatpush1.bf16.msra.mxu1 %v1496_v43  ;;  %1371 = vmatprep.subr.bf16.mxu0 %v1370_v44  ;;  %v1390_v43 = vpack.c.bf16 %v453_v38, %v449_v37  ;;  %v448_v44 = vld [vmem:[%s1774_s7 + $0x5c0] sm:$0xff]  ;;  %v1534_v34 = vpack.c.bf16 %v487_v27, %v483_v24  ;;  %v493_v37 = vld [vmem:[%s1774_s7 + $0x728] sm:$0xff]  ;;  %v491_v38 = vld [vmem:[%s1774_s7 + $0x718] sm:$0xff] }
  0x61   : > { %1499 = vmatprep.subr.bf16.mxu1 %v1498_v48  ;;  %v454_v48 = vld [vmem:[%s1774_s7 + $0x5f0] sm:$0xff]  ;;  %v1392_v52 = vpack.c.bf16 %v452_v45, %v448_v44  ;;  %v495_v39 = vld [vmem:[%s1774_s7 + $0x738] sm:$0xff]  ;;  %v492_v44 = vld [vmem:[%s1774_s7 + $0x720] sm:$0xff] }
  0x62   : > { %v490_v45 = vld [vmem:[%s1774_s7 + $0x710] sm:$0xff]  ;;  %v503_v51 = vld [vmem:[%s1774_s7 + $0x778] sm:$0xff] }
  0x63   : > { %1373 = vmatpush1.bf16.msra.mxu0 %v1372_v53  ;;  %v1520_v53 = vpack.c.bf16 %v454_v48, %v450_v46  ;;  %v1538_v46 = vpack.c.bf16 %v495_v39, %v491_v38  ;;  %v497_v48 = vld [vmem:[%s1774_s7 + $0x748] sm:$0xff]  ;;  %v511_v62 = vld [vmem:[%s1774_s7 + $0x7b8] sm:$0xff] }
  0x64   : > { %1501 = vmatpush1.bf16.msra.mxu1 %v1500_v54  ;;  %1375 = vmatprep.subr.bf16.mxu0 %v1374_v55  ;;  %v1394_v54 = vpack.c.bf16 %v461_v50, %v457_v49  ;;  %v456_v55 = vld [vmem:[%s1774_s7 + $0x600] sm:$0xff]  ;;  %v501_v49 = vld [vmem:[%s1774_s7 + $0x768] sm:$0xff]  ;;  %v499_v50 = vld [vmem:[%s1774_s7 + $0x758] sm:$0xff] }
  0x65   : > { %1503 = vmatprep.subr.bf16.mxu1 %v1502_v59  ;;  %v462_v59 = vld [vmem:[%s1774_s7 + $0x630] sm:$0xff]  ;;  %v1396_v1 = vpack.c.bf16 %v460_v56, %v456_v55  ;;  %v500_v55 = vld [vmem:[%s1774_s7 + $0x760] sm:$0xff]  ;;  %v519_v11 = vld [vmem:[%s1774_s7 + $0x7f8] sm:$0xff] }
  0x66   : > { %v498_v56 = vld [vmem:[%s1774_s7 + $0x750] sm:$0xff]  ;;  %v895_v39 = vld [vmem:[%s2318_s3 + $0x8] sm:$0xff] (!%p1218_p5) }
  0x67   : > { %1377 = vmatpush1.bf16.msra.mxu0 %v1376_v2  ;;  %v1524_v2 = vpack.c.bf16 %v462_v59, %v458_v57  ;;  %v1542_v57 = vpack.c.bf16 %v503_v51, %v499_v50  ;;  %v505_v59 = vld [vmem:[%s1774_s7 + $0x788] sm:$0xff]  ;;  %v897_v50 = vld [vmem:[%s2318_s3 + $0x18] sm:$0xff] (!%p1218_p5) }
  0x68   : > { %1505 = vmatpush1.bf16.msra.mxu1 %v1504_v3  ;;  %1379 = vmatprep.subr.bf16.mxu0 %v1378_v4  ;;  %v1398_v3 = vpack.c.bf16 %v469_v61, %v465_v60  ;;  %v464_v4 = vld [vmem:[%s1774_s7 + $0x640] sm:$0xff]  ;;  %v509_v60 = vld [vmem:[%s1774_s7 + $0x7a8] sm:$0xff]  ;;  %v507_v61 = vld [vmem:[%s1774_s7 + $0x798] sm:$0xff] }
  0x69   : > { %1507 = vmatprep.subr.bf16.mxu1 %v1506_v8  ;;  %v470_v8 = vld [vmem:[%s1774_s7 + $0x670] sm:$0xff]  ;;  %v1400_v14 = vpack.c.bf16 %v468_v5, %v464_v4  ;;  %v508_v4 = vld [vmem:[%s1774_s7 + $0x7a0] sm:$0xff] }
  0x6a   : > { %v506_v5 = vld [vmem:[%s1774_s7 + $0x790] sm:$0xff] }
  0x6b   : > { %1381 = vmatpush1.bf16.msra.mxu0 %v1380_v15  ;;  %v1528_v15 = vpack.c.bf16 %v470_v8, %v466_v6  ;;  %v1546_v6 = vpack.c.bf16 %v511_v62, %v507_v61  ;;  %v513_v8 = vld [vmem:[%s1774_s7 + $0x7c8] sm:$0xff]  ;;  %v898_v61 = vld [vmem:[%s2318_s3 + $0x20] sm:$0xff] (!%p1218_p5) }
  0x6c   : > { %1509 = vmatpush1.bf16.msra.mxu1 %v1508_v16  ;;  %1383 = vmatprep.subr.bf16.mxu0 %v1382_v17  ;;  %v1402_v16 = vpack.c.bf16 %v477_v10, %v473_v9  ;;  %v472_v17 = vld [vmem:[%s1774_s7 + $0x680] sm:$0xff]  ;;  %v517_v9 = vld [vmem:[%s1774_s7 + $0x7e8] sm:$0xff]  ;;  %v515_v10 = vld [vmem:[%s1774_s7 + $0x7d8] sm:$0xff] }
  0x6d   : > { %1511 = vmatprep.subr.bf16.mxu1 %v1510_v21  ;;  %v478_v21 = vld [vmem:[%s1774_s7 + $0x6b0] sm:$0xff]  ;;  %v1404_v28 = vpack.c.bf16 %v476_v18, %v472_v17  ;;  %v516_v17 = vld [vmem:[%s1774_s7 + $0x7e0] sm:$0xff]  ;;  %v1550_v18 = vpack.c.bf16 %v519_v11, %v515_v10  ;;  %v899_v62 = vld [vmem:[%s2318_s3 + $0x28] sm:$0xff] (!%p1218_p5) }
  0x6e   : > { %v901_v11 = vld [vmem:[%s2318_s3 + $0x38] sm:$0xff] (!%p1218_p5) }
  0x6f   : > { %1385 = vmatpush1.bf16.msra.mxu0 %v1384_v29  ;;  %v1532_v29 = vpack.c.bf16 %v478_v21, %v474_v19  ;;  %v514_v19 = vld [vmem:[%s1774_s7 + $0x7d0] sm:$0xff] }
  0x70   : > { %1513 = vmatpush1.bf16.msra.mxu1 %v1512_v30  ;;  %1387 = vmatprep.subr.bf16.mxu0 %v1386_v31  ;;  %v1406_v30 = vpack.c.bf16 %v485_v23, %v481_v22  ;;  %v480_v31 = vld [vmem:[%s1774_s7 + $0x6c0] sm:$0xff] }
  0x71   : > { %1515 = vmatprep.subr.bf16.mxu1 %v1514_v35  ;;  %v486_v35 = vld [vmem:[%s1774_s7 + $0x6f0] sm:$0xff]  ;;  %v1408_v40 = vpack.c.bf16 %v484_v32, %v480_v31 }
  0x73   : > { %1389 = vmatpush1.bf16.msra.mxu0 %v1388_v41  ;;  %v1536_v41 = vpack.c.bf16 %v486_v35, %v482_v33  ;;  %v262_v33 = vld [vmem:[#allocation2] sm:$0xff] }
  0x74   : > { %1517 = vmatpush1.bf16.msra.mxu1 %v1516_v42  ;;  %1391 = vmatprep.subr.bf16.mxu0 %v1390_v43  ;;  %v1410_v42 = vpack.c.bf16 %v493_v37, %v489_v36  ;;  %v488_v43 = vld [vmem:[%s1774_s7 + $0x700] sm:$0xff]  ;;  %v911_v36 = vld [vmem:[%s2318_s3 + $0x88] sm:$0xff] (!%p1218_p5) }
  0x75   : > { %1519 = vmatprep.subr.bf16.mxu1 %v1518_v47  ;;  %v494_v47 = vld [vmem:[%s1774_s7 + $0x730] sm:$0xff]  ;;  %v1412_v26 = vpack.c.bf16 %v492_v44, %v488_v43  ;;  %v894_v37 = vld [vmem:[%s2318_s3] sm:$0xff] (!%p1218_p5) }
  0x76   : > { %v926_v44 = vld [vmem:[%s2318_s3 + $0x100] sm:$0xff] (!%p1218_p5) }
  0x77   : > { %1393 = vmatpush1.bf16.msra.mxu0 %v1392_v52  ;;  %v1540_v52 = vpack.c.bf16 %v494_v47, %v490_v45  ;;  %v927_v45 = vld [vmem:[%s2318_s3 + $0x108] sm:$0xff] (!%p1218_p5) }
  0x78   : > { %1521 = vmatpush1.bf16.msra.mxu1 %v1520_v53  ;;  %1395 = vmatprep.subr.bf16.mxu0 %v1394_v54  ;;  %v1414_v53 = vpack.c.bf16 %v501_v49, %v497_v48  ;;  %v496_v54 = vld [vmem:[%s1774_s7 + $0x740] sm:$0xff]  ;;  %v1588_v47 = vpack.c.bf16 (!%p1218_p5), %v927_v45, %v926_v44  ;;  %v913_v48 = vld [vmem:[%s2318_s3 + $0x98] sm:$0xff] (!%p1218_p5)  ;;  %v896_v49 = vld [vmem:[%s2318_s3 + $0x10] sm:$0xff] (!%p1218_p5)  ;;  %v859_v45 = vsub.s32 (!%p1218_p5), 0, %v1861_v63 }
  0x79   : > { %1523 = vmatprep.subr.bf16.mxu1 %v1522_v58  ;;  %v502_v58 = vld [vmem:[%s1774_s7 + $0x770] sm:$0xff]  ;;  %v1416_v0 = vpack.c.bf16 %v500_v55, %v496_v54  ;;  %v923_v44 = vld [vmem:[%s2318_s3 + $0xe8] sm:$0xff] (!%p1218_p5) }
  0x7a   : > { %v928_v54 = vld [vmem:[%s2318_s3 + $0x110] sm:$0xff] (!%p1218_p5) }
  0x7b   : > { %1397 = vmatpush1.bf16.msra.mxu0 %v1396_v1  ;;  %v1544_v1 = vpack.c.bf16 %v502_v58, %v498_v56  ;;  %v929_v56 = vld [vmem:[%s2318_s3 + $0x118] sm:$0xff] (!%p1218_p5)  ;;  %v915_v58 = vld [vmem:[%s2318_s3 + $0xa8] sm:$0xff] (!%p1218_p5) }
  0x7c   : > { %1525 = vmatpush1.bf16.msra.mxu1 %v1524_v2  ;;  %1399 = vmatprep.subr.bf16.mxu0 %v1398_v3  ;;  %v1418_v2 = vpack.c.bf16 %v509_v60, %v505_v59  ;;  %v504_v3 = vld [vmem:[%s1774_s7 + $0x780] sm:$0xff]  ;;  %v1592_v59 = vpack.c.bf16 (!%p1218_p5), %v929_v56, %v928_v54  ;;  %v907_v54 = vld [vmem:[%s2318_s3 + $0x68] sm:$0xff] (!%p1218_p5) }
  0x7d   : > { %1527 = vmatprep.subr.bf16.mxu1 %v1526_v7  ;;  %v510_v7 = vld [vmem:[%s1774_s7 + $0x7b0] sm:$0xff]  ;;  %v1420_v13 = vpack.c.bf16 %v508_v4, %v504_v3  ;;  %v931_v3 = vld [vmem:[%s2318_s3 + $0x128] sm:$0xff] (!%p1218_p5)  ;;  %v1564_v4 = vpack.c.bf16 (!%p1218_p5), %v899_v62, %v898_v61 }
  0x7f   : > { %1401 = vmatpush1.bf16.msra.mxu0 %v1400_v14  ;;  %v1548_v14 = vpack.c.bf16 %v510_v7, %v506_v5  ;;  %v917_v7 = vld [vmem:[%s2318_s3 + $0xb8] sm:$0xff] (!%p1218_p5) }
  0x80   : > { %1529 = vmatpush1.bf16.msra.mxu1 %v1528_v15  ;;  %1403 = vmatprep.subr.bf16.mxu0 %v1402_v16  ;;  %v1422_v15 = vpack.c.bf16 %v517_v9, %v513_v8  ;;  %v512_v16 = vld [vmem:[%s1774_s7 + $0x7c0] sm:$0xff]  ;;  %v900_v8 = vld [vmem:[%s2318_s3 + $0x30] sm:$0xff] (!%p1218_p5) }
  0x81   : > { %1531 = vmatprep.subr.bf16.mxu1 %v1530_v20  ;;  %v518_v20 = vld [vmem:[%s1774_s7 + $0x7f0] sm:$0xff]  ;;  %v1424_v21 = vpack.c.bf16 %v516_v17, %v512_v16  ;;  %v933_v17 = vld [vmem:[%s2318_s3 + $0x138] sm:$0xff] (!%p1218_p5) }
  0x82   : > { %v1552_v22 = vpack.c.bf16 %v518_v20, %v514_v19  ;;  %v932_v16 = vld [vmem:[%s2318_s3 + $0x130] sm:$0xff] (!%p1218_p5)  ;;  %v919_v19 = vld [vmem:[%s2318_s3 + $0xc8] sm:$0xff] (!%p1218_p5)  ;;  %v1568_v20 = vpack.c.bf16 (!%p1218_p5), %v901_v11, %v900_v8  ;;  %v909_v8 = vld [vmem:[%s2318_s3 + $0x78] sm:$0xff] (!%p1218_p5) }
  0x83   : > { %1405 = vmatpush1.bf16.msra.mxu0 %v1404_v28  ;;  %v940_v11 = vld [vmem:[%s2318_s3 + $0x170] sm:$0xff] (!%p1218_p5) }
  0x84   : > { %1533 = vmatpush1.bf16.msra.mxu1 %v1532_v29  ;;  %1407 = vmatprep.subr.bf16.mxu0 %v1406_v30 }
  0x85   : > { %1535 = vmatprep.subr.bf16.mxu1 %v1534_v34 }
  0x87   : > { %1409 = vmatpush1.bf16.msra.mxu0 %v1408_v40  ;;  %v942_v40 = vld [vmem:[%s2318_s3 + $0x180] sm:$0xff] (!%p1218_p5) }
  0x88   : > { %1537 = vmatpush1.bf16.msra.mxu1 %v1536_v41  ;;  %1411 = vmatprep.subr.bf16.mxu0 %v1410_v42  ;;  %v943_v41 = vld [vmem:[%s2318_s3 + $0x188] sm:$0xff] (!%p1218_p5)  ;;  %v1556_v42 = vpack.c.bf16 (!%p1218_p5), %v895_v39, %v894_v37  ;;  %v905_v39 = vld [vmem:[%s2318_s3 + $0x58] sm:$0xff] (!%p1218_p5) }
  0x89   : > { %1539 = vmatprep.subr.bf16.mxu1 %v1538_v46  ;;  %v1586_v43 = vpack.c.bf16 (!%p1218_p5), %v943_v41, %v942_v40  ;;  %v912_v46 = vld [vmem:[%s2318_s3 + $0x90] sm:$0xff] (!%p1218_p5) }
  0x8a   : > { %v1558_v51 = vpack.c.bf16 (!%p1218_p5), %v913_v48, %v912_v46  ;;  %v936_v40 = vld [vmem:[%s2318_s3 + $0x150] sm:$0xff] (!%p1218_p5)  ;;  %v863_v46 = vsub.s32 (!%p1218_p5), 1, %v1861_v63  ;;  %v954_v48 = vld [vmem:[%s2318_s3 + $0x1e0] sm:$0xff] (!%p1218_p5) }
  0x8b   : > { %1413 = vmatpush1.bf16.msra.mxu0 %v1412_v26  ;;  %v1560_v26 = vpack.c.bf16 (!%p1218_p5), %v897_v50, %v896_v49  ;;  %v955_v49 = vld [vmem:[%s2318_s3 + $0x1e8] sm:$0xff] (!%p1218_p5)  ;;  %v871_v50 = vsub.s32 (!%p1218_p5), 3, %v1861_v63 }
  0x8c   : > { %1541 = vmatpush1.bf16.msra.mxu1 %v1540_v52  ;;  %1415 = vmatprep.subr.bf16.mxu0 %v1414_v53  ;;  %v944_v52 = vld [vmem:[%s2318_s3 + $0x190] sm:$0xff] (!%p1218_p5)  ;;  %v945_v53 = vld [vmem:[%s2318_s3 + $0x198] sm:$0xff] (!%p1218_p5)  ;;  %v1610_v56 = vpack.c.bf16 (!%p1218_p5), %v955_v49, %v954_v48 }
  0x8d   : > { %1543 = vmatprep.subr.bf16.mxu1 %v1542_v57  ;;  %v1590_v55 = vpack.c.bf16 (!%p1218_p5), %v945_v53, %v944_v52  ;;  %v914_v57 = vld [vmem:[%s2318_s3 + $0xa0] sm:$0xff] (!%p1218_p5) }
  0x8e   : > { %v1562_v60 = vpack.c.bf16 (!%p1218_p5), %v915_v58, %v914_v57  ;;  %v939_v57 = vld [vmem:[%s2318_s3 + $0x168] sm:$0xff] (!%p1218_p5)  ;;  %v924_v58 = vld [vmem:[%s2318_s3 + $0xf0] sm:$0xff] (!%p1218_p5) }
  0x8f   : > { %1417 = vmatpush1.bf16.msra.mxu0 %v1416_v0  ;;  %v946_v0 = vld [vmem:[%s2318_s3 + $0x1a0] sm:$0xff] (!%p1218_p5) }
  0x90   : > { %1545 = vmatpush1.bf16.msra.mxu1 %v1544_v1  ;;  %1419 = vmatprep.subr.bf16.mxu0 %v1418_v2  ;;  %v947_v1 = vld [vmem:[%s2318_s3 + $0x1a8] sm:$0xff] (!%p1218_p5)  ;;  %v930_v2 = vld [vmem:[%s2318_s3 + $0x120] sm:$0xff] (!%p1218_p5) }
  0x91   : > { %1547 = vmatprep.subr.bf16.mxu1 %v1546_v6  ;;  %v1594_v5 = vpack.c.bf16 (!%p1218_p5), %v947_v1, %v946_v0  ;;  %v916_v6 = vld [vmem:[%s2318_s3 + $0xb0] sm:$0xff] (!%p1218_p5)  ;;  %v1596_v9 = vpack.c.bf16 (!%p1218_p5), %v931_v3, %v930_v2  ;;  %v957_v1 = vld [vmem:[%s2318_s3 + $0x1f8] sm:$0xff] (!%p1218_p5) }
  0x92   : > { %v1566_v10 = vpack.c.bf16 (!%p1218_p5), %v917_v7, %v916_v6  ;;  %v956_v0 = vld [vmem:[%s2318_s3 + $0x1f0] sm:$0xff] (!%p1218_p5) }
  0x93   : > { %1421 = vmatpush1.bf16.msra.mxu0 %v1420_v13  ;;  %v948_v13 = vld [vmem:[%s2318_s3 + $0x1b0] sm:$0xff] (!%p1218_p5) }
  0x94   : > { %1549 = vmatpush1.bf16.msra.mxu1 %v1548_v14  ;;  %1423 = vmatprep.subr.bf16.mxu0 %v1422_v15  ;;  %v949_v14 = vld [vmem:[%s2318_s3 + $0x1b8] sm:$0xff] (!%p1218_p5)  ;;  %v908_v7 = vld [vmem:[%s2318_s3 + $0x70] sm:$0xff] (!%p1218_p5) }
  0x95   : > { %1551 = vmatprep.subr.bf16.mxu1 %v1550_v18  ;;  %v1598_v15 = vpack.c.bf16 (!%p1218_p5), %v949_v14, %v948_v13  ;;  %v918_v18 = vld [vmem:[%s2318_s3 + $0xc0] sm:$0xff] (!%p1218_p5)  ;;  %v941_v13 = vld [vmem:[%s2318_s3 + $0x178] sm:$0xff] (!%p1218_p5) }
  0x97   : > { %1425 = vmatpush1.bf16.msra.mxu0 %v1424_v21  ;;  %v950_v21 = vld [vmem:[%s2318_s3 + $0x1c0] sm:$0xff] (!%p1218_p5) }
  0x98   : > { %1553 = vmatpush1.bf16.msra.mxu1 %v1552_v22  ;;  %v951_v22 = vld [vmem:[%s2318_s3 + $0x1c8] sm:$0xff] (!%p1218_p5) }
  0x99   : > { %1587 = vmatprep.subr.bf16.mxu1 (!%p1218_p5), %v1586_v43  ;;  %v922_v43 = vld [vmem:[%s2318_s3 + $0xe0] sm:$0xff] (!%p1218_p5) }
  0x9a   : > { %678 = vmatmul.mubr.f32.vlgmr.msra.gmra.mrb[0].mxu0 %v1932_v25  ;;  %v1578_v53 = vpack.c.bf16 (!%p1218_p5), %v923_v44, %v922_v43 }
  0x9b   : > { %820 = vmatmul.mubr.f32.vlgmr.msra.gmra.mrb[0].mxu1 %v1932_v25  ;;  %v910_v25 = vld [vmem:[%s2318_s3 + $0x80] sm:$0xff] (!%p1218_p5) }
  0x9c   : > { %v1554_v38 = vpack.c.bf16 (!%p1218_p5), %v911_v36, %v910_v25  ;;  %1589 = vmatpush3.bf16.msra.mxu1 (!%p1218_p5), %v1588_v47  ;;  %v867_v47 = vsub.s32 (!%p1218_p5), 2, %v1861_v63  ;;  %v855_v63 = vld [vmem:[%s2317_s2] sm:$0xf] (!%p1218_p5) }
  0x9d   : > { %1591 = vmatprep.subr.bf16.mxu1 (!%p1218_p5), %v1590_v55  ;;  %v938_v55 = vld [vmem:[%s2318_s3 + $0x160] sm:$0xff] (!%p1218_p5)  ;;  %v864_v61 = vrot.slane (!%p1218_p5), %v855_v63, %v863_v46  ;;  %v872_v2 = vrot.slane (!%p1218_p5), %v855_v63, %v871_v50 }
  0x9e   : > { %1555 = vmatprep.subr.bf16.mxu0 (!%p1218_p5), %v1554_v38  ;;  %v904_v38 = vld [vmem:[%s2318_s3 + $0x50] sm:$0xff] (!%p1218_p5)  ;;  %v868_v62 = vrot.slane (!%p1218_p5), %v855_v63, %v867_v47 }
  0x9f   : > { %1557 = vmatpush3.bf16.msra.mxu0 (!%p1218_p5), %v1556_v42  ;;  %v937_v42 = vld [vmem:[%s2318_s3 + $0x158] sm:$0xff] (!%p1218_p5) }
  0xa0   : > { %1559 = vmatprep.subr.bf16.mxu0 (!%p1218_p5), %v1558_v51  ;;  %1593 = vmatpush3.bf16.msra.mxu1 (!%p1218_p5), %v1592_v59  ;;  %v1576_v51 = vpack.c.bf16 (!%p1218_p5), %v905_v39, %v904_v38  ;;  %v1608_v52 = vpack.c.bf16 (!%p1218_p5), %v937_v42, %v936_v40  ;;  %v925_v59 = vld [vmem:[%s2318_s3 + $0xf8] sm:$0xff] (!%p1218_p5) }
  0xa1   : > { %1595 = vmatprep.subr.bf16.mxu1 (!%p1218_p5), %v1594_v5  ;;  %v1612_v5 = vpack.c.bf16 (!%p1218_p5), %v939_v57, %v938_v55  ;;  %v1582_v6 = vpack.c.bf16 (!%p1218_p5), %v925_v59, %v924_v58 }
  0xa3   : > { %1561 = vmatpush3.bf16.msra.mxu0 (!%p1218_p5), %v1560_v26  ;;  %v906_v26 = vld [vmem:[%s2318_s3 + $0x60] sm:$0xff] (!%p1218_p5) }
  0xa4   : > { %1563 = vmatprep.subr.bf16.mxu0 (!%p1218_p5), %v1562_v60  ;;  %1597 = vmatpush3.bf16.msra.mxu1 (!%p1218_p5), %v1596_v9  ;;  %v860_v60 = vrot.slane (!%p1218_p5), %v855_v63, %v859_v45  ;;  %v1580_v3 = vpack.c.bf16 (!%p1218_p5), %v907_v54, %v906_v26  ;;  %v874_v9 = vcombine.low (!%p1218_p5), %v868_v62, %v872_v2 }
  0xa5   : > { %1599 = vmatprep.subr.bf16.mxu1 (!%p1218_p5), %v1598_v15 }
  0xa6   : > { %v888_v15 = vrot.slane (!%p1218_p5), %v874_v9, %v1872_v12 }
  0xa7   : > { %1565 = vmatpush3.bf16.msra.mxu0 (!%p1218_p5), %v1564_v4  ;;  %v873_v4 = vcombine.low (!%p1218_p5), %v860_v60, %v864_v61 }
  0xa8   : > { %1567 = vmatprep.subr.bf16.mxu0 (!%p1218_p5), %v1566_v10  ;;  %v1614_v10 = vpack.c.bf16 (!%p1218_p5), %v957_v1, %v956_v0 }
  0xa9   : > { %v881_v14 = vrot.slane (!%p1218_p5), %v873_v4, %v1872_v12 }
  0xab   : > { %1569 = vmatpush3.bf16.msra.mxu0 (!%p1218_p5), %v1568_v20 }
 0x16d   : > { %v679_v23 = vpop.f32.mrb[0].mxu0 }
 0x16e   : > { %v821_v24 = vpop.f32.mrb[0].mxu1  ;;  %v681_v27 = vpop.f32.mrb[1].mxu0 }
 0x16f   : > { %v830_v28 = vcombine.low %v679_v23, %v681_v27  ;;  %v823_v29 = vpop.f32.mrb[1].mxu1  ;;  %v1600_v23 = vpack.c.bf16 (!%p1218_p5), %v933_v17, %v932_v16  ;;  %v902_v27 = vld [vmem:[%s2318_s3 + $0x40] sm:$0xff] (!%p1218_p5)  ;;  %v1584_v16 = vpack.c.bf16 (!%p1218_p5), %v909_v8, %v908_v7 }
 0x170   : > { %v831_v30 = vcombine.low %v821_v24, %v823_v29  ;;  %v1570_v24 = vpack.c.bf16 (!%p1218_p5), %v919_v19, %v918_v18  ;;  %v934_v29 = vld [vmem:[%s2318_s3 + $0x140] sm:$0xff] (!%p1218_p5)  ;;  %v1616_v18 = vpack.c.bf16 (!%p1218_p5), %v941_v13, %v940_v11  ;;  %v889_v19 = vcombine.low (!%p1218_p5), %v881_v14, %v888_v15 }
 0x171   : > { %v838_v31 = vrot.slane %v830_v28, %v1872_v12  ;;  %v903_v28 = vld [vmem:[%s2318_s3 + $0x48] sm:$0xff] (!%p1218_p5)  ;;  %1601 = vmatpush3.bf16.msra.mxu1 (!%p1218_p5), %v1600_v23 }
 0x172   : > { %v845_v32 = vrot.slane %v831_v30, %v1872_v12  ;;  %853 = sbr.rel (%p1218_p5) target bundleno = 613 (0x265), region = 48  ;;  %v1602_v30 = vpack.c.bf16 (!%p1218_p5), %v951_v22, %v950_v21  ;;  %v1572_v25 = vpack.c.bf16 (!%p1218_p5), %v903_v28, %v902_v27  ;;  %1571 = vmatprep.subr.bf16.mxu0 (!%p1218_p5), %v1570_v24 }
 0x174   : > { %v846_v34 = vcombine.low %v838_v31, %v845_v32  ;;  %v935_v31 = vld [vmem:[%s2318_s3 + $0x148] sm:$0xff] (!%p1218_p5)  ;;  %v920_v32 = vld [vmem:[%s2318_s3 + $0xd0] sm:$0xff] (!%p1218_p5)  ;;  %1603 = vmatprep.subr.bf16.mxu1 (!%p1218_p5), %v1602_v30  ;;  %1573 = vmatpush3.bf16.msra.mxu0 (!%p1218_p5), %v1572_v25  ;;  %v1219_v30 = vld [vmem:[%s2319_s4] ss:$0 sm:$0xff] (!%p1218_p5) }
 0x175   : > { %v1604_v36 = vpack.c.bf16 (!%p1218_p5), %v935_v31, %v934_v29 }
 0x176   : > { %v848_v35 = vadd.f32 %v846_v34, %v262_v33  ;;  %v921_v33 = vld [vmem:[%s2318_s3 + $0xd8] sm:$0xff] (!%p1218_p5)  ;;  %v952_v34 = vld [vmem:[%s2318_s3 + $0x1d0] sm:$0xff] (!%p1218_p5) }
 0x177   : > { %v1574_v37 = vpack.c.bf16 (!%p1218_p5), %v921_v33, %v920_v32  ;;  %1605 = vmatpush3.bf16.msra.mxu1 (!%p1218_p5), %v1604_v36 }
 0x178   : > { %849 = vst [vmem:[#allocation2] sm:$0xff] %v848_v35  ;;  %v953_v35 = vld [vmem:[%s2318_s3 + $0x1d8] sm:$0xff] (!%p1218_p5) }
 0x179   : > { %v1606_v41 = vpack.c.bf16 %v953_v35, %v952_v34  ;;  %1575 = vmatprep.subr.bf16.mxu0 %v1574_v37 }
 0x17a   : > { %1577 = vmatpush3.bf16.msra.mxu0 %v1576_v51 }
 0x17b   : > { %1607 = vmatprep.subr.bf16.mxu1 %v1606_v41  ;;  %1579 = vmatprep.subr.bf16.mxu0 %v1578_v53 }
 0x17c   : > { %1609 = vmatpush3.bf16.msra.mxu1 %v1608_v52 }
 0x17d   : > { %1611 = vmatprep.subr.bf16.mxu1 %v1610_v56 }
 0x17e   : > { %1581 = vmatpush3.bf16.msra.mxu0 %v1580_v3 }
 0x17f   : > { %v854_v17 = vld [vmem:[#allocation2] sm:$0xff]  ;;  %1583 = vmatprep.subr.bf16.mxu0 %v1582_v6 }
 0x180   : > { %1613 = vmatpush3.bf16.msra.mxu1 %v1612_v5  ;;  %v891_v20 = vadd.f32 %v889_v19, %v854_v17 }
 0x181   : > { %1615 = vmatprep.subr.bf16.mxu1 %v1614_v10 }
 0x182   : > { %1585 = vmatpush3.bf16.msra.mxu0 %v1584_v16  ;;  %v892_v21 = vmax.f32 %v891_v20, 0.0 }
 0x184   : > { %1617 = vmatpush3.bf16.msra.mxu1 %v1616_v18  ;;  %893 = vst [vmem:[#allocation5] sm:$0xff] %v892_v21  ;;  %v973_v22 = vrot.slane %v892_v21, %v1872_v12  ;;  %v966_v23 = vcombine.high %v892_v21, %v892_v21 }
 0x186   : > { %v981_v24 = vcombine.high %v973_v22, %v973_v22  ;;  %v980_v27 = vrot.slane %v966_v23, %v1872_v12 }
 0x188   : > { %1051 = vmatprep.mubr.f32.mxu0 %v981_v24  ;;  %v982_v28 = vcombine.high %v980_v27, %v980_v27 }
 0x189   : > { %1052 = vmatmul.mubr.f32.vlgmr.msra.gmra.mrb[0].mxu0 %v973_v22 }
 0x18a   : > { %1121 = vmatprep.mubr.f32.mxu1 %v982_v28 }
 0x18b   : > { %1122 = vmatmul.mubr.f32.vlgmr.msra.gmra.mrb[0].mxu1 %v980_v27 }
 0x25c   : > { %v1260_v29 = vpop.f32.mrb[0].mxu0 }
 0x25d   : > { %v1261_v31 = vpop.f32.mrb[1].mxu0 }
 0x25e   : > { %v1262_v32 = vadd.f32 %v1261_v31, %v1260_v29  ;;  %v1295_v33 = vpop.f32.mrb[0].mxu1 }
 0x25f   : > { %v1296_v34 = vpop.f32.mrb[1].mxu1 }
 0x260   : > { %v1054_v35 = vadd.f32 %v1262_v32, %v1219_v30  ;;  %v1297_v25 = vadd.f32 %v1296_v34, %v1295_v33 }
 0x262   : > { %v1124_v36 = vadd.f32 %v1297_v25, %v1054_v35 }
 0x264   : > { %1128 = vst.msk [vmem:[#allocation3] sm:$0x3] %vm1127_vm0, %v1124_v36 }
 0x265 PF: > { %p1630_p6 = scmp.eq.s32.totalorder %s1760_s22, 1  ;;  %s1717_s8 = smov [#allocation3]  }
 0x266   : > { %s1136_s9 = sshll.u32 %s1717_s8, 4  ;;  %s1718_s10 = smov [#allocation5]   ;;  %s1137_s9 = int_to_ptr.vmem [resolvable:$true] %s1136_s9 }
 0x267   : > { %s1147_s11 = sshll.u32 %s1718_s10, 4  ;;  %s1647_s12 = scalar_lea.vmem %s1137_s9, 32  ;;  %s1148_s11 = int_to_ptr.vmem [resolvable:$true] %s1147_s11 }
 0x268   : > { %p1648_p7 = scmp.ne.s32.totalorder %s1137_s9, %s1647_s12  ;;  %p1654_p10 = scmp.lt.s32.totalorder %s1137_s9, %s1137_s9 }
 0x269   : > { %p1655_p11 = scmp.lt.s32.totalorder %s1647_s12, %s1647_s12 }
 0x26a   : > { %p1649_p8 = pnand %p1648_p7, %p1630_p6 }
 0x26b   : > { %p1656_p12 = por %p1655_p11, %p1654_p10 }
 0x26c   : > { %p1650_p9 = pneg %p1649_p8 }
 0x26e   : > { %p1657_p13 = pnand %p1656_p12, %p1650_p9 }
 0x270   : > { %1660 = shalt.err (!%p1657_p13)
}
 0x271   : > { %s1661_s15 = scalar_lea.hbm %s2320_s5, 32 }
 0x272   : > { %p1662_p0 = scmp.ne.s32.totalorder %s2320_s5, %s1661_s15  ;;  %p1667_p3 = scmp.lt.u32.totalorder %s1661_s15, %s2320_s5 }
 0x274   : > { %p1663_p1 = pnand %p1662_p0, %p1630_p6 }
 0x276   : > { %p1664_p2 = pneg %p1663_p1 }
 0x278   : > { %p1669_p4 = pnand %p1667_p3, %p1664_p2 }
 0x27a   : > { %1672 = shalt.err (!%p1669_p4)
}
 0x27b   : > { %1623 = dma.vmem_to_hbm [thread:$0]  (%p1630_p6), %s1137_s9, 32, %s2320_s5, [#allocation4]  }
 0x27c   : > { %s1673_s24 = scalar_lea.vmem %s1148_s11, 128  ;;  %p1680_p9 = scmp.lt.s32.totalorder %s1148_s11, %s1148_s11 }
 0x27d   : > { %p1674_p5 = scmp.ne.s32.totalorder %s1148_s11, %s1673_s24  ;;  %p1681_p10 = scmp.lt.s32.totalorder %s1673_s24, %s1673_s24 }
 0x27f   : > { %p1675_p7 = pnand %p1674_p5, %p1630_p6  ;;  %p1682_p11 = por %p1681_p10, %p1680_p9 }
 0x281   : > { %p1676_p8 = pneg %p1675_p7 }
 0x283   : > { %p1683_p12 = pnand %p1682_p11, %p1676_p8 }
 0x285   : > { %1686 = shalt.err (!%p1683_p12)
}
 0x286   : > { %s1687_s27 = scalar_lea.hbm %s2321_s6, 128 }
 0x287   : > { %p1688_p13 = scmp.ne.s32.totalorder %s2321_s6, %s1687_s27  ;;  %p1693_p2 = scmp.lt.u32.totalorder %s1687_s27, %s2321_s6 }
 0x289   : > { %p1689_p0 = pnand %p1688_p13, %p1630_p6 }
 0x28b   : > { %p1690_p1 = pneg %p1689_p0 }
 0x28d   : > { %p1695_p3 = pnand %p1693_p2, %p1690_p1 }
 0x28f   : > { %1698 = shalt.err (!%p1695_p3)
}
 0x290   : > { %1625 = dma.vmem_to_hbm [thread:$0]  (%p1630_p6), %s1148_s11, 128, %s2321_s6, [#allocation6]  }
 0x291   : > { %1704 = dma.done.wait (%p1630_p6), [#allocation4], 32  }
 0x292   : > { %1706 = vsyncadd (%p1630_p6), [#allocation4], 4294967264 }
 0x293   : > { %1708 = dma.done.wait (%p1630_p6), [#allocation6], 128  }
 0x294   : > { %1710 = vsyncadd (%p1630_p6), [#allocation6], 4294967168 }
 0x295 PF: > { %s19_s21 = sadd.s32 1, %s1713_s21  }
 0x296   : > { %p16_p4 = scmp.ge.s32.totalorder %s19_s21, 4  }
 0x298   :  { %18 = sbr.rel (!%p16_p4) target bundleno = 2 (0x2), region = 86 }
 0x29f   :  { %1164 = vsyncpa [#allocation4], 1 }
 0x2a0   :  { %1166 = vsyncpa [#allocation4 + $0x1], 1 }
 0x2a1   :  { %1167 = vsyncpa [#allocation6], 1 }

// kernel: har_forward.2
= control target key start
LH: loop header
LB: loop body
LE: loop exit
PB: predicated region body
PF: predicated region fallthrough
CT: control target
= control target key end

     0   :  { %s11893_s0 = inlined_call_operand.vmem [shape: f32[2,128,2], index: 0, kind: input, shape index: {}]   ;;  %s11894_s1 = inlined_call_operand.vmem [shape: f32[2,5,16], index: 1, kind: input, shape index: {}]   ;;  %s11895_s2 = inlined_call_operand.hbm [shape: f32[2,1,16], index: 2, kind: input, shape index: {}]   ;;  %s11896_s3 = inlined_call_operand.hbm [shape: f32[2,1,16], index: 3, kind: input, shape index: {}]   ;;  %s11897_s4 = inlined_call_operand.hbm [shape: f32[2,1,16], index: 4, kind: input, shape index: {}]   ;;  %s11898_s5 = inlined_call_operand.vmem [shape: f32[2,80,16], index: 5, kind: input, shape index: {}]   ;;  %s11899_s6 = inlined_call_operand.hbm [shape: f32[2,1,16], index: 6, kind: input, shape index: {}]   ;;  %s11900_s7 = inlined_call_operand.hbm [shape: f32[2,1,16], index: 7, kind: input, shape index: {}]   ;;  %s11901_s8 = inlined_call_operand.hbm [shape: f32[2,1,16], index: 8, kind: input, shape index: {}]   ;;  %s11902_s9 = inlined_call_operand.vmem [shape: f32[2,80,16], index: 9, kind: input, shape index: {}]   ;;  %s11903_s10 = inlined_call_operand.hbm [shape: f32[2,1,16], index: 10, kind: input, shape index: {}]   ;;  %s11904_s11 = inlined_call_operand.hbm [shape: f32[2,1,16], index: 11, kind: input, shape index: {}]   ;;  %s11905_s12 = inlined_call_operand.hbm [shape: f32[2,1,16], index: 12, kind: input, shape index: {}]   ;;  %s11906_s13 = inlined_call_operand.vmem [shape: f32[2,80,16], index: 13, kind: input, shape index: {}]   ;;  %s11907_s14 = inlined_call_operand.hbm [shape: f32[2,1,16], index: 14, kind: input, shape index: {}]   ;;  %s11908_s15 = inlined_call_operand.hbm [shape: f32[2,1,16], index: 15, kind: input, shape index: {}]   ;;  %s11909_s16 = inlined_call_operand.hbm [shape: f32[2,1,16], index: 16, kind: input, shape index: {}]   ;;  %s11910_s17 = inlined_call_operand.hbm [shape: f32[2,416,512], index: 17, kind: input, shape index: {}]   ;;  %s11911_s18 = inlined_call_operand.hbm [shape: f32[2,1,512], index: 18, kind: input, shape index: {}]   ;;  %s11912_s19 = inlined_call_operand.vmem [shape: f32[2,2,512], index: 19, kind: output, shape index: {}]  }
   0x1   :  { %11955 = sst [smem:[#allocation54_spill]] %s11893_s0 }
   0x2   :  { %11956 = sst [smem:[#allocation55_spill]] %s11894_s1 }
   0x3   :  { %11957 = sst [smem:[#allocation56_spill]] %s11895_s2 }
   0x4   :  { %11958 = sst [smem:[#allocation57_spill]] %s11896_s3 }
   0x5   :  { %11959 = sst [smem:[#allocation58_spill]] %s11898_s5 }
   0x6   :  { %11960 = sst [smem:[#allocation59_spill]] %s11899_s6 }
   0x7   :  { %11961 = sst [smem:[#allocation60_spill]] %s11901_s8 }
   0x8   :  { %11962 = sst [smem:[#allocation61_spill]] %s11902_s9 }
   0x9   :  { %11963 = sst [smem:[#allocation62_spill]] %s11904_s11 }
   0xa   :  { %11964 = sst [smem:[#allocation63_spill]] %s11906_s13 }
   0xb   :  { %11965 = sst [smem:[#allocation64_spill]] %s11907_s14 }
   0xc   :  { %11966 = sst [smem:[#allocation65_spill]] %s11909_s16 }
   0xd   :  { %11967 = sst [smem:[#allocation66_spill]] %s11912_s19 }
   0xe   :  { %24 = vsyncpa [#allocation7], 0 }
   0xf   :  { %26 = vsyncpa [#allocation7 + $0x1], 0 }
  0x10   :  { %27 = vsyncpa [#allocation9], 0 }
  0x11   :  { %29 = vsyncpa [#allocation9 + $0x1], 0 }
  0x12   :  { %30 = vsyncpa [#allocation12], 0 }
  0x13   :  { %32 = vsyncpa [#allocation12 + $0x1], 0 }
  0x14   :  { %33 = vsyncpa [#allocation15], 0 }
  0x15   :  { %35 = vsyncpa [#allocation15 + $0x1], 0 }
  0x16   :  { %36 = vsyncpa [#allocation18], 0 }
  0x17   :  { %38 = vsyncpa [#allocation18 + $0x1], 0 }
  0x18   :  { %39 = vsyncpa [#allocation21], 0 }
  0x19   :  { %41 = vsyncpa [#allocation21 + $0x1], 0 }
  0x1a   :  { %42 = vsyncpa [#allocation24], 0 }
  0x1b   :  { %44 = vsyncpa [#allocation24 + $0x1], 0 }
  0x1c   :  { %45 = vsyncpa [#allocation27], 0 }
  0x1d   :  { %47 = vsyncpa [#allocation27 + $0x1], 0  ;;  %s8109_s0 = smov 0   ;;  %s8111_s30 = smov 0  }
  0x1e   :  { %s8113_s20 = smov 0   ;;  %s8115_s21 = smov 0  }
  0x1f LB: > { %11968 = sst [smem:[#allocation36_spill]] %s7971_s20  ;;  %s8128_s1 = sadd.s32 4294967295, %s7975_s21   ;;  %s7975_s21 = sphi %s8115_s21, %s12064_s21   ;;  %s7971_s20 = sphi %s8113_s20, %s12066_s20   ;;  %s7967_s30 = sphi %s8111_s30, %s12068_s30   ;;  %s7963_s0 = sphi %s8109_s0, %s12067_s0  }
  0x20   : > { %11969 = sst [smem:[#allocation37_spill]] %s8128_s1  ;;  %s8131_s22 = sadd.s32 1, %s7975_s21  }
  0x21   : > { %11970 = sst [smem:[#allocation38_spill]] %s8131_s22  ;;  %s109_s2 = ssub.s32 %s7975_s21, %s8131_s22 }
  0x22   : > { %s112_s23 = sadd.s32 1, %s7971_s20  ;;  %p110_p0 = scmp.eq.s32.totalorder %s109_s2, 0 }
  0x23   : > { %p119_p1 = scmp.ne.s32.totalorder %s7971_s20, %s7967_s30  ;;  %p120_p2 = scmp.eq.s32.totalorder %s7975_s21, 0 }
  0x24   : > { %p125_p3 = scmp.ne.s32.totalorder %s7967_s30, %s7963_s0  ;;  %p126_p5 = scmp.eq.s32.totalorder %s8128_s1, 0 }
  0x25   : > { %s8141_s24 = scalar_select %p110_p0, %s7971_s20, %s112_s23  }
  0x26   : > { %p121_p4 = por %p120_p2, %p119_p1  ;;  %p7433_p6 = scmp.lt.s32.totalorder %s7975_s21, 2 }
  0x27   : > { %11971 = sst [smem:[#allocation39_spill]] %s8141_s24  ;;  %p8145_p7 = por %p126_p5, %p125_p3 }
  0x28   : > { %s8150_s3 = sand.u32 1, %s7971_s20   ;;  %s8153_s26 = sshll.u32 %s7975_s21, 4 }
  0x29   : > { %s11972_s25 = scalar_select %p8145_p7, 1, 0 }
  0x2a   : > { %p8155_p8 = pnand %p7433_p6, %p121_p4  ;;  %s8160_s28 = sand.u32 1, %s7975_s21  }
  0x2b   : > { %11973 = sst [smem:[#allocation40_spill]] %s11972_s25  ;;  %s11975_s2 = sld [smem:[#allocation57_spill]] }
  0x2c   : > { %s11974_s27 = scalar_select %p8155_p8, 1, 0 }
  0x2d   : > { %s626_s24 = scalar_lea.vmem [#allocation8], %s8150_s3  ;;  %p8177_p11 = pneg %p8155_p8 }
  0x2e   : > { %s633_s20 = sshll.u32 %s626_s24, 4  ;;  %s8169_s20 = int_to_ptr.vmem [resolvable:$true] %s633_s20 }
  0x31   : > { %s8166_s23 = scalar_lea.hbm %s11975_s2, %s8153_s26  ;;  %s7498_s9 = scalar_lea.hbm %s11975_s2, 32 }
  0x32   : > { %s7493_s19 = scalar_lea.hbm %s8166_s23, 16  ;;  %p7499_p0 = scmp.lt.u32.totalorder %s8166_s23, %s11975_s2 }
  0x33   : > { %p7494_p10 = scmp.ne.s32.totalorder %s8166_s23, %s7493_s19  ;;  %p7500_p1 = scmp.lt.u32.totalorder %s7498_s9, %s7493_s19 }
  0x34   : > { %p7502_p3 = scmp.lt.u32.totalorder %s7493_s19, %s8166_s23 }
  0x35   : > { %p7496_p12 = pnand %p8177_p11, %p7494_p10  ;;  %p7501_p2 = por %p7500_p1, %p7499_p0 }
  0x37   : > { %p7497_p13 = pneg %p7496_p12  ;;  %p7503_p4 = por %p7502_p3, %p7501_p2 }
  0x39   : > { %p7504_p5 = pnand %p7503_p4, %p7497_p13 }
  0x3b   : > { %7507 = shalt.err (!%p7504_p5)
}
  0x3c   : > { %s7508_s22 = scalar_lea.vmem %s8169_s20, 16  ;;  %s7977_s29 = smov [#allocation8]  }
  0x3d   : > { %p7509_p6 = scmp.ne.s32.totalorder %s8169_s20, %s7508_s22  ;;  %s7513_s0 = sshll.u32 %s7977_s29, 4  ;;  %s7514_s0 = int_to_ptr.vmem [resolvable:$false] %s7513_s0 }
  0x3e   : > { %s7515_s5 = scalar_lea.vmem %s7514_s0, 32  ;;  %p7516_p9 = scmp.lt.s32.totalorder %s8169_s20, %s7514_s0 }
  0x3f   : > { %p7511_p10 = pnand %p7509_p6, %p8177_p11  ;;  %p7517_p7 = scmp.lt.s32.totalorder %s7515_s5, %s7508_s22 }
  0x41   : > { %p7512_p12 = pneg %p7511_p10  ;;  %p7518_p0 = por %p7517_p7, %p7516_p9 }
  0x43   : > { %p7519_p1 = pnand %p7518_p0, %p7512_p12 }
  0x45   : > { %7522 = shalt.err (!%p7519_p1)
}
  0x46   : > { %s11977_s9 = scalar_lea.sflag [#allocation9], %s8160_s28  ;;  %p872_p13 = scmp.lt.s32.totalorder %s7975_s21, 3 }
  0x47   : > { %7396 = dma.hbm_to_vmem [thread:$0]  (!%p8155_p8), %s8166_s23, 16, %s8169_s20, %s11977_s9  }
  0x48   : > { %s11978_s6 = sld [smem:[#allocation59_spill]]  ;;  %p11979_p7 = scmp.ge.s32.totalorder %s7975_s21, 1 }
  0x49   : > { %s668_s0 = scalar_lea.vmem [#allocation11], %s8150_s3 }
  0x4a   : > { %p8211_p9 = pnand %p11979_p7, %p872_p13  ;;  %s675_s5 = sshll.u32 %s668_s0, 4  ;;  %s676_s5 = int_to_ptr.vmem [resolvable:$true] %s675_s5 }
  0x4c   : > { %s11980_s29 = scalar_select %p8211_p9, 1, 0 }
  0x4e   : > { %s8207_s22 = scalar_lea.hbm %s11978_s6, %s8153_s26  ;;  %s7528_s19 = scalar_lea.hbm %s11978_s6, 32 }
  0x4f   : > { %s7523_s20 = scalar_lea.hbm %s8207_s22, 16  ;;  %p7529_p5 = scmp.lt.u32.totalorder %s8207_s22, %s11978_s6 }
  0x50   : > { %p7524_p2 = scmp.ne.s32.totalorder %s8207_s22, %s7523_s20  ;;  %p7530_p6 = scmp.lt.u32.totalorder %s7528_s19, %s7523_s20 }
  0x51   : > { %p7532_p12 = scmp.lt.u32.totalorder %s7523_s20, %s8207_s22 }
  0x52   : > { %p7526_p3 = pnand %p7524_p2, %p8177_p11  ;;  %p7531_p10 = por %p7530_p6, %p7529_p5 }
  0x54   : > { %p7527_p4 = pneg %p7526_p3  ;;  %p7533_p0 = por %p7532_p12, %p7531_p10 }
  0x56   : > { %p7534_p1 = pnand %p7533_p0, %p7527_p4 }
  0x58   : > { %7537 = shalt.err (!%p7534_p1)
}
  0x59   : > { %s7538_s0 = scalar_lea.vmem %s676_s5, 16  ;;  %s7978_s2 = smov [#allocation11]  }
  0x5a   : > { %p7539_p13 = scmp.ne.s32.totalorder %s676_s5, %s7538_s0  ;;  %s7543_s25 = sshll.u32 %s7978_s2, 4  ;;  %s7544_s25 = int_to_ptr.vmem [resolvable:$false] %s7543_s25 }
  0x5b   : > { %s7545_s23 = scalar_lea.vmem %s7544_s25, 32  ;;  %p7546_p3 = scmp.lt.s32.totalorder %s676_s5, %s7544_s25 }
  0x5c   : > { %p7541_p7 = pnand %p7539_p13, %p8177_p11  ;;  %p7547_p9 = scmp.lt.s32.totalorder %s7545_s23, %s7538_s0 }
  0x5e   : > { %p7542_p2 = pneg %p7541_p7  ;;  %p7548_p8 = por %p7547_p9, %p7546_p3 }
  0x60   : > { %p7549_p5 = pnand %p7548_p8, %p7542_p2 }
  0x62   : > { %7552 = shalt.err (!%p7549_p5)
}
  0x63   : > { %p11981_p6 = scmp.ne.s32.totalorder %s11974_s27, 0  ;;  %s11982_s1 = scalar_lea.sflag [#allocation12], %s8160_s28 }
  0x64   : > { %s11983_s8 = sld [smem:[#allocation60_spill]]  ;;  %s702_s25 = scalar_lea.vmem [#allocation14], %s8150_s3 }
  0x65   : > { %7402 = dma.hbm_to_vmem [thread:$0]  (!%p11981_p6), %s8207_s22, 16, %s676_s5, %s11982_s1  }
  0x66   : > { %s709_s19 = sshll.u32 %s702_s25, 4  ;;  %s710_s19 = int_to_ptr.vmem [resolvable:$true] %s709_s19 }
  0x6a   : > { %s8240_s2 = scalar_lea.hbm %s11983_s8, %s8153_s26  ;;  %s7558_s5 = scalar_lea.hbm %s11983_s8, 32 }
  0x6b   : > { %s7553_s0 = scalar_lea.hbm %s8240_s2, 16  ;;  %p7559_p10 = scmp.lt.u32.totalorder %s8240_s2, %s11983_s8 }
  0x6c   : > { %p7554_p8 = scmp.ne.s32.totalorder %s8240_s2, %s7553_s0  ;;  %p7560_p12 = scmp.lt.u32.totalorder %s7558_s5, %s7553_s0 }
  0x6d   : > { %p7562_p1 = scmp.lt.u32.totalorder %s7553_s0, %s8240_s2 }
  0x6e   : > { %p7556_p9 = pnand %p7554_p8, %p8177_p11  ;;  %p7561_p0 = por %p7560_p12, %p7559_p10 }
  0x70   : > { %p7557_p4 = pneg %p7556_p9  ;;  %p7563_p13 = por %p7562_p1, %p7561_p0 }
  0x72   : > { %p7564_p7 = pnand %p7563_p13, %p7557_p4 }
  0x74   : > { %7567 = shalt.err (!%p7564_p7)
}
  0x75   : > { %s7568_s9 = scalar_lea.vmem %s710_s19, 16  ;;  %s7979_s25 = smov [#allocation14]  }
  0x76   : > { %p7569_p2 = scmp.ne.s32.totalorder %s710_s19, %s7568_s9  ;;  %s7573_s24 = sshll.u32 %s7979_s25, 4  ;;  %s7574_s24 = int_to_ptr.vmem [resolvable:$false] %s7573_s24 }
  0x77   : > { %s7575_s23 = scalar_lea.vmem %s7574_s24, 32  ;;  %p7576_p8 = scmp.lt.s32.totalorder %s710_s19, %s7574_s24 }
  0x78   : > { %p7571_p3 = pnand %p7569_p2, %p8177_p11  ;;  %p7577_p9 = scmp.lt.s32.totalorder %s7575_s23, %s7568_s9 }
  0x7a   : > { %p7572_p5 = pneg %p7571_p3  ;;  %p7578_p6 = por %p7577_p9, %p7576_p8 }
  0x7c   : > { %p7579_p10 = pnand %p7578_p6, %p7572_p5 }
  0x7e   : > { %7582 = shalt.err (!%p7579_p10)
}
  0x7f   : > { %p11984_p12 = scmp.ne.s32.totalorder %s11974_s27, 0  ;;  %s11985_s0 = scalar_lea.sflag [#allocation15], %s8160_s28 }
  0x80   : > { %s11986_s11 = sld [smem:[#allocation62_spill]]  ;;  %s744_s24 = scalar_lea.vmem [#allocation17], %s8150_s3 }
  0x81   : > { %7408 = dma.hbm_to_vmem [thread:$0]  (!%p11984_p12), %s8240_s2, 16, %s710_s19, %s11985_s0  }
  0x82   : > { %s751_s20 = sshll.u32 %s744_s24, 4  ;;  %s752_s20 = int_to_ptr.vmem [resolvable:$true] %s751_s20 }
  0x86   : > { %s8267_s1 = scalar_lea.hbm %s11986_s11, %s8153_s26  ;;  %s7588_s19 = scalar_lea.hbm %s11986_s11, 32 }
  0x87   : > { %s7583_s25 = scalar_lea.hbm %s8267_s1, 16  ;;  %p7589_p1 = scmp.lt.u32.totalorder %s8267_s1, %s11986_s11 }
  0x88   : > { %p7584_p6 = scmp.ne.s32.totalorder %s8267_s1, %s7583_s25  ;;  %p7590_p13 = scmp.lt.u32.totalorder %s7588_s19, %s7583_s25 }
  0x89   : > { %p7592_p2 = scmp.lt.u32.totalorder %s7583_s25, %s8267_s1 }
  0x8a   : > { %p7586_p4 = pnand %p7584_p6, %p8177_p11  ;;  %p7591_p7 = por %p7590_p13, %p7589_p1 }
  0x8c   : > { %p7587_p0 = pneg %p7586_p4  ;;  %p7593_p3 = por %p7592_p2, %p7591_p7 }
  0x8e   : > { %p7594_p5 = pnand %p7593_p3, %p7587_p0 }
  0x90   : > { %7597 = shalt.err (!%p7594_p5)
}
  0x91   : > { %s7598_s5 = scalar_lea.vmem %s752_s20, 16  ;;  %s7980_s24 = smov [#allocation17]  }
  0x92   : > { %p7599_p8 = scmp.ne.s32.totalorder %s752_s20, %s7598_s5  ;;  %s7603_s9 = sshll.u32 %s7980_s24, 4  ;;  %s7604_s9 = int_to_ptr.vmem [resolvable:$false] %s7603_s9 }
  0x93   : > { %s7605_s23 = scalar_lea.vmem %s7604_s9, 32  ;;  %p7606_p6 = scmp.lt.s32.totalorder %s752_s20, %s7604_s9 }
  0x94   : > { %p7601_p9 = pnand %p7599_p8, %p8177_p11  ;;  %p7607_p4 = scmp.lt.s32.totalorder %s7605_s23, %s7598_s5 }
  0x96   : > { %p7602_p10 = pneg %p7601_p9  ;;  %p7608_p12 = por %p7607_p4, %p7606_p6 }
  0x98   : > { %p7609_p1 = pnand %p7608_p12, %p7602_p10 }
  0x9a   : > { %7612 = shalt.err (!%p7609_p1)
}
  0x9b   : > { %p11987_p13 = scmp.ne.s32.totalorder %s11974_s27, 0  ;;  %s11988_s25 = scalar_lea.sflag [#allocation18], %s8160_s28 }
  0x9c   : > { %s11989_s14 = sld [smem:[#allocation64_spill]]  ;;  %s786_s9 = scalar_lea.vmem [#allocation20], %s8150_s3 }
  0x9d   : > { %7414 = dma.hbm_to_vmem [thread:$0]  (!%p11987_p13), %s8267_s1, 16, %s752_s20, %s11988_s25  }
  0x9e   : > { %s793_s22 = sshll.u32 %s786_s9, 4  ;;  %s794_s22 = int_to_ptr.vmem [resolvable:$true] %s793_s22 }
  0xa2   : > { %s8294_s0 = scalar_lea.hbm %s11989_s14, %s8153_s26  ;;  %s7618_s20 = scalar_lea.hbm %s11989_s14, 32 }
  0xa3   : > { %s7613_s24 = scalar_lea.hbm %s8294_s0, 16  ;;  %p7619_p2 = scmp.lt.u32.totalorder %s8294_s0, %s11989_s14 }
  0xa4   : > { %p7614_p12 = scmp.ne.s32.totalorder %s8294_s0, %s7613_s24  ;;  %p7620_p3 = scmp.lt.u32.totalorder %s7618_s20, %s7613_s24 }
  0xa5   : > { %p7622_p8 = scmp.lt.u32.totalorder %s7613_s24, %s8294_s0 }
  0xa6   : > { %p7616_p0 = pnand %p7614_p12, %p8177_p11  ;;  %p7621_p5 = por %p7620_p3, %p7619_p2 }
  0xa8   : > { %p7617_p7 = pneg %p7616_p0  ;;  %p7623_p9 = por %p7622_p8, %p7621_p5 }
  0xaa   : > { %p7624_p10 = pnand %p7623_p9, %p7617_p7 }
  0xac   : > { %7627 = shalt.err (!%p7624_p10)
}
  0xad   : > { %s7628_s19 = scalar_lea.vmem %s794_s22, 16  ;;  %s7981_s9 = smov [#allocation20]  }
  0xae   : > { %p7629_p6 = scmp.ne.s32.totalorder %s794_s22, %s7628_s19  ;;  %s7633_s5 = sshll.u32 %s7981_s9, 4  ;;  %s7634_s5 = int_to_ptr.vmem [resolvable:$false] %s7633_s5 }
  0xaf   : > { %s7635_s23 = scalar_lea.vmem %s7634_s5, 32  ;;  %p7636_p12 = scmp.lt.s32.totalorder %s794_s22, %s7634_s5 }
  0xb0   : > { %p7631_p4 = pnand %p7629_p6, %p8177_p11  ;;  %p7637_p0 = scmp.lt.s32.totalorder %s7635_s23, %s7628_s19 }
  0xb2   : > { %p7632_p1 = pneg %p7631_p4  ;;  %p7638_p13 = por %p7637_p0, %p7636_p12 }
  0xb4   : > { %p7639_p2 = pnand %p7638_p13, %p7632_p1 }
  0xb6   : > { %7642 = shalt.err (!%p7639_p2)
}
  0xb7   : > { %p11990_p3 = scmp.ne.s32.totalorder %s11974_s27, 0  ;;  %s11991_s24 = scalar_lea.sflag [#allocation21], %s8160_s28 }
  0xb8   : > { %s11992_s16 = sld [smem:[#allocation65_spill]]  ;;  %s820_s5 = scalar_lea.vmem [#allocation23], %s8150_s3 }
  0xb9   : > { %7420 = dma.hbm_to_vmem [thread:$0]  (!%p11990_p3), %s8294_s0, 16, %s794_s22, %s11991_s24  }
  0xba   : > { %s827_s2 = sshll.u32 %s820_s5, 4  ;;  %s828_s2 = int_to_ptr.vmem [resolvable:$true] %s827_s2 }
  0xbe   : > { %s8321_s25 = scalar_lea.hbm %s11992_s16, %s8153_s26  ;;  %s7648_s22 = scalar_lea.hbm %s11992_s16, 32 }
  0xbf   : > { %s7643_s9 = scalar_lea.hbm %s8321_s25, 16  ;;  %p7649_p8 = scmp.lt.u32.totalorder %s8321_s25, %s11992_s16 }
  0xc0   : > { %p7644_p13 = scmp.ne.s32.totalorder %s8321_s25, %s7643_s9  ;;  %p7650_p9 = scmp.lt.u32.totalorder %s7648_s22, %s7643_s9 }
  0xc1   : > { %p7652_p6 = scmp.lt.u32.totalorder %s7643_s9, %s8321_s25 }
  0xc2   : > { %p7646_p7 = pnand %p7644_p13, %p8177_p11  ;;  %p7651_p10 = por %p7650_p9, %p7649_p8 }
  0xc4   : > { %p7647_p5 = pneg %p7646_p7  ;;  %p7653_p4 = por %p7652_p6, %p7651_p10 }
  0xc6   : > { %p7654_p1 = pnand %p7653_p4, %p7647_p5 }
  0xc8   : > { %7657 = shalt.err (!%p7654_p1)
}
  0xc9   : > { %s7658_s20 = scalar_lea.vmem %s828_s2, 16  ;;  %s7982_s5 = smov [#allocation23]  }
  0xca   : > { %p7659_p12 = scmp.ne.s32.totalorder %s828_s2, %s7658_s20  ;;  %s7663_s19 = sshll.u32 %s7982_s5, 4  ;;  %s7664_s19 = int_to_ptr.vmem [resolvable:$false] %s7663_s19 }
  0xcb   : > { %s7665_s23 = scalar_lea.vmem %s7664_s19, 32  ;;  %p7666_p13 = scmp.lt.s32.totalorder %s828_s2, %s7664_s19 }
  0xcc   : > { %p7661_p0 = pnand %p7659_p12, %p8177_p11  ;;  %p7667_p7 = scmp.lt.s32.totalorder %s7665_s23, %s7658_s20 }
  0xce   : > { %p7662_p2 = pneg %p7661_p0  ;;  %p7668_p3 = por %p7667_p7, %p7666_p13 }
  0xd0   : > { %p7669_p8 = pnand %p7668_p3, %p7662_p2 }
  0xd2   : > { %7672 = shalt.err (!%p7669_p8)
}
  0xd3   : > { %p11993_p9 = scmp.ne.s32.totalorder %s11974_s27, 0  ;;  %s11994_s9 = scalar_lea.sflag [#allocation24], %s8160_s28 }
  0xd4   : > { %s11995_s24 = sld [smem:[#allocation56_spill]]  ;;  %s609_s19 = scalar_lea.vmem [#allocation6], %s8150_s3 }
  0xd5   : > { %7426 = dma.hbm_to_vmem [thread:$0]  (!%p11993_p9), %s8321_s25, 16, %s828_s2, %s11994_s9  }
  0xd6   : > { %s616_s20 = sshll.u32 %s609_s19, 4  ;;  %s8357_s6 = scalar_lea.hbm %s11897_s4, %s8153_s26  ;;  %s8351_s20 = int_to_ptr.vmem [resolvable:$true] %s616_s20 }
  0xd7   : > { %s607_s8 = scalar_lea.sflag [#allocation7], %s8150_s3 }
  0xda   : > { %s8348_s1 = scalar_lea.hbm %s11995_s24, %s8153_s26  ;;  %s7678_s0 = scalar_lea.hbm %s11995_s24, 32 }
  0xdb   : > { %s7673_s25 = scalar_lea.hbm %s8348_s1, 16  ;;  %p7679_p6 = scmp.lt.u32.totalorder %s8348_s1, %s11995_s24 }
  0xdc   : > { %p7674_p3 = scmp.ne.s32.totalorder %s8348_s1, %s7673_s25  ;;  %p7680_p4 = scmp.lt.u32.totalorder %s7678_s0, %s7673_s25 }
  0xdd   : > { %p7682_p12 = scmp.lt.u32.totalorder %s7673_s25, %s8348_s1 }
  0xde   : > { %p7676_p5 = pnand %p7674_p3, %p8177_p11  ;;  %p7681_p1 = por %p7680_p4, %p7679_p6 }
  0xe0   : > { %p7677_p10 = pneg %p7676_p5  ;;  %p7683_p0 = por %p7682_p12, %p7681_p1 }
  0xe2   : > { %p7684_p2 = pnand %p7683_p0, %p7677_p10 }
  0xe4   : > { %7687 = shalt.err (!%p7684_p2)
}
  0xe5   : > { %s7688_s19 = scalar_lea.vmem %s8351_s20, 16  ;;  %s7983_s5 = smov [#allocation6]  }
  0xe6   : > { %p7689_p13 = scmp.ne.s32.totalorder %s8351_s20, %s7688_s19  ;;  %s7693_s23 = sshll.u32 %s7983_s5, 4  ;;  %s7694_s23 = int_to_ptr.vmem [resolvable:$false] %s7693_s23 }
  0xe7   : > { %s7695_s11 = scalar_lea.vmem %s7694_s23, 32  ;;  %p7696_p3 = scmp.lt.s32.totalorder %s8351_s20, %s7694_s23 }
  0xe8   : > { %p7691_p7 = pnand %p7689_p13, %p8177_p11  ;;  %p7697_p5 = scmp.lt.s32.totalorder %s7695_s11, %s7688_s19 }
  0xea   : > { %p7692_p8 = pneg %p7691_p7  ;;  %p7698_p6 = por %p7697_p5, %p7696_p3 }
  0xec   : > { %p7699_p4 = pnand %p7698_p6, %p7692_p8 }
  0xee   : > { %7702 = shalt.err (!%p7699_p4)
}
  0xef   : > { %7393 = dma.hbm_to_vmem [thread:$0]  (!%p11993_p9), %s8348_s1, 16, %s8351_s20, %s607_s8  }
  0xf0   : > { %s643_s25 = scalar_lea.vmem [#allocation10], %s8150_s3  ;;  %s8386_s22 = scalar_lea.hbm %s11900_s7, %s8153_s26 }
  0xf1   : > { %s650_s2 = sshll.u32 %s643_s25, 4  ;;  %s7703_s19 = scalar_lea.hbm %s8357_s6, 16  ;;  %s651_s2 = int_to_ptr.vmem [resolvable:$true] %s650_s2 }
  0xf2   : > { %p7704_p10 = scmp.ne.s32.totalorder %s8357_s6, %s7703_s19  ;;  %s7708_s11 = scalar_lea.hbm %s11897_s4, 32 }
  0xf3   : > { %p7709_p0 = scmp.lt.u32.totalorder %s8357_s6, %s11897_s4  ;;  %p7710_p2 = scmp.lt.u32.totalorder %s7708_s11, %s7703_s19 }
  0xf4   : > { %p7706_p1 = pnand %p7704_p10, %p8177_p11  ;;  %p7712_p7 = scmp.lt.u32.totalorder %s7703_s19, %s8357_s6 }
  0xf5   : > { %p7711_p13 = por %p7710_p2, %p7709_p0 }
  0xf6   : > { %p7707_p12 = pneg %p7706_p1 }
  0xf7   : > { %p7713_p8 = por %p7712_p7, %p7711_p13 }
  0xf9   : > { %p7714_p3 = pnand %p7713_p8, %p7707_p12 }
  0xfb   : > { %7717 = shalt.err (!%p7714_p3)
}
  0xfc   : > { %s7718_s8 = scalar_lea.vmem %s651_s2, 16  ;;  %s7984_s1 = smov [#allocation10]  }
  0xfd   : > { %p7719_p5 = scmp.ne.s32.totalorder %s651_s2, %s7718_s8  ;;  %s7723_s20 = sshll.u32 %s7984_s1, 4  ;;  %s7724_s20 = int_to_ptr.vmem [resolvable:$false] %s7723_s20 }
  0xfe   : > { %s7725_s25 = scalar_lea.vmem %s7724_s20, 32  ;;  %p7726_p10 = scmp.lt.s32.totalorder %s651_s2, %s7724_s20 }
  0xff   : > { %p7721_p6 = pnand %p7719_p5, %p8177_p11  ;;  %p7727_p1 = scmp.lt.s32.totalorder %s7725_s25, %s7718_s8 }
 0x101   : > { %p7722_p4 = pneg %p7721_p6  ;;  %p7728_p9 = por %p7727_p1, %p7726_p10 }
 0x103   : > { %p7729_p0 = pnand %p7728_p9, %p7722_p4 }
 0x105   : > { %7732 = shalt.err (!%p7729_p0)
}
 0x106   : > { %p11996_p2 = scmp.ne.s32.totalorder %s11974_s27, 0  ;;  %s11997_s14 = scalar_lea.sflag [#allocation9], %s8160_s28 }
 0x107   : > { %s685_s16 = scalar_lea.vmem [#allocation13], %s8150_s3  ;;  %s8412_s5 = scalar_lea.hbm %s11903_s10, %s8153_s26 }
 0x108   : > { %7399 = dma.hbm_to_vmem [thread:$0]  (!%p11996_p2), %s8357_s6, 16, %s651_s2, %s11997_s14  }
 0x109   : > { %s692_s9 = sshll.u32 %s685_s16, 4  ;;  %s7733_s23 = scalar_lea.hbm %s8386_s22, 16  ;;  %s693_s9 = int_to_ptr.vmem [resolvable:$true] %s692_s9 }
 0x10a   : > { %p7734_p9 = scmp.ne.s32.totalorder %s8386_s22, %s7733_s23  ;;  %s7738_s1 = scalar_lea.hbm %s11900_s7, 32 }
 0x10b   : > { %p7739_p7 = scmp.lt.u32.totalorder %s8386_s22, %s11900_s7  ;;  %p7740_p8 = scmp.lt.u32.totalorder %s7738_s1, %s7733_s23 }
 0x10c   : > { %p7736_p12 = pnand %p7734_p9, %p8177_p11  ;;  %p7742_p5 = scmp.lt.u32.totalorder %s7733_s23, %s8386_s22 }
 0x10d   : > { %p7741_p3 = por %p7740_p8, %p7739_p7 }
 0x10e   : > { %p7737_p13 = pneg %p7736_p12 }
 0x10f   : > { %p7743_p6 = por %p7742_p5, %p7741_p3 }
 0x111   : > { %p7744_p4 = pnand %p7743_p6, %p7737_p13 }
 0x113   : > { %7747 = shalt.err (!%p7744_p4)
}
 0x114   : > { %s7748_s6 = scalar_lea.vmem %s693_s9, 16  ;;  %s7985_s2 = smov [#allocation13]  }
 0x115   : > { %p7749_p10 = scmp.ne.s32.totalorder %s693_s9, %s7748_s6  ;;  %s7753_s14 = sshll.u32 %s7985_s2, 4  ;;  %s7754_s14 = int_to_ptr.vmem [resolvable:$false] %s7753_s14 }
 0x116   : > { %s7755_s16 = scalar_lea.vmem %s7754_s14, 32  ;;  %p7756_p9 = scmp.lt.s32.totalorder %s693_s9, %s7754_s14 }
 0x117   : > { %p7751_p1 = pnand %p7749_p10, %p8177_p11  ;;  %p7757_p12 = scmp.lt.s32.totalorder %s7755_s16, %s7748_s6 }
 0x119   : > { %p7752_p0 = pneg %p7751_p1  ;;  %p7758_p2 = por %p7757_p12, %p7756_p9 }
 0x11b   : > { %p7759_p7 = pnand %p7758_p2, %p7752_p0 }
 0x11d   : > { %7762 = shalt.err (!%p7759_p7)
}
 0x11e   : > { %p11998_p8 = scmp.ne.s32.totalorder %s11974_s27, 0  ;;  %s11999_s0 = scalar_lea.sflag [#allocation12], %s8160_s28 }
 0x11f   : > { %s727_s19 = scalar_lea.vmem [#allocation16], %s8150_s3  ;;  %s8438_s1 = scalar_lea.hbm %s11905_s12, %s8153_s26 }
 0x120   : > { %7405 = dma.hbm_to_vmem [thread:$0]  (!%p11998_p8), %s8386_s22, 16, %s693_s9, %s11999_s0  }
 0x121   : > { %s734_s23 = sshll.u32 %s727_s19, 4  ;;  %s7763_s20 = scalar_lea.hbm %s8412_s5, 16  ;;  %s735_s23 = int_to_ptr.vmem [resolvable:$true] %s734_s23 }
 0x122   : > { %p7764_p2 = scmp.ne.s32.totalorder %s8412_s5, %s7763_s20  ;;  %s7768_s2 = scalar_lea.hbm %s11903_s10, 32 }
 0x123   : > { %p7769_p5 = scmp.lt.u32.totalorder %s8412_s5, %s11903_s10  ;;  %p7770_p6 = scmp.lt.u32.totalorder %s7768_s2, %s7763_s20 }
 0x124   : > { %p7766_p13 = pnand %p7764_p2, %p8177_p11  ;;  %p7772_p10 = scmp.lt.u32.totalorder %s7763_s20, %s8412_s5 }
 0x125   : > { %p7771_p4 = por %p7770_p6, %p7769_p5 }
 0x126   : > { %p7767_p3 = pneg %p7766_p13 }
 0x127   : > { %p7773_p1 = por %p7772_p10, %p7771_p4 }
 0x129   : > { %p7774_p0 = pnand %p7773_p1, %p7767_p3 }
 0x12b   : > { %7777 = shalt.err (!%p7774_p0)
}
 0x12c   : > { %s7778_s22 = scalar_lea.vmem %s735_s23, 16  ;;  %s7986_s9 = smov [#allocation16]  }
 0x12d   : > { %p7779_p9 = scmp.ne.s32.totalorder %s735_s23, %s7778_s22  ;;  %s7783_s0 = sshll.u32 %s7986_s9, 4  ;;  %s7784_s0 = int_to_ptr.vmem [resolvable:$false] %s7783_s0 }
 0x12e   : > { %s7785_s19 = scalar_lea.vmem %s7784_s0, 32  ;;  %p7786_p2 = scmp.lt.s32.totalorder %s735_s23, %s7784_s0 }
 0x12f   : > { %p7781_p12 = pnand %p7779_p9, %p8177_p11  ;;  %p7787_p13 = scmp.lt.s32.totalorder %s7785_s19, %s7778_s22 }
 0x131   : > { %p7782_p7 = pneg %p7781_p12  ;;  %p7788_p8 = por %p7787_p13, %p7786_p2 }
 0x133   : > { %p7789_p5 = pnand %p7788_p8, %p7782_p7 }
 0x135   : > { %7792 = shalt.err (!%p7789_p5)
}
 0x136   : > { %p12000_p6 = scmp.ne.s32.totalorder %s11974_s27, 0  ;;  %s12001_s11 = scalar_lea.sflag [#allocation15], %s8160_s28 }
 0x137   : > { %s761_s8 = scalar_lea.vmem [#allocation19], %s8150_s3  ;;  %s8464_s2 = scalar_lea.hbm %s11908_s15, %s8153_s26 }
 0x138   : > { %7411 = dma.hbm_to_vmem [thread:$0]  (!%p12000_p6), %s8412_s5, 16, %s735_s23, %s12001_s11  }
 0x139   : > { %s768_s20 = sshll.u32 %s761_s8, 4  ;;  %s7793_s14 = scalar_lea.hbm %s8438_s1, 16  ;;  %s769_s20 = int_to_ptr.vmem [resolvable:$true] %s768_s20 }
 0x13a   : > { %p7794_p8 = scmp.ne.s32.totalorder %s8438_s1, %s7793_s14  ;;  %s7798_s9 = scalar_lea.hbm %s11905_s12, 32 }
 0x13b   : > { %p7799_p10 = scmp.lt.u32.totalorder %s8438_s1, %s11905_s12  ;;  %p7800_p1 = scmp.lt.u32.totalorder %s7798_s9, %s7793_s14 }
 0x13c   : > { %p7796_p3 = pnand %p7794_p8, %p8177_p11  ;;  %p7802_p9 = scmp.lt.u32.totalorder %s7793_s14, %s8438_s1 }
 0x13d   : > { %p7801_p0 = por %p7800_p1, %p7799_p10 }
 0x13e   : > { %p7797_p4 = pneg %p7796_p3 }
 0x13f   : > { %p7803_p12 = por %p7802_p9, %p7801_p0 }
 0x141   : > { %p7804_p7 = pnand %p7803_p12, %p7797_p4 }
 0x143   : > { %7807 = shalt.err (!%p7804_p7)
}
 0x144   : > { %s7808_s26 = scalar_lea.vmem %s769_s20, 16  ;;  %s7987_s5 = smov [#allocation19]  }
 0x145   : > { %p7809_p2 = scmp.ne.s32.totalorder %s769_s20, %s7808_s26  ;;  %s7813_s23 = sshll.u32 %s7987_s5, 4  ;;  %s7814_s23 = int_to_ptr.vmem [resolvable:$false] %s7813_s23 }
 0x146   : > { %s7815_s11 = scalar_lea.vmem %s7814_s23, 32  ;;  %p7816_p8 = scmp.lt.s32.totalorder %s769_s20, %s7814_s23 }
 0x147   : > { %p7811_p13 = pnand %p7809_p2, %p8177_p11  ;;  %p7817_p3 = scmp.lt.s32.totalorder %s7815_s11, %s7808_s26 }
 0x149   : > { %p7812_p5 = pneg %p7811_p13  ;;  %p7818_p6 = por %p7817_p3, %p7816_p8 }
 0x14b   : > { %p7819_p1 = pnand %p7818_p6, %p7812_p5 }
 0x14d   : > { %7822 = shalt.err (!%p7819_p1)
}
 0x14e   : > { %p12002_p10 = scmp.ne.s32.totalorder %s11974_s27, 0  ;;  %s12003_s8 = scalar_lea.sflag [#allocation18], %s8160_s28 }
 0x14f   : > { %s803_s25 = scalar_lea.vmem [#allocation22], %s8150_s3  ;;  %s7358_s14 = smul.u32 1664, %s8150_s3 }
 0x150   : > { %7417 = dma.hbm_to_vmem [thread:$0]  (!%p12002_p10), %s8438_s1, 16, %s769_s20, %s12003_s8  }
 0x151   : > { %s810_s6 = sshll.u32 %s803_s25, 4  ;;  %s7359_s16 = smul.u32 26624, %s7975_s21  ;;  %s811_s6 = int_to_ptr.vmem [resolvable:$true] %s810_s6 }
 0x152   : > { %s7823_s22 = scalar_lea.hbm %s8464_s2, 16  ;;  %s7828_s19 = scalar_lea.hbm %s11908_s15, 32 }
 0x153   : > { %p7824_p6 = scmp.ne.s32.totalorder %s8464_s2, %s7823_s22  ;;  %p7829_p9 = scmp.lt.u32.totalorder %s8464_s2, %s11908_s15 }
 0x154   : > { %p7830_p12 = scmp.lt.u32.totalorder %s7828_s19, %s7823_s22  ;;  %p7832_p2 = scmp.lt.u32.totalorder %s7823_s22, %s8464_s2 }
 0x155   : > { %p7826_p4 = pnand %p7824_p6, %p8177_p11 }
 0x156   : > { %p7831_p7 = por %p7830_p12, %p7829_p9 }
 0x157   : > { %p7827_p0 = pneg %p7826_p4 }
 0x158   : > { %p7833_p13 = por %p7832_p2, %p7831_p7 }
 0x15a   : > { %p7834_p5 = pnand %p7833_p13, %p7827_p0 }
 0x15c   : > { %7837 = shalt.err (!%p7834_p5)
}
 0x15d   : > { %s7838_s1 = scalar_lea.vmem %s811_s6, 16  ;;  %s7988_s20 = smov [#allocation22]  }
 0x15e   : > { %p7839_p8 = scmp.ne.s32.totalorder %s811_s6, %s7838_s1  ;;  %s7843_s23 = sshll.u32 %s7988_s20, 4  ;;  %s7844_s23 = int_to_ptr.vmem [resolvable:$false] %s7843_s23 }
 0x15f   : > { %s7845_s11 = scalar_lea.vmem %s7844_s23, 32  ;;  %p7846_p6 = scmp.lt.s32.totalorder %s811_s6, %s7844_s23 }
 0x160   : > { %p7841_p3 = pnand %p7839_p8, %p8177_p11  ;;  %p7847_p4 = scmp.lt.s32.totalorder %s7845_s11, %s7838_s1 }
 0x162   : > { %p7842_p1 = pneg %p7841_p3  ;;  %p7848_p10 = por %p7847_p4, %p7846_p6 }
 0x164   : > { %p7849_p9 = pnand %p7848_p10, %p7842_p1 }
 0x166   : > { %7852 = shalt.err (!%p7849_p9)
}
 0x167   : > { %p12004_p12 = scmp.ne.s32.totalorder %s11974_s27, 0  ;;  %s12005_s8 = scalar_lea.sflag [#allocation21], %s8160_s28 }
 0x168   : > { %s8510_s9 = scalar_lea.hbm %s11910_s17, %s7359_s16  ;;  %s838_s0 = scalar_lea.vmem [#allocation25], %s7358_s14 }
 0x169   : > { %7423 = dma.hbm_to_vmem [thread:$0]  (!%p12004_p12), %s8464_s2, 16, %s811_s6, %s12005_s8  }
 0x16a   : > { %s845_s19 = sshll.u32 %s838_s0, 4  ;;  %s7853_s26 = scalar_lea.hbm %s8510_s9, 26624  ;;  %s8514_s19 = int_to_ptr.vmem [resolvable:$true] %s845_s19 }
 0x16b   : > { %p7854_p10 = scmp.ne.s32.totalorder %s8510_s9, %s7853_s26  ;;  %s7858_s5 = scalar_lea.hbm %s11910_s17, 53248 }
 0x16c   : > { %p7859_p2 = scmp.lt.u32.totalorder %s8510_s9, %s11910_s17  ;;  %p7860_p13 = scmp.lt.u32.totalorder %s7858_s5, %s7853_s26 }
 0x16d   : > { %p7856_p0 = pnand %p7854_p10, %p8177_p11  ;;  %p7862_p8 = scmp.lt.u32.totalorder %s7853_s26, %s8510_s9 }
 0x16e   : > { %p7861_p5 = por %p7860_p13, %p7859_p2 }
 0x16f   : > { %p7857_p7 = pneg %p7856_p0 }
 0x170   : > { %p7863_p3 = por %p7862_p8, %p7861_p5 }
 0x172   : > { %p7864_p1 = pnand %p7863_p3, %p7857_p7 }
 0x174   : > { %7867 = shalt.err (!%p7864_p1)
}
 0x175   : > { %s7868_s14 = scalar_lea.vmem %s8514_s19, 26624  ;;  %s7989_s20 = smov [#allocation25]  }
 0x176   : > { %p7869_p6 = scmp.ne.s32.totalorder %s8514_s19, %s7868_s14  ;;  %s7873_s23 = sshll.u32 %s7989_s20, 4  ;;  %s7874_s23 = int_to_ptr.vmem [resolvable:$false] %s7873_s23 }
 0x177   : > { %s7875_s11 = scalar_lea.vmem %s7874_s23, 53248  ;;  %p7876_p10 = scmp.lt.s32.totalorder %s8514_s19, %s7874_s23 }
 0x178   : > { %p7871_p4 = pnand %p7869_p6, %p8177_p11  ;;  %p7877_p0 = scmp.lt.s32.totalorder %s7875_s11, %s7868_s14 }
 0x17a   : > { %p7872_p9 = pneg %p7871_p4  ;;  %p7878_p2 = por %p7877_p0, %p7876_p10 }
 0x17c   : > { %p7879_p13 = pnand %p7878_p2, %p7872_p9 }
 0x17e   : > { %7882 = shalt.err (!%p7879_p13)
}
 0x17f   : > { %s7990_s8 = smov 512   ;;  %s7991_s25 = smov 32  }
 0x180   : > { %s12006_s22 = scalar_lea.sflag [#allocation24], %s8160_s28  ;;  %s6589_s0 = sshll.u32 %s8150_s3, 2 }
 0x181   : > { %7429 = dma.hbm_to_vmem [thread:$0]  (!%p12004_p12), %s8510_s9, 26624, %s8514_s19, %s12006_s22, %s7990_s8, %s7990_s8, %s7991_s25  }
 0x182   : > { %s6703_s26 = sshll.u32 %s7975_s21, 6  ;;  %s859_s16 = scalar_lea.vmem [#allocation26], %s6589_s0 }
 0x183   : > { %s8544_s5 = scalar_lea.hbm %s11911_s18, %s6703_s26  ;;  %s867_s1 = sshll.u32 %s859_s16, 4  ;;  %s868_s1 = int_to_ptr.vmem [resolvable:$true] %s867_s1 }
 0x184   : > { %s856_s14 = scalar_lea.sflag [#allocation27], %s8150_s3  ;;  %s7883_s20 = scalar_lea.hbm %s8544_s5, 64 }
 0x185   : > { %p7884_p7 = scmp.ne.s32.totalorder %s8544_s5, %s7883_s20  ;;  %s7888_s9 = scalar_lea.hbm %s11911_s18, 128 }
 0x186   : > { %p7889_p3 = scmp.lt.u32.totalorder %s8544_s5, %s11911_s18  ;;  %p7890_p1 = scmp.lt.u32.totalorder %s7888_s9, %s7883_s20 }
 0x187   : > { %p7886_p5 = pnand %p7884_p7, %p8177_p11  ;;  %p7892_p4 = scmp.lt.u32.totalorder %s7883_s20, %s8544_s5 }
 0x188   : > { %p7891_p6 = por %p7890_p1, %p7889_p3 }
 0x189   : > { %p7887_p8 = pneg %p7886_p5 }
 0x18a   : > { %p7893_p9 = por %p7892_p4, %p7891_p6 }
 0x18c   : > { %p7894_p10 = pnand %p7893_p9, %p7887_p8 }
 0x18e   : > { %7897 = shalt.err (!%p7894_p10)
}
 0x18f   : > { %s7898_s3 = scalar_lea.vmem %s868_s1, 64  ;;  %s7992_s11 = smov [#allocation26]  }
 0x190   : > { %p7899_p0 = scmp.ne.s32.totalorder %s868_s1, %s7898_s3  ;;  %s7903_s8 = sshll.u32 %s7992_s11, 4  ;;  %s7904_s8 = int_to_ptr.vmem [resolvable:$false] %s7903_s8 }
 0x191   : > { %s7905_s25 = scalar_lea.vmem %s7904_s8, 128  ;;  %p7906_p7 = scmp.lt.s32.totalorder %s868_s1, %s7904_s8 }
 0x192   : > { %p7901_p2 = pnand %p7899_p0, %p8177_p11  ;;  %p7907_p5 = scmp.lt.s32.totalorder %s7905_s25, %s7898_s3 }
 0x194   : > { %p7902_p13 = pneg %p7901_p2  ;;  %p7908_p12 = por %p7907_p5, %p7906_p7 }
 0x196   : > { %p7909_p1 = pnand %p7908_p12, %p7902_p13 }
 0x198   : > { %7912 = shalt.err (!%p7909_p1)
}
 0x199   : > { %p12007_p3 = scmp.ne.s32.totalorder %s11974_s27, 0  ;;  %p12008_p8 = scmp.ne.s32.totalorder %s11980_s29, 0 }
 0x19b   : > { %7432 = dma.hbm_to_vmem [thread:$0]  (!%p12007_p3), %s8544_s5, 64, %s868_s1, %s856_s14  }
 0x19c   : > { %876 = sbr.rel (%p12008_p8) target bundleno = 3469 (0xd8d), region = 96 }
 0x1a3   : > { %s12009_s13 = sld [smem:[#allocation40_spill]]  ;;  %s8567_s22 = sand.u32 1, %s7967_s30  }
 0x1a4   : > { %s879_s0 = scalar_lea.sflag [#allocation7], %s8567_s22  ;;  %s881_s26 = scalar_lea.vmem [#allocation6], %s8567_s22 }
 0x1a9   : > { %p12010_p11 = scmp.ne.s32.totalorder %s12009_s13, 0 }
 0x1ab   : > { %7930 = dma.done.wait (%p12010_p11), %s879_s0, 16  }
 0x1ac   : > { %7932 = vsyncadd (%p12010_p11), %s879_s0, 4294967280  ;;  %s12011_s2 = sld [smem:[#allocation37_spill]]  ;;  %s889_s6 = scalar_lea.vmem [#allocation8], %s8567_s22 }
 0x1b2   : > { %s8576_s27 = sand.u32 1, %s12011_s2  }
 0x1b3   : > { %s887_s29 = scalar_lea.sflag [#allocation9], %s8576_s27 }
 0x1b4   : > { %7934 = dma.done.wait (%p12010_p11), %s887_s29, 32  }
 0x1b5   : > { %7936 = vsyncadd (%p12010_p11), %s887_s29, 4294967264  ;;  %s897_s5 = scalar_lea.vmem [#allocation10], %s8567_s22  ;;  %s903_s16 = scalar_lea.sflag [#allocation12], %s8576_s27 }
 0x1b6   : > { %s905_s1 = scalar_lea.vmem [#allocation11], %s8567_s22 }
 0x1b7   : > { %7938 = dma.done.wait (%p12010_p11), %s903_s16, 32  }
 0x1b8   : > { %7940 = vsyncadd (%p12010_p11), %s903_s16, 4294967264  ;;  %s913_s14 = scalar_lea.vmem [#allocation13], %s8567_s22  ;;  %s919_s20 = scalar_lea.sflag [#allocation15], %s8576_s27 }
 0x1b9   : > { %s921_s28 = scalar_lea.vmem [#allocation14], %s8567_s22 }
 0x1ba   : > { %7942 = dma.done.wait (%p12010_p11), %s919_s20, 32  }
 0x1bb   : > { %7944 = vsyncadd (%p12010_p11), %s919_s20, 4294967264  ;;  %s929_s21 = scalar_lea.vmem [#allocation16], %s8567_s22  ;;  %s935_s9 = scalar_lea.sflag [#allocation18], %s8576_s27 }
 0x1bc   : > { %s937_s19 = scalar_lea.vmem [#allocation17], %s8567_s22 }
 0x1bd   : > { %7946 = dma.done.wait (%p12010_p11), %s935_s9, 32  }
 0x1be   : > { %7948 = vsyncadd (%p12010_p11), %s935_s9, 4294967264  ;;  %s951_s3 = scalar_lea.sflag [#allocation21], %s8576_s27 }
 0x1bf   : > { %7950 = dma.done.wait (%p12010_p11), %s951_s3, 32  }
 0x1c0   : > { %7952 = vsyncadd (%p12010_p11), %s951_s3, 4294967264  ;;  %s967_s25 = scalar_lea.sflag [#allocation24], %s8576_s27 }
 0x1c1   : > { %7954 = dma.done.wait (%p12010_p11), %s967_s25, 26640  }
 0x1c2   : > { %7956 = vsyncadd (%p12010_p11), %s967_s25, 4294940656  ;;  %s7360_s29 = smul.u32 1664, %s8567_s22  ;;  %s6593_s16 = sshll.u32 %s8567_s22, 2 }
 0x1c3   : > { %s984_s9 = scalar_lea.sflag [#allocation27], %s8567_s22  ;;  %s8624_s3 = scalar_lea.vmem [#allocation26], %s6593_s16 }
 0x1c4   : > { %s8621_s20 = scalar_lea.vmem [#allocation25], %s7360_s29 }
 0x1c5   : > { %7958 = dma.done.wait (%p12010_p11), %s984_s9, 64  }
 0x1c6   : > { %7960 = vsyncadd (%p12010_p11), %s984_s9, 4294967232  ;;  %p1119_p12 = scmp.lt.s32.totalorder %s12011_s2, 1  ;;  %s12012_s8 = sld [smem:[#allocation54_spill]]  ;;  %v11928_v2 = vmov 0.0   ;;  %vm11943_vm0 = vmmov 0   ;;  %vm1164_vm1 = vcmask 7168  }
 0x1c7   : > { %6825 = vmatprep.subr.mxu0 %v11928_v2  ;;  %7348 = vmatprep.subr.mxu1 %v11928_v2  ;;  %s7994_s13 = smov 3   ;;  %s7997_s0 = smov 4   ;;  %vm2123_vm2 = vcmask 1044480   ;;  %vm1180_vm3 = vcmask 3072   ;;  %vm1262_vm4 = vcmask 15368   ;;  %vm1360_vm5 = vcmask 23568  }
 0x1c8   : > { %s12070_s2 = smov (!%p1119_p12, %s12011_s2), 1  ;;  %6827 = vmatprep.mubr.msk.f32.mxu0 %vm11943_vm0, %v11928_v2  ;;  %6902 = vmatprep.mubr.msk.f32.mxu1 %vm11943_vm0, %v11928_v2  ;;  %s7998_s16 = smov 2   ;;  %vm1458_vm6 = vcmask 31768   ;;  %vm1556_vm7 = vcmask 39968   ;;  %vm2029_vm8 = vcmask 39936   ;;  %vm1278_vm9 = vcmask 11272  }
 0x1c9   : > { %s6704_s27 = sshll.u32 %s12070_s2, 7  ;;  %s6596_s9 = sshll.u32 %s12070_s2, 3  ;;  %vm1376_vm10 = vcmask 19472   ;;  %vm1474_vm11 = vcmask 27672   ;;  %vm1572_vm12 = vcmask 35872   ;;  %vm2347_vm13 = vcmask 130048  }
 0x1ca   : > { %s12015_s11 = sld [smem:[#allocation55_spill]]  ;;  %vm2969_vm14 = vcmask 125952   ;;  %vm2953_vm15 = vcmask 130052  }
 0x1cc   : > { %s8638_s29 = scalar_lea.vmem %s12012_s8, %s6704_s27  ;;  %s7995_s8 = smov 1  }
 0x1cd   : > { %v8641_v0 = vld [vmem:[%s8638_s29 + $0x3] sm:$0xff]  ;;  %v8677_v7 = vld [vmem:[%s8638_s29 + $0xc] sm:$0xff]  ;;  %v8698_v11 = vld [vmem:[%s8638_s29 + $0x14] sm:$0xff] }
 0x1ce   : > { %v8644_v1 = vld [vmem:[%s8638_s29 + $0x1] sm:$0xff]  ;;  %1410 = vrot.lane.b32.xlu1 %v8641_v0, %s7994_s13  ;;  %v8667_v5 = vld [vmem:[%s8638_s29 + $0xa] sm:$0xff]  ;;  %v8687_v9 = vld [vmem:[%s8638_s29 + $0x12] sm:$0xff] }
 0x1cf   : > { %1214 = vrot.lane.b32.xlu0 %v8644_v1, %s7995_s8  ;;  %v8653_v3 = vld [vmem:[%s8638_s29 + $0x4] sm:$0xff]  ;;  %v8690_v10 = vld [vmem:[%s8638_s29 + $0x11] sm:$0xff]  ;;  %v8716_v14 = vld [vmem:[%s8638_s29 + $0x1a] sm:$0xff] }
 0x1d0   : > { %v8656_v4 = vld [vmem:[%s8638_s29 + $0x2] sm:$0xff]  ;;  %v8680_v8 = vld [vmem:[%s8638_s29 + $0xb] sm:$0xff]  ;;  %12014 = vst [vmem:[#allocation42_spill] sm:$0xff] %v8690_v10  ;;  %v8701_v12 = vld [vmem:[%s8638_s29 + $0x13] sm:$0xff]  ;;  %s1127_s23 = scalar_lea.vmem %s12015_s11, %s6596_s9  ;;  %s12061_s11 = scalar_lea.vmem [#allocation22], %s8567_s22 }
 0x1d1   : > { %v8670_v6 = vld [vmem:[%s8638_s29 + $0x9] sm:$0xff]  ;;  %v8713_v13 = vld [vmem:[%s8638_s29] sm:$0xff]  ;;  %v8732_v19 = vld [vmem:[%s8638_s29 + $0x18] sm:$0xff] }
 0x1d2   : > { %1508 = vrot.lane.b32.xlu1 %v8653_v3, %s7997_s0  ;;  %12013 = vst [vmem:[#allocation41_spill] sm:$0xff] %v8670_v6  ;;  %v8719_v15 = vld [vmem:[%s8638_s29 + $0x19] sm:$0xff]  ;;  %1165 = vst.msk [vmem:[#allocation2] sm:$0xff] %vm1164_vm1, %v8713_v13  ;;  %v8724_v16 = vld [vmem:[%s8638_s29 + $0x8] sm:$0xff] }
 0x1d3   : > { %1312 = vrot.lane.b32.xlu0 %v8656_v4, %s7998_s16  ;;  %12016 = vst [vmem:[#allocation43_spill] sm:$0xff] %v8719_v15  ;;  %1166 = vst.msk [vmem:[#allocation2 + $0x8] sm:$0xff] %vm1164_vm1, %v8724_v16  ;;  %v2021_v17 = vld [vmem:[%s1127_s23] sm:$0x1f]  ;;  %v8729_v18 = vld [vmem:[%s8638_s29 + $0x10] sm:$0xff]  ;;  %s7999_s23 = smov 127  }
 0x1d4   : > { %6826 = vmatpush3.msk.msra.mxu0 %vm2123_vm2, %v2021_v17  ;;  %7349 = vmatpush3.msk.msra.mxu1 %vm2123_vm2, %v2021_v17  ;;  %1167 = vst.msk [vmem:[#allocation2 + $0x10] sm:$0xff] %vm1164_vm1, %v8729_v18  ;;  %1168 = vst.msk [vmem:[#allocation2 + $0x18] sm:$0xff] %vm1164_vm1, %v8732_v19  ;;  %v8743_v20 = vld [vmem:[%s8638_s29 + $0x20] sm:$0xff]  ;;  %v8754_v23 = vld [vmem:[%s8638_s29 + $0x28] sm:$0xff]  ;;  %vm11954_vm2 = vcmask 261249  }
 0x1d5   : > { %v8746_v21 = vld [vmem:[%s8638_s29 + $0x1c] sm:$0xff]  ;;  %1169 = vst.msk [vmem:[#allocation2 + $0x20] sm:$0xff] %vm1164_vm1, %v8743_v20  ;;  %1170 = vst.msk [vmem:[#allocation2 + $0x28] sm:$0xff] %vm1164_vm1, %v8754_v23  ;;  %v8773_v26 = vld [vmem:[%s8638_s29 + $0x24] sm:$0xff] }
 0x1d6   : > { %1314 = vrot.lane.b32.xlu1 %v8667_v5, %s7998_s16  ;;  %v8749_v22 = vld [vmem:[%s8638_s29 + $0x1b] sm:$0xff]  ;;  %v8776_v27 = vld [vmem:[%s8638_s29 + $0x23] sm:$0xff]  ;;  %v8779_v28 = vld [vmem:[%s8638_s29 + $0x30] sm:$0xff] }
 0x1d7   : > { %1216 = vrot.lane.b32.xlu0 %v8670_v6, %s7995_s8  ;;  %v8763_v24 = vld [vmem:[%s8638_s29 + $0x22] sm:$0xff]  ;;  %1171 = vst.msk [vmem:[#allocation2 + $0x30] sm:$0xff] %vm1164_vm1, %v8779_v28  ;;  %v8788_v29 = vld [vmem:[%s8638_s29 + $0x2a] sm:$0xff]  ;;  %v8804_v33 = vld [vmem:[%s8638_s29 + $0x38] sm:$0xff] }
 0x1d8   : > { %v8766_v25 = vld [vmem:[%s8638_s29 + $0x21] sm:$0xff]  ;;  %v8791_v30 = vld [vmem:[%s8638_s29 + $0x29] sm:$0xff]  ;;  %1172 = vst.msk [vmem:[#allocation2 + $0x38] sm:$0xff] %vm1164_vm1, %v8804_v33  ;;  %v8813_v34 = vld [vmem:[%s8638_s29 + $0x32] sm:$0xff] }
 0x1d9   : > { %12017 = vst [vmem:[#allocation44_spill] sm:$0xff] %v8766_v25  ;;  %12018 = vst [vmem:[#allocation45_spill] sm:$0xff] %v8791_v30  ;;  %v8798_v31 = vld [vmem:[%s8638_s29 + $0x2c] sm:$0xff]  ;;  %v8823_v36 = vld [vmem:[%s8638_s29 + $0x34] sm:$0xff] }
 0x1da   : > { %1510 = vrot.lane.b32.xlu1 %v8677_v7, %s7997_s0  ;;  %v8801_v32 = vld [vmem:[%s8638_s29 + $0x2b] sm:$0xff]  ;;  %v8826_v37 = vld [vmem:[%s8638_s29 + $0x33] sm:$0xff]  ;;  %v8829_v38 = vld [vmem:[%s8638_s29 + $0x40] sm:$0xff] }
 0x1db   : > { %1412 = vrot.lane.b32.xlu0 %v8680_v8, %s7994_s13  ;;  %v8816_v35 = vld [vmem:[%s8638_s29 + $0x31] sm:$0xff]  ;;  %1173 = vst.msk [vmem:[#allocation2 + $0x40] sm:$0xff] %vm1164_vm1, %v8829_v38  ;;  %v8838_v39 = vld [vmem:[%s8638_s29 + $0x3a] sm:$0xff]  ;;  %v8851_v42 = vld [vmem:[%s8638_s29 + $0x48] sm:$0xff] }
 0x1dc   : > { %12019 = vst [vmem:[#allocation46_spill] sm:$0xff] %v8816_v35  ;;  %v8841_v40 = vld [vmem:[%s8638_s29 + $0x39] sm:$0xff]  ;;  %v8848_v41 = vld [vmem:[%s8638_s29 + $0x50] sm:$0xff]  ;;  %1174 = vst.msk [vmem:[#allocation2 + $0x48] sm:$0xff] %vm1164_vm1, %v8851_v42 }
 0x1dd   : > { %12020 = vst [vmem:[#allocation47_spill] sm:$0xff] %v8841_v40  ;;  %v8854_v43 = vld [vmem:[%s8638_s29 + $0x3c] sm:$0xff]  ;;  %1175 = vst.msk [vmem:[#allocation2 + $0x50] sm:$0xff] %vm1164_vm1, %v8848_v41  ;;  %v8875_v47 = vld [vmem:[%s8638_s29 + $0x44] sm:$0xff] }
 0x1de   : > { %1316 = vrot.lane.b32.xlu1 %v8687_v9, %s7998_s16  ;;  %v8857_v44 = vld [vmem:[%s8638_s29 + $0x3b] sm:$0xff]  ;;  %v8878_v48 = vld [vmem:[%s8638_s29 + $0x43] sm:$0xff]  ;;  %v8895_v51 = vld [vmem:[%s8638_s29 + $0x4c] sm:$0xff] }
 0x1df   : > { %1218 = vrot.lane.b32.xlu0 %v8690_v10, %s7995_s8  ;;  %v8868_v45 = vld [vmem:[%s8638_s29 + $0x42] sm:$0xff]  ;;  %v8885_v49 = vld [vmem:[%s8638_s29 + $0x4a] sm:$0xff]  ;;  %v8901_v53 = vld [vmem:[%s8638_s29 + $0x58] sm:$0xff] }
 0x1e0   : > { %v1190_v46 = vld [vmem:[%s8638_s29 + $0x41] sm:$0xff]  ;;  %v8888_v50 = vld [vmem:[%s8638_s29 + $0x49] sm:$0xff]  ;;  %1176 = vst.msk [vmem:[#allocation2 + $0x58] sm:$0xff] %vm1164_vm1, %v8901_v53  ;;  %v8910_v54 = vld [vmem:[%s8638_s29 + $0x52] sm:$0xff] }
 0x1e1   : > { %12021 = vst [vmem:[#allocation48_spill] sm:$0xff] %v8888_v50  ;;  %v8898_v52 = vld [vmem:[%s8638_s29 + $0x4b] sm:$0xff]  ;;  %v8920_v56 = vld [vmem:[%s8638_s29 + $0x54] sm:$0xff]  ;;  %v8926_v58 = vld [vmem:[%s8638_s29 + $0x60] sm:$0xff] }
 0x1e2   : > { %1512 = vrot.lane.b32.xlu1 %v8698_v11, %s7997_s0  ;;  %v8913_v55 = vld [vmem:[%s8638_s29 + $0x51] sm:$0xff]  ;;  %1177 = vst.msk [vmem:[#allocation2 + $0x60] sm:$0xff] %vm1164_vm1, %v8926_v58  ;;  %v8935_v59 = vld [vmem:[%s8638_s29 + $0x5a] sm:$0xff]  ;;  %v8948_v63 = vld [vmem:[%s8638_s29 + $0x68] sm:$0xff] }
 0x1e3   : > { %1414 = vrot.lane.b32.xlu0 %v8701_v12, %s7994_s13  ;;  %12022 = vst [vmem:[#allocation49_spill] sm:$0xff] %v8913_v55  ;;  %v8923_v57 = vld [vmem:[%s8638_s29 + $0x53] sm:$0xff]  ;;  %v8942_v61 = vld [vmem:[%s8638_s29 + $0x5c] sm:$0xff]  ;;  %1178 = vst.msk [vmem:[#allocation2 + $0x68] sm:$0xff] %vm1164_vm1, %v8948_v63 }
 0x1e4   : > { %v1193_v60 = vld [vmem:[%s8638_s29 + $0x59] sm:$0xff]  ;;  %v8957_v17 = vld [vmem:[%s8638_s29 + $0x62] sm:$0xff] }
 0x1e5   : > { %v8945_v62 = vld [vmem:[%s8638_s29 + $0x5b] sm:$0xff]  ;;  %v8967_v2 = vld [vmem:[%s8638_s29 + $0x63] sm:$0xff]  ;;  %v9008_v10 = vld [vmem:[%s8638_s29 + $0x73] sm:$0xff] }
 0x1e6   : > { %1318 = vrot.lane.b32.xlu1 %v8716_v14, %s7998_s16  ;;  %12026 = vst [vmem:[#allocation53_spill] sm:$0xff] %v9008_v10 }
 0x1e7   : > { %1220 = vrot.lane.b32.xlu0 %v8719_v15, %s7995_s8  ;;  %v1196_v15 = vld [vmem:[%s8638_s29 + $0x71] sm:$0xff] }
 0x1ea   : > { %1514 = vrot.lane.b32.xlu1 %v8746_v21, %s7997_s0 }
 0x1eb   : > { %1416 = vrot.lane.b32.xlu0 %v8749_v22, %s7994_s13 }
 0x1ee   : > { %1320 = vrot.lane.b32.xlu1 %v8763_v24, %s7998_s16 }
 0x1ef   : > { %1222 = vrot.lane.b32.xlu0 %v8766_v25, %s7995_s8  ;;  %v8998_v25 = vld [vmem:[%s8638_s29 + $0x72] sm:$0xff] }
 0x1f0   : > { %12024 = vst [vmem:[#allocation51_spill] sm:$0xff] %v8998_v25 }
 0x1f2   : > { %1516 = vrot.lane.b32.xlu1 %v8773_v26, %s7997_s0 }
 0x1f3   : > { %1418 = vrot.lane.b32.xlu0 %v8776_v27, %s7994_s13 }
 0x1f6   : > { %1322 = vrot.lane.b32.xlu1 %v8788_v29, %s7998_s16 }
 0x1f7   : > { %1224 = vrot.lane.b32.xlu0 %v8791_v30, %s7995_s8  ;;  %v1163_v30 = vld [vmem:[%s8638_s29 + $0x78] sm:$0xf] }
 0x1f8   : > { %1181 = vst.msk [vmem:[#allocation2 + $0x78] sm:$0xf] %vm1180_vm3, %v1163_v30 }
 0x1fa   : > { %1518 = vrot.lane.b32.xlu1 %v8798_v31, %s7997_s0 }
 0x1fb   : > { %1420 = vrot.lane.b32.xlu0 %v8801_v32, %s7994_s13 }
 0x1fe   : > { %1324 = vrot.lane.b32.xlu1 %v8813_v34, %s7998_s16 }
 0x1ff   : > { %1226 = vrot.lane.b32.xlu0 %v8816_v35, %s7995_s8  ;;  %v8989_v35 = vld [vmem:[%s8638_s29 + $0x6b] sm:$0xff] }
 0x202   : > { %1520 = vrot.lane.b32.xlu1 %v8823_v36, %s7997_s0 }
 0x203   : > { %1422 = vrot.lane.b32.xlu0 %v8826_v37, %s7994_s13 }
 0x206   : > { %1326 = vrot.lane.b32.xlu1 %v8838_v39, %s7998_s16 }
 0x207   : > { %1228 = vrot.lane.b32.xlu0 %v8841_v40, %s7995_s8  ;;  %v8986_v40 = vld [vmem:[%s8638_s29 + $0x6c] sm:$0xff] }
 0x208   : > { %12023 = vst [vmem:[#allocation50_spill] sm:$0xff] %v8986_v40 }
 0x20a   : > { %1522 = vrot.lane.b32.xlu1 %v8854_v43, %s7997_s0 }
 0x20b   : > { %1424 = vrot.lane.b32.xlu0 %v8857_v44, %s7994_s13 }
 0x20e   : > { %1328 = vrot.lane.b32.xlu1 %v8868_v45, %s7998_s16 }
 0x20f   : > { %1230 = vrot.lane.b32.xlu0 %v1190_v46, %s7995_s8  ;;  %v1194_v46 = vld [vmem:[%s8638_s29 + $0x61] sm:$0xff] }
 0x212   : > { %1524 = vrot.lane.b32.xlu1 %v8875_v47, %s7997_s0 }
 0x213   : > { %1426 = vrot.lane.b32.xlu0 %v8878_v48, %s7994_s13 }
 0x216   : > { %1330 = vrot.lane.b32.xlu1 %v8885_v49, %s7998_s16 }
 0x217   : > { %1232 = vrot.lane.b32.xlu0 %v8888_v50, %s7995_s8  ;;  %v8970_v50 = vld [vmem:[%s8638_s29 + $0x70] sm:$0xff] }
 0x218   : > { %1179 = vst.msk [vmem:[#allocation2 + $0x70] sm:$0xff] %vm1164_vm1, %v8970_v50 }
 0x21a   : > { %1526 = vrot.lane.b32.xlu1 %v8895_v51, %s7997_s0 }
 0x21b   : > { %1428 = vrot.lane.b32.xlu0 %v8898_v52, %s7994_s13 }
 0x21e   : > { %1332 = vrot.lane.b32.xlu1 %v8910_v54, %s7998_s16 }
 0x21f   : > { %1234 = vrot.lane.b32.xlu0 %v8913_v55, %s7995_s8  ;;  %v8979_v55 = vld [vmem:[%s8638_s29 + $0x6a] sm:$0xff] }
 0x222   : > { %1528 = vrot.lane.b32.xlu1 %v8920_v56, %s7997_s0 }
 0x223   : > { %1430 = vrot.lane.b32.xlu0 %v8923_v57, %s7994_s13 }
 0x226   : > { %1334 = vrot.lane.b32.xlu1 %v8935_v59, %s7998_s16 }
 0x227   : > { %1236 = vrot.lane.b32.xlu0 %v1193_v60, %s7995_s8  ;;  %v8964_v60 = vld [vmem:[%s8638_s29 + $0x64] sm:$0xff] }
 0x22a   : > { %1530 = vrot.lane.b32.xlu1 %v8942_v61, %s7997_s0 }
 0x22b   : > { %1432 = vrot.lane.b32.xlu0 %v8945_v62, %s7994_s13 }
 0x22e   : > { %1336 = vrot.lane.b32.xlu1 %v8957_v17, %s7998_s16 }
 0x22f   : > { %1238 = vrot.lane.b32.xlu0 %v1194_v46, %s7995_s8  ;;  %v1195_v46 = vld [vmem:[%s8638_s29 + $0x69] sm:$0xff] }
 0x232   : > { %1532 = vrot.lane.b32.xlu1 %v8964_v60, %s7997_s0 }
 0x233   : > { %1434 = vrot.lane.b32.xlu0 %v8967_v2, %s7994_s13 }
 0x236   : > { %1338 = vrot.lane.b32.xlu1 %v8979_v55, %s7998_s16 }
 0x237   : > { %1240 = vrot.lane.b32.xlu0 %v1195_v46, %s7995_s8  ;;  %v9005_v46 = vld [vmem:[%s8638_s29 + $0x74] sm:$0xff] }
 0x238   : > { %12025 = vst [vmem:[#allocation52_spill] sm:$0xff] %v9005_v46 }
 0x23a   : > { %1534 = vrot.lane.b32.xlu1 %v8986_v40, %s7997_s0 }
 0x23b   : > { %1436 = vrot.lane.b32.xlu0 %v8989_v35, %s7994_s13 }
 0x23e   : > { %1340 = vrot.lane.b32.xlu1 %v8998_v25, %s7998_s16  ;;  %v1197_v25 = vld [vmem:[%s8638_s29 + $0x79] sm:$0xf] }
 0x23f   : > { %1242 = vrot.lane.b32.xlu0 %v1196_v15, %s7995_s8 }
 0x240   : > { %v1411_v30 = vpop.permute.xlu1 %1410 }
 0x241   : > { %v1215_v6 = vpop.permute.xlu0 %1214 }
 0x242   : > { %1263 = vst.msk [vmem:[#allocation2] sm:$0xff] %vm1262_vm4, %v1215_v6  ;;  %1536 = vrot.lane.b32.xlu1 %v9005_v46, %s7997_s0  ;;  %v1295_v6 = vld [vmem:[%s8638_s29 + $0x7a] sm:$0xf] }
 0x243   : > { %1438 = vrot.lane.b32.xlu0 %v9008_v10, %s7994_s13 }
 0x244   : > { %v1509_v15 = vpop.permute.xlu1 %1508 }
 0x245   : > { %v1313_v40 = vpop.permute.xlu0 %1312 }
 0x246   : > { %1361 = vst.msk [vmem:[#allocation2] sm:$0xff] %vm1360_vm5, %v1313_v40  ;;  %1244 = vrot.lane.b32.xlu1 %v1197_v25, %s7995_s8  ;;  %v1393_v25 = vld [vmem:[%s8638_s29 + $0x7b] sm:$0xf] }
 0x247   : > { %1459 = vst.msk [vmem:[#allocation2] sm:$0xff] %vm1458_vm6, %v1411_v30  ;;  %1606 = vrot.lane.b32.xlu0 %v8713_v13, %s7999_s23  ;;  %v1491_v13 = vld [vmem:[%s8638_s29 + $0x7c] sm:$0xf] }
 0x248   : > { %1557 = vst.msk [vmem:[#allocation2] sm:$0xff] %vm1556_vm7, %v1509_v15  ;;  %v1315_v46 = vpop.permute.xlu1 %1314  ;;  %v12027_v15 = vmov 0.0  }
 0x249   : > { %v1217_v10 = vpop.permute.xlu0 %1216 }
 0x24a   : > { %1264 = vst.msk [vmem:[#allocation2 + $0x8] sm:$0xff] %vm1262_vm4, %v1217_v10  ;;  %1734 = vrot.lane.b32.xlu1 %v8656_v4, %s7995_s8 }
 0x24b   : > { %1362 = vst.msk [vmem:[#allocation2 + $0x8] sm:$0xff] %vm1360_vm5, %v1315_v46  ;;  %1342 = vrot.lane.b32.xlu0 %v1295_v6, %s7998_s16 }
 0x24c   : > { %v1511_v40 = vpop.permute.xlu1 %1510 }
 0x24d   : > { %v1413_v30 = vpop.permute.xlu0 %1412 }
 0x24e   : > { %1460 = vst.msk [vmem:[#allocation2 + $0x8] sm:$0xff] %vm1458_vm6, %v1413_v30  ;;  %1830 = vrot.lane.b32.xlu1 %v8641_v0, %s7998_s16 }
 0x24f   : > { %1558 = vst.msk [vmem:[#allocation2 + $0x8] sm:$0xff] %vm1556_vm7, %v1511_v40  ;;  %1440 = vrot.lane.b32.xlu0 %v1393_v25, %s7994_s13  ;;  %v1990_v10 = vld [vmem:[#allocation2] sm:$0xff] }
 0x250   : > { %6828 = vmatmul.mubr.msk.f32.vlgmr.msra.gmra.mrb[0].mxu0 %vm2029_vm8, %v1990_v10  ;;  %v1317_v4 = vpop.permute.xlu1 %1316 }
 0x251   : > { %v1219_v46 = vpop.permute.xlu0 %1218  ;;  %6830 = vmatprep.mubr.msk.f32.mxu0 %vm11943_vm0, %v12027_v15 }
 0x252   : > { %1265 = vst.msk [vmem:[#allocation2 + $0x10] sm:$0xff] %vm1262_vm4, %v1219_v46  ;;  %1608 = vrot.lane.b32.xlu1 %v8724_v16, %s7999_s23 }
 0x253   : > { %1363 = vst.msk [vmem:[#allocation2 + $0x10] sm:$0xff] %vm1360_vm5, %v1317_v4  ;;  %1538 = vrot.lane.b32.xlu0 %v1491_v13, %s7997_s0  ;;  %s8002_s0 = smov 48  }
 0x254   : > { %v1513_v0 = vpop.permute.xlu1 %1512 }
 0x255   : > { %v1415_v6 = vpop.permute.xlu0 %1414 }
 0x256   : > { %1461 = vst.msk [vmem:[#allocation2 + $0x10] sm:$0xff] %vm1458_vm6, %v1415_v6  ;;  %v1991_v25 = vld [vmem:[#allocation2 + $0x8] sm:$0xff]  ;;  %1736 = vrot.lane.b32.xlu1 %v8667_v5, %s7995_s8 }
 0x257   : > { %1559 = vst.msk [vmem:[#allocation2 + $0x10] sm:$0xff] %vm1556_vm7, %v1513_v0  ;;  %1926 = vrot.lane.b32.xlu0 %v8653_v3, %s7994_s13  ;;  %6831 = vmatmul.mubr.msk.f32.gmra.mrb[2].mxu0 %vm2029_vm8, %v1991_v25 }
 0x258   : > { %v1319_v40 = vpop.permute.xlu1 %1318  ;;  %6833 = vmatprep.mubr.msk.f32.mxu0 %vm11943_vm0, %v12027_v15 }
 0x259   : > { %v1221_v30 = vpop.permute.xlu0 %1220 }
 0x25a   : > { %1266 = vst.msk [vmem:[#allocation2 + $0x18] sm:$0xff] %vm1262_vm4, %v1221_v30  ;;  %1610 = vrot.lane.b32.xlu1 %v8729_v18, %s7999_s23 }
 0x25b   : > { %1364 = vst.msk [vmem:[#allocation2 + $0x18] sm:$0xff] %vm1360_vm5, %v1319_v40  ;;  %1832 = vrot.lane.b32.xlu0 %v8680_v8, %s7998_s16 }
 0x25c   : > { %v1515_v5 = vpop.permute.xlu1 %1514 }
 0x25d   : > { %v1417_v16 = vpop.permute.xlu0 %1416 }
 0x25e   : > { %1462 = vst.msk [vmem:[#allocation2 + $0x18] sm:$0xff] %vm1458_vm6, %v1417_v16  ;;  %v1992_v3 = vld [vmem:[#allocation2 + $0x10] sm:$0xff]  ;;  %1738 = vrot.lane.b32.xlu1 %v8687_v9, %s7995_s8 }
 0x25f   : > { %1560 = vst.msk [vmem:[#allocation2 + $0x18] sm:$0xff] %vm1556_vm7, %v1515_v5  ;;  %1928 = vrot.lane.b32.xlu0 %v8677_v7, %s7994_s13  ;;  %6834 = vmatmul.mubr.msk.f32.gmra.mrb[4].mxu0 %vm2029_vm8, %v1992_v3 }
 0x260   : > { %v1321_v10 = vpop.permute.xlu1 %1320  ;;  %6836 = vmatprep.mubr.msk.f32.mxu0 %vm11943_vm0, %v12027_v15 }
 0x261   : > { %v1223_v18 = vpop.permute.xlu0 %1222 }
 0x262   : > { %1267 = vst.msk [vmem:[#allocation2 + $0x20] sm:$0xff] %vm1262_vm4, %v1223_v18  ;;  %1612 = vrot.lane.b32.xlu1 %v8732_v19, %s7999_s23  ;;  %v1589_v18 = vld [vmem:[%s8638_s29 + $0x78] sm:$0xf] }
 0x263   : > { %1365 = vst.msk [vmem:[#allocation2 + $0x20] sm:$0xff] %vm1360_vm5, %v1321_v10  ;;  %1834 = vrot.lane.b32.xlu0 %v8701_v12, %s7998_s16  ;;  %v12028_v10 = vld [vmem:[#allocation50_spill] sm:$0xff] }
 0x264   : > { %v1517_v8 = vpop.permute.xlu1 %1516 }
 0x265   : > { %v1419_v9 = vpop.permute.xlu0 %1418 }
 0x266   : > { %1463 = vst.msk [vmem:[#allocation2 + $0x20] sm:$0xff] %vm1458_vm6, %v1419_v9  ;;  %v1993_v7 = vld [vmem:[#allocation2 + $0x18] sm:$0xff]  ;;  %1740 = vrot.lane.b32.xlu1 %v8716_v14, %s7995_s8 }
 0x267   : > { %1561 = vst.msk [vmem:[#allocation2 + $0x20] sm:$0xff] %vm1556_vm7, %v1517_v8  ;;  %1930 = vrot.lane.b32.xlu0 %v8698_v11, %s7994_s13  ;;  %6837 = vmatmul.mubr.msk.f32.gmra.mrb[6].mxu0 %vm2029_vm8, %v1993_v7  ;;  %v12030_v8 = vld [vmem:[#allocation53_spill] sm:$0xff] }
 0x268   : > { %v1323_v13 = vpop.permute.xlu1 %1322  ;;  %6839 = vmatprep.mubr.msk.f32.mxu0 %vm11943_vm0, %v12027_v15 }
 0x269   : > { %v1225_v19 = vpop.permute.xlu0 %1224 }
 0x26a   : > { %1268 = vst.msk [vmem:[#allocation2 + $0x28] sm:$0xff] %vm1262_vm4, %v1225_v19  ;;  %1614 = vrot.lane.b32.xlu1 %v8743_v20, %s7999_s23  ;;  %v12031_v19 = vld [vmem:[#allocation41_spill] sm:$0xff] }
 0x26b   : > { %1366 = vst.msk [vmem:[#allocation2 + $0x28] sm:$0xff] %vm1360_vm5, %v1323_v13  ;;  %1836 = vrot.lane.b32.xlu0 %v8749_v22, %s7998_s16  ;;  %v1717_v13 = vld [vmem:[%s8638_s29 + $0x7a] sm:$0xf] }
 0x26c   : > { %v1519_v12 = vpop.permute.xlu1 %1518 }
 0x26d   : > { %v1421_v14 = vpop.permute.xlu0 %1420 }
 0x26e   : > { %1464 = vst.msk [vmem:[#allocation2 + $0x28] sm:$0xff] %vm1458_vm6, %v1421_v14  ;;  %v1994_v11 = vld [vmem:[#allocation2 + $0x20] sm:$0xff]  ;;  %1742 = vrot.lane.b32.xlu1 %v8763_v24, %s7995_s8  ;;  %v1813_v14 = vld [vmem:[%s8638_s29 + $0x7b] sm:$0xf] }
 0x26f   : > { %1562 = vst.msk [vmem:[#allocation2 + $0x28] sm:$0xff] %vm1556_vm7, %v1519_v12  ;;  %1932 = vrot.lane.b32.xlu0 %v8746_v21, %s7994_s13  ;;  %6840 = vmatmul.mubr.msk.f32.gmra.mrb[8].mxu0 %vm2029_vm8, %v1994_v11  ;;  %v12032_v12 = vld [vmem:[#allocation52_spill] sm:$0xff] }
 0x270   : > { %v1325_v4 = vpop.permute.xlu1 %1324  ;;  %6842 = vmatprep.mubr.msk.f32.mxu0 %vm11943_vm0, %v12027_v15 }
 0x271   : > { %v1227_v20 = vpop.permute.xlu0 %1226 }
 0x272   : > { %1269 = vst.msk [vmem:[#allocation2 + $0x30] sm:$0xff] %vm1262_vm4, %v1227_v20  ;;  %1616 = vrot.lane.b32.xlu1 %v8754_v23, %s7999_s23  ;;  %v1909_v20 = vld [vmem:[%s8638_s29 + $0x7c] sm:$0xf] }
 0x273   : > { %1367 = vst.msk [vmem:[#allocation2 + $0x30] sm:$0xff] %vm1360_vm5, %v1325_v4  ;;  %1838 = vrot.lane.b32.xlu0 %v8776_v27, %s7998_s16 }
 0x274   : > { %v1521_v22 = vpop.permute.xlu1 %1520 }
 0x275   : > { %v1423_v24 = vpop.permute.xlu0 %1422 }
 0x276   : > { %1465 = vst.msk [vmem:[#allocation2 + $0x30] sm:$0xff] %vm1458_vm6, %v1423_v24  ;;  %v1995_v21 = vld [vmem:[#allocation2 + $0x28] sm:$0xff]  ;;  %1744 = vrot.lane.b32.xlu1 %v8788_v29, %s7995_s8 }
 0x277   : > { %1563 = vst.msk [vmem:[#allocation2 + $0x30] sm:$0xff] %vm1556_vm7, %v1521_v22  ;;  %1934 = vrot.lane.b32.xlu0 %v8773_v26, %s7994_s13  ;;  %6843 = vmatmul.mubr.msk.f32.gmra.mrb[10].mxu0 %vm2029_vm8, %v1995_v21  ;;  %v12033_v21 = vld [vmem:[#allocation42_spill] sm:$0xff] }
 0x278   : > { %v1327_v46 = vpop.permute.xlu1 %1326  ;;  %6845 = vmatprep.mubr.msk.f32.mxu0 %vm11943_vm0, %v12027_v15 }
 0x279   : > { %v1229_v23 = vpop.permute.xlu0 %1228 }
 0x27a   : > { %1270 = vst.msk [vmem:[#allocation2 + $0x38] sm:$0xff] %vm1262_vm4, %v1229_v23  ;;  %1618 = vrot.lane.b32.xlu1 %v8779_v28, %s7999_s23 }
 0x27b   : > { %1368 = vst.msk [vmem:[#allocation2 + $0x38] sm:$0xff] %vm1360_vm5, %v1327_v46  ;;  %1840 = vrot.lane.b32.xlu0 %v8801_v32, %s7998_s16 }
 0x27c   : > { %v1523_v27 = vpop.permute.xlu1 %1522 }
 0x27d   : > { %v1425_v29 = vpop.permute.xlu0 %1424 }
 0x27e   : > { %1466 = vst.msk [vmem:[#allocation2 + $0x38] sm:$0xff] %vm1458_vm6, %v1425_v29  ;;  %v1996_v26 = vld [vmem:[#allocation2 + $0x30] sm:$0xff]  ;;  %1746 = vrot.lane.b32.xlu1 %v8813_v34, %s7995_s8 }
 0x27f   : > { %1564 = vst.msk [vmem:[#allocation2 + $0x38] sm:$0xff] %vm1556_vm7, %v1523_v27  ;;  %1936 = vrot.lane.b32.xlu0 %v8798_v31, %s7994_s13  ;;  %6846 = vmatmul.mubr.msk.f32.gmra.mrb[12].mxu0 %vm2029_vm8, %v1996_v26 }
 0x280   : > { %v1329_v0 = vpop.permute.xlu1 %1328  ;;  %6848 = vmatprep.mubr.msk.f32.mxu0 %vm11943_vm0, %v12027_v15 }
 0x281   : > { %v1231_v28 = vpop.permute.xlu0 %1230 }
 0x282   : > { %1271 = vst.msk [vmem:[#allocation2 + $0x40] sm:$0xff] %vm1262_vm4, %v1231_v28  ;;  %1620 = vrot.lane.b32.xlu1 %v8804_v33, %s7999_s23 }
 0x283   : > { %1369 = vst.msk [vmem:[#allocation2 + $0x40] sm:$0xff] %vm1360_vm5, %v1329_v0  ;;  %1842 = vrot.lane.b32.xlu0 %v8826_v37, %s7998_s16  ;;  %v12034_v0 = vld [vmem:[#allocation43_spill] sm:$0xff] }
 0x284   : > { %v1525_v32 = vpop.permute.xlu1 %1524 }
 0x285   : > { %v1427_v34 = vpop.permute.xlu0 %1426 }
 0x286   : > { %1467 = vst.msk [vmem:[#allocation2 + $0x40] sm:$0xff] %vm1458_vm6, %v1427_v34  ;;  %v1997_v31 = vld [vmem:[#allocation2 + $0x38] sm:$0xff]  ;;  %1626 = vrot.lane.b32.xlu1 %v8848_v41, %s7999_s23 }
 0x287   : > { %1565 = vst.msk [vmem:[#allocation2 + $0x40] sm:$0xff] %vm1556_vm7, %v1525_v32  ;;  %1624 = vrot.lane.b32.xlu0 %v8851_v42, %s7999_s23  ;;  %6849 = vmatmul.mubr.msk.f32.gmra.mrb[14].mxu0 %vm2029_vm8, %v1997_v31 }
 0x288   : > { %v1331_v6 = vpop.permute.xlu1 %1330  ;;  %6851 = vmatprep.mubr.msk.f32.mxu0 %vm11943_vm0, %v12027_v15 }
 0x289   : > { %v1233_v33 = vpop.permute.xlu0 %1232 }
 0x28a   : > { %1272 = vst.msk [vmem:[#allocation2 + $0x48] sm:$0xff] %vm1262_vm4, %v1233_v33  ;;  %1748 = vrot.lane.b32.xlu1 %v8838_v39, %s7995_s8  ;;  %v12035_v33 = vld [vmem:[#allocation44_spill] sm:$0xff] }
 0x28b   : > { %1370 = vst.msk [vmem:[#allocation2 + $0x48] sm:$0xff] %vm1360_vm5, %v1331_v6  ;;  %1938 = vrot.lane.b32.xlu0 %v8823_v36, %s7994_s13 }
 0x28c   : > { %v1527_v37 = vpop.permute.xlu1 %1526 }
 0x28d   : > { %v1429_v41 = vpop.permute.xlu0 %1428 }
 0x28e   : > { %1468 = vst.msk [vmem:[#allocation2 + $0x48] sm:$0xff] %vm1458_vm6, %v1429_v41  ;;  %v1998_v42 = vld [vmem:[#allocation2 + $0x40] sm:$0xff]  ;;  %1754 = vrot.lane.b32.xlu1 %v8910_v54, %s7995_s8 }
 0x28f   : > { %1566 = vst.msk [vmem:[#allocation2 + $0x48] sm:$0xff] %vm1556_vm7, %v1527_v37  ;;  %1752 = vrot.lane.b32.xlu0 %v8885_v49, %s7995_s8  ;;  %6852 = vmatmul.mubr.msk.f32.gmra.mrb[16].mxu0 %vm2029_vm8, %v1998_v42 }
 0x290   : > { %v1333_v25 = vpop.permute.xlu1 %1332  ;;  %6854 = vmatprep.mubr.msk.f32.mxu0 %vm11943_vm0, %v12027_v15 }
 0x291   : > { %v1235_v39 = vpop.permute.xlu0 %1234 }
 0x292   : > { %1273 = vst.msk [vmem:[#allocation2 + $0x50] sm:$0xff] %vm1262_vm4, %v1235_v39  ;;  %1848 = vrot.lane.b32.xlu1 %v8898_v52, %s7998_s16 }
 0x293   : > { %1371 = vst.msk [vmem:[#allocation2 + $0x50] sm:$0xff] %vm1360_vm5, %v1333_v25  ;;  %1844 = vrot.lane.b32.xlu0 %v8857_v44, %s7998_s16 }
 0x294   : > { %v1529_v36 = vpop.permute.xlu1 %1528 }
 0x295   : > { %v1431_v54 = vpop.permute.xlu0 %1430 }
 0x296   : > { %1469 = vst.msk [vmem:[#allocation2 + $0x50] sm:$0xff] %vm1458_vm6, %v1431_v54  ;;  %v1999_v49 = vld [vmem:[#allocation2 + $0x48] sm:$0xff]  ;;  %1622 = vrot.lane.b32.xlu1 %v8829_v38, %s7999_s23 }
 0x297   : > { %1567 = vst.msk [vmem:[#allocation2 + $0x50] sm:$0xff] %vm1556_vm7, %v1529_v36  ;;  %1850 = vrot.lane.b32.xlu0 %v8923_v57, %s7998_s16  ;;  %6855 = vmatmul.mubr.msk.f32.gmra.mrb[18].mxu0 %vm2029_vm8, %v1999_v49  ;;  %v12036_v36 = vld [vmem:[#allocation45_spill] sm:$0xff] }
 0x298   : > { %v1335_v40 = vpop.permute.xlu1 %1334  ;;  %6857 = vmatprep.mubr.msk.f32.mxu0 %vm11943_vm0, %v12027_v15 }
 0x299   : > { %v1237_v52 = vpop.permute.xlu0 %1236 }
 0x29a   : > { %1274 = vst.msk [vmem:[#allocation2 + $0x58] sm:$0xff] %vm1262_vm4, %v1237_v52  ;;  %1940 = vrot.lane.b32.xlu1 %v8854_v43, %s7994_s13 }
 0x29b   : > { %1372 = vst.msk [vmem:[#allocation2 + $0x58] sm:$0xff] %vm1360_vm5, %v1335_v40  ;;  %1628 = vrot.lane.b32.xlu0 %v8901_v53, %s7999_s23 }
 0x29c   : > { %v1531_v38 = vpop.permute.xlu1 %1530 }
 0x29d   : > { %v1433_v44 = vpop.permute.xlu0 %1432 }
 0x29e   : > { %1470 = vst.msk [vmem:[#allocation2 + $0x58] sm:$0xff] %vm1458_vm6, %v1433_v44  ;;  %v2000_v57 = vld [vmem:[#allocation2 + $0x50] sm:$0xff]  ;;  %1946 = vrot.lane.b32.xlu1 %v8920_v56, %s7994_s13  ;;  %v12037_v44 = vld [vmem:[#allocation46_spill] sm:$0xff] }
 0x29f   : > { %1568 = vst.msk [vmem:[#allocation2 + $0x58] sm:$0xff] %vm1556_vm7, %v1531_v38  ;;  %1944 = vrot.lane.b32.xlu0 %v8895_v51, %s7994_s13  ;;  %6858 = vmatmul.mubr.msk.f32.gmra.mrb[20].mxu0 %vm2029_vm8, %v2000_v57 }
 0x2a0   : > { %v1337_v30 = vpop.permute.xlu1 %1336  ;;  %6860 = vmatprep.mubr.msk.f32.mxu0 %vm11943_vm0, %v12027_v15 }
 0x2a1   : > { %v1239_v43 = vpop.permute.xlu0 %1238 }
 0x2a2   : > { %1275 = vst.msk [vmem:[#allocation2 + $0x60] sm:$0xff] %vm1262_vm4, %v1239_v43  ;;  %1756 = vrot.lane.b32.xlu1 %v8935_v59, %s7995_s8 }
 0x2a3   : > { %1373 = vst.msk [vmem:[#allocation2 + $0x60] sm:$0xff] %vm1360_vm5, %v1337_v30  ;;  %1750 = vrot.lane.b32.xlu0 %v8868_v45, %s7995_s8 }
 0x2a4   : > { %v1533_v53 = vpop.permute.xlu1 %1532 }
 0x2a5   : > { %v1435_v56 = vpop.permute.xlu0 %1434 }
 0x2a6   : > { %1471 = vst.msk [vmem:[#allocation2 + $0x60] sm:$0xff] %vm1458_vm6, %v1435_v56  ;;  %v2001_v51 = vld [vmem:[#allocation2 + $0x58] sm:$0xff]  ;;  %1852 = vrot.lane.b32.xlu1 %v8945_v62, %s7998_s16 }
 0x2a7   : > { %1569 = vst.msk [vmem:[#allocation2 + $0x60] sm:$0xff] %vm1556_vm7, %v1533_v53  ;;  %1846 = vrot.lane.b32.xlu0 %v8878_v48, %s7998_s16  ;;  %6861 = vmatmul.mubr.msk.f32.gmra.mrb[22].mxu0 %vm2029_vm8, %v2001_v51  ;;  %v12038_v51 = vld [vmem:[#allocation47_spill] sm:$0xff] }
 0x2a8   : > { %v1339_v5 = vpop.permute.xlu1 %1338  ;;  %6863 = vmatprep.mubr.msk.f32.mxu0 %vm11943_vm0, %v12027_v15 }
 0x2a9   : > { %v1241_v59 = vpop.permute.xlu0 %1240 }
 0x2aa   : > { %1276 = vst.msk [vmem:[#allocation2 + $0x68] sm:$0xff] %vm1262_vm4, %v1241_v59  ;;  %1942 = vrot.lane.b32.xlu1 %v8875_v47, %s7994_s13 }
 0x2ab   : > { %1374 = vst.msk [vmem:[#allocation2 + $0x68] sm:$0xff] %vm1360_vm5, %v1339_v5  ;;  %1630 = vrot.lane.b32.xlu0 %v8926_v58, %s7999_s23 }
 0x2ac   : > { %v1535_v45 = vpop.permute.xlu1 %1534 }
 0x2ad   : > { %v1437_v62 = vpop.permute.xlu0 %1436 }
 0x2ae   : > { %1472 = vst.msk [vmem:[#allocation2 + $0x68] sm:$0xff] %vm1458_vm6, %v1437_v62  ;;  %v2002_v48 = vld [vmem:[#allocation2 + $0x60] sm:$0xff]  ;;  %1758 = vrot.lane.b32.xlu1 %v8957_v17, %s7995_s8  ;;  %v12039_v62 = vld [vmem:[#allocation49_spill] sm:$0xff] }
 0x2af   : > { %1570 = vst.msk [vmem:[#allocation2 + $0x68] sm:$0xff] %vm1556_vm7, %v1535_v45  ;;  %1948 = vrot.lane.b32.xlu0 %v8942_v61, %s7994_s13  ;;  %6864 = vmatmul.mubr.msk.f32.gmra.mrb[24].mxu0 %vm2029_vm8, %v2002_v48  ;;  %v12040_v48 = vld [vmem:[#allocation48_spill] sm:$0xff] }
 0x2b0   : > { %6866 = vmatprep.mubr.msk.f32.mxu0 %vm11943_vm0, %v12027_v15  ;;  %v1341_v47 = vpop.permute.xlu1 %1340 }
 0x2b1   : > { %v1243_v58 = vpop.permute.xlu0 %1242 }
 0x2b2   : > { %1277 = vst.msk [vmem:[#allocation2 + $0x70] sm:$0xff] %vm1262_vm4, %v1243_v58  ;;  %1632 = vrot.lane.b32.xlu1 %v8948_v63, %s7999_s23 }
 0x2b3   : > { %1375 = vst.msk [vmem:[#allocation2 + $0x70] sm:$0xff] %vm1360_vm5, %v1341_v47  ;;  %1854 = vrot.lane.b32.xlu0 %v8967_v2, %s7998_s16 }
 0x2b4   : > { %v1537_v61 = vpop.permute.xlu1 %1536 }
 0x2b5   : > { %v1439_v16 = vpop.permute.xlu0 %1438 }
 0x2b6   : > { %1473 = vst.msk [vmem:[#allocation2 + $0x70] sm:$0xff] %vm1458_vm6, %v1439_v16  ;;  %v2003_v17 = vld [vmem:[#allocation2 + $0x68] sm:$0xff]  ;;  %1760 = vrot.lane.b32.xlu1 %v8979_v55, %s7995_s8 }
 0x2b7   : > { %1571 = vst.msk [vmem:[#allocation2 + $0x70] sm:$0xff] %vm1556_vm7, %v1537_v61  ;;  %1950 = vrot.lane.b32.xlu0 %v8964_v60, %s7994_s13  ;;  %6867 = vmatmul.mubr.msk.f32.gmra.mrb[26].mxu0 %vm2029_vm8, %v2003_v17 }
 0x2b8   : > { %6869 = vmatprep.mubr.msk.f32.mxu0 %vm11943_vm0, %v12027_v15  ;;  %v1245_v2 = vpop.permute.xlu1 %1244 }
 0x2b9   : > { %v1607_v63 = vpop.permute.xlu0 %1606  ;;  %1279 = vst.msk [vmem:[#allocation2 + $0x78] sm:$0xf] %vm1278_vm9, %v1245_v2 }
 0x2ba   : > { %1654 = vst.msk [vmem:[#allocation2 + $0x7c] sm:$0xff] %vm1164_vm1, %v1607_v63  ;;  %1634 = vrot.lane.b32.xlu1 %v8970_v50, %s7999_s23 }
 0x2bb   : > { %1686 = vst.msk [vmem:[#allocation2 + $0x7c] sm:$0xff] %vm1262_vm4, %v8644_v1  ;;  %1856 = vrot.lane.b32.xlu0 %v8989_v35, %s7998_s16  ;;  %v12029_v1 = vld [vmem:[#allocation51_spill] sm:$0xff] }
 0x2bc   : > { %v1735_v55 = vpop.permute.xlu1 %1734 }
 0x2bd   : > { %v1343_v60 = vpop.permute.xlu0 %1342  ;;  %1782 = vst.msk [vmem:[#allocation2 + $0x7c] sm:$0xff] %vm1360_vm5, %v1735_v55  ;;  %v1678_v55 = vld [vmem:[%s8638_s29 + $0x41] sm:$0xff] }
 0x2be   : > { %1377 = vst.msk [vmem:[#allocation2 + $0x78] sm:$0xf] %vm1376_vm10, %v1343_v60  ;;  %v2004_v3 = vld [vmem:[#allocation2 + $0x70] sm:$0xff]  ;;  %1762 = vrot.lane.b32.xlu1 %v12029_v1, %s7995_s8 }
 0x2bf   : > { %1952 = vrot.lane.b32.xlu0 %v12028_v10, %s7994_s13  ;;  %6870 = vmatmul.mubr.msk.f32.gmra.mrb[28].mxu0 %vm2029_vm8, %v2004_v3  ;;  %v1681_v10 = vld [vmem:[%s8638_s29 + $0x59] sm:$0xff] }
 0x2c0   : > { %6872 = vmatprep.mubr.msk.f32.mxu0 %vm11943_vm0, %v12027_v15  ;;  %v1831_v35 = vpop.permute.xlu1 %1830 }
 0x2c1   : > { %v1441_v50 = vpop.permute.xlu0 %1440  ;;  %1878 = vst.msk [vmem:[#allocation2 + $0x7c] sm:$0xff] %vm1458_vm6, %v1831_v35 }
 0x2c2   : > { %1475 = vst.msk [vmem:[#allocation2 + $0x78] sm:$0xf] %vm1474_vm11, %v1441_v50  ;;  %1636 = vrot.lane.b32.xlu1 %v1589_v18, %s7999_s23  ;;  %s12050_s23 = sld [smem:[#allocation63_spill]] }
 0x2c3   : > { %1858 = vrot.lane.b32.xlu0 %v12030_v8, %s7998_s16 }
 0x2c4   : > { %v1609_v9 = vpop.permute.xlu1 %1608 }
 0x2c5   : > { %v1539_v7 = vpop.permute.xlu0 %1538  ;;  %1655 = vst.msk [vmem:[#allocation2 + $0x84] sm:$0xff] %vm1164_vm1, %v1609_v9 }
 0x2c6   : > { %1573 = vst.msk [vmem:[#allocation2 + $0x78] sm:$0xf] %vm1572_vm12, %v1539_v7  ;;  %1764 = vrot.lane.b32.xlu1 %v1717_v13, %s7995_s8  ;;  %s8001_s8 = smov 32  }
 0x2c7   : > { %1687 = vst.msk [vmem:[#allocation2 + $0x84] sm:$0xff] %vm1262_vm4, %v12031_v19  ;;  %1954 = vrot.lane.b32.xlu0 %v12032_v12, %s7994_s13 }
 0x2c8   : > { %v1737_v11 = vpop.permute.xlu1 %1736 }
 0x2c9   : > { %v1927_v4 = vpop.permute.xlu0 %1926  ;;  %1783 = vst.msk [vmem:[#allocation2 + $0x84] sm:$0xff] %vm1360_vm5, %v1737_v11 }
 0x2ca   : > { %1974 = vst.msk [vmem:[#allocation2 + $0x7c] sm:$0xff] %vm1556_vm7, %v1927_v4  ;;  %1956 = vrot.lane.b32.xlu1 %v1909_v20, %s7994_s13 }
 0x2cb   : > { %1860 = vrot.lane.b32.xlu0 %v1813_v14, %s7998_s16  ;;  %v1682_v14 = vld [vmem:[%s8638_s29 + $0x61] sm:$0xff]  ;;  %s8003_s16 = smov 64  }
 0x2cc   : > { %v1611_v22 = vpop.permute.xlu1 %1610 }
 0x2cd   : > { %v1833_v24 = vpop.permute.xlu0 %1832  ;;  %1656 = vst.msk [vmem:[#allocation2 + $0x8c] sm:$0xff] %vm1164_vm1, %v1611_v22 }
 0x2ce   : > { %1879 = vst.msk [vmem:[#allocation2 + $0x84] sm:$0xff] %vm1458_vm6, %v1833_v24 }
 0x2cf   : > { %1688 = vst.msk [vmem:[#allocation2 + $0x8c] sm:$0xff] %vm1262_vm4, %v12033_v21 }
 0x2d0   : > { %v1739_v46 = vpop.permute.xlu1 %1738 }
 0x2d1   : > { %v1929_v23 = vpop.permute.xlu0 %1928  ;;  %v2005_v27 = vld [vmem:[#allocation2 + $0x78] sm:$0xff]  ;;  %1784 = vst.msk [vmem:[#allocation2 + $0x8c] sm:$0xff] %vm1360_vm5, %v1739_v46 }
 0x2d2   : > { %1975 = vst.msk [vmem:[#allocation2 + $0x84] sm:$0xff] %vm1556_vm7, %v1929_v23  ;;  %6873 = vmatmul.mubr.msk.f32.gmra.mrb[30].mxu0 %vm2029_vm8, %v2005_v27  ;;  %v1683_v23 = vld [vmem:[%s8638_s29 + $0x69] sm:$0xff] }
 0x2d3   : > { %6875 = vmatprep.mubr.msk.f32.mxu0 %vm11943_vm0, %v12027_v15 }
 0x2d4   : > { %v1613_v29 = vpop.permute.xlu1 %1612 }
 0x2d5   : > { %v1835_v26 = vpop.permute.xlu0 %1834  ;;  %1657 = vst.msk [vmem:[#allocation2 + $0x94] sm:$0xff] %vm1164_vm1, %v1613_v29 }
 0x2d6   : > { %1880 = vst.msk [vmem:[#allocation2 + $0x8c] sm:$0xff] %vm1458_vm6, %v1835_v26 }
 0x2d7   : > { %1689 = vst.msk [vmem:[#allocation2 + $0x94] sm:$0xff] %vm1262_vm4, %v12034_v0 }
 0x2d8   : > { %v1741_v28 = vpop.permute.xlu1 %1740 }
 0x2d9   : > { %v1931_v32 = vpop.permute.xlu0 %1930  ;;  %v2006_v34 = vld [vmem:[#allocation2 + $0x80] sm:$0xff]  ;;  %1785 = vst.msk [vmem:[#allocation2 + $0x94] sm:$0xff] %vm1360_vm5, %v1741_v28 }
 0x2da   : > { %1976 = vst.msk [vmem:[#allocation2 + $0x8c] sm:$0xff] %vm1556_vm7, %v1931_v32  ;;  %6876 = vmatmul.mubr.msk.f32.gmra.mrb[32].mxu0 %vm2029_vm8, %v2006_v34 }
 0x2db   : > { %6878 = vmatprep.mubr.msk.f32.mxu0 %vm11943_vm0, %v12027_v15 }
 0x2dc   : > { %v1615_v31 = vpop.permute.xlu1 %1614 }
 0x2dd   : > { %v1837_v6 = vpop.permute.xlu0 %1836  ;;  %1658 = vst.msk [vmem:[#allocation2 + $0x9c] sm:$0xff] %vm1164_vm1, %v1615_v31 }
 0x2de   : > { %1881 = vst.msk [vmem:[#allocation2 + $0x94] sm:$0xff] %vm1458_vm6, %v1837_v6 }
 0x2df   : > { %1690 = vst.msk [vmem:[#allocation2 + $0x9c] sm:$0xff] %vm1262_vm4, %v12035_v33  ;;  %v1684_v33 = vld [vmem:[%s8638_s29 + $0x71] sm:$0xff] }
 0x2e0   : > { %v1743_v37 = vpop.permute.xlu1 %1742 }
 0x2e1   : > { %v1933_v41 = vpop.permute.xlu0 %1932  ;;  %v2007_v42 = vld [vmem:[#allocation2 + $0x88] sm:$0xff]  ;;  %1786 = vst.msk [vmem:[#allocation2 + $0x9c] sm:$0xff] %vm1360_vm5, %v1743_v37 }
 0x2e2   : > { %1977 = vst.msk [vmem:[#allocation2 + $0x94] sm:$0xff] %vm1556_vm7, %v1933_v41  ;;  %6879 = vmatmul.mubr.msk.f32.gmra.mrb[34].mxu0 %vm2029_vm8, %v2007_v42 }
 0x2e3   : > { %6881 = vmatprep.mubr.msk.f32.mxu0 %vm11943_vm0, %v12027_v15 }
 0x2e4   : > { %v1617_v25 = vpop.permute.xlu1 %1616 }
 0x2e5   : > { %v1839_v39 = vpop.permute.xlu0 %1838  ;;  %1659 = vst.msk [vmem:[#allocation2 + $0xa4] sm:$0xff] %vm1164_vm1, %v1617_v25 }
 0x2e6   : > { %1882 = vst.msk [vmem:[#allocation2 + $0x9c] sm:$0xff] %vm1458_vm6, %v1839_v39 }
 0x2e7   : > { %1691 = vst.msk [vmem:[#allocation2 + $0xa4] sm:$0xff] %vm1262_vm4, %v12036_v36 }
 0x2e8   : > { %v1745_v54 = vpop.permute.xlu1 %1744 }
 0x2e9   : > { %v1935_v49 = vpop.permute.xlu0 %1934  ;;  %v2008_v40 = vld [vmem:[#allocation2 + $0x90] sm:$0xff]  ;;  %1787 = vst.msk [vmem:[#allocation2 + $0xa4] sm:$0xff] %vm1360_vm5, %v1745_v54 }
 0x2ea   : > { %1978 = vst.msk [vmem:[#allocation2 + $0x9c] sm:$0xff] %vm1556_vm7, %v1935_v49  ;;  %6882 = vmatmul.mubr.msk.f32.gmra.mrb[36].mxu0 %vm2029_vm8, %v2008_v40  ;;  %v1685_v49 = vld [vmem:[%s8638_s29 + $0x79] sm:$0xf]  ;;  %s12041_s29 = sld [smem:[#allocation58_spill]] }
 0x2eb   : > { %6884 = vmatprep.mubr.msk.f32.mxu0 %vm11943_vm0, %v12027_v15 }
 0x2ec   : > { %v1619_v52 = vpop.permute.xlu1 %1618 }
 0x2ed   : > { %v1841_v38 = vpop.permute.xlu0 %1840  ;;  %1660 = vst.msk [vmem:[#allocation2 + $0xac] sm:$0xff] %vm1164_vm1, %v1619_v52 }
 0x2ee   : > { %1883 = vst.msk [vmem:[#allocation2 + $0xa4] sm:$0xff] %vm1458_vm6, %v1841_v38 }
 0x2ef   : > { %1692 = vst.msk [vmem:[#allocation2 + $0xac] sm:$0xff] %vm1262_vm4, %v12037_v44 }
 0x2f0   : > { %v1747_v57 = vpop.permute.xlu1 %1746 }
 0x2f1   : > { %v1937_v30 = vpop.permute.xlu0 %1936  ;;  %v2009_v43 = vld [vmem:[#allocation2 + $0x98] sm:$0xff]  ;;  %1788 = vst.msk [vmem:[#allocation2 + $0xac] sm:$0xff] %vm1360_vm5, %v1747_v57 }
 0x2f2   : > { %1979 = vst.msk [vmem:[#allocation2 + $0xa4] sm:$0xff] %vm1556_vm7, %v1937_v30  ;;  %6885 = vmatmul.mubr.msk.f32.gmra.mrb[38].mxu0 %vm2029_vm8, %v2009_v43 }
 0x2f3   : > { %6887 = vmatprep.mubr.msk.f32.mxu0 %vm11943_vm0, %v12027_v15 }
 0x2f4   : > { %v1621_v53 = vpop.permute.xlu1 %1620 }
 0x2f5   : > { %v1843_v56 = vpop.permute.xlu0 %1842  ;;  %1661 = vst.msk [vmem:[#allocation2 + $0xb4] sm:$0xff] %vm1164_vm1, %v1621_v53 }
 0x2f6   : > { %1884 = vst.msk [vmem:[#allocation2 + $0xac] sm:$0xff] %vm1458_vm6, %v1843_v56 }
 0x2f7   : > { %1693 = vst.msk [vmem:[#allocation2 + $0xb4] sm:$0xff] %vm1262_vm4, %v12038_v51 }
 0x2f8   : > { %v1627_v5 = vpop.permute.xlu1 %1626 }
 0x2f9   : > { %v1625_v59 = vpop.permute.xlu0 %1624  ;;  %v2010_v45 = vld [vmem:[#allocation2 + $0xa0] sm:$0xff]  ;;  %1664 = vst.msk [vmem:[#allocation2 + $0xcc] sm:$0xff] %vm1164_vm1, %v1627_v5 }
 0x2fa   : > { %1663 = vst.msk [vmem:[#allocation2 + $0xc4] sm:$0xff] %vm1164_vm1, %v1625_v59  ;;  %6888 = vmatmul.mubr.msk.f32.gmra.mrb[40].mxu0 %vm2029_vm8, %v2010_v45 }
 0x2fb   : > { %1696 = vst.msk [vmem:[#allocation2 + $0xcc] sm:$0xff] %vm1262_vm4, %v12039_v62  ;;  %1695 = vst.msk [vmem:[#allocation2 + $0xc4] sm:$0xff] %vm1262_vm4, %v12040_v48  ;;  %6890 = vmatprep.mubr.msk.f32.mxu0 %vm11943_vm0, %v12027_v15 }
 0x2fc   : > { %v1749_v47 = vpop.permute.xlu1 %1748 }
 0x2fd   : > { %v1939_v58 = vpop.permute.xlu0 %1938  ;;  %1789 = vst.msk [vmem:[#allocation2 + $0xb4] sm:$0xff] %vm1360_vm5, %v1749_v47 }
 0x2fe   : > { %1980 = vst.msk [vmem:[#allocation2 + $0xac] sm:$0xff] %vm1556_vm7, %v1939_v58 }
 0x300   : > { %v1755_v61 = vpop.permute.xlu1 %1754 }
 0x301   : > { %v1753_v16 = vpop.permute.xlu0 %1752  ;;  %1792 = vst.msk [vmem:[#allocation2 + $0xcc] sm:$0xff] %vm1360_vm5, %v1755_v61 }
 0x302   : > { %1791 = vst.msk [vmem:[#allocation2 + $0xc4] sm:$0xff] %vm1360_vm5, %v1753_v16 }
 0x304   : > { %v1849_v17 = vpop.permute.xlu1 %1848 }
 0x305   : > { %v1845_v2 = vpop.permute.xlu0 %1844  ;;  %v2011_v63 = vld [vmem:[#allocation2 + $0xa8] sm:$0xff]  ;;  %1887 = vst.msk [vmem:[#allocation2 + $0xc4] sm:$0xff] %vm1458_vm6, %v1849_v17 }
 0x306   : > { %1885 = vst.msk [vmem:[#allocation2 + $0xb4] sm:$0xff] %vm1458_vm6, %v1845_v2  ;;  %6891 = vmatmul.mubr.msk.f32.gmra.mrb[42].mxu0 %vm2029_vm8, %v2011_v63 }
 0x307   : > { %6893 = vmatprep.mubr.msk.f32.mxu0 %vm11943_vm0, %v12027_v15 }
 0x308   : > { %v1623_v60 = vpop.permute.xlu1 %1622 }
 0x309   : > { %v1851_v3 = vpop.permute.xlu0 %1850  ;;  %1662 = vst.msk [vmem:[#allocation2 + $0xbc] sm:$0xff] %vm1164_vm1, %v1623_v60 }
 0x30a   : > { %1888 = vst.msk [vmem:[#allocation2 + $0xcc] sm:$0xff] %vm1458_vm6, %v1851_v3 }
 0x30b   : > { %1694 = vst.msk [vmem:[#allocation2 + $0xbc] sm:$0xff] %vm1262_vm4, %v1678_v55 }
 0x30c   : > { %v1941_v1 = vpop.permute.xlu1 %1940 }
 0x30d   : > { %v1629_v35 = vpop.permute.xlu0 %1628  ;;  %1981 = vst.msk [vmem:[#allocation2 + $0xb4] sm:$0xff] %vm1556_vm7, %v1941_v1 }
 0x30e   : > { %1665 = vst.msk [vmem:[#allocation2 + $0xd4] sm:$0xff] %vm1164_vm1, %v1629_v35 }
 0x30f   : > { %1697 = vst.msk [vmem:[#allocation2 + $0xd4] sm:$0xff] %vm1262_vm4, %v1681_v10 }
 0x310   : > { %v1947_v50 = vpop.permute.xlu1 %1946 }
 0x311   : > { %v1945_v18 = vpop.permute.xlu0 %1944  ;;  %1984 = vst.msk [vmem:[#allocation2 + $0xcc] sm:$0xff] %vm1556_vm7, %v1947_v50 }
 0x312   : > { %1983 = vst.msk [vmem:[#allocation2 + $0xc4] sm:$0xff] %vm1556_vm7, %v1945_v18 }
 0x314   : > { %v1757_v8 = vpop.permute.xlu1 %1756  ;;  %v2012_v7 = vld [vmem:[#allocation2 + $0xb0] sm:$0xff] }
 0x315   : > { %v1751_v9 = vpop.permute.xlu0 %1750  ;;  %1793 = vst.msk [vmem:[#allocation2 + $0xd4] sm:$0xff] %vm1360_vm5, %v1757_v8  ;;  %6894 = vmatmul.mubr.msk.f32.gmra.mrb[44].mxu0 %vm2029_vm8, %v2012_v7 }
 0x316   : > { %1790 = vst.msk [vmem:[#allocation2 + $0xbc] sm:$0xff] %vm1360_vm5, %v1751_v9  ;;  %6896 = vmatprep.mubr.msk.f32.mxu0 %vm11943_vm0, %v12027_v15 }
 0x318   : > { %v1853_v13 = vpop.permute.xlu1 %1852 }
 0x319   : > { %v1847_v19 = vpop.permute.xlu0 %1846  ;;  %v2015_v12 = vld [vmem:[#allocation2 + $0xc8] sm:$0xff]  ;;  %1889 = vst.msk [vmem:[#allocation2 + $0xd4] sm:$0xff] %vm1458_vm6, %v1853_v13 }
 0x31a   : > { %1886 = vst.msk [vmem:[#allocation2 + $0xbc] sm:$0xff] %vm1458_vm6, %v1847_v19  ;;  %6903 = vmatmul.mubr.msk.f32.vlgmr.msra.gmra.mrb[0].mxu1 %vm2029_vm8, %v2015_v12 }
 0x31b   : > { %6905 = vmatprep.mubr.msk.f32.mxu1 %vm11943_vm0, %v12027_v15 }
 0x31c   : > { %v1943_v11 = vpop.permute.xlu1 %1942 }
 0x31d   : > { %v1631_v4 = vpop.permute.xlu0 %1630  ;;  %1982 = vst.msk [vmem:[#allocation2 + $0xbc] sm:$0xff] %vm1556_vm7, %v1943_v11 }
 0x31e   : > { %1666 = vst.msk [vmem:[#allocation2 + $0xdc] sm:$0xff] %vm1164_vm1, %v1631_v4 }
 0x31f   : > { %1698 = vst.msk [vmem:[#allocation2 + $0xdc] sm:$0xff] %vm1262_vm4, %v1682_v14 }
 0x320   : > { %v1759_v22 = vpop.permute.xlu1 %1758 }
 0x321   : > { %v1949_v20 = vpop.permute.xlu0 %1948  ;;  %1794 = vst.msk [vmem:[#allocation2 + $0xdc] sm:$0xff] %vm1360_vm5, %v1759_v22 }
 0x322   : > { %1985 = vst.msk [vmem:[#allocation2 + $0xd4] sm:$0xff] %vm1556_vm7, %v1949_v20 }
 0x323   : > { %v9362_v24 = vpop.f32.mrb[0].mxu0 }
 0x324   : > { %v6829_v21 = vpop.f32.mrb[1].mxu0  ;;  %v2013_v27 = vld [vmem:[#allocation2 + $0xb8] sm:$0xff]  ;;  %v1633_v29 = vpop.permute.xlu1 %1632  ;;  %v2014_v0 = vld [vmem:[#allocation2 + $0xc0] sm:$0xff] }
 0x325   : > { %v1855_v46 = vpop.permute.xlu0 %1854  ;;  %6897 = vmatmul.mubr.msk.f32.gmra.mrb[46].mxu0 %vm2029_vm8, %v2013_v27  ;;  %1667 = vst.msk [vmem:[#allocation2 + $0xe4] sm:$0xff] %vm1164_vm1, %v1633_v29 }
 0x326   : > { %1890 = vst.msk [vmem:[#allocation2 + $0xdc] sm:$0xff] %vm1458_vm6, %v1855_v46  ;;  %6899 = vmatprep.mubr.msk.f32.mxu0 %vm11943_vm0, %v12027_v15  ;;  %v9409_v46 = vld [vmem:[%s881_s26] ss:$0 sm:$0xff]  ;;  %s9819_s26 = smul.u32 80, %s12070_s2 }
 0x327   : > { %1699 = vst.msk [vmem:[#allocation2 + $0xe4] sm:$0xff] %vm1262_vm4, %v1683_v23  ;;  %v9419_v29 = vadd.f32 %v9409_v46, %v9362_v24 }
 0x328   : > { %v1761_v32 = vpop.permute.xlu1 %1760  ;;  %s9859_s13 = scalar_lea.vmem %s12041_s29, %s9819_s26  ;;  %s12062_s29 = scalar_lea.vmem [#allocation23], %s8567_s22 }
 0x329   : > { %v1951_v26 = vpop.permute.xlu0 %1950  ;;  %v2016_v28 = vld [vmem:[#allocation2 + $0xd0] sm:$0xff]  ;;  %6900 = vmatmul.mubr.msk.f32.gmra.mrb[48].mxu0 %vm2029_vm8, %v2014_v0  ;;  %1795 = vst.msk [vmem:[#allocation2 + $0xe4] sm:$0xff] %vm1360_vm5, %v1761_v32 }
 0x32a   : > { %1986 = vst.msk [vmem:[#allocation2 + $0xdc] sm:$0xff] %vm1556_vm7, %v1951_v26  ;;  %6906 = vmatmul.mubr.msk.f32.gmra.mrb[2].mxu1 %vm2029_vm8, %v2016_v28  ;;  %v9375_v34 = vpop.f32.mrb[2].mxu0 }
 0x32b   : > { %6908 = vmatprep.mubr.msk.f32.mxu1 %vm11943_vm0, %v12027_v15  ;;  %v6832_v31 = vpop.f32.mrb[3].mxu0  ;;  %v9413_v23 = vadd.f32 %v9409_v46, %v9375_v34  ;;  %v2348_v34 = vsel %vm2347_vm13, %v9419_v29, 0.0 }
 0x32c   : > { %v1635_v37 = vpop.permute.xlu1 %1634 }
 0x32d   : > { %v1857_v6 = vpop.permute.xlu0 %1856  ;;  %1668 = vst.msk [vmem:[#allocation2 + $0xec] sm:$0xff] %vm1164_vm1, %v1635_v37  ;;  %v2349_v28 = vsel %vm2347_vm13, %v9413_v23, 0.0  ;;  %vm2735_vm1 = vcmask 261248  }
 0x32e   : > { %1891 = vst.msk [vmem:[#allocation2 + $0xe4] sm:$0xff] %vm1458_vm6, %v1857_v6  ;;  %v2350_v6 = vadd.f32 %v2349_v28, %v2348_v34 }
 0x32f   : > { %1700 = vst.msk [vmem:[#allocation2 + $0xec] sm:$0xff] %vm1262_vm4, %v1684_v33  ;;  %vm2802_vm4 = vcmask 392448  }
 0x330   : > { %v1763_v25 = vpop.permute.xlu1 %1762 }
 0x331   : > { %v1953_v41 = vpop.permute.xlu0 %1952  ;;  %v2017_v42 = vld [vmem:[#allocation2 + $0xd8] sm:$0xff]  ;;  %1796 = vst.msk [vmem:[#allocation2 + $0xec] sm:$0xff] %vm1360_vm5, %v1763_v25  ;;  %vm2869_vm5 = vcmask 523648  }
 0x332   : > { %1987 = vst.msk [vmem:[#allocation2 + $0xe4] sm:$0xff] %vm1556_vm7, %v1953_v41  ;;  %6909 = vmatmul.mubr.msk.f32.gmra.mrb[4].mxu1 %vm2029_vm8, %v2017_v42  ;;  %v9386_v39 = vpop.f32.mrb[4].mxu0 }
 0x333   : > { %6911 = vmatprep.mubr.msk.f32.mxu1 %vm11943_vm0, %v12027_v15  ;;  %v6835_v36 = vpop.f32.mrb[5].mxu0  ;;  %v9423_v26 = vadd.f32 %v9409_v46, %v9386_v39 }
 0x334   : > { %v1637_v40 = vpop.permute.xlu1 %1636 }
 0x335   : > { %v1859_v54 = vpop.permute.xlu0 %1858  ;;  %1669 = vst.msk [vmem:[#allocation2 + $0xf4] sm:$0xf] %vm1180_vm3, %v1637_v40  ;;  %v2351_v31 = vsel %vm2347_vm13, %v9423_v26, 0.0  ;;  %vm11953_vm3 = vcmask 392450  }
 0x336   : > { %1892 = vst.msk [vmem:[#allocation2 + $0xec] sm:$0xff] %vm1458_vm6, %v1859_v54  ;;  %v2352_v41 = vadd.f32 %v2351_v31, %v2350_v6  ;;  %vm11952_vm6 = vcmask 523651  }
 0x337   : > { %1701 = vst.msk [vmem:[#allocation2 + $0xf4] sm:$0xf] %vm1278_vm9, %v1685_v49  ;;  %vm3282_vm9 = vcmask 654336  }
 0x338   : > { %v1765_v44 = vpop.permute.xlu1 %1764 }
 0x339   : > { %v1955_v52 = vpop.permute.xlu0 %1954  ;;  %v2018_v38 = vld [vmem:[#allocation2 + $0xe0] sm:$0xff]  ;;  %1797 = vst.msk [vmem:[#allocation2 + $0xf4] sm:$0xf] %vm1376_vm10, %v1765_v44  ;;  %vm11946_vm10 = vcmask 254080  }
 0x33a   : > { %1988 = vst.msk [vmem:[#allocation2 + $0xec] sm:$0xff] %vm1556_vm7, %v1955_v52  ;;  %6912 = vmatmul.mubr.msk.f32.gmra.mrb[6].mxu1 %vm2029_vm8, %v2018_v38  ;;  %v2208_v57 = vpop.f32.mrb[6].mxu0  ;;  %vm11951_vm7 = vcmask 654852  }
 0x33b   : > { %6914 = vmatprep.mubr.msk.f32.mxu1 %vm11943_vm0, %v12027_v15  ;;  %v6838_v30 = vpop.f32.mrb[7].mxu0  ;;  %v9428_v32 = vadd.f32 %v9409_v46, %v2208_v57 }
 0x33c   : > { %v1957_v53 = vpop.permute.xlu1 %1956 }
 0x33d   : > { %v1861_v43 = vpop.permute.xlu0 %1860  ;;  %v2353_v33 = vsel %vm2347_vm13, %v9428_v32, 0.0 }
 0x33e   : > { %1893 = vst.msk [vmem:[#allocation2 + $0xf4] sm:$0xf] %vm1474_vm11, %v1861_v43  ;;  %v2354_v39 = vadd.f32 %v2353_v33, %v2352_v41  ;;  %vm11945_vm11 = vcmask 261253  }
 0x33f   : > { %1989 = vst.msk [vmem:[#allocation2 + $0xf4] sm:$0xf] %vm1572_vm12, %v1957_v53  ;;  %vm2817_vm12 = vcmask 386304  }
 0x341   : > { %v2019_v56 = vld [vmem:[#allocation2 + $0xe8] sm:$0xff] }
 0x342   : > { %6915 = vmatmul.mubr.msk.f32.gmra.mrb[8].mxu1 %vm2029_vm8, %v2019_v56  ;;  %v2213_v51 = vpop.f32.mrb[8].mxu0 }
 0x343   : > { %6917 = vmatprep.mubr.msk.f32.mxu1 %vm11943_vm0, %v12027_v15  ;;  %v6841_v5 = vpop.f32.mrb[9].mxu0  ;;  %v9435_v24 = vadd.f32 %v9409_v46, %v2213_v51  ;;  %vm11947_vm0 = vcmask 392454  }
 0x345   : > { %v2355_v42 = vsel %vm2347_vm13, %v9435_v24, 0.0 }
 0x346   : > { %v2020_v59 = vld [vmem:[#allocation2 + $0xf0] sm:$0xff]  ;;  %v2356_v49 = vadd.f32 %v2355_v42, %v2354_v39 }
 0x347   : > { %6918 = vmatmul.mubr.msk.f32.gmra.mrb[10].mxu1 %vm2029_vm8, %v2020_v59  ;;  %vm2936_vm8 = vcmask 654848  }
 0x34a   : > { %v2218_v45 = vpop.f32.mrb[10].mxu0 }
 0x34b   : > { %v6844_v62 = vpop.f32.mrb[11].mxu0  ;;  %v9440_v37 = vadd.f32 %v9409_v46, %v2218_v45 }
 0x34d   : > { %v2357_v36 = vsel %vm2347_vm13, %v9440_v37, 0.0 }
 0x34e   : > { %v2358_v57 = vadd.f32 %v2357_v36, %v2356_v49 }
 0x352   : > { %v2223_v48 = vpop.f32.mrb[12].mxu0 }
 0x353   : > { %v6847_v47 = vpop.f32.mrb[13].mxu0  ;;  %v9445_v25 = vadd.f32 %v9409_v46, %v2223_v48 }
 0x355   : > { %v2359_v52 = vsel %vm2347_vm13, %v9445_v25, 0.0 }
 0x356   : > { %v2360_v53 = vadd.f32 %v2359_v52, %v2358_v57 }
 0x35a   : > { %v2228_v58 = vpop.f32.mrb[14].mxu0 }
 0x35b   : > { %v6850_v61 = vpop.f32.mrb[15].mxu0  ;;  %v9450_v54 = vadd.f32 %v9409_v46, %v2228_v58 }
 0x35d   : > { %v2361_v30 = vsel %vm2347_vm13, %v9450_v54, 0.0 }
 0x35e   : > { %v2362_v5 = vadd.f32 %v2361_v30, %v2360_v53 }
 0x362   : > { %v2233_v16 = vpop.f32.mrb[16].mxu0 }
 0x363   : > { %v6853_v17 = vpop.f32.mrb[17].mxu0  ;;  %v9455_v38 = vadd.f32 %v9409_v46, %v2233_v16 }
 0x365   : > { %v2363_v56 = vsel %vm2347_vm13, %v9455_v38, 0.0 }
 0x366   : > { %v2364_v62 = vadd.f32 %v2363_v56, %v2362_v5 }
 0x36a   : > { %v2238_v2 = vpop.f32.mrb[18].mxu0 }
 0x36b   : > { %v6856_v63 = vpop.f32.mrb[19].mxu0  ;;  %v9460_v43 = vadd.f32 %v9409_v46, %v2238_v2 }
 0x36d   : > { %v2365_v59 = vsel %vm2347_vm13, %v9460_v43, 0.0 }
 0x36e   : > { %v2366_v58 = vadd.f32 %v2365_v59, %v2364_v62 }
 0x372   : > { %v2243_v55 = vpop.f32.mrb[20].mxu0 }
 0x373   : > { %v6859_v60 = vpop.f32.mrb[21].mxu0  ;;  %v9465_v51 = vadd.f32 %v9409_v46, %v2243_v55 }
 0x375   : > { %v2367_v48 = vsel %vm2347_vm13, %v9465_v51, 0.0 }
 0x376   : > { %v2368_v17 = vadd.f32 %v2367_v48, %v2366_v58 }
 0x37a   : > { %v2248_v3 = vpop.f32.mrb[22].mxu0 }
 0x37b   : > { %v6862_v10 = vpop.f32.mrb[23].mxu0  ;;  %v9470_v45 = vadd.f32 %v9409_v46, %v2248_v3 }
 0x37d   : > { %v2369_v61 = vsel %vm2347_vm13, %v9470_v45, 0.0 }
 0x37e   : > { %v2370_v55 = vadd.f32 %v2369_v61, %v2368_v17 }
 0x382   : > { %v2253_v1 = vpop.f32.mrb[24].mxu0 }
 0x383   : > { %v6865_v35 = vpop.f32.mrb[25].mxu0  ;;  %v9475_v47 = vadd.f32 %v9409_v46, %v2253_v1 }
 0x385   : > { %v2371_v2 = vsel %vm2347_vm13, %v9475_v47, 0.0 }
 0x386   : > { %v2372_v10 = vadd.f32 %v2371_v2, %v2370_v55 }
 0x38a   : > { %v2258_v50 = vpop.f32.mrb[26].mxu0 }
 0x38b   : > { %v6868_v18 = vpop.f32.mrb[27].mxu0  ;;  %v9480_v16 = vadd.f32 %v9409_v46, %v2258_v50 }
 0x38d   : > { %v2373_v60 = vsel %vm2347_vm13, %v9480_v16, 0.0 }
 0x392   : > { %v2263_v8 = vpop.f32.mrb[28].mxu0 }
 0x393   : > { %v6871_v9 = vpop.f32.mrb[29].mxu0  ;;  %v9485_v63 = vadd.f32 %v9409_v46, %v2263_v8 }
 0x394   : > { %v2374_v9 = vadd.f32 %v2373_v60, %v2372_v10 }
 0x395   : > { %v2375_v35 = vsel %vm2347_vm13, %v9485_v63, 0.0 }
 0x3a5   : > { %v2268_v7 = vpop.f32.mrb[30].mxu0 }
 0x3a6   : > { %v6874_v13 = vpop.f32.mrb[31].mxu0  ;;  %v9490_v3 = vadd.f32 %v9409_v46, %v2268_v7 }
 0x3a8   : > { %v2377_v8 = vsel %vm2347_vm13, %v9490_v3, 0.0 }
 0x3ad   : > { %v2273_v19 = vpop.f32.mrb[32].mxu0 }
 0x3ae   : > { %v6877_v12 = vpop.f32.mrb[33].mxu0  ;;  %v9495_v50 = vadd.f32 %v9409_v46, %v2273_v19 }
 0x3af   : > { %v2376_v12 = vadd.f32 %v2375_v35, %v2374_v9 }
 0x3b0   : > { %v2379_v7 = vsel %vm2347_vm13, %v9495_v50, 0.0 }
 0x3b5   : > { %v2278_v14 = vpop.f32.mrb[34].mxu0 }
 0x3b6   : > { %v6880_v11 = vpop.f32.mrb[35].mxu0  ;;  %v9500_v13 = vadd.f32 %v9409_v46, %v2278_v14 }
 0x3b8   : > { %v2381_v19 = vsel %vm2347_vm13, %v9500_v13, 0.0 }
 0x3bd   : > { %v2283_v4 = vpop.f32.mrb[36].mxu0 }
 0x3be   : > { %v6883_v20 = vpop.f32.mrb[37].mxu0 }
 0x3bf   : > { %v9505_v20 = vadd.f32 %v9409_v46, %v2283_v4 }
 0x3c1   : > { %v2383_v14 = vsel %vm2347_vm13, %v9505_v20, 0.0 }
 0x3c5   : > { %v9405_v22 = vpop.f32.mrb[38].mxu0 }
 0x3c6   : > { %v6886_v21 = vpop.f32.mrb[39].mxu0  ;;  %v9511_v28 = vadd.f32 %v9409_v46, %v9405_v22 }
 0x3c8   : > { %v2385_v4 = vsel %vm2347_vm13, %v9511_v28, 0.0 }
 0x3cd   : > { %v9415_v27 = vpop.f32.mrb[40].mxu0 }
 0x3ce   : > { %v6889_v0 = vpop.f32.mrb[41].mxu0  ;;  %v9517_v31 = vadd.f32 %v9409_v46, %v9415_v27 }
 0x3cf   : > { %v2378_v0 = vadd.f32 %v2377_v8, %v2376_v12 }
 0x3d0   : > { %v2387_v22 = vsel %vm2347_vm13, %v9517_v31, 0.0 }
 0x3d1   : > { %v2380_v34 = vadd.f32 %v2379_v7, %v2378_v0 }
 0x3d3   : > { %v2382_v6 = vadd.f32 %v2381_v19, %v2380_v34 }
 0x3d5   : > { %v2384_v41 = vadd.f32 %v2383_v14, %v2382_v6 }
 0x3d7   : > { %v2386_v39 = vadd.f32 %v2385_v4, %v2384_v41 }
 0x3d9   : > { %v2298_v40 = vpop.f32.mrb[42].mxu0  ;;  %v2388_v27 = vadd.f32 %v2387_v22, %v2386_v39 }
 0x3da   : > { %v6892_v44 = vpop.f32.mrb[43].mxu0  ;;  %v9522_v33 = vadd.f32 %v9409_v46, %v2298_v40 }
 0x3dc   : > { %v2389_v36 = vsel %vm2347_vm13, %v9522_v33, 0.0 }
 0x3dd   : > { %v2390_v57 = vadd.f32 %v2389_v36, %v2388_v27 }
 0x3e8   : > { %v2303_v1 = vpop.f32.mrb[44].mxu0 }
 0x3e9   : > { %v6895_v18 = vpop.f32.mrb[45].mxu0  ;;  %v9527_v42 = vadd.f32 %v9409_v46, %v2303_v1 }
 0x3eb   : > { %v2391_v52 = vsel %vm2347_vm13, %v9527_v42, 0.0 }
 0x3ec   : > { %v2392_v53 = vadd.f32 %v2391_v52, %v2390_v57 }
 0x3ed   : > { %v2318_v11 = vpop.f32.mrb[0].mxu1 }
 0x3ee   : > { %v6904_v21 = vpop.f32.mrb[1].mxu1  ;;  %v9536_v59 = vadd.f32 %v9409_v46, %v2318_v11 }
 0x3f0   : > { %v2397_v60 = vsel %vm2347_vm13, %v9536_v59, 0.0 }
 0x3f8   : > { %v2308_v49 = vpop.f32.mrb[46].mxu0 }
 0x3f9   : > { %v2309_v44 = vadd.f32 %v9409_v46, %v2308_v49  ;;  %v6898_v40 = vpop.f32.mrb[47].mxu0 }
 0x3fb   : > { %v2393_v30 = vsel %vm2347_vm13, %v2309_v44, 0.0 }
 0x3fc   : > { %v2313_v56 = vpop.f32.mrb[48].mxu0  ;;  %v2394_v61 = vadd.f32 %v2393_v30, %v2392_v53 }
 0x3fd   : > { %v2323_v5 = vpop.f32.mrb[2].mxu1  ;;  %v2314_v62 = vadd.f32 %v9409_v46, %v2313_v56  ;;  %v6901_v48 = vpop.f32.mrb[49].mxu0 }
 0x3fe   : > { %v6907_v58 = vpop.f32.mrb[3].mxu1  ;;  %v2324_v2 = vadd.f32 %v9409_v46, %v2323_v5 }
 0x3ff   : > { %v2395_v17 = vsel %vm2347_vm13, %v2314_v62, 0.0 }
 0x400   : > { %v2396_v55 = vadd.f32 %v2395_v17, %v2394_v61  ;;  %v2399_v1 = vsel %vm2347_vm13, %v2324_v2, 0.0 }
 0x402   : > { %v2398_v10 = vadd.f32 %v2397_v60, %v2396_v55 }
 0x404   : > { %v2400_v35 = vadd.f32 %v2399_v1, %v2398_v10 }
 0x405   : > { %v2328_v18 = vpop.f32.mrb[4].mxu1 }
 0x406   : > { %v2329_v9 = vadd.f32 %v9409_v46, %v2328_v18  ;;  %v6910_v8 = vpop.f32.mrb[5].mxu1 }
 0x408   : > { %v2401_v12 = vsel %vm2347_vm13, %v2329_v9, 0.0 }
 0x409   : > { %v2402_v11 = vadd.f32 %v2401_v12, %v2400_v35 }
 0x40d   : > { %v2333_v7 = vpop.f32.mrb[6].mxu1 }
 0x40e   : > { %v2334_v21 = vadd.f32 %v9409_v46, %v2333_v7  ;;  %v6913_v0 = vpop.f32.mrb[7].mxu1 }
 0x410   : > { %v2403_v19 = vsel %vm2347_vm13, %v2334_v21, 0.0 }
 0x411   : > { %v2404_v34 = vadd.f32 %v2403_v19, %v2402_v11 }
 0x415   : > { %v2338_v14 = vpop.f32.mrb[8].mxu1 }
 0x416   : > { %v2339_v6 = vadd.f32 %v9409_v46, %v2338_v14  ;;  %v6916_v4 = vpop.f32.mrb[9].mxu1 }
 0x418   : > { %v2405_v41 = vsel %vm2347_vm13, %v2339_v6, 0.0 }
 0x419   : > { %v2406_v22 = vadd.f32 %v2405_v41, %v2404_v34 }
 0x41a   : > { %v2343_v39 = vpop.f32.mrb[10].mxu1 }
 0x41b   : > { %v2344_v36 = vadd.f32 %v9409_v46, %v2343_v39  ;;  %v6919_v27 = vpop.f32.mrb[11].mxu1 }
 0x41d   : > { %v2407_v49 = vsel %vm2347_vm13, %v2344_v36, 0.0 }
 0x41e   : > { %v2408_v52 = vadd.f32 %v2407_v49, %v2406_v22 }
 0x420   : > { %v2409_v40 = vrot.slane %v2408_v52, 4 }
 0x422   : > { %v2410_v57 = vadd.f32 %v2409_v40, %v2408_v52 }
 0x424   : > { %v2411_v30 = vrot.slane %v2410_v57, 2 }
 0x426   : > { %v2412_v53 = vadd.f32 %v2411_v30, %v2410_v57 }
 0x428   : > { %v2413_v56 = vrot.slane %v2412_v53, 1 }
 0x42a   : > { %v2414_v5 = vadd.f32 %v2413_v56, %v2412_v53 }
 0x42c   : > { %v9552_v48 = vmul.f32 0.004032258, %v2414_v5 }
 0x42e   : > { %v9555_v58 = vsub.f32 %v2309_v44, %v9552_v48  ;;  %v9559_v61 = vsub.f32 %v9419_v29, %v9552_v48  ;;  %v9562_v46 = vsub.f32 %v2314_v62, %v9552_v48  ;;  %v9565_v17 = vsub.f32 %v2324_v2, %v9552_v48 }
 0x42f   : > { %v9568_v55 = vsub.f32 %v2329_v9, %v9552_v48  ;;  %v9572_v60 = vsub.f32 %v9413_v23, %v9552_v48  ;;  %v9575_v44 = vsub.f32 %v2334_v21, %v9552_v48  ;;  %v9578_v10 = vsub.f32 %v2339_v6, %v9552_v48 }
 0x430   : > { %v9581_v29 = vsub.f32 %v2344_v36, %v9552_v48  ;;  %v9585_v62 = vsub.f32 %v9423_v26, %v9552_v48  ;;  %v9589_v2 = vsub.f32 %v9428_v32, %v9552_v48  ;;  %v2447_v23 = vmul.f32 %v9559_v61, %v9559_v61 }
 0x431   : > { %v2448_v1 = vmul.f32 %v9572_v60, %v9572_v60  ;;  %v9597_v35 = vsub.f32 %v9435_v24, %v9552_v48  ;;  %v9603_v26 = vsub.f32 %v9440_v37, %v9552_v48  ;;  %v9611_v11 = vsub.f32 %v9445_v25, %v9552_v48 }
 0x432   : > { %v2449_v18 = vmul.f32 %v9585_v62, %v9585_v62  ;;  %v2450_v32 = vmul.f32 %v9589_v2, %v9589_v2  ;;  %v2478_v9 = vsel %vm2347_vm13, %v2447_v23, 0.0  ;;  %v9618_v37 = vsub.f32 %v9450_v54, %v9552_v48 }
 0x433   : > { %v2479_v8 = vsel %vm2347_vm13, %v2448_v1, 0.0  ;;  %v2451_v24 = vmul.f32 %v9597_v35, %v9597_v35  ;;  %v2452_v0 = vmul.f32 %v9603_v26, %v9603_v26  ;;  %v9625_v25 = vsub.f32 %v9455_v38, %v9552_v48 }
 0x434   : > { %v2480_v12 = vadd.f32 %v2479_v8, %v2478_v9  ;;  %v2481_v7 = vsel %vm2347_vm13, %v2449_v18, 0.0  ;;  %v2483_v19 = vsel %vm2347_vm13, %v2450_v32, 0.0  ;;  %v2453_v14 = vmul.f32 %v9611_v11, %v9611_v11 }
 0x435   : > { %v2485_v6 = vsel %vm2347_vm13, %v2451_v24, 0.0  ;;  %v9632_v54 = vsub.f32 %v9460_v43, %v9552_v48  ;;  %v2454_v41 = vmul.f32 %v9618_v37, %v9618_v37  ;;  %v2487_v22 = vsel %vm2347_vm13, %v2452_v0, 0.0 }
 0x436   : > { %v2482_v21 = vadd.f32 %v2481_v7, %v2480_v12  ;;  %v9639_v38 = vsub.f32 %v9465_v51, %v9552_v48  ;;  %v2455_v36 = vmul.f32 %v9625_v25, %v9625_v25  ;;  %v2489_v27 = vsel %vm2347_vm13, %v2453_v14, 0.0 }
 0x437   : > { %v9646_v43 = vsub.f32 %v9470_v45, %v9552_v48  ;;  %v2456_v52 = vmul.f32 %v9632_v54, %v9632_v54  ;;  %v2491_v40 = vsel %vm2347_vm13, %v2454_v41, 0.0  ;;  %v9653_v51 = vsub.f32 %v9475_v47, %v9552_v48 }
 0x438   : > { %v2484_v34 = vadd.f32 %v2483_v19, %v2482_v21  ;;  %v2457_v30 = vmul.f32 %v9639_v38, %v9639_v38  ;;  %v2493_v53 = vsel %vm2347_vm13, %v2455_v36, 0.0  ;;  %v9660_v45 = vsub.f32 %v9480_v16, %v9552_v48 }
 0x439   : > { %v2458_v5 = vmul.f32 %v9646_v43, %v9646_v43  ;;  %v2495_v23 = vsel %vm2347_vm13, %v2456_v52, 0.0  ;;  %v9667_v47 = vsub.f32 %v9485_v63, %v9552_v48  ;;  %v2459_v18 = vmul.f32 %v9653_v51, %v9653_v51 }
 0x43a   : > { %v2486_v4 = vadd.f32 %v2485_v6, %v2484_v34  ;;  %v2497_v32 = vsel %vm2347_vm13, %v2457_v30, 0.0  ;;  %v9674_v16 = vsub.f32 %v9490_v3, %v9552_v48  ;;  %v2460_v8 = vmul.f32 %v9660_v45, %v9660_v45 }
 0x43b   : > { %v2499_v12 = vsel %vm2347_vm13, %v2458_v5, 0.0  ;;  %v9681_v63 = vsub.f32 %v9495_v50, %v9552_v48  ;;  %v2461_v7 = vmul.f32 %v9667_v47, %v9667_v47  ;;  %v2501_v21 = vsel %vm2347_vm13, %v2459_v18, 0.0 }
 0x43c   : > { %v2488_v39 = vadd.f32 %v2487_v22, %v2486_v4  ;;  %v9688_v3 = vsub.f32 %v9500_v13, %v9552_v48  ;;  %v2462_v19 = vmul.f32 %v9674_v16, %v9674_v16  ;;  %v2503_v34 = vsel %vm2347_vm13, %v2460_v8, 0.0 }
 0x43d   : > { %v9695_v50 = vsub.f32 %v9505_v20, %v9552_v48  ;;  %v2463_v6 = vmul.f32 %v9681_v63, %v9681_v63  ;;  %v2505_v4 = vsel %vm2347_vm13, %v2461_v7, 0.0  ;;  %v9702_v13 = vsub.f32 %v9511_v28, %v9552_v48 }
 0x43e   : > { %v2490_v49 = vadd.f32 %v2489_v27, %v2488_v39  ;;  %v2464_v22 = vmul.f32 %v9688_v3, %v9688_v3  ;;  %v2507_v39 = vsel %vm2347_vm13, %v2462_v19, 0.0  ;;  %v9709_v20 = vsub.f32 %v9517_v31, %v9552_v48 }
 0x43f   : > { %v2465_v27 = vmul.f32 %v9695_v50, %v9695_v50  ;;  %v9716_v28 = vsub.f32 %v9522_v33, %v9552_v48  ;;  %v9723_v31 = vsub.f32 %v9527_v42, %v9552_v48  ;;  %v9736_v42 = vsub.f32 %v9536_v59, %v9552_v48 }
 0x440   : > { %v2492_v57 = vadd.f32 %v2491_v40, %v2490_v49  ;;  %v2509_v49 = vsel %vm2347_vm13, %v2463_v6, 0.0  ;;  %v2466_v40 = vmul.f32 %v9702_v13, %v9702_v13  ;;  %v2470_v8 = vmul.f32 %v9555_v58, %v9555_v58 }
 0x441   : > { %v2468_v33 = vmul.f32 %v9716_v28, %v9716_v28  ;;  %v2469_v18 = vmul.f32 %v9723_v31, %v9723_v31  ;;  %v2471_v7 = vmul.f32 %v9562_v46, %v9562_v46  ;;  %v2472_v19 = vmul.f32 %v9736_v42, %v9736_v42 }
 0x442   : > { %v2494_v56 = vadd.f32 %v2493_v53, %v2492_v57  ;;  %v2511_v57 = vsel %vm2347_vm13, %v2464_v22, 0.0  ;;  %v2467_v53 = vmul.f32 %v9709_v20, %v9709_v20  ;;  %v2473_v59 = vmul.f32 %v9565_v17, %v9565_v17 }
 0x443   : > { %v2525_v48 = vsel %vm2347_vm13, %v2471_v7, 0.0 }
 0x444   : > { %v2496_v1 = vadd.f32 %v2495_v23, %v2494_v56  ;;  %v2513_v56 = vsel %vm2347_vm13, %v2465_v27, 0.0  ;;  %v2515_v23 = vsel %vm2347_vm13, %v2466_v40, 0.0 }
 0x446   : > { %v2498_v9 = vadd.f32 %v2497_v32, %v2496_v1  ;;  %v2517_v32 = vsel %vm2347_vm13, %v2467_v53, 0.0 }
 0x448   : > { %v2500_v24 = vadd.f32 %v2499_v12, %v2498_v9  ;;  %v2519_v12 = vsel %vm2347_vm13, %v2468_v33, 0.0 }
 0x44a   : > { %v2502_v0 = vadd.f32 %v2501_v21, %v2500_v24  ;;  %v2521_v21 = vsel %vm2347_vm13, %v2469_v18, 0.0 }
 0x44c   : > { %v2504_v14 = vadd.f32 %v2503_v34, %v2502_v0  ;;  %v2523_v34 = vsel %vm2347_vm13, %v2470_v8, 0.0 }
 0x44e   : > { %v2506_v41 = vadd.f32 %v2505_v4, %v2504_v14  ;;  %v2474_v4 = vmul.f32 %v9568_v55, %v9568_v55 }
 0x450   : > { %v2508_v36 = vadd.f32 %v2507_v39, %v2506_v41  ;;  %v2527_v41 = vsel %vm2347_vm13, %v2472_v19, 0.0  ;;  %v2475_v39 = vmul.f32 %v9575_v44, %v9575_v44  ;;  %v2548_v19 = vld [vmem:[%s889_s6] sm:$0x1]  ;;  %s8000_s6 = smov 16  }
 0x452   : > { %v2510_v52 = vadd.f32 %v2509_v49, %v2508_v36  ;;  %v2529_v36 = vsel %vm2347_vm13, %v2473_v59, 0.0  ;;  %v2476_v49 = vmul.f32 %v9578_v10, %v9578_v10 }
 0x454   : > { %v2512_v30 = vadd.f32 %v2511_v57, %v2510_v52  ;;  %v2531_v52 = vsel %vm2347_vm13, %v2474_v4, 0.0  ;;  %v2477_v57 = vmul.f32 %v9581_v29, %v9581_v29 }
 0x456   : > { %v2514_v5 = vadd.f32 %v2513_v56, %v2512_v30  ;;  %v2533_v30 = vsel %vm2347_vm13, %v2475_v39, 0.0  ;;  %v2535_v56 = vsel %vm2347_vm13, %v2476_v49, 0.0  ;;  %v2537_v33 = vsel %vm2347_vm13, %v2477_v57, 0.0 }
 0x458   : > { %v2516_v1 = vadd.f32 %v2515_v23, %v2514_v5 }
 0x45a   : > { %v2518_v9 = vadd.f32 %v2517_v32, %v2516_v1 }
 0x45c   : > { %v2520_v24 = vadd.f32 %v2519_v12, %v2518_v9 }
 0x45e   : > { %v2522_v0 = vadd.f32 %v2521_v21, %v2520_v24  ;;  %v2550_v21 = vlaneseq }
 0x460   : > { %v2524_v14 = vadd.f32 %v2523_v34, %v2522_v0  ;;  %v9764_v0 = vshrl.u32 %v2550_v21, 7  ;;  %v3265_v21 = vld [vmem:[%s9859_s13] sm:$0xff] }
 0x462   : > { %v2526_v6 = vadd.f32 %v2525_v48, %v2524_v14  ;;  %v9769_v34 = vsub.s32 0, %v9764_v0 }
 0x464   : > { %v2528_v22 = vadd.f32 %v2527_v41, %v2526_v6  ;;  %v9776_v6 = vld [vmem:[%s897_s5] ss:$0 sm:$0xff]  ;;  %s11211_s5 = scalar_lea.vmem %s12050_s23, %s9819_s26 }
 0x466   : > { %v2530_v27 = vadd.f32 %v2529_v36, %v2528_v22 }
 0x468   : > { %v2532_v40 = vadd.f32 %v2531_v52, %v2530_v27 }
 0x46a   : > { %v2534_v53 = vadd.f32 %v2533_v30, %v2532_v40 }
 0x46c   : > { %v2536_v5 = vadd.f32 %v2535_v56, %v2534_v53 }
 0x46e   : > { %v2538_v23 = vadd.f32 %v2537_v33, %v2536_v5 }
 0x470   : > { %v2539_v1 = vrot.slane %v2538_v23, 4 }
 0x472   : > { %v2540_v18 = vadd.f32 %v2539_v1, %v2538_v23 }
 0x474   : > { %v2541_v32 = vrot.slane %v2540_v18, 2 }
 0x476   : > { %v2542_v9 = vadd.f32 %v2541_v32, %v2540_v18 }
 0x478   : > { %v2543_v8 = vrot.slane %v2542_v9, 1 }
 0x47a   : > { %v2544_v12 = vadd.f32 %v2543_v8, %v2542_v9 }
 0x47c   : > { %v2545_v24 = vmul.f32 0.004032258, %v2544_v12 }
 0x47e   : > { %v2546_v7 = vadd.f32 1e-05, %v2545_v24 }
 0x480   : > { %7485 = vrsqrt.f32 %v2546_v7 }
 0x48a   : > { %v7486_v14 = vpop.eup %7485 }
 0x48b   : > { %v2549_v59 = vmul.f32 %v7486_v14, %v2548_v19  ;;  %v3266_v19 = vld [vmem:[%s9859_s13 + $0x8] sm:$0xff] }
 0x48d   : > { %v9772_v48 = vrot.slane %v2549_v59, %v9769_v34 }
 0x48f   : > { %v2584_v4 = vmul.f32 %v9772_v48, %v9581_v29  ;;  %v2555_v41 = vmul.f32 %v9772_v48, %v9572_v60  ;;  %v2554_v22 = vmul.f32 %v9772_v48, %v9559_v61  ;;  %v2556_v39 = vmul.f32 %v9772_v48, %v9585_v62 }
 0x490   : > { %v2557_v36 = vmul.f32 %v9772_v48, %v9589_v2  ;;  %v2558_v27 = vmul.f32 %v9772_v48, %v9597_v35  ;;  %v2559_v49 = vmul.f32 %v9772_v48, %v9603_v26  ;;  %v2560_v29 = vmul.f32 %v9772_v48, %v9611_v11 }
 0x491   : > { %v2622_v60 = vadd.f32 %v9776_v6, %v2584_v4  ;;  %v2593_v61 = vadd.f32 %v9776_v6, %v2555_v41  ;;  %v2592_v52 = vadd.f32 %v9776_v6, %v2554_v22  ;;  %v2594_v62 = vadd.f32 %v9776_v6, %v2556_v39  ;;  %v3267_v41 = vld [vmem:[%s9859_s13 + $0x10] sm:$0xff]  ;;  %v3268_v22 = vld [vmem:[%s9859_s13 + $0x18] sm:$0xff] }
 0x492   : > { %v2595_v2 = vadd.f32 %v9776_v6, %v2557_v36  ;;  %v2596_v40 = vadd.f32 %v9776_v6, %v2558_v27  ;;  %v2597_v35 = vadd.f32 %v9776_v6, %v2559_v49  ;;  %v2598_v26 = vadd.f32 %v9776_v6, %v2560_v29 }
 0x493   : > { %v9802_v57 = vmax.f32 %v2622_v60, 0.0  ;;  %v9804_v11 = vmax.f32 %v2593_v61, 0.0  ;;  %v9806_v30 = vmax.f32 %v2592_v52, 0.0  ;;  %v9808_v53 = vmax.f32 %v2594_v62, 0.0 }
 0x494   : > { %v9810_v56 = vmax.f32 %v2595_v2, 0.0  ;;  %v9812_v5 = vmax.f32 %v2596_v40, 0.0  ;;  %v9814_v33 = vmax.f32 %v2597_v35, 0.0  ;;  %v9816_v23 = vmax.f32 %v2598_v26, 0.0  ;;  %v3269_v2 = vld [vmem:[%s9859_s13 + $0x20] sm:$0xff]  ;;  %v3270_v40 = vld [vmem:[%s9859_s13 + $0x28] sm:$0xff] }
 0x495   : > { %2687 = vrot.lane.b32.xlu1 %v9804_v11, %s8000_s6  ;;  %2655 = vst.msk [vmem:[#allocation2 + $0x8] sm:$0xff] %vm2347_vm13, %v9804_v11  ;;  %2685 = vrot.lane.b32.xlu0 %v9806_v30, %s8000_s6  ;;  %2654 = vst.msk [vmem:[#allocation2] sm:$0xff] %vm2347_vm13, %v9806_v30  ;;  %v2561_v1 = vmul.f32 %v9772_v48, %v9618_v37  ;;  %v2562_v18 = vmul.f32 %v9772_v48, %v9625_v25 }
 0x496   : > { %2656 = vst.msk [vmem:[#allocation2 + $0x10] sm:$0xff] %vm2347_vm13, %v9808_v53  ;;  %v2563_v32 = vmul.f32 %v9772_v48, %v9632_v54  ;;  %2657 = vst.msk [vmem:[#allocation2 + $0x18] sm:$0xff] %vm2347_vm13, %v9810_v56  ;;  %v2564_v37 = vmul.f32 %v9772_v48, %v9639_v38  ;;  %v2565_v25 = vmul.f32 %v9772_v48, %v9646_v43 }
 0x497   : > { %2970 = vst.msk [vmem:[#allocation2 + $0xec] sm:$0xf] %vm2969_vm14, %v9802_v57  ;;  %v2566_v54 = vmul.f32 %v9772_v48, %v9653_v51  ;;  %v2567_v9 = vmul.f32 %v9772_v48, %v9660_v45  ;;  %v2599_v8 = vadd.f32 %v9776_v6, %v2561_v1  ;;  %v2600_v38 = vadd.f32 %v9776_v6, %v2562_v18 }
 0x498   : > { %2658 = vst.msk [vmem:[#allocation2 + $0x20] sm:$0xff] %vm2347_vm13, %v9812_v5  ;;  %2659 = vst.msk [vmem:[#allocation2 + $0x28] sm:$0xff] %vm2347_vm13, %v9814_v33  ;;  %v2601_v43 = vadd.f32 %v9776_v6, %v2563_v32  ;;  %v2568_v51 = vmul.f32 %v9772_v48, %v9667_v47  ;;  %v2602_v45 = vadd.f32 %v9776_v6, %v2564_v37 }
 0x499   : > { %2660 = vst.msk [vmem:[#allocation2 + $0x30] sm:$0xff] %vm2347_vm13, %v9816_v23  ;;  %v2603_v12 = vadd.f32 %v9776_v6, %v2565_v25  ;;  %v2604_v24 = vadd.f32 %v9776_v6, %v2566_v54  ;;  %v2605_v7 = vadd.f32 %v9776_v6, %v2567_v9  ;;  %2752 = vrot.lane.b32.xlu1 %v9806_v30, %s8001_s8  ;;  %v9876_v14 = vmax.f32 %v2599_v8, 0.0 }
 0x49a   : > { %2689 = vrot.lane.b32.xlu0 %v9808_v53, %s8000_s6  ;;  %v9878_v47 = vmax.f32 %v2600_v38, 0.0  ;;  %v9880_v59 = vmax.f32 %v2601_v43, 0.0  ;;  %v2606_v4 = vadd.f32 %v9776_v6, %v2568_v51  ;;  %v9885_v39 = vmax.f32 %v2602_v45, 0.0 }
 0x49b   : > { %v9887_v36 = vmax.f32 %v2603_v12, 0.0  ;;  %v9889_v27 = vmax.f32 %v2604_v24, 0.0  ;;  %v9891_v49 = vmax.f32 %v2605_v7, 0.0  ;;  %2661 = vst.msk [vmem:[#allocation2 + $0x38] sm:$0xff] %vm2347_vm13, %v9876_v14  ;;  %v2569_v60 = vmul.f32 %v9772_v48, %v9674_v16 }
 0x49c   : > { %2662 = vst.msk [vmem:[#allocation2 + $0x40] sm:$0xff] %vm2347_vm13, %v9878_v47  ;;  %2663 = vst.msk [vmem:[#allocation2 + $0x48] sm:$0xff] %vm2347_vm13, %v9880_v59  ;;  %v9899_v29 = vmax.f32 %v2606_v4, 0.0  ;;  %v2570_v61 = vmul.f32 %v9772_v48, %v9681_v63  ;;  %v7085_v52 = vpack.c.bf16 %v3266_v19, %v3265_v21  ;;  %v7089_v62 = vpack.c.bf16 %v3268_v22, %v3267_v41 }
 0x49d   : > { %2664 = vst.msk [vmem:[#allocation2 + $0x50] sm:$0xff] %vm2347_vm13, %v9885_v39  ;;  %2665 = vst.msk [vmem:[#allocation2 + $0x58] sm:$0xff] %vm2347_vm13, %v9887_v36  ;;  %v2571_v16 = vmul.f32 %v9772_v48, %v9688_v3  ;;  %2756 = vrot.lane.b32.xlu1 %v9808_v53, %s8001_s8  ;;  %v2607_v63 = vadd.f32 %v9776_v6, %v2569_v60  ;;  %v7093_v26 = vpack.c.bf16 %v3270_v40, %v3269_v2  ;;  %v3274_v60 = vld [vmem:[%s9859_s13 + $0x48] sm:$0xff] }
 0x49e   : > { %2666 = vst.msk [vmem:[#allocation2 + $0x60] sm:$0xff] %vm2347_vm13, %v9889_v27  ;;  %2667 = vst.msk [vmem:[#allocation2 + $0x68] sm:$0xff] %vm2347_vm13, %v9891_v49  ;;  %2754 = vrot.lane.b32.xlu0 %v9804_v11, %s8001_s8  ;;  %v2608_v35 = vadd.f32 %v9776_v6, %v2570_v61  ;;  %7086 = vmatprep.subr.bf16.mxu1 %v7085_v52  ;;  %v2572_v1 = vmul.f32 %v9772_v48, %v9695_v50 }
 0x49f   : > { %2668 = vst.msk [vmem:[#allocation2 + $0x70] sm:$0xff] %vm2347_vm13, %v9899_v29  ;;  %v2609_v3 = vadd.f32 %v9776_v6, %v2571_v16  ;;  %v2573_v18 = vmul.f32 %v9772_v48, %v9702_v13  ;;  %v2574_v32 = vmul.f32 %v9772_v48, %v9709_v20  ;;  %v9932_v37 = vmax.f32 %v2607_v63, 0.0  ;;  %7088 = vmatpush3.bf16.msra.mxu1 %v7085_v52 }
 0x4a0   : > { %v9934_v25 = vmax.f32 %v2608_v35, 0.0  ;;  %v2575_v54 = vmul.f32 %v9772_v48, %v9716_v28  ;;  %v2576_v9 = vmul.f32 %v9772_v48, %v9723_v31  ;;  %7090 = vmatprep.subr.bf16.mxu1 %v7089_v62  ;;  %v2610_v13 = vadd.f32 %v9776_v6, %v2572_v1  ;;  %v3271_v28 = vld [vmem:[%s9859_s13 + $0x30] sm:$0xff]  ;;  %v3272_v31 = vld [vmem:[%s9859_s13 + $0x38] sm:$0xff] }
 0x4a1   : > { %v9940_v50 = vmax.f32 %v2609_v3, 0.0  ;;  %v2611_v8 = vadd.f32 %v9776_v6, %v2573_v18  ;;  %v2612_v20 = vadd.f32 %v9776_v6, %v2574_v32  ;;  %2821 = vrot.lane.b32.xlu1 %v9804_v11, %s8002_s0  ;;  %2954 = vst.msk [vmem:[#allocation2 + $0x74] sm:$0xf0] %vm2953_vm15, %v9932_v37  ;;  %v2577_v24 = vmul.f32 %v9772_v48, %v9555_v58 }
 0x4a2   : > { %2819 = vrot.lane.b32.xlu0 %v9806_v30, %s8002_s0  ;;  %2955 = vst.msk [vmem:[#allocation2 + $0x7c] sm:$0xff] %vm2347_vm13, %v9934_v25  ;;  %v2613_v38 = vadd.f32 %v9776_v6, %v2575_v54  ;;  %v2614_v43 = vadd.f32 %v9776_v6, %v2576_v9  ;;  %v9959_v51 = vmax.f32 %v2610_v13, 0.0  ;;  %v2578_v19 = vmul.f32 %v9772_v48, %v9562_v46 }
 0x4a3   : > { %2956 = vst.msk [vmem:[#allocation2 + $0x84] sm:$0xff] %vm2347_vm13, %v9940_v50  ;;  %v9961_v45 = vmax.f32 %v2611_v8, 0.0  ;;  %v9963_v12 = vmax.f32 %v2612_v20, 0.0  ;;  %7092 = vmatpush3.bf16.msra.mxu1 %v7089_v62  ;;  %v2579_v4 = vmul.f32 %v9772_v48, %v9736_v42  ;;  %v7097_v41 = vpack.c.bf16 %v3272_v31, %v3271_v28  ;;  %v3273_v42 = vld [vmem:[%s9859_s13 + $0x40] sm:$0xff]  ;;  %s8007_s13 = smov 96  }
 0x4a4   : > { %v9967_v7 = vmax.f32 %v2613_v38, 0.0  ;;  %v9969_v21 = vmax.f32 %v2614_v43, 0.0  ;;  %7094 = vmatprep.subr.bf16.mxu1 %v7093_v26  ;;  %2957 = vst.msk [vmem:[#allocation2 + $0x8c] sm:$0xff] %vm2347_vm13, %v9959_v51  ;;  %v2615_v58 = vadd.f32 %v9776_v6, %v2577_v24  ;;  %v2580_v22 = vmul.f32 %v9772_v48, %v9565_v17 }
 0x4a5   : > { %2958 = vst.msk [vmem:[#allocation2 + $0x94] sm:$0xff] %vm2347_vm13, %v9961_v45  ;;  %2959 = vst.msk [vmem:[#allocation2 + $0x9c] sm:$0xff] %vm2347_vm13, %v9963_v12  ;;  %v2581_v46 = vmul.f32 %v9772_v48, %v9568_v55  ;;  %2886 = vrot.lane.b32.xlu1 %v9806_v30, %s8003_s16  ;;  %v2616_v17 = vadd.f32 %v9776_v6, %v2578_v19  ;;  %v2617_v61 = vadd.f32 %v9776_v6, %v2579_v4 }
 0x4a6   : > { %2823 = vrot.lane.b32.xlu0 %v9808_v53, %s8002_s0  ;;  %2960 = vst.msk [vmem:[#allocation2 + $0xa4] sm:$0xff] %vm2347_vm13, %v9967_v7  ;;  %2961 = vst.msk [vmem:[#allocation2 + $0xac] sm:$0xff] %vm2347_vm13, %v9969_v21  ;;  %v9998_v55 = vmax.f32 %v2615_v58, 0.0  ;;  %v2618_v52 = vadd.f32 %v9776_v6, %v2580_v22  ;;  %v2582_v62 = vmul.f32 %v9772_v48, %v9575_v44 }
 0x4a7   : > { %v2619_v30 = vadd.f32 %v9776_v6, %v2581_v46  ;;  %7096 = vmatpush3.bf16.msra.mxu1 %v7093_v26  ;;  %v10004_v16 = vmax.f32 %v2616_v17, 0.0  ;;  %v10006_v2 = vmax.f32 %v2617_v61, 0.0  ;;  %v2583_v40 = vmul.f32 %v9772_v48, %v9578_v10 }
 0x4a8   : > { %7098 = vmatprep.subr.bf16.mxu1 %v7097_v41  ;;  %v7101_v63 = vpack.c.bf16 %v3274_v60, %v3273_v42  ;;  %2962 = vst.msk [vmem:[#allocation2 + $0xb4] sm:$0xff] %vm2347_vm13, %v9998_v55  ;;  %v10012_v35 = vmax.f32 %v2618_v52, 0.0  ;;  %v2620_v1 = vadd.f32 %v9776_v6, %v2582_v62 }
 0x4a9   : > { %v10014_v3 = vmax.f32 %v2619_v30, 0.0  ;;  %2691 = vrot.lane.b32.xlu1 %v9810_v56, %s8000_s6  ;;  %2963 = vst.msk [vmem:[#allocation2 + $0xbc] sm:$0xff] %vm2347_vm13, %v10004_v16  ;;  %2964 = vst.msk [vmem:[#allocation2 + $0xc4] sm:$0xff] %vm2347_vm13, %v10006_v2  ;;  %v2621_v44 = vadd.f32 %v9776_v6, %v2583_v40 }
 0x4aa   : > { %2888 = vrot.lane.b32.xlu0 %v9804_v11, %s8003_s16  ;;  %2965 = vst.msk [vmem:[#allocation2 + $0xcc] sm:$0xff] %vm2347_vm13, %v10012_v35  ;;  %v10030_v10 = vmax.f32 %v2620_v1, 0.0 }
 0x4ab   : > { %2966 = vst.msk [vmem:[#allocation2 + $0xd4] sm:$0xff] %vm2347_vm13, %v10014_v3  ;;  %7100 = vmatpush3.bf16.msra.mxu1 %v7097_v41  ;;  %v10032_v48 = vmax.f32 %v2621_v44, 0.0 }
 0x4ac   : > { %7102 = vmatprep.subr.bf16.mxu1 %v7101_v63  ;;  %2967 = vst.msk [vmem:[#allocation2 + $0xdc] sm:$0xff] %vm2347_vm13, %v10030_v10 }
 0x4ad   : > { %2693 = vrot.lane.b32.xlu1 %v9812_v5, %s8000_s6  ;;  %2968 = vst.msk [vmem:[#allocation2 + $0xe4] sm:$0xff] %vm2347_vm13, %v10032_v48 }
 0x4ae   : > { %2890 = vrot.lane.b32.xlu0 %v9808_v53, %s8003_s16 }
 0x4af   : > { %7104 = vmatpush3.bf16.msra.mxu1 %v7101_v63 }
 0x4b1   : > { %2760 = vrot.lane.b32.xlu1 %v9812_v5, %s8001_s8 }
 0x4b2   : > { %2758 = vrot.lane.b32.xlu0 %v9810_v56, %s8001_s8 }
 0x4b5   : > { %2827 = vrot.lane.b32.xlu1 %v9812_v5, %s8002_s0 }
 0x4b6   : > { %2825 = vrot.lane.b32.xlu0 %v9810_v56, %s8002_s0 }
 0x4b9   : > { %2695 = vrot.lane.b32.xlu1 %v9814_v33, %s8000_s6 }
 0x4ba   : > { %2892 = vrot.lane.b32.xlu0 %v9810_v56, %s8003_s16 }
 0x4bd   : > { %2697 = vrot.lane.b32.xlu1 %v9816_v23, %s8000_s6 }
 0x4be   : > { %2894 = vrot.lane.b32.xlu0 %v9812_v5, %s8003_s16 }
 0x4c1   : > { %2764 = vrot.lane.b32.xlu1 %v9816_v23, %s8001_s8 }
 0x4c2   : > { %2762 = vrot.lane.b32.xlu0 %v9814_v33, %s8001_s8 }
 0x4c5   : > { %2831 = vrot.lane.b32.xlu1 %v9816_v23, %s8002_s0 }
 0x4c6   : > { %2829 = vrot.lane.b32.xlu0 %v9814_v33, %s8002_s0 }
 0x4c9   : > { %2699 = vrot.lane.b32.xlu1 %v9876_v14, %s8000_s6 }
 0x4ca   : > { %2896 = vrot.lane.b32.xlu0 %v9814_v33, %s8003_s16 }
 0x4cd   : > { %2701 = vrot.lane.b32.xlu1 %v9878_v47, %s8000_s6 }
 0x4ce   : > { %2898 = vrot.lane.b32.xlu0 %v9816_v23, %s8003_s16 }
 0x4d1   : > { %2768 = vrot.lane.b32.xlu1 %v9878_v47, %s8001_s8 }
 0x4d2   : > { %2766 = vrot.lane.b32.xlu0 %v9876_v14, %s8001_s8 }
 0x4d5   : > { %2835 = vrot.lane.b32.xlu1 %v9878_v47, %s8002_s0 }
 0x4d6   : > { %2833 = vrot.lane.b32.xlu0 %v9876_v14, %s8002_s0 }
 0x4d9   : > { %2703 = vrot.lane.b32.xlu1 %v9880_v59, %s8000_s6 }
 0x4da   : > { %2900 = vrot.lane.b32.xlu0 %v9876_v14, %s8003_s16 }
 0x4dd   : > { %2705 = vrot.lane.b32.xlu1 %v9885_v39, %s8000_s6 }
 0x4de   : > { %2902 = vrot.lane.b32.xlu0 %v9878_v47, %s8003_s16 }
 0x4e1   : > { %2772 = vrot.lane.b32.xlu1 %v9885_v39, %s8001_s8 }
 0x4e2   : > { %2770 = vrot.lane.b32.xlu0 %v9880_v59, %s8001_s8 }
 0x4e5   : > { %2839 = vrot.lane.b32.xlu1 %v9885_v39, %s8002_s0 }
 0x4e6   : > { %2837 = vrot.lane.b32.xlu0 %v9880_v59, %s8002_s0 }
 0x4e9   : > { %2707 = vrot.lane.b32.xlu1 %v9887_v36, %s8000_s6 }
 0x4ea   : > { %2904 = vrot.lane.b32.xlu0 %v9880_v59, %s8003_s16 }
 0x4ed   : > { %2709 = vrot.lane.b32.xlu1 %v9889_v27, %s8000_s6 }
 0x4ee   : > { %2906 = vrot.lane.b32.xlu0 %v9885_v39, %s8003_s16 }
 0x4f1   : > { %2776 = vrot.lane.b32.xlu1 %v9889_v27, %s8001_s8 }
 0x4f2   : > { %2774 = vrot.lane.b32.xlu0 %v9887_v36, %s8001_s8 }
 0x4f5   : > { %2843 = vrot.lane.b32.xlu1 %v9889_v27, %s8002_s0 }
 0x4f6   : > { %2841 = vrot.lane.b32.xlu0 %v9887_v36, %s8002_s0 }
 0x4f9   : > { %2711 = vrot.lane.b32.xlu1 %v9891_v49, %s8000_s6 }
 0x4fa   : > { %2908 = vrot.lane.b32.xlu0 %v9887_v36, %s8003_s16 }
 0x4fd   : > { %2713 = vrot.lane.b32.xlu1 %v9899_v29, %s8000_s6 }
 0x4fe   : > { %2910 = vrot.lane.b32.xlu0 %v9889_v27, %s8003_s16 }
 0x501   : > { %2780 = vrot.lane.b32.xlu1 %v9899_v29, %s8001_s8 }
 0x502   : > { %2778 = vrot.lane.b32.xlu0 %v9891_v49, %s8001_s8 }
 0x505   : > { %2847 = vrot.lane.b32.xlu1 %v9899_v29, %s8002_s0 }
 0x506   : > { %2845 = vrot.lane.b32.xlu0 %v9891_v49, %s8002_s0 }
 0x507   : > { %v2688_v6 = vpop.permute.xlu1 %2687  ;;  %v2686_v11 = vpop.permute.xlu0 %2685 }
 0x508   : > { %2736 = vst.msk [vmem:[#allocation2 + $0x7] sm:$0xff] %vm2735_vm1, %v2688_v6 }
 0x509   : > { %2734 = vst.msk [vmem:[#allocation2 - $0x1] sm:$0xfe] %vm11954_vm2, %v2686_v11  ;;  %2715 = vrot.lane.b32.xlu1 %v9932_v37, %s8000_s6 }
 0x50a   : > { %2912 = vrot.lane.b32.xlu0 %v9891_v49, %s8003_s16 }
 0x50b   : > { %v2753_v53 = vpop.permute.xlu1 %2752 }
 0x50c   : > { %v2690_v56 = vpop.permute.xlu0 %2689  ;;  %2801 = vst.msk [vmem:[#allocation2 - $0x2] sm:$0xfc] %vm11953_vm3, %v2753_v53 }
 0x50d   : > { %2737 = vst.msk [vmem:[#allocation2 + $0xf] sm:$0xff] %vm2735_vm1, %v2690_v56  ;;  %2782 = vrot.lane.b32.xlu1 %v9932_v37, %s8001_s8 }
 0x50e   : > { %2914 = vrot.lane.b32.xlu0 %v9899_v29, %s8003_s16 }
 0x50f   : > { %v2757_v5 = vpop.permute.xlu1 %2756 }
 0x510   : > { %v2755_v33 = vpop.permute.xlu0 %2754  ;;  %2804 = vst.msk [vmem:[#allocation2 + $0xe] sm:$0xff] %vm2802_vm4, %v2757_v5 }
 0x511   : > { %2803 = vst.msk [vmem:[#allocation2 + $0x6] sm:$0xff] %vm2802_vm4, %v2755_v33  ;;  %2849 = vrot.lane.b32.xlu1 %v9932_v37, %s8002_s0 }
 0x512   : > { %2986 = vrot.lane.b32.xlu0 %v9934_v25, %s8000_s6 }
 0x513   : > { %v2822_v23 = vpop.permute.xlu1 %2821 }
 0x514   : > { %v2820_v14 = vpop.permute.xlu0 %2819  ;;  %2870 = vst.msk [vmem:[#allocation2 + $0x5] sm:$0xff] %vm2869_vm5, %v2822_v23 }
 0x515   : > { %2868 = vst.msk [vmem:[#allocation2 - $0x3] sm:$0xf8] %vm11952_vm6, %v2820_v14  ;;  %2916 = vrot.lane.b32.xlu1 %v9932_v37, %s8003_s16 }
 0x516   : > { %3049 = vrot.lane.b32.xlu0 %v9934_v25, %s8001_s8 }
 0x517   : > { %v2887_v47 = vpop.permute.xlu1 %2886 }
 0x518   : > { %v2824_v59 = vpop.permute.xlu0 %2823  ;;  %2935 = vst.msk [vmem:[#allocation2 - $0x4] sm:$0xf0] %vm11951_vm7, %v2887_v47 }
 0x519   : > { %2871 = vst.msk [vmem:[#allocation2 + $0xd] sm:$0xff] %vm2869_vm5, %v2824_v59  ;;  %2988 = vrot.lane.b32.xlu1 %v9940_v50, %s8000_s6 }
 0x51a   : > { %3112 = vrot.lane.b32.xlu0 %v9934_v25, %s8002_s0 }
 0x51b   : > { %v2692_v39 = vpop.permute.xlu1 %2691 }
 0x51c   : > { %v2889_v36 = vpop.permute.xlu0 %2888  ;;  %2738 = vst.msk [vmem:[#allocation2 + $0x17] sm:$0xff] %vm2735_vm1, %v2692_v39 }
 0x51d   : > { %2937 = vst.msk [vmem:[#allocation2 + $0x4] sm:$0xff] %vm2936_vm8, %v2889_v36  ;;  %2990 = vrot.lane.b32.xlu1 %v9959_v51, %s8000_s6 }
 0x51e   : > { %3175 = vrot.lane.b32.xlu0 %v9934_v25, %s8003_s16 }
 0x51f   : > { %v2694_v27 = vpop.permute.xlu1 %2693 }
 0x520   : > { %v2891_v49 = vpop.permute.xlu0 %2890  ;;  %2739 = vst.msk [vmem:[#allocation2 + $0x1f] sm:$0xff] %vm2735_vm1, %v2694_v27 }
 0x521   : > { %2938 = vst.msk [vmem:[#allocation2 + $0xc] sm:$0xff] %vm2936_vm8, %v2891_v49  ;;  %3053 = vrot.lane.b32.xlu1 %v9959_v51, %s8001_s8 }
 0x522   : > { %3051 = vrot.lane.b32.xlu0 %v9940_v50, %s8001_s8 }
 0x523   : > { %v2761_v29 = vpop.permute.xlu1 %2760 }
 0x524   : > { %v2759_v26 = vpop.permute.xlu0 %2758  ;;  %v3235_v18 = vld [vmem:[#allocation2] sm:$0xff]  ;;  %2806 = vst.msk [vmem:[#allocation2 + $0x1e] sm:$0xff] %vm2802_vm4, %v2761_v29 }
 0x525   : > { %2805 = vst.msk [vmem:[#allocation2 + $0x16] sm:$0xff] %vm2802_vm4, %v2759_v26  ;;  %6940 = vmatprep.mubr.msk.f32.mxu1 %vm3282_vm9, %v3235_v18  ;;  %3116 = vrot.lane.b32.xlu1 %v9959_v51, %s8002_s0 }
 0x526   : > { %3114 = vrot.lane.b32.xlu0 %v9940_v50, %s8002_s0 }
 0x527   : > { %v2828_v32 = vpop.permute.xlu1 %2827 }
 0x528   : > { %v2826_v37 = vpop.permute.xlu0 %2825  ;;  %v3236_v25 = vld [vmem:[#allocation2 + $0x8] sm:$0xff]  ;;  %2873 = vst.msk [vmem:[#allocation2 + $0x1d] sm:$0xff] %vm2869_vm5, %v2828_v32 }
 0x529   : > { %2872 = vst.msk [vmem:[#allocation2 + $0x15] sm:$0xff] %vm2869_vm5, %v2826_v37  ;;  %6941 = vmatmul.mubr.msk.f32.vlgmr.msra.gmra.mrb[12].mxu1 %vm3282_vm9, %v3236_v25  ;;  %2992 = vrot.lane.b32.xlu1 %v9961_v45, %s8000_s6 }
 0x52a   : > { %3177 = vrot.lane.b32.xlu0 %v9940_v50, %s8003_s16 }
 0x52b   : > { %v2696_v54 = vpop.permute.xlu1 %2695 }
 0x52c   : > { %v2893_v9 = vpop.permute.xlu0 %2892  ;;  %2740 = vst.msk [vmem:[#allocation2 + $0x27] sm:$0xff] %vm2735_vm1, %v2696_v54 }
 0x52d   : > { %2939 = vst.msk [vmem:[#allocation2 + $0x14] sm:$0xff] %vm2936_vm8, %v2893_v9  ;;  %2994 = vrot.lane.b32.xlu1 %v9963_v12, %s8000_s6 }
 0x52e   : > { %3179 = vrot.lane.b32.xlu0 %v9959_v51, %s8003_s16 }
 0x52f   : > { %v2698_v13 = vpop.permute.xlu1 %2697 }
 0x530   : > { %v2895_v8 = vpop.permute.xlu0 %2894  ;;  %2741 = vst.msk [vmem:[#allocation2 + $0x2f] sm:$0xff] %vm2735_vm1, %v2698_v13 }
 0x531   : > { %2940 = vst.msk [vmem:[#allocation2 + $0x1c] sm:$0xff] %vm2936_vm8, %v2895_v8  ;;  %3057 = vrot.lane.b32.xlu1 %v9963_v12, %s8001_s8 }
 0x532   : > { %3055 = vrot.lane.b32.xlu0 %v9961_v45, %s8001_s8 }
 0x533   : > { %v2765_v50 = vpop.permute.xlu1 %2764 }
 0x534   : > { %v2763_v20 = vpop.permute.xlu0 %2762  ;;  %v3237_v28 = vld [vmem:[#allocation2 + $0x10] sm:$0xff]  ;;  %2808 = vst.msk [vmem:[#allocation2 + $0x2e] sm:$0xff] %vm2802_vm4, %v2765_v50 }
 0x535   : > { %2807 = vst.msk [vmem:[#allocation2 + $0x26] sm:$0xff] %vm2802_vm4, %v2763_v20  ;;  %6943 = vmatprep.mubr.msk.f32.mxu1 %vm3282_vm9, %v3237_v28  ;;  %3120 = vrot.lane.b32.xlu1 %v9963_v12, %s8002_s0 }
 0x536   : > { %3118 = vrot.lane.b32.xlu0 %v9961_v45, %s8002_s0 }
 0x537   : > { %v2832_v31 = vpop.permute.xlu1 %2831 }
 0x538   : > { %v2830_v38 = vpop.permute.xlu0 %2829  ;;  %v3238_v43 = vld [vmem:[#allocation2 + $0x18] sm:$0xff]  ;;  %2875 = vst.msk [vmem:[#allocation2 + $0x2d] sm:$0xff] %vm2869_vm5, %v2832_v31 }
 0x539   : > { %2874 = vst.msk [vmem:[#allocation2 + $0x25] sm:$0xff] %vm2869_vm5, %v2830_v38  ;;  %6944 = vmatmul.mubr.msk.f32.gmra.mrb[14].mxu1 %vm3282_vm9, %v3238_v43  ;;  %2996 = vrot.lane.b32.xlu1 %v9967_v7, %s8000_s6 }
 0x53a   : > { %3181 = vrot.lane.b32.xlu0 %v9961_v45, %s8003_s16 }
 0x53b   : > { %v2700_v51 = vpop.permute.xlu1 %2699 }
 0x53c   : > { %v2897_v24 = vpop.permute.xlu0 %2896  ;;  %2742 = vst.msk [vmem:[#allocation2 + $0x37] sm:$0xff] %vm2735_vm1, %v2700_v51 }
 0x53d   : > { %2941 = vst.msk [vmem:[#allocation2 + $0x24] sm:$0xff] %vm2936_vm8, %v2897_v24  ;;  %2998 = vrot.lane.b32.xlu1 %v9969_v21, %s8000_s6 }
 0x53e   : > { %3183 = vrot.lane.b32.xlu0 %v9963_v12, %s8003_s16 }
 0x53f   : > { %v2702_v19 = vpop.permute.xlu1 %2701 }
 0x540   : > { %v2899_v4 = vpop.permute.xlu0 %2898  ;;  %2743 = vst.msk [vmem:[#allocation2 + $0x3f] sm:$0xff] %vm2735_vm1, %v2702_v19 }
 0x541   : > { %2942 = vst.msk [vmem:[#allocation2 + $0x2c] sm:$0xff] %vm2936_vm8, %v2899_v4  ;;  %3061 = vrot.lane.b32.xlu1 %v9969_v21, %s8001_s8 }
 0x542   : > { %3059 = vrot.lane.b32.xlu0 %v9967_v7, %s8001_s8 }
 0x543   : > { %v2769_v45 = vpop.permute.xlu1 %2768 }
 0x544   : > { %v2767_v41 = vpop.permute.xlu0 %2766  ;;  %v3239_v58 = vld [vmem:[#allocation2 + $0x20] sm:$0xff]  ;;  %2810 = vst.msk [vmem:[#allocation2 + $0x3e] sm:$0xff] %vm2802_vm4, %v2769_v45 }
 0x545   : > { %2809 = vst.msk [vmem:[#allocation2 + $0x36] sm:$0xff] %vm2802_vm4, %v2767_v41  ;;  %6946 = vmatprep.mubr.msk.f32.mxu1 %vm3282_vm9, %v3239_v58  ;;  %3124 = vrot.lane.b32.xlu1 %v9969_v21, %s8002_s0 }
 0x546   : > { %3122 = vrot.lane.b32.xlu0 %v9967_v7, %s8002_s0 }
 0x547   : > { %v2836_v12 = vpop.permute.xlu1 %2835 }
 0x548   : > { %v2834_v22 = vpop.permute.xlu0 %2833  ;;  %v3240_v46 = vld [vmem:[#allocation2 + $0x28] sm:$0xff]  ;;  %2877 = vst.msk [vmem:[#allocation2 + $0x3d] sm:$0xff] %vm2869_vm5, %v2836_v12 }
 0x549   : > { %2876 = vst.msk [vmem:[#allocation2 + $0x35] sm:$0xff] %vm2869_vm5, %v2834_v22  ;;  %6947 = vmatmul.mubr.msk.f32.gmra.mrb[16].mxu1 %vm3282_vm9, %v3240_v46  ;;  %3000 = vrot.lane.b32.xlu1 %v9998_v55, %s8000_s6 }
 0x54a   : > { %3185 = vrot.lane.b32.xlu0 %v9967_v7, %s8003_s16 }
 0x54b   : > { %v2704_v42 = vpop.permute.xlu1 %2703 }
 0x54c   : > { %v2901_v60 = vpop.permute.xlu0 %2900  ;;  %2744 = vst.msk [vmem:[#allocation2 + $0x47] sm:$0xff] %vm2735_vm1, %v2704_v42 }
 0x54d   : > { %2943 = vst.msk [vmem:[#allocation2 + $0x34] sm:$0xff] %vm2936_vm8, %v2901_v60  ;;  %3002 = vrot.lane.b32.xlu1 %v10004_v16, %s8000_s6 }
 0x54e   : > { %3187 = vrot.lane.b32.xlu0 %v9969_v21, %s8003_s16 }
 0x54f   : > { %v2706_v17 = vpop.permute.xlu1 %2705 }
 0x550   : > { %v2903_v61 = vpop.permute.xlu0 %2902  ;;  %2745 = vst.msk [vmem:[#allocation2 + $0x4f] sm:$0xff] %vm2735_vm1, %v2706_v17 }
 0x551   : > { %2944 = vst.msk [vmem:[#allocation2 + $0x3c] sm:$0xff] %vm2936_vm8, %v2903_v61  ;;  %3065 = vrot.lane.b32.xlu1 %v10004_v16, %s8001_s8 }
 0x552   : > { %3063 = vrot.lane.b32.xlu0 %v9998_v55, %s8001_s8 }
 0x553   : > { %v2773_v7 = vpop.permute.xlu1 %2772 }
 0x554   : > { %v2771_v52 = vpop.permute.xlu0 %2770  ;;  %v3241_v30 = vld [vmem:[#allocation2 + $0x30] sm:$0xff]  ;;  %2812 = vst.msk [vmem:[#allocation2 + $0x4e] sm:$0xff] %vm2802_vm4, %v2773_v7 }
 0x555   : > { %2811 = vst.msk [vmem:[#allocation2 + $0x46] sm:$0xff] %vm2802_vm4, %v2771_v52  ;;  %6949 = vmatprep.mubr.msk.f32.mxu1 %vm3282_vm9, %v3241_v30  ;;  %3128 = vrot.lane.b32.xlu1 %v10004_v16, %s8002_s0 }
 0x556   : > { %3126 = vrot.lane.b32.xlu0 %v9998_v55, %s8002_s0 }
 0x557   : > { %v2840_v21 = vpop.permute.xlu1 %2839 }
 0x558   : > { %v2838_v62 = vpop.permute.xlu0 %2837  ;;  %v3242_v40 = vld [vmem:[#allocation2 + $0x38] sm:$0xff]  ;;  %2879 = vst.msk [vmem:[#allocation2 + $0x4d] sm:$0xff] %vm2869_vm5, %v2840_v21 }
 0x559   : > { %2878 = vst.msk [vmem:[#allocation2 + $0x45] sm:$0xff] %vm2869_vm5, %v2838_v62  ;;  %6950 = vmatmul.mubr.msk.f32.gmra.mrb[18].mxu1 %vm3282_vm9, %v3242_v40  ;;  %3004 = vrot.lane.b32.xlu1 %v10006_v2, %s8000_s6 }
 0x55a   : > { %3189 = vrot.lane.b32.xlu0 %v9998_v55, %s8003_s16 }
 0x55b   : > { %v2708_v63 = vpop.permute.xlu1 %2707 }
 0x55c   : > { %v2905_v1 = vpop.permute.xlu0 %2904  ;;  %2746 = vst.msk [vmem:[#allocation2 + $0x57] sm:$0xff] %vm2735_vm1, %v2708_v63 }
 0x55d   : > { %2945 = vst.msk [vmem:[#allocation2 + $0x44] sm:$0xff] %vm2936_vm8, %v2905_v1  ;;  %3006 = vrot.lane.b32.xlu1 %v10012_v35, %s8000_s6 }
 0x55e   : > { %3191 = vrot.lane.b32.xlu0 %v10004_v16, %s8003_s16 }
 0x55f   : > { %v2710_v44 = vpop.permute.xlu1 %2709 }
 0x560   : > { %v2907_v6 = vpop.permute.xlu0 %2906  ;;  %2747 = vst.msk [vmem:[#allocation2 + $0x5f] sm:$0xff] %vm2735_vm1, %v2710_v44 }
 0x561   : > { %2946 = vst.msk [vmem:[#allocation2 + $0x4c] sm:$0xff] %vm2936_vm8, %v2907_v6  ;;  %3069 = vrot.lane.b32.xlu1 %v10012_v35, %s8001_s8 }
 0x562   : > { %3067 = vrot.lane.b32.xlu0 %v10006_v2, %s8001_s8 }
 0x563   : > { %v2777_v55 = vpop.permute.xlu1 %2776 }
 0x564   : > { %v2775_v11 = vpop.permute.xlu0 %2774  ;;  %v3243_v53 = vld [vmem:[#allocation2 + $0x40] sm:$0xff]  ;;  %2814 = vst.msk [vmem:[#allocation2 + $0x5e] sm:$0xff] %vm2802_vm4, %v2777_v55 }
 0x565   : > { %2813 = vst.msk [vmem:[#allocation2 + $0x56] sm:$0xff] %vm2802_vm4, %v2775_v11  ;;  %6952 = vmatprep.mubr.msk.f32.mxu1 %vm3282_vm9, %v3243_v53  ;;  %3132 = vrot.lane.b32.xlu1 %v10012_v35, %s8002_s0 }
 0x566   : > { %3130 = vrot.lane.b32.xlu0 %v10006_v2, %s8002_s0 }
 0x567   : > { %v2844_v16 = vpop.permute.xlu1 %2843 }
 0x568   : > { %v2842_v56 = vpop.permute.xlu0 %2841  ;;  %v3244_v5 = vld [vmem:[#allocation2 + $0x48] sm:$0xff]  ;;  %2881 = vst.msk [vmem:[#allocation2 + $0x5d] sm:$0xff] %vm2869_vm5, %v2844_v16 }
 0x569   : > { %2880 = vst.msk [vmem:[#allocation2 + $0x55] sm:$0xff] %vm2869_vm5, %v2842_v56  ;;  %6953 = vmatmul.mubr.msk.f32.gmra.mrb[20].mxu1 %vm3282_vm9, %v3244_v5  ;;  %3008 = vrot.lane.b32.xlu1 %v10014_v3, %s8000_s6 }
 0x56a   : > { %3193 = vrot.lane.b32.xlu0 %v10006_v2, %s8003_s16 }
 0x56b   : > { %v2712_v33 = vpop.permute.xlu1 %2711 }
 0x56c   : > { %v2909_v23 = vpop.permute.xlu0 %2908  ;;  %2748 = vst.msk [vmem:[#allocation2 + $0x67] sm:$0xff] %vm2735_vm1, %v2712_v33 }
 0x56d   : > { %2947 = vst.msk [vmem:[#allocation2 + $0x54] sm:$0xff] %vm2936_vm8, %v2909_v23  ;;  %3010 = vrot.lane.b32.xlu1 %v10030_v10, %s8000_s6 }
 0x56e   : > { %3195 = vrot.lane.b32.xlu0 %v10012_v35, %s8003_s16 }
 0x56f   : > { %v2714_v14 = vpop.permute.xlu1 %2713 }
 0x570   : > { %v2911_v47 = vpop.permute.xlu0 %2910  ;;  %2749 = vst.msk [vmem:[#allocation2 + $0x6f] sm:$0xff] %vm2735_vm1, %v2714_v14 }
 0x571   : > { %2948 = vst.msk [vmem:[#allocation2 + $0x5c] sm:$0xff] %vm2936_vm8, %v2911_v47  ;;  %3073 = vrot.lane.b32.xlu1 %v10030_v10, %s8001_s8 }
 0x572   : > { %3071 = vrot.lane.b32.xlu0 %v10014_v3, %s8001_s8 }
 0x573   : > { %v2781_v2 = vpop.permute.xlu1 %2780 }
 0x574   : > { %v2779_v59 = vpop.permute.xlu0 %2778  ;;  %v3245_v39 = vld [vmem:[#allocation2 + $0x50] sm:$0xff]  ;;  %2816 = vst.msk [vmem:[#allocation2 + $0x6e] sm:$0xff] %vm2802_vm4, %v2781_v2 }
 0x575   : > { %2815 = vst.msk [vmem:[#allocation2 + $0x66] sm:$0xff] %vm2802_vm4, %v2779_v59  ;;  %6955 = vmatprep.mubr.msk.f32.mxu1 %vm3282_vm9, %v3245_v39  ;;  %3136 = vrot.lane.b32.xlu1 %v10030_v10, %s8002_s0 }
 0x576   : > { %3134 = vrot.lane.b32.xlu0 %v10014_v3, %s8002_s0 }
 0x577   : > { %v2848_v35 = vpop.permute.xlu1 %2847 }
 0x578   : > { %v2846_v36 = vpop.permute.xlu0 %2845  ;;  %v3246_v27 = vld [vmem:[#allocation2 + $0x58] sm:$0xff]  ;;  %2883 = vst.msk [vmem:[#allocation2 + $0x6d] sm:$0xff] %vm2869_vm5, %v2848_v35 }
 0x579   : > { %2882 = vst.msk [vmem:[#allocation2 + $0x65] sm:$0xff] %vm2869_vm5, %v2846_v36  ;;  %6956 = vmatmul.mubr.msk.f32.gmra.mrb[22].mxu1 %vm3282_vm9, %v3246_v27  ;;  %3012 = vrot.lane.b32.xlu1 %v10032_v48, %s8000_s6 }
 0x57a   : > { %3197 = vrot.lane.b32.xlu0 %v10014_v3, %s8003_s16 }
 0x57b   : > { %v2716_v49 = vpop.permute.xlu1 %2715 }
 0x57c   : > { %v2913_v29 = vpop.permute.xlu0 %2912  ;;  %2751 = vst.msk [vmem:[#allocation2 + $0x77] sm:$0x1] %vm11946_vm10, %v2716_v49  ;;  %vm11949_vm10 = vcmask 523655  }
 0x57d   : > { %3032 = vst.msk [vmem:[#allocation2 + $0x73] sm:$0xe0] %vm11945_vm11, %v2716_v49  ;;  %3014 = vrot.lane.b32.xlu1 %v9802_v57, %s8000_s6  ;;  %vm11950_vm11 = vcmask 518528  }
 0x57e   : > { %2949 = vst.msk [vmem:[#allocation2 + $0x64] sm:$0xff] %vm2936_vm8, %v2913_v29  ;;  %3199 = vrot.lane.b32.xlu0 %v10030_v10, %s8003_s16 }
 0x57f   : > { %v2783_v26 = vpop.permute.xlu1 %2782 }
 0x580   : > { %v2915_v3 = vpop.permute.xlu0 %2914  ;;  %2818 = vst.msk [vmem:[#allocation2 + $0x76] sm:$0x3] %vm2817_vm12, %v2783_v26 }
 0x581   : > { %3095 = vst.msk [vmem:[#allocation2 + $0x72] sm:$0xc0] %vm11947_vm0, %v2783_v26  ;;  %3077 = vrot.lane.b32.xlu1 %v9802_v57, %s8001_s8  ;;  %vm11948_vm0 = vcmask 650752  }
 0x582   : > { %2950 = vst.msk [vmem:[#allocation2 + $0x6c] sm:$0xff] %vm2936_vm8, %v2915_v3  ;;  %3075 = vrot.lane.b32.xlu0 %v10032_v48, %s8001_s8 }
 0x583   : > { %v2850_v18 = vpop.permute.xlu1 %2849 }
 0x584   : > { %v2987_v10 = vpop.permute.xlu0 %2986  ;;  %2885 = vst.msk [vmem:[#allocation2 + $0x75] sm:$0x7] %vm11950_vm11, %v2850_v18  ;;  %vm3173_vm11 = vcmask 522624  }
 0x585   : > { %v3247_v32 = vld [vmem:[#allocation2 + $0x60] sm:$0xff]  ;;  %3158 = vst.msk [vmem:[#allocation2 + $0x71] sm:$0x80] %vm11949_vm10, %v2850_v18  ;;  %3140 = vrot.lane.b32.xlu1 %v9802_v57, %s8002_s0  ;;  %vm3110_vm10 = vcmask 390400  }
 0x586   : > { %3033 = vst.msk [vmem:[#allocation2 + $0x7b] sm:$0xff] %vm2735_vm1, %v2987_v10  ;;  %6958 = vmatprep.mubr.msk.f32.mxu1 %vm3282_vm9, %v3247_v32  ;;  %3138 = vrot.lane.b32.xlu0 %v10032_v48, %s8002_s0 }
 0x587   : > { %v2917_v37 = vpop.permute.xlu1 %2916 }
 0x588   : > { %v3050_v25 = vpop.permute.xlu0 %3049  ;;  %2952 = vst.msk [vmem:[#allocation2 + $0x74] sm:$0xf] %vm11948_vm0, %v2917_v37  ;;  %vm3047_vm0 = vcmask 258176  }
 0x589   : > { %v3248_v54 = vld [vmem:[#allocation2 + $0x68] sm:$0xff]  ;;  %3096 = vst.msk [vmem:[#allocation2 + $0x7a] sm:$0xff] %vm2802_vm4, %v3050_v25  ;;  %3203 = vrot.lane.b32.xlu1 %v9802_v57, %s8003_s16 }
 0x58a   : > { %6959 = vmatmul.mubr.msk.f32.gmra.mrb[24].mxu1 %vm3282_vm9, %v3248_v54  ;;  %3201 = vrot.lane.b32.xlu0 %v10032_v48, %s8003_s16 }
 0x58b   : > { %v2989_v9 = vpop.permute.xlu1 %2988 }
 0x58c   : > { %v3113_v13 = vpop.permute.xlu0 %3112  ;;  %3034 = vst.msk [vmem:[#allocation2 + $0x83] sm:$0xff] %vm2735_vm1, %v2989_v9 }
 0x58d   : > { %3159 = vst.msk [vmem:[#allocation2 + $0x79] sm:$0xff] %vm2869_vm5, %v3113_v13 }
 0x58f   : > { %v2991_v8 = vpop.permute.xlu1 %2990  ;;  %v3249_v20 = vld [vmem:[#allocation2 + $0x70] sm:$0xff] }
 0x590   : > { %v3176_v50 = vpop.permute.xlu0 %3175  ;;  %3035 = vst.msk [vmem:[#allocation2 + $0x8b] sm:$0xff] %vm2735_vm1, %v2991_v8  ;;  %6961 = vmatprep.mubr.msk.f32.mxu1 %vm3282_vm9, %v3249_v20 }
 0x591   : > { %3220 = vst.msk [vmem:[#allocation2 + $0x78] sm:$0xff] %vm2936_vm8, %v3176_v50 }
 0x593   : > { %v3054_v28 = vpop.permute.xlu1 %3053 }
 0x594   : > { %v3052_v57 = vpop.permute.xlu0 %3051  ;;  %3098 = vst.msk [vmem:[#allocation2 + $0x8a] sm:$0xff] %vm2802_vm4, %v3054_v28 }
 0x595   : > { %3097 = vst.msk [vmem:[#allocation2 + $0x82] sm:$0xff] %vm2802_vm4, %v3052_v57 }
 0x597   : > { %v3117_v48 = vpop.permute.xlu1 %3116 }
 0x598   : > { %v3115_v31 = vpop.permute.xlu0 %3114  ;;  %v3250_v38 = vld [vmem:[#allocation2 + $0x78] sm:$0xff]  ;;  %3161 = vst.msk [vmem:[#allocation2 + $0x89] sm:$0xff] %vm2869_vm5, %v3117_v48 }
 0x599   : > { %3160 = vst.msk [vmem:[#allocation2 + $0x81] sm:$0xff] %vm2869_vm5, %v3115_v31  ;;  %6962 = vmatmul.mubr.msk.f32.gmra.mrb[26].mxu1 %vm3282_vm9, %v3250_v38 }
 0x59b   : > { %v2993_v43 = vpop.permute.xlu1 %2992 }
 0x59c   : > { %v3178_v51 = vpop.permute.xlu0 %3177  ;;  %3036 = vst.msk [vmem:[#allocation2 + $0x93] sm:$0xff] %vm2735_vm1, %v2993_v43 }
 0x59d   : > { %3221 = vst.msk [vmem:[#allocation2 + $0x80] sm:$0xff] %vm2936_vm8, %v3178_v51 }
 0x59f   : > { %v2995_v24 = vpop.permute.xlu1 %2994 }
 0x5a0   : > { %v3180_v19 = vpop.permute.xlu0 %3179  ;;  %3037 = vst.msk [vmem:[#allocation2 + $0x9b] sm:$0xff] %vm2735_vm1, %v2995_v24 }
 0x5a1   : > { %3222 = vst.msk [vmem:[#allocation2 + $0x88] sm:$0xff] %vm2936_vm8, %v3180_v19 }
 0x5a3   : > { %v3058_v4 = vpop.permute.xlu1 %3057 }
 0x5a4   : > { %v3056_v45 = vpop.permute.xlu0 %3055  ;;  %v3251_v41 = vld [vmem:[#allocation2 + $0x80] sm:$0xff]  ;;  %3100 = vst.msk [vmem:[#allocation2 + $0x9a] sm:$0xff] %vm2802_vm4, %v3058_v4 }
 0x5a5   : > { %3099 = vst.msk [vmem:[#allocation2 + $0x92] sm:$0xff] %vm2802_vm4, %v3056_v45  ;;  %6964 = vmatprep.mubr.msk.f32.mxu1 %vm3282_vm9, %v3251_v41 }
 0x5a7   : > { %v3121_v58 = vpop.permute.xlu1 %3120 }
 0x5a8   : > { %v3119_v12 = vpop.permute.xlu0 %3118  ;;  %v3252_v22 = vld [vmem:[#allocation2 + $0x88] sm:$0xff]  ;;  %3163 = vst.msk [vmem:[#allocation2 + $0x99] sm:$0xff] %vm2869_vm5, %v3121_v58 }
 0x5a9   : > { %3162 = vst.msk [vmem:[#allocation2 + $0x91] sm:$0xff] %vm2869_vm5, %v3119_v12  ;;  %6965 = vmatmul.mubr.msk.f32.gmra.mrb[28].mxu1 %vm3282_vm9, %v3252_v22 }
 0x5ab   : > { %v2997_v46 = vpop.permute.xlu1 %2996 }
 0x5ac   : > { %v3182_v42 = vpop.permute.xlu0 %3181  ;;  %3038 = vst.msk [vmem:[#allocation2 + $0xa3] sm:$0xff] %vm2735_vm1, %v2997_v46 }
 0x5ad   : > { %3223 = vst.msk [vmem:[#allocation2 + $0x90] sm:$0xff] %vm2936_vm8, %v3182_v42 }
 0x5af   : > { %v2999_v60 = vpop.permute.xlu1 %2998 }
 0x5b0   : > { %v3184_v17 = vpop.permute.xlu0 %3183  ;;  %3039 = vst.msk [vmem:[#allocation2 + $0xab] sm:$0xff] %vm2735_vm1, %v2999_v60 }
 0x5b1   : > { %3224 = vst.msk [vmem:[#allocation2 + $0x98] sm:$0xff] %vm2936_vm8, %v3184_v17 }
 0x5b3   : > { %v3062_v61 = vpop.permute.xlu1 %3061 }
 0x5b4   : > { %v3060_v7 = vpop.permute.xlu0 %3059  ;;  %v3253_v52 = vld [vmem:[#allocation2 + $0x90] sm:$0xff]  ;;  %3102 = vst.msk [vmem:[#allocation2 + $0xaa] sm:$0xff] %vm2802_vm4, %v3062_v61 }
 0x5b5   : > { %3101 = vst.msk [vmem:[#allocation2 + $0xa2] sm:$0xff] %vm2802_vm4, %v3060_v7  ;;  %6967 = vmatprep.mubr.msk.f32.mxu1 %vm3282_vm9, %v3253_v52 }
 0x5b7   : > { %v3125_v30 = vpop.permute.xlu1 %3124 }
 0x5b8   : > { %v3123_v21 = vpop.permute.xlu0 %3122  ;;  %v3254_v62 = vld [vmem:[#allocation2 + $0x98] sm:$0xff]  ;;  %3165 = vst.msk [vmem:[#allocation2 + $0xa9] sm:$0xff] %vm2869_vm5, %v3125_v30 }
 0x5b9   : > { %3164 = vst.msk [vmem:[#allocation2 + $0xa1] sm:$0xff] %vm2869_vm5, %v3123_v21  ;;  %6968 = vmatmul.mubr.msk.f32.gmra.mrb[30].mxu1 %vm3282_vm9, %v3254_v62  ;;  %v10421_v62 = vld [vmem:[%s905_s1] ss:$0 sm:$0xff] }
 0x5bb   : > { %v3001_v40 = vpop.permute.xlu1 %3000 }
 0x5bc   : > { %v3186_v63 = vpop.permute.xlu0 %3185  ;;  %3040 = vst.msk [vmem:[#allocation2 + $0xb3] sm:$0xff] %vm2735_vm1, %v3001_v40 }
 0x5bd   : > { %3225 = vst.msk [vmem:[#allocation2 + $0xa0] sm:$0xff] %vm2936_vm8, %v3186_v63 }
 0x5bf   : > { %v3003_v1 = vpop.permute.xlu1 %3002 }
 0x5c0   : > { %v3188_v44 = vpop.permute.xlu0 %3187  ;;  %3041 = vst.msk [vmem:[#allocation2 + $0xbb] sm:$0xff] %vm2735_vm1, %v3003_v1 }
 0x5c1   : > { %3226 = vst.msk [vmem:[#allocation2 + $0xa8] sm:$0xff] %vm2936_vm8, %v3188_v44 }
 0x5c3   : > { %v3066_v6 = vpop.permute.xlu1 %3065 }
 0x5c4   : > { %v3064_v55 = vpop.permute.xlu0 %3063  ;;  %v3255_v11 = vld [vmem:[#allocation2 + $0xa0] sm:$0xff]  ;;  %3104 = vst.msk [vmem:[#allocation2 + $0xba] sm:$0xff] %vm2802_vm4, %v3066_v6 }
 0x5c5   : > { %3103 = vst.msk [vmem:[#allocation2 + $0xb2] sm:$0xff] %vm2802_vm4, %v3064_v55  ;;  %6970 = vmatprep.mubr.msk.f32.mxu1 %vm3282_vm9, %v3255_v11 }
 0x5c7   : > { %v3129_v53 = vpop.permute.xlu1 %3128 }
 0x5c8   : > { %v3127_v16 = vpop.permute.xlu0 %3126  ;;  %v3256_v56 = vld [vmem:[#allocation2 + $0xa8] sm:$0xff]  ;;  %3167 = vst.msk [vmem:[#allocation2 + $0xb9] sm:$0xff] %vm2869_vm5, %v3129_v53 }
 0x5c9   : > { %3166 = vst.msk [vmem:[#allocation2 + $0xb1] sm:$0xff] %vm2869_vm5, %v3127_v16  ;;  %6971 = vmatmul.mubr.msk.f32.gmra.mrb[32].mxu1 %vm3282_vm9, %v3256_v56 }
 0x5cb   : > { %v3005_v5 = vpop.permute.xlu1 %3004 }
 0x5cc   : > { %v3190_v33 = vpop.permute.xlu0 %3189  ;;  %3042 = vst.msk [vmem:[#allocation2 + $0xc3] sm:$0xff] %vm2735_vm1, %v3005_v5 }
 0x5cd   : > { %3227 = vst.msk [vmem:[#allocation2 + $0xb0] sm:$0xff] %vm2936_vm8, %v3190_v33 }
 0x5cf   : > { %v3007_v23 = vpop.permute.xlu1 %3006 }
 0x5d0   : > { %v3192_v14 = vpop.permute.xlu0 %3191  ;;  %3043 = vst.msk [vmem:[#allocation2 + $0xcb] sm:$0xff] %vm2735_vm1, %v3007_v23 }
 0x5d1   : > { %3228 = vst.msk [vmem:[#allocation2 + $0xb8] sm:$0xff] %vm2936_vm8, %v3192_v14 }
 0x5d3   : > { %v3070_v47 = vpop.permute.xlu1 %3069 }
 0x5d4   : > { %v3068_v2 = vpop.permute.xlu0 %3067  ;;  %v3257_v59 = vld [vmem:[#allocation2 + $0xb0] sm:$0xff]  ;;  %3106 = vst.msk [vmem:[#allocation2 + $0xca] sm:$0xff] %vm2802_vm4, %v3070_v47 }
 0x5d5   : > { %3105 = vst.msk [vmem:[#allocation2 + $0xc2] sm:$0xff] %vm2802_vm4, %v3068_v2  ;;  %6973 = vmatprep.mubr.msk.f32.mxu1 %vm3282_vm9, %v3257_v59 }
 0x5d7   : > { %v3133_v39 = vpop.permute.xlu1 %3132 }
 0x5d8   : > { %v3131_v35 = vpop.permute.xlu0 %3130  ;;  %v3258_v36 = vld [vmem:[#allocation2 + $0xb8] sm:$0xff]  ;;  %3169 = vst.msk [vmem:[#allocation2 + $0xc9] sm:$0xff] %vm2869_vm5, %v3133_v39 }
 0x5d9   : > { %3168 = vst.msk [vmem:[#allocation2 + $0xc1] sm:$0xff] %vm2869_vm5, %v3131_v35  ;;  %6974 = vmatmul.mubr.msk.f32.gmra.mrb[34].mxu1 %vm3282_vm9, %v3258_v36 }
 0x5db   : > { %v3009_v27 = vpop.permute.xlu1 %3008 }
 0x5dc   : > { %v3194_v49 = vpop.permute.xlu0 %3193  ;;  %3044 = vst.msk [vmem:[#allocation2 + $0xd3] sm:$0xff] %vm2735_vm1, %v3009_v27 }
 0x5dd   : > { %3229 = vst.msk [vmem:[#allocation2 + $0xc0] sm:$0xff] %vm2936_vm8, %v3194_v49 }
 0x5df   : > { %v3011_v29 = vpop.permute.xlu1 %3010 }
 0x5e0   : > { %v3196_v26 = vpop.permute.xlu0 %3195  ;;  %3045 = vst.msk [vmem:[#allocation2 + $0xdb] sm:$0xff] %vm2735_vm1, %v3011_v29 }
 0x5e1   : > { %3230 = vst.msk [vmem:[#allocation2 + $0xc8] sm:$0xff] %vm2936_vm8, %v3196_v26 }
 0x5e3   : > { %v3074_v3 = vpop.permute.xlu1 %3073 }
 0x5e4   : > { %v3072_v18 = vpop.permute.xlu0 %3071  ;;  %v3259_v10 = vld [vmem:[#allocation2 + $0xc0] sm:$0xff]  ;;  %3108 = vst.msk [vmem:[#allocation2 + $0xda] sm:$0xff] %vm2802_vm4, %v3074_v3 }
 0x5e5   : > { %3107 = vst.msk [vmem:[#allocation2 + $0xd2] sm:$0xff] %vm2802_vm4, %v3072_v18  ;;  %6976 = vmatprep.mubr.msk.f32.mxu1 %vm3282_vm9, %v3259_v10 }
 0x5e7   : > { %v3137_v32 = vpop.permute.xlu1 %3136 }
 0x5e8   : > { %v3135_v37 = vpop.permute.xlu0 %3134  ;;  %v3260_v25 = vld [vmem:[#allocation2 + $0xc8] sm:$0xff]  ;;  %3171 = vst.msk [vmem:[#allocation2 + $0xd9] sm:$0xff] %vm2869_vm5, %v3137_v32 }
 0x5e9   : > { %3170 = vst.msk [vmem:[#allocation2 + $0xd1] sm:$0xff] %vm2869_vm5, %v3135_v37  ;;  %6977 = vmatmul.mubr.msk.f32.gmra.mrb[36].mxu1 %vm3282_vm9, %v3260_v25 }
 0x5eb   : > { %v3013_v54 = vpop.permute.xlu1 %3012 }
 0x5ec   : > { %v3198_v9 = vpop.permute.xlu0 %3197  ;;  %3046 = vst.msk [vmem:[#allocation2 + $0xe3] sm:$0xff] %vm2735_vm1, %v3013_v54 }
 0x5ed   : > { %3231 = vst.msk [vmem:[#allocation2 + $0xd0] sm:$0xff] %vm2936_vm8, %v3198_v9 }
 0x5ef   : > { %v3015_v13 = vpop.permute.xlu1 %3014 }
 0x5f0   : > { %v3200_v8 = vpop.permute.xlu0 %3199  ;;  %3048 = vst.msk [vmem:[#allocation2 + $0xeb] sm:$0x1f] %vm3047_vm0, %v3015_v13 }
 0x5f1   : > { %3232 = vst.msk [vmem:[#allocation2 + $0xd8] sm:$0xff] %vm2936_vm8, %v3200_v8 }
 0x5f3   : > { %v3078_v50 = vpop.permute.xlu1 %3077 }
 0x5f4   : > { %v3076_v20 = vpop.permute.xlu0 %3075  ;;  %v3261_v28 = vld [vmem:[#allocation2 + $0xd0] sm:$0xff]  ;;  %3111 = vst.msk [vmem:[#allocation2 + $0xea] sm:$0x3f] %vm3110_vm10, %v3078_v50 }
 0x5f5   : > { %3109 = vst.msk [vmem:[#allocation2 + $0xe2] sm:$0xff] %vm2802_vm4, %v3076_v20  ;;  %6979 = vmatprep.mubr.msk.f32.mxu1 %vm3282_vm9, %v3261_v28 }
 0x5f7   : > { %v3141_v57 = vpop.permute.xlu1 %3140 }
 0x5f8   : > { %v3139_v48 = vpop.permute.xlu0 %3138  ;;  %v3262_v31 = vld [vmem:[#allocation2 + $0xd8] sm:$0xff]  ;;  %3174 = vst.msk [vmem:[#allocation2 + $0xe9] sm:$0x7f] %vm3173_vm11, %v3141_v57 }
 0x5f9   : > { %3172 = vst.msk [vmem:[#allocation2 + $0xe1] sm:$0xff] %vm2869_vm5, %v3139_v48  ;;  %6980 = vmatmul.mubr.msk.f32.gmra.mrb[38].mxu1 %vm3282_vm9, %v3262_v31 }
 0x5fb   : > { %v3204_v38 = vpop.permute.xlu1 %3203 }
 0x5fc   : > { %v3202_v43 = vpop.permute.xlu0 %3201  ;;  %3234 = vst.msk [vmem:[#allocation2 + $0xe8] sm:$0xff] %vm2936_vm8, %v3204_v38  ;;  %v6942_v51 = vpop.f32.mrb[12].mxu1 }
 0x5fd   : > { %3233 = vst.msk [vmem:[#allocation2 + $0xe0] sm:$0xff] %vm2936_vm8, %v3202_v43  ;;  %v3439_v24 = vpop.f32.mrb[13].mxu1  ;;  %v10424_v40 = vadd.f32 %v6942_v51, %v10421_v62 }
 0x5fe   : > { %v10427_v63 = vadd.f32 %v10421_v62, %v3439_v24 }
 0x5ff   : > { %v3589_v44 = vsel %vm2347_vm13, %v10424_v40, 0.0 }
 0x600   : > { %v3588_v6 = vsel %vm2347_vm13, %v10427_v63, 0.0 }
 0x601   : > { %v3590_v53 = vadd.f32 %v3589_v44, %v3588_v6 }
 0x603   : > { %v3264_v4 = vld [vmem:[#allocation2 + $0xe8] sm:$0xff] }
 0x604   : > { %v3263_v19 = vld [vmem:[#allocation2 + $0xe0] sm:$0xff] }
 0x605   : > { %6982 = vmatprep.mubr.msk.f32.mxu1 %vm3282_vm9, %v3263_v19 }
 0x606   : > { %6983 = vmatmul.mubr.msk.f32.gmra.mrb[40].mxu1 %vm3282_vm9, %v3264_v4 }
 0x60c   : > { %v6945_v45 = vpop.f32.mrb[14].mxu1 }
 0x60d   : > { %v3449_v41 = vpop.f32.mrb[15].mxu1  ;;  %v10439_v56 = vadd.f32 %v6945_v45, %v10421_v62 }
 0x60e   : > { %v10430_v1 = vadd.f32 %v10421_v62, %v3449_v41 }
 0x60f   : > { %v3593_v23 = vsel %vm2347_vm13, %v10439_v56, 0.0 }
 0x610   : > { %v3591_v55 = vsel %vm2347_vm13, %v10430_v1, 0.0 }
 0x611   : > { %v3592_v33 = vadd.f32 %v3591_v55, %v3590_v53 }
 0x613   : > { %v3594_v47 = vadd.f32 %v3593_v23, %v3592_v33 }
 0x61c   : > { %v6948_v58 = vpop.f32.mrb[16].mxu1 }
 0x61d   : > { %v3459_v12 = vpop.f32.mrb[17].mxu1  ;;  %v10449_v2 = vadd.f32 %v6948_v58, %v10421_v62 }
 0x61e   : > { %v10442_v5 = vadd.f32 %v10421_v62, %v3459_v12 }
 0x61f   : > { %v3597_v35 = vsel %vm2347_vm13, %v10449_v2, 0.0 }
 0x620   : > { %v3595_v14 = vsel %vm2347_vm13, %v10442_v5, 0.0 }
 0x621   : > { %v3596_v39 = vadd.f32 %v3595_v14, %v3594_v47 }
 0x623   : > { %v3598_v27 = vadd.f32 %v3597_v35, %v3596_v39 }
 0x62c   : > { %v6951_v22 = vpop.f32.mrb[18].mxu1 }
 0x62d   : > { %v3469_v46 = vpop.f32.mrb[19].mxu1  ;;  %v10459_v49 = vadd.f32 %v6951_v22, %v10421_v62 }
 0x62e   : > { %v10452_v59 = vadd.f32 %v10421_v62, %v3469_v46 }
 0x62f   : > { %v3601_v10 = vsel %vm2347_vm13, %v10459_v49, 0.0 }
 0x630   : > { %v3599_v36 = vsel %vm2347_vm13, %v10452_v59, 0.0 }
 0x631   : > { %v3600_v26 = vadd.f32 %v3599_v36, %v3598_v27 }
 0x633   : > { %v3602_v37 = vadd.f32 %v3601_v10, %v3600_v26 }
 0x63c   : > { %v6954_v42 = vpop.f32.mrb[20].mxu1 }
 0x63d   : > { %v3479_v60 = vpop.f32.mrb[21].mxu1  ;;  %v10469_v25 = vadd.f32 %v6954_v42, %v10421_v62 }
 0x63e   : > { %v10462_v29 = vadd.f32 %v10421_v62, %v3479_v60 }
 0x63f   : > { %v3605_v13 = vsel %vm2347_vm13, %v10469_v25, 0.0 }
 0x640   : > { %v3603_v32 = vsel %vm2347_vm13, %v10462_v29, 0.0 }
 0x641   : > { %v3604_v9 = vadd.f32 %v3603_v32, %v3602_v37 }
 0x643   : > { %v3606_v50 = vadd.f32 %v3605_v13, %v3604_v9 }
 0x64c   : > { %v6957_v17 = vpop.f32.mrb[22].mxu1 }
 0x64d   : > { %v3489_v61 = vpop.f32.mrb[23].mxu1  ;;  %v10479_v20 = vadd.f32 %v6957_v17, %v10421_v62 }
 0x64e   : > { %v10472_v54 = vadd.f32 %v10421_v62, %v3489_v61 }
 0x64f   : > { %v3609_v48 = vsel %vm2347_vm13, %v10479_v20, 0.0 }
 0x650   : > { %v3607_v8 = vsel %vm2347_vm13, %v10472_v54, 0.0 }
 0x651   : > { %v3608_v57 = vadd.f32 %v3607_v8, %v3606_v50 }
 0x653   : > { %v3610_v38 = vadd.f32 %v3609_v48, %v3608_v57 }
 0x65d   : > { %v6960_v7 = vpop.f32.mrb[24].mxu1 }
 0x65e   : > { %v3499_v52 = vpop.f32.mrb[25].mxu1  ;;  %v10489_v43 = vadd.f32 %v6960_v7, %v10421_v62 }
 0x65f   : > { %v10482_v28 = vadd.f32 %v10421_v62, %v3499_v52 }
 0x660   : > { %v3613_v45 = vsel %vm2347_vm13, %v10489_v43, 0.0 }
 0x661   : > { %v3611_v31 = vsel %vm2347_vm13, %v10482_v28, 0.0 }
 0x662   : > { %v3612_v19 = vadd.f32 %v3611_v31, %v3610_v38 }
 0x664   : > { %v3614_v58 = vadd.f32 %v3613_v45, %v3612_v19 }
 0x66c   : > { %v6963_v30 = vpop.f32.mrb[26].mxu1 }
 0x66d   : > { %v3509_v21 = vpop.f32.mrb[27].mxu1  ;;  %v10499_v12 = vadd.f32 %v6963_v30, %v10421_v62 }
 0x66e   : > { %v10492_v51 = vadd.f32 %v10421_v62, %v3509_v21 }
 0x66f   : > { %v3617_v42 = vsel %vm2347_vm13, %v10499_v12, 0.0 }
 0x670   : > { %v3615_v41 = vsel %vm2347_vm13, %v10492_v51, 0.0 }
 0x671   : > { %v3616_v46 = vadd.f32 %v3615_v41, %v3614_v58 }
 0x673   : > { %v3618_v17 = vadd.f32 %v3617_v42, %v3616_v46 }
 0x67c   : > { %v6966_v11 = vpop.f32.mrb[28].mxu1 }
 0x67d   : > { %v3519_v16 = vpop.f32.mrb[29].mxu1  ;;  %v10509_v61 = vadd.f32 %v6966_v11, %v10421_v62 }
 0x67e   : > { %v10502_v22 = vadd.f32 %v10421_v62, %v3519_v16 }
 0x67f   : > { %v3621_v30 = vsel %vm2347_vm13, %v10509_v61, 0.0 }
 0x680   : > { %v3619_v60 = vsel %vm2347_vm13, %v10502_v22, 0.0 }
 0x681   : > { %v3620_v52 = vadd.f32 %v3619_v60, %v3618_v17 }
 0x683   : > { %v3622_v6 = vadd.f32 %v3621_v30, %v3620_v52 }
 0x68c   : > { %v6969_v3 = vpop.f32.mrb[30].mxu1 }
 0x68d   : > { %v3529_v18 = vpop.f32.mrb[31].mxu1  ;;  %v10519_v53 = vadd.f32 %v6969_v3, %v10421_v62 }
 0x68e   : > { %v10512_v7 = vadd.f32 %v10421_v62, %v3529_v18 }
 0x68f   : > { %v3625_v33 = vsel %vm2347_vm13, %v10519_v53, 0.0 }
 0x690   : > { %v3623_v21 = vsel %vm2347_vm13, %v10512_v7, 0.0 }
 0x691   : > { %v3624_v11 = vadd.f32 %v3623_v21, %v3622_v6 }
 0x693   : > { %v3626_v14 = vadd.f32 %v3625_v33, %v3624_v11 }
 0x69c   : > { %v6972_v24 = vpop.f32.mrb[32].mxu1 }
 0x69d   : > { %v3539_v4 = vpop.f32.mrb[33].mxu1  ;;  %v10529_v47 = vadd.f32 %v6972_v24, %v10421_v62 }
 0x69e   : > { %v10522_v16 = vadd.f32 %v10421_v62, %v3539_v4 }
 0x69f   : > { %v3629_v36 = vsel %vm2347_vm13, %v10529_v47, 0.0 }
 0x6a0   : > { %v3627_v23 = vsel %vm2347_vm13, %v10522_v16, 0.0 }
 0x6a1   : > { %v3628_v35 = vadd.f32 %v3627_v23, %v3626_v14 }
 0x6a3   : > { %v3630_v26 = vadd.f32 %v3629_v36, %v3628_v35 }
 0x6ac   : > { %v6975_v44 = vpop.f32.mrb[34].mxu1 }
 0x6ad   : > { %v3549_v55 = vpop.f32.mrb[35].mxu1  ;;  %v10539_v3 = vadd.f32 %v6975_v44, %v10421_v62 }
 0x6ae   : > { %v10532_v39 = vadd.f32 %v10421_v62, %v3549_v55 }
 0x6af   : > { %v3633_v37 = vsel %vm2347_vm13, %v10539_v3, 0.0 }
 0x6b0   : > { %v3631_v27 = vsel %vm2347_vm13, %v10532_v39, 0.0 }
 0x6b1   : > { %v3632_v18 = vadd.f32 %v3631_v27, %v3630_v26 }
 0x6b3   : > { %v3634_v8 = vadd.f32 %v3633_v37, %v3632_v18 }
 0x6bc   : > { %v6978_v10 = vpop.f32.mrb[36].mxu1 }
 0x6bd   : > { %v3559_v32 = vpop.f32.mrb[37].mxu1  ;;  %v3565_v9 = vadd.f32 %v6978_v10, %v10421_v62 }
 0x6be   : > { %v3560_v13 = vadd.f32 %v10421_v62, %v3559_v32 }
 0x6bf   : > { %v3637_v48 = vsel %vm2347_vm13, %v3565_v9, 0.0 }
 0x6c0   : > { %v3635_v50 = vsel %vm2347_vm13, %v3560_v13, 0.0 }
 0x6c1   : > { %v3636_v57 = vadd.f32 %v3635_v50, %v3634_v8 }
 0x6c3   : > { %v3638_v31 = vadd.f32 %v3637_v48, %v3636_v57 }
 0x6cc   : > { %v6981_v38 = vpop.f32.mrb[38].mxu1 }
 0x6cd   : > { %v3569_v24 = vpop.f32.mrb[39].mxu1  ;;  %v3575_v19 = vadd.f32 %v6981_v38, %v10421_v62 }
 0x6ce   : > { %v3570_v4 = vadd.f32 %v10421_v62, %v3569_v24 }
 0x6cf   : > { %v3641_v58 = vsel %vm2347_vm13, %v3575_v19, 0.0 }
 0x6d0   : > { %v3639_v45 = vsel %vm2347_vm13, %v3570_v4, 0.0 }
 0x6d1   : > { %v3640_v41 = vadd.f32 %v3639_v45, %v3638_v31 }
 0x6d3   : > { %v3642_v46 = vadd.f32 %v3641_v58, %v3640_v41 }
 0x6d9   : > { %v6984_v42 = vpop.f32.mrb[40].mxu1 }
 0x6da   : > { %v3579_v60 = vpop.f32.mrb[41].mxu1  ;;  %v3585_v17 = vadd.f32 %v6984_v42, %v10421_v62 }
 0x6db   : > { %v3580_v52 = vadd.f32 %v10421_v62, %v3579_v60 }
 0x6dc   : > { %v3645_v44 = vsel %vm2347_vm13, %v3585_v17, 0.0 }
 0x6dd   : > { %v3643_v30 = vsel %vm2347_vm13, %v3580_v52, 0.0 }
 0x6de   : > { %v3644_v21 = vadd.f32 %v3643_v30, %v3642_v46 }
 0x6e0   : > { %v3646_v6 = vadd.f32 %v3645_v44, %v3644_v21 }
 0x6e2   : > { %v3647_v55 = vrot.slane %v3646_v6, 4 }
 0x6e4   : > { %v3648_v11 = vadd.f32 %v3647_v55, %v3646_v6 }
 0x6e6   : > { %v3649_v33 = vrot.slane %v3648_v11, 2 }
 0x6e8   : > { %v3650_v23 = vadd.f32 %v3649_v33, %v3648_v11 }
 0x6ea   : > { %v3651_v14 = vrot.slane %v3650_v23, 1 }
 0x6ec   : > { %v3652_v35 = vadd.f32 %v3651_v14, %v3650_v23 }
 0x6ee   : > { %v10555_v36 = vmul.f32 0.004166667, %v3652_v35 }
 0x6f0   : > { %v10558_v27 = vsub.f32 %v3560_v13, %v10555_v36  ;;  %v10561_v26 = vsub.f32 %v3565_v9, %v10555_v36  ;;  %v10564_v62 = vsub.f32 %v3570_v4, %v10555_v36  ;;  %v10567_v18 = vsub.f32 %v3575_v19, %v10555_v36 }
 0x6f1   : > { %v10571_v10 = vsub.f32 %v10427_v63, %v10555_v36  ;;  %v10575_v32 = vsub.f32 %v10424_v40, %v10555_v36  ;;  %v10578_v37 = vsub.f32 %v3580_v52, %v10555_v36  ;;  %v10581_v9 = vsub.f32 %v3585_v17, %v10555_v36 }
 0x6f2   : > { %v10585_v13 = vsub.f32 %v10430_v1, %v10555_v36  ;;  %v10589_v8 = vsub.f32 %v10439_v56, %v10555_v36  ;;  %v10597_v50 = vsub.f32 %v10442_v5, %v10555_v36  ;;  %v10603_v1 = vsub.f32 %v10449_v2, %v10555_v36 }
 0x6f3   : > { %v3684_v63 = vmul.f32 %v10571_v10, %v10571_v10  ;;  %v3685_v40 = vmul.f32 %v10575_v32, %v10575_v32  ;;  %v10611_v24 = vsub.f32 %v10452_v59, %v10555_v36  ;;  %v10618_v2 = vsub.f32 %v10459_v49, %v10555_v36 }
 0x6f4   : > { %v3686_v57 = vmul.f32 %v10585_v13, %v10585_v13  ;;  %v3687_v56 = vmul.f32 %v10589_v8, %v10589_v8  ;;  %v3688_v5 = vmul.f32 %v10597_v50, %v10597_v50  ;;  %v3689_v45 = vmul.f32 %v10603_v1, %v10603_v1 }
 0x6f5   : > { %v3714_v48 = vsel %vm2347_vm13, %v3684_v63, 0.0  ;;  %v3715_v31 = vsel %vm2347_vm13, %v3685_v40, 0.0  ;;  %v10625_v59 = vsub.f32 %v10462_v29, %v10555_v36  ;;  %v3690_v46 = vmul.f32 %v10611_v24, %v10611_v24 }
 0x6f6   : > { %v3716_v38 = vadd.f32 %v3715_v31, %v3714_v48  ;;  %v3717_v19 = vsel %vm2347_vm13, %v3686_v57, 0.0  ;;  %v3719_v41 = vsel %vm2347_vm13, %v3687_v56, 0.0  ;;  %v3721_v42 = vsel %vm2347_vm13, %v3688_v5, 0.0 }
 0x6f7   : > { %v10632_v49 = vsub.f32 %v10469_v25, %v10555_v36  ;;  %v3691_v17 = vmul.f32 %v10618_v2, %v10618_v2  ;;  %v3723_v52 = vsel %vm2347_vm13, %v3689_v45, 0.0  ;;  %v10639_v29 = vsub.f32 %v10472_v54, %v10555_v36 }
 0x6f8   : > { %v3718_v4 = vadd.f32 %v3717_v19, %v3716_v38  ;;  %v3692_v21 = vmul.f32 %v10625_v59, %v10625_v59  ;;  %v3725_v44 = vsel %vm2347_vm13, %v3690_v46, 0.0  ;;  %v10646_v25 = vsub.f32 %v10479_v20, %v10555_v36 }
 0x6f9   : > { %v3693_v55 = vmul.f32 %v10632_v49, %v10632_v49  ;;  %v3727_v11 = vsel %vm2347_vm13, %v3691_v17, 0.0  ;;  %v10653_v54 = vsub.f32 %v10482_v28, %v10555_v36  ;;  %v3694_v23 = vmul.f32 %v10639_v29, %v10639_v29 }
 0x6fa   : > { %v3720_v58 = vadd.f32 %v3719_v41, %v3718_v4  ;;  %v3729_v14 = vsel %vm2347_vm13, %v3692_v21, 0.0  ;;  %v10660_v20 = vsub.f32 %v10489_v43, %v10555_v36  ;;  %v3695_v63 = vmul.f32 %v10646_v25, %v10646_v25 }
 0x6fb   : > { %v3731_v40 = vsel %vm2347_vm13, %v3693_v55, 0.0  ;;  %v10667_v28 = vsub.f32 %v10492_v51, %v10555_v36  ;;  %v3696_v56 = vmul.f32 %v10653_v54, %v10653_v54  ;;  %v3733_v48 = vsel %vm2347_vm13, %v3694_v23, 0.0 }
 0x6fc   : > { %v3722_v60 = vadd.f32 %v3721_v42, %v3720_v58  ;;  %v10674_v43 = vsub.f32 %v10499_v12, %v10555_v36  ;;  %v3697_v38 = vmul.f32 %v10660_v20, %v10660_v20  ;;  %v3735_v5 = vsel %vm2347_vm13, %v3695_v63, 0.0 }
 0x6fd   : > { %v10681_v51 = vsub.f32 %v10502_v22, %v10555_v36  ;;  %v3698_v4 = vmul.f32 %v10667_v28, %v10667_v28  ;;  %v3737_v45 = vsel %vm2347_vm13, %v3696_v56, 0.0  ;;  %v10688_v12 = vsub.f32 %v10509_v61, %v10555_v36 }
 0x6fe   : > { %v3724_v30 = vadd.f32 %v3723_v52, %v3722_v60  ;;  %v3699_v58 = vmul.f32 %v10674_v43, %v10674_v43  ;;  %v3739_v46 = vsel %vm2347_vm13, %v3697_v38, 0.0  ;;  %v10695_v22 = vsub.f32 %v10512_v7, %v10555_v36 }
 0x6ff   : > { %v3700_v60 = vmul.f32 %v10681_v51, %v10681_v51  ;;  %v3741_v17 = vsel %vm2347_vm13, %v3698_v4, 0.0  ;;  %v10702_v61 = vsub.f32 %v10519_v53, %v10555_v36  ;;  %v10709_v7 = vsub.f32 %v10522_v16, %v10555_v36 }
 0x700   : > { %v3726_v6 = vadd.f32 %v3725_v44, %v3724_v30  ;;  %v3701_v30 = vmul.f32 %v10688_v12, %v10688_v12  ;;  %v3743_v21 = vsel %vm2347_vm13, %v3699_v58, 0.0  ;;  %v10716_v53 = vsub.f32 %v10529_v47, %v10555_v36 }
 0x701   : > { %v3745_v55 = vsel %vm2347_vm13, %v3700_v60, 0.0  ;;  %v3676_v16 = vsub.f32 %v10532_v39, %v10555_v36 }
 0x702   : > { %v3728_v33 = vadd.f32 %v3727_v11, %v3726_v6  ;;  %v3702_v6 = vmul.f32 %v10695_v22, %v10695_v22  ;;  %v3747_v23 = vsel %vm2347_vm13, %v3701_v30, 0.0  ;;  %v3705_v47 = vmul.f32 %v10716_v53, %v10716_v53 }
 0x704   : > { %v3730_v35 = vadd.f32 %v3729_v14, %v3728_v33  ;;  %v3703_v33 = vmul.f32 %v10702_v61, %v10702_v61  ;;  %v3749_v63 = vsel %vm2347_vm13, %v3702_v6, 0.0 }
 0x706   : > { %v3732_v57 = vadd.f32 %v3731_v40, %v3730_v35  ;;  %v3704_v35 = vmul.f32 %v10709_v7, %v10709_v7  ;;  %v3751_v56 = vsel %vm2347_vm13, %v3703_v33, 0.0 }
 0x708   : > { %v3734_v31 = vadd.f32 %v3733_v48, %v3732_v57  ;;  %v3677_v57 = vsub.f32 %v10539_v3, %v10555_v36  ;;  %v3753_v38 = vsel %vm2347_vm13, %v3704_v35, 0.0  ;;  %v3709_v36 = vmul.f32 %v10561_v26, %v10561_v26 }
 0x70a   : > { %v3736_v19 = vadd.f32 %v3735_v5, %v3734_v31  ;;  %v3706_v31 = vmul.f32 %v3676_v16, %v3676_v16  ;;  %v3707_v39 = vmul.f32 %v3677_v57, %v3677_v57  ;;  %v3763_v30 = vsel %vm2347_vm13, %v3709_v36, 0.0 }
 0x70c   : > { %v3738_v41 = vadd.f32 %v3737_v45, %v3736_v19  ;;  %v3755_v19 = vsel %vm2347_vm13, %v3705_v47, 0.0  ;;  %v3708_v45 = vmul.f32 %v10558_v27, %v10558_v27  ;;  %v3759_v58 = vsel %vm2347_vm13, %v3707_v39, 0.0 }
 0x70e   : > { %v3740_v42 = vadd.f32 %v3739_v46, %v3738_v41  ;;  %v3757_v41 = vsel %vm2347_vm13, %v3706_v31, 0.0  ;;  %v3761_v60 = vsel %vm2347_vm13, %v3708_v45, 0.0 }
 0x710   : > { %v3742_v52 = vadd.f32 %v3741_v17, %v3740_v42  ;;  %v3710_v42 = vmul.f32 %v10564_v62, %v10564_v62 }
 0x712   : > { %v3744_v44 = vadd.f32 %v3743_v21, %v3742_v52  ;;  %v3711_v52 = vmul.f32 %v10567_v18, %v10567_v18  ;;  %v3765_v6 = vsel %vm2347_vm13, %v3710_v42, 0.0 }
 0x714   : > { %v3746_v11 = vadd.f32 %v3745_v55, %v3744_v44  ;;  %v3712_v44 = vmul.f32 %v10578_v37, %v10578_v37  ;;  %v3767_v33 = vsel %vm2347_vm13, %v3711_v52, 0.0 }
 0x716   : > { %v3748_v14 = vadd.f32 %v3747_v23, %v3746_v11  ;;  %v3713_v11 = vmul.f32 %v10581_v9, %v10581_v9 }
 0x718   : > { %v3750_v40 = vadd.f32 %v3749_v63, %v3748_v14  ;;  %v3769_v14 = vsel %vm2347_vm13, %v3712_v44, 0.0  ;;  %v3771_v63 = vsel %vm2347_vm13, %v3713_v11, 0.0 }
 0x71a   : > { %v3752_v48 = vadd.f32 %v3751_v56, %v3750_v40 }
 0x71c   : > { %v3754_v5 = vadd.f32 %v3753_v38, %v3752_v48 }
 0x71e   : > { %v3756_v4 = vadd.f32 %v3755_v19, %v3754_v5 }
 0x720   : > { %v3758_v3 = vadd.f32 %v3757_v41, %v3756_v4  ;;  %v3782_v4 = vld [vmem:[%s913_s14] sm:$0x1] }
 0x722   : > { %v3760_v46 = vadd.f32 %v3759_v58, %v3758_v3 }
 0x724   : > { %v3762_v17 = vadd.f32 %v3761_v60, %v3760_v46 }
 0x726   : > { %v3764_v21 = vadd.f32 %v3763_v30, %v3762_v17 }
 0x728   : > { %v3766_v55 = vadd.f32 %v3765_v6, %v3764_v21 }
 0x72a   : > { %v3768_v23 = vadd.f32 %v3767_v33, %v3766_v55 }
 0x72c   : > { %v3770_v35 = vadd.f32 %v3769_v14, %v3768_v23 }
 0x72e   : > { %v3772_v40 = vadd.f32 %v3771_v63, %v3770_v35 }
 0x730   : > { %v3773_v47 = vrot.slane %v3772_v40, 4 }
 0x732   : > { %v3774_v56 = vadd.f32 %v3773_v47, %v3772_v40 }
 0x734   : > { %v3775_v48 = vrot.slane %v3774_v56, 2 }
 0x736   : > { %v3776_v31 = vadd.f32 %v3775_v48, %v3774_v56 }
 0x738   : > { %v3777_v38 = vrot.slane %v3776_v31, 1 }
 0x73a   : > { %v3778_v5 = vadd.f32 %v3777_v38, %v3776_v31 }
 0x73c   : > { %v3779_v39 = vmul.f32 0.004166667, %v3778_v5 }
 0x73e   : > { %v3780_v19 = vadd.f32 1e-05, %v3779_v39 }
 0x740   : > { %7487 = vrsqrt.f32 %v3780_v19 }
 0x74a   : > { %v7488_v45 = vpop.eup %7487 }
 0x74b   : > { %v3783_v41 = vmul.f32 %v7488_v45, %v3782_v4 }
 0x74d   : > { %v10756_v3 = vrot.slane %v3783_v41, %v9769_v34 }
 0x74f   : > { %v10760_v36 = vmul.f32 %v10756_v3, %v10639_v29  ;;  %v10764_v58 = vmul.f32 %v10756_v3, %v10646_v25  ;;  %v3800_v46 = vmul.f32 %v10756_v3, %v10653_v54  ;;  %v3801_v42 = vmul.f32 %v10756_v3, %v10660_v20 }
 0x750   : > { %v3802_v60 = vmul.f32 %v10756_v3, %v10667_v28  ;;  %v3803_v17 = vmul.f32 %v10756_v3, %v10674_v43  ;;  %v3804_v29 = vmul.f32 %v10756_v3, %v10681_v51  ;;  %v3805_v52 = vmul.f32 %v10756_v3, %v10688_v12  ;;  %v10788_v43 = vld [vmem:[%s921_s28] ss:$0 sm:$0xff]  ;;  %s12042_s28 = sld [smem:[#allocation61_spill]] }
 0x751   : > { %v3806_v25 = vmul.f32 %v10756_v3, %v10695_v22  ;;  %v3807_v54 = vmul.f32 %v10756_v3, %v10702_v61  ;;  %v3808_v20 = vmul.f32 %v10756_v3, %v10709_v7  ;;  %v3809_v28 = vmul.f32 %v10756_v3, %v10716_v53 }
 0x752   : > { %v3810_v51 = vmul.f32 %v10756_v3, %v3676_v16  ;;  %v3811_v30 = vmul.f32 %v10756_v3, %v3677_v57  ;;  %v3812_v12 = vmul.f32 %v10756_v3, %v10558_v27  ;;  %v3813_v22 = vmul.f32 %v10756_v3, %v10561_v26 }
 0x753   : > { %v3814_v61 = vmul.f32 %v10756_v3, %v10564_v62  ;;  %v3815_v7 = vmul.f32 %v10756_v3, %v10567_v18  ;;  %v3816_v53 = vmul.f32 %v10756_v3, %v10578_v37  ;;  %v3817_v16 = vmul.f32 %v10756_v3, %v10581_v9 }
 0x754   : > { %v3837_v57 = vadd.f32 %v10788_v43, %v3800_v46  ;;  %v3838_v21 = vadd.f32 %v10788_v43, %v3801_v42  ;;  %v3839_v27 = vadd.f32 %v10788_v43, %v3802_v60  ;;  %v3840_v26 = vadd.f32 %v10788_v43, %v3803_v17 }
 0x755   : > { %v3841_v44 = vadd.f32 %v10788_v43, %v3804_v29  ;;  %v3842_v62 = vadd.f32 %v10788_v43, %v3805_v52  ;;  %v3843_v18 = vadd.f32 %v10788_v43, %v3806_v25  ;;  %v3844_v6 = vadd.f32 %v10788_v43, %v3807_v54 }
 0x756   : > { %v3845_v37 = vadd.f32 %v10788_v43, %v3808_v20  ;;  %v3846_v9 = vadd.f32 %v10788_v43, %v3809_v28  ;;  %v3847_v55 = vadd.f32 %v10788_v43, %v3810_v51  ;;  %v3848_v11 = vadd.f32 %v10788_v43, %v3811_v30  ;;  %s10928_s27 = scalar_lea.vmem %s12042_s28, %s9819_s26  ;;  %s12060_s26 = scalar_lea.vmem [#allocation20], %s8567_s22 }
 0x757   : > { %v3849_v33 = vadd.f32 %v10788_v43, %v3812_v12  ;;  %v3850_v23 = vadd.f32 %v10788_v43, %v3813_v22  ;;  %v3851_v14 = vadd.f32 %v10788_v43, %v3814_v61  ;;  %v3852_v35 = vadd.f32 %v10788_v43, %v3815_v7 }
 0x758   : > { %v3853_v63 = vadd.f32 %v10788_v43, %v3816_v53  ;;  %v3854_v40 = vadd.f32 %v10788_v43, %v3817_v16  ;;  %v3867_v47 = vmax.f32 %v3837_v57, 0.0  ;;  %v3868_v56 = vmax.f32 %v3838_v21, 0.0 }
 0x759   : > { %v3869_v48 = vmax.f32 %v3839_v27, 0.0  ;;  %v3870_v31 = vmax.f32 %v3840_v26, 0.0  ;;  %v3871_v38 = vmax.f32 %v3841_v44, 0.0  ;;  %v3872_v5 = vmax.f32 %v3842_v62, 0.0 }
 0x75a   : > { %v3873_v39 = vmax.f32 %v3843_v18, 0.0  ;;  %v3874_v19 = vmax.f32 %v3844_v6, 0.0  ;;  %v3875_v4 = vmax.f32 %v3845_v37, 0.0  ;;  %v3876_v45 = vmax.f32 %v3846_v9, 0.0  ;;  %3897 = vst.msk [vmem:[#allocation3 + $0x60] sm:$0xff] %vm2347_vm13, %v3867_v47  ;;  %3898 = vst.msk [vmem:[#allocation3 + $0x68] sm:$0xff] %vm2347_vm13, %v3868_v56 }
 0x75b   : > { %v3877_v41 = vmax.f32 %v3847_v55, 0.0  ;;  %v3878_v46 = vmax.f32 %v3848_v11, 0.0  ;;  %v3879_v42 = vmax.f32 %v3849_v33, 0.0  ;;  %v3880_v60 = vmax.f32 %v3850_v23, 0.0  ;;  %3902 = vst.msk [vmem:[#allocation3 + $0x88] sm:$0xff] %vm2347_vm13, %v3872_v5  ;;  %3899 = vst.msk [vmem:[#allocation3 + $0x70] sm:$0xff] %vm2347_vm13, %v3869_v48 }
 0x75c   : > { %3900 = vst.msk [vmem:[#allocation3 + $0x78] sm:$0xff] %vm2347_vm13, %v3870_v31  ;;  %3901 = vst.msk [vmem:[#allocation3 + $0x80] sm:$0xff] %vm2347_vm13, %v3871_v38  ;;  %v3881_v17 = vmax.f32 %v3851_v14, 0.0  ;;  %v3882_v29 = vmax.f32 %v3852_v35, 0.0  ;;  %v3883_v52 = vmax.f32 %v3853_v63, 0.0  ;;  %v3884_v25 = vmax.f32 %v3854_v40, 0.0 }
 0x75d   : > { %3903 = vst.msk [vmem:[#allocation3 + $0x90] sm:$0xff] %vm2347_vm13, %v3873_v39  ;;  %3904 = vst.msk [vmem:[#allocation3 + $0x98] sm:$0xff] %vm2347_vm13, %v3874_v19  ;;  %v3790_v54 = vmul.f32 %v10756_v3, %v10585_v13  ;;  %v3791_v20 = vmul.f32 %v10756_v3, %v10589_v8  ;;  %v3788_v28 = vmul.f32 %v10756_v3, %v10571_v10 }
 0x75e   : > { %3905 = vst.msk [vmem:[#allocation3 + $0xa0] sm:$0xff] %vm2347_vm13, %v3875_v4  ;;  %3906 = vst.msk [vmem:[#allocation3 + $0xa8] sm:$0xff] %vm2347_vm13, %v3876_v45  ;;  %v3789_v51 = vmul.f32 %v10756_v3, %v10575_v32  ;;  %v3792_v13 = vmul.f32 %v10756_v3, %v10597_v50  ;;  %v3793_v8 = vmul.f32 %v10756_v3, %v10603_v1 }
 0x75f   : > { %3907 = vst.msk [vmem:[#allocation3 + $0xb0] sm:$0xff] %vm2347_vm13, %v3877_v41  ;;  %3908 = vst.msk [vmem:[#allocation3 + $0xb8] sm:$0xff] %vm2347_vm13, %v3878_v46  ;;  %v3794_v10 = vmul.f32 %v10756_v3, %v10611_v24  ;;  %v3795_v32 = vmul.f32 %v10756_v3, %v10618_v2  ;;  %v3827_v30 = vadd.f32 %v10788_v43, %v3790_v54 }
 0x760   : > { %3909 = vst.msk [vmem:[#allocation3 + $0xc0] sm:$0xff] %vm2347_vm13, %v3879_v42  ;;  %3910 = vst.msk [vmem:[#allocation3 + $0xc8] sm:$0xff] %vm2347_vm13, %v3880_v60  ;;  %v3828_v12 = vadd.f32 %v10788_v43, %v3791_v20  ;;  %v3825_v22 = vadd.f32 %v10788_v43, %v3788_v28  ;;  %v3826_v61 = vadd.f32 %v10788_v43, %v3789_v51 }
 0x761   : > { %3911 = vst.msk [vmem:[#allocation3 + $0xd0] sm:$0xff] %vm2347_vm13, %v3881_v17  ;;  %3912 = vst.msk [vmem:[#allocation3 + $0xd8] sm:$0xff] %vm2347_vm13, %v3882_v29  ;;  %v3829_v7 = vadd.f32 %v10788_v43, %v3792_v13  ;;  %v3830_v50 = vadd.f32 %v10788_v43, %v3793_v8  ;;  %v3831_v1 = vadd.f32 %v10788_v43, %v3794_v10  ;;  %v3857_v24 = vmax.f32 %v3827_v30, 0.0  ;;  %v3927_v21 = vld [vmem:[#allocation3 + $0x60] ss:$2 sm:$0xff] }
 0x762   : > { %3913 = vst.msk [vmem:[#allocation3 + $0xe0] sm:$0xff] %vm2347_vm13, %v3883_v52  ;;  %3914 = vst.msk [vmem:[#allocation3 + $0xe8] sm:$0xff] %vm2347_vm13, %v3884_v25  ;;  %v3832_v53 = vadd.f32 %v10788_v43, %v3795_v32  ;;  %v3858_v16 = vmax.f32 %v3828_v12, 0.0  ;;  %v3855_v57 = vmax.f32 %v3825_v22, 0.0  ;;  %v3856_v2 = vmax.f32 %v3826_v61, 0.0 }
 0x763   : > { %v3859_v27 = vmax.f32 %v3829_v7, 0.0  ;;  %v3860_v26 = vmax.f32 %v3830_v50, 0.0  ;;  %v3861_v44 = vmax.f32 %v3831_v1, 0.0  ;;  %v3957_v18 = vld [vmem:[#allocation3 + $0x61] ss:$2 sm:$0xff]  ;;  %3887 = vst.msk [vmem:[#allocation3 + $0x10] sm:$0xff] %vm2347_vm13, %v3857_v24  ;;  %v3796_v6 = vmul.f32 %v10756_v3, %v10625_v59 }
 0x764   : > { %v3862_v62 = vmax.f32 %v3832_v53, 0.0  ;;  %3888 = vst.msk [vmem:[#allocation3 + $0x18] sm:$0xff] %vm2347_vm13, %v3858_v16  ;;  %3885 = vst.msk [vmem:[#allocation3] sm:$0xff] %vm2347_vm13, %v3855_v57  ;;  %v3797_v37 = vmul.f32 %v10756_v3, %v10632_v49  ;;  %v3835_v9 = vadd.f32 %v10788_v43, %v10760_v36  ;;  %v3836_v55 = vadd.f32 %v10788_v43, %v10764_v58  ;;  %v3929_v11 = vld [vmem:[#allocation3 + $0x70] ss:$2 sm:$0xff]  ;;  %v4276_v1 = vld [vmem:[%s10928_s27] sm:$0xff] }
 0x765   : > { %3886 = vst.msk [vmem:[#allocation3 + $0x8] sm:$0xff] %vm2347_vm13, %v3856_v2  ;;  %v3959_v33 = vld [vmem:[#allocation3 + $0x71] ss:$2 sm:$0xff]  ;;  %v3931_v23 = vld [vmem:[#allocation3 + $0x80] ss:$2 sm:$0xff]  ;;  %3889 = vst.msk [vmem:[#allocation3 + $0x20] sm:$0xff] %vm2347_vm13, %v3859_v27  ;;  %v10880_v59 = vmax.f32 %v3927_v21, %v3957_v18  ;;  %v3833_v58 = vadd.f32 %v10788_v43, %v3796_v6 }
 0x766   : > { %3890 = vst.msk [vmem:[#allocation3 + $0x28] sm:$0xff] %vm2347_vm13, %v3860_v26  ;;  %3891 = vst.msk [vmem:[#allocation3 + $0x30] sm:$0xff] %vm2347_vm13, %v3861_v44  ;;  %v10882_v49 = vmax.f32 %v3929_v11, %v3959_v33  ;;  %v3961_v3 = vld [vmem:[#allocation3 + $0x81] ss:$2 sm:$0xff]  ;;  %v3933_v36 = vld [vmem:[#allocation3 + $0x90] ss:$2 sm:$0xff]  ;;  %v3834_v35 = vadd.f32 %v10788_v43, %v3797_v37 }
 0x767   : > { %3892 = vst.msk [vmem:[#allocation3 + $0x38] sm:$0xff] %vm2347_vm13, %v3862_v62  ;;  %v3963_v14 = vld [vmem:[#allocation3 + $0x91] ss:$2 sm:$0xff]  ;;  %v3865_v63 = vmax.f32 %v3835_v9, 0.0  ;;  %v3866_v40 = vmax.f32 %v3836_v55, 0.0  ;;  %3995 = vst.msk [vmem:[#allocation2 + $0x30] sm:$0xff] %vm2347_vm13, %v10880_v59  ;;  %v10890_v48 = vmax.f32 %v3931_v23, %v3961_v3 }
 0x768   : > { %v3935_v47 = vld [vmem:[#allocation3 + $0xa0] ss:$2 sm:$0xff]  ;;  %v3965_v56 = vld [vmem:[#allocation3 + $0xa1] ss:$2 sm:$0xff]  ;;  %4132 = vst.msk [vmem:[#allocation2 + $0x34] sm:$0xf0] %vm2953_vm15, %v10882_v49  ;;  %v10892_v31 = vmax.f32 %v3933_v36, %v3963_v14 }
 0x769   : > { %v10894_v38 = vmax.f32 %v3935_v47, %v3965_v56  ;;  %v3937_v5 = vld [vmem:[#allocation3 + $0xb0] ss:$2 sm:$0xff]  ;;  %v3967_v39 = vld [vmem:[#allocation3 + $0xb1] ss:$2 sm:$0xff]  ;;  %v3939_v19 = vld [vmem:[#allocation3 + $0xc0] ss:$2 sm:$0xff] }
 0x76a   : > { %v3863_v43 = vmax.f32 %v3833_v58, 0.0  ;;  %v3864_v4 = vmax.f32 %v3834_v35, 0.0  ;;  %3895 = vst.msk [vmem:[#allocation3 + $0x50] sm:$0xff] %vm2347_vm13, %v3865_v63  ;;  %3896 = vst.msk [vmem:[#allocation3 + $0x58] sm:$0xff] %vm2347_vm13, %v3866_v40  ;;  %v10898_v45 = vmax.f32 %v3937_v5, %v3967_v39  ;;  %v3969_v41 = vld [vmem:[#allocation3 + $0xc1] ss:$2 sm:$0xff] }
 0x76b   : > { %v3941_v46 = vld [vmem:[#allocation3 + $0xd0] ss:$2 sm:$0xff]  ;;  %4133 = vst.msk [vmem:[#allocation2 + $0x3c] sm:$0xff] %vm2347_vm13, %v10890_v48  ;;  %4134 = vst.msk [vmem:[#allocation2 + $0x44] sm:$0xff] %vm2347_vm13, %v10892_v31  ;;  %v10906_v42 = vmax.f32 %v3939_v19, %v3969_v41  ;;  %v3971_v60 = vld [vmem:[#allocation3 + $0xd1] ss:$2 sm:$0xff] }
 0x76c   : > { %4135 = vst.msk [vmem:[#allocation2 + $0x4c] sm:$0xff] %vm2347_vm13, %v10894_v38  ;;  %v3943_v17 = vld [vmem:[#allocation3 + $0xe0] ss:$2 sm:$0xff]  ;;  %v3973_v29 = vld [vmem:[#allocation3 + $0xe1] ss:$2 sm:$0xff]  ;;  %3893 = vst.msk [vmem:[#allocation3 + $0x40] sm:$0xff] %vm2347_vm13, %v3863_v43  ;;  %v10912_v52 = vmax.f32 %v3941_v46, %v3971_v60 }
 0x76d   : > { %3894 = vst.msk [vmem:[#allocation3 + $0x48] sm:$0xff] %vm2347_vm13, %v3864_v4  ;;  %4136 = vst.msk [vmem:[#allocation2 + $0x54] sm:$0xff] %vm2347_vm13, %v10898_v45  ;;  %v10914_v25 = vmax.f32 %v3943_v17, %v3973_v29  ;;  %v3917_v54 = vld [vmem:[#allocation3 + $0x10] ss:$2 sm:$0xff]  ;;  %v3947_v20 = vld [vmem:[#allocation3 + $0x11] ss:$2 sm:$0xff] }
 0x76e   : > { %v3915_v28 = vld [vmem:[#allocation3] ss:$2 sm:$0xff]  ;;  %4137 = vst.msk [vmem:[#allocation2 + $0x5c] sm:$0xff] %vm2347_vm13, %v10906_v42  ;;  %v3975_v51 = vmax.f32 %v3917_v54, %v3947_v20  ;;  %v3945_v13 = vld [vmem:[#allocation3 + $0x1] ss:$2 sm:$0xff]  ;;  %4138 = vst.msk [vmem:[#allocation2 + $0x64] sm:$0xff] %vm2347_vm13, %v10912_v52 }
 0x76f   : > { %v3919_v8 = vld [vmem:[#allocation3 + $0x20] ss:$2 sm:$0xff]  ;;  %v3949_v10 = vld [vmem:[#allocation3 + $0x21] ss:$2 sm:$0xff]  ;;  %4139 = vst.msk [vmem:[#allocation2 + $0x6c] sm:$0xf] %vm2969_vm14, %v10914_v25  ;;  %v3974_v32 = vmax.f32 %v3915_v28, %v3945_v13 }
 0x770   : > { %v3976_v30 = vmax.f32 %v3919_v8, %v3949_v10  ;;  %v3921_v12 = vld [vmem:[#allocation3 + $0x30] ss:$2 sm:$0xff]  ;;  %v3951_v22 = vld [vmem:[#allocation3 + $0x31] ss:$2 sm:$0xff]  ;;  %4006 = vrot.lane.b32.xlu1 %v3975_v51, %s8000_s6  ;;  %3990 = vst.msk [vmem:[#allocation2 + $0x8] sm:$0xff] %vm2347_vm13, %v3975_v51  ;;  %v4279_v26 = vld [vmem:[%s10928_s27 + $0x18] sm:$0xff] }
 0x771   : > { %v3977_v61 = vmax.f32 %v3921_v12, %v3951_v22  ;;  %4004 = vrot.lane.b32.xlu0 %v3974_v32, %s8000_s6  ;;  %3989 = vst.msk [vmem:[#allocation2] sm:$0xff] %vm2347_vm13, %v3974_v32  ;;  %v3925_v7 = vld [vmem:[#allocation3 + $0x50] ss:$2 sm:$0xff]  ;;  %v3955_v50 = vld [vmem:[#allocation3 + $0x51] ss:$2 sm:$0xff]  ;;  %v4280_v62 = vld [vmem:[%s10928_s27 + $0x20] sm:$0xff] }
 0x772   : > { %3991 = vst.msk [vmem:[#allocation2 + $0x10] sm:$0xff] %vm2347_vm13, %v3976_v30  ;;  %v3979_v53 = vmax.f32 %v3925_v7, %v3955_v50  ;;  %v4277_v24 = vld [vmem:[%s10928_s27 + $0x8] sm:$0xff]  ;;  %v4278_v27 = vld [vmem:[%s10928_s27 + $0x10] sm:$0xff]  ;;  %v4283_v9 = vld [vmem:[%s10928_s27 + $0x38] sm:$0xff]  ;;  %vm12043_vm15 = vcmask 254080  }
 0x773   : > { %3992 = vst.msk [vmem:[#allocation2 + $0x18] sm:$0xff] %vm2347_vm13, %v3977_v61  ;;  %v7105_v2 = vpack.c.bf16 %v4277_v24, %v4276_v1  ;;  %v7109_v44 = vpack.c.bf16 %v4279_v26, %v4278_v27  ;;  %v4281_v18 = vld [vmem:[%s10928_s27 + $0x28] sm:$0xff]  ;;  %v4282_v37 = vld [vmem:[%s10928_s27 + $0x30] sm:$0xff]  ;;  %v4284_v11 = vld [vmem:[%s10928_s27 + $0x40] sm:$0xff] }
 0x774   : > { %v3923_v16 = vld [vmem:[#allocation3 + $0x40] ss:$2 sm:$0xff]  ;;  %v3953_v57 = vld [vmem:[#allocation3 + $0x41] ss:$2 sm:$0xff]  ;;  %4036 = vrot.lane.b32.xlu1 %v3974_v32, %s8001_s8  ;;  %3994 = vst.msk [vmem:[#allocation2 + $0x28] sm:$0xff] %vm2347_vm13, %v3979_v53  ;;  %v7113_v6 = vpack.c.bf16 %v4281_v18, %v4280_v62  ;;  %v7117_v55 = vpack.c.bf16 %v4283_v9, %v4282_v37  ;;  %v4285_v33 = vld [vmem:[%s10928_s27 + $0x48] sm:$0xff] }
 0x775   : > { %v3978_v21 = vmax.f32 %v3923_v16, %v3953_v57  ;;  %4008 = vrot.lane.b32.xlu0 %v3976_v30, %s8000_s6  ;;  %7106 = vmatprep.subr.bf16.mxu1 %v7105_v2  ;;  %v7121_v23 = vpack.c.bf16 %v4285_v33, %v4284_v11 }
 0x776   : > { %7108 = vmatpush3.bf16.msra.mxu1 %v7105_v2 }
 0x777   : > { %3993 = vst.msk [vmem:[#allocation2 + $0x20] sm:$0xff] %vm2347_vm13, %v3978_v21  ;;  %7110 = vmatprep.subr.bf16.mxu1 %v7109_v44 }
 0x778   : > { %4040 = vrot.lane.b32.xlu1 %v3976_v30, %s8001_s8 }
 0x779   : > { %4038 = vrot.lane.b32.xlu0 %v3975_v51, %s8001_s8 }
 0x77a   : > { %7112 = vmatpush3.bf16.msra.mxu1 %v7109_v44 }
 0x77b   : > { %7114 = vmatprep.subr.bf16.mxu1 %v7113_v6 }
 0x77c   : > { %4070 = vrot.lane.b32.xlu1 %v3975_v51, %s8002_s0 }
 0x77d   : > { %4068 = vrot.lane.b32.xlu0 %v3974_v32, %s8002_s0 }
 0x77e   : > { %7116 = vmatpush3.bf16.msra.mxu1 %v7113_v6 }
 0x77f   : > { %7118 = vmatprep.subr.bf16.mxu1 %v7117_v55 }
 0x780   : > { %4100 = vrot.lane.b32.xlu1 %v3974_v32, %s8003_s16 }
 0x781   : > { %4072 = vrot.lane.b32.xlu0 %v3976_v30, %s8002_s0 }
 0x782   : > { %7120 = vmatpush3.bf16.msra.mxu1 %v7117_v55 }
 0x783   : > { %7122 = vmatprep.subr.bf16.mxu1 %v7121_v23 }
 0x784   : > { %4010 = vrot.lane.b32.xlu1 %v3977_v61, %s8000_s6 }
 0x785   : > { %4102 = vrot.lane.b32.xlu0 %v3975_v51, %s8003_s16 }
 0x786   : > { %7124 = vmatpush3.bf16.msra.mxu1 %v7121_v23 }
 0x788   : > { %4012 = vrot.lane.b32.xlu1 %v3978_v21, %s8000_s6 }
 0x789   : > { %4104 = vrot.lane.b32.xlu0 %v3976_v30, %s8003_s16 }
 0x78c   : > { %4044 = vrot.lane.b32.xlu1 %v3978_v21, %s8001_s8 }
 0x78d   : > { %4042 = vrot.lane.b32.xlu0 %v3977_v61, %s8001_s8 }
 0x790   : > { %4076 = vrot.lane.b32.xlu1 %v3978_v21, %s8002_s0 }
 0x791   : > { %4074 = vrot.lane.b32.xlu0 %v3977_v61, %s8002_s0 }
 0x794   : > { %4014 = vrot.lane.b32.xlu1 %v3979_v53, %s8000_s6 }
 0x795   : > { %4106 = vrot.lane.b32.xlu0 %v3977_v61, %s8003_s16 }
 0x798   : > { %4016 = vrot.lane.b32.xlu1 %v10880_v59, %s8000_s6 }
 0x799   : > { %4108 = vrot.lane.b32.xlu0 %v3978_v21, %s8003_s16 }
 0x79c   : > { %4048 = vrot.lane.b32.xlu1 %v10880_v59, %s8001_s8 }
 0x79d   : > { %4046 = vrot.lane.b32.xlu0 %v3979_v53, %s8001_s8 }
 0x7a0   : > { %4080 = vrot.lane.b32.xlu1 %v10880_v59, %s8002_s0 }
 0x7a1   : > { %4078 = vrot.lane.b32.xlu0 %v3979_v53, %s8002_s0 }
 0x7a4   : > { %4018 = vrot.lane.b32.xlu1 %v10882_v49, %s8000_s6 }
 0x7a5   : > { %4110 = vrot.lane.b32.xlu0 %v3979_v53, %s8003_s16 }
 0x7a8   : > { %4050 = vrot.lane.b32.xlu1 %v10882_v49, %s8001_s8 }
 0x7a9   : > { %4112 = vrot.lane.b32.xlu0 %v10880_v59, %s8003_s16 }
 0x7ac   : > { %4082 = vrot.lane.b32.xlu1 %v10882_v49, %s8002_s0 }
 0x7ad   : > { %4147 = vrot.lane.b32.xlu0 %v10890_v48, %s8000_s6 }
 0x7b0   : > { %4114 = vrot.lane.b32.xlu1 %v10882_v49, %s8003_s16 }
 0x7b1   : > { %4176 = vrot.lane.b32.xlu0 %v10890_v48, %s8001_s8 }
 0x7b4   : > { %4149 = vrot.lane.b32.xlu1 %v10892_v31, %s8000_s6 }
 0x7b5   : > { %4205 = vrot.lane.b32.xlu0 %v10890_v48, %s8002_s0 }
 0x7b8   : > { %4151 = vrot.lane.b32.xlu1 %v10894_v38, %s8000_s6 }
 0x7b9   : > { %4234 = vrot.lane.b32.xlu0 %v10890_v48, %s8003_s16 }
 0x7bc   : > { %4180 = vrot.lane.b32.xlu1 %v10894_v38, %s8001_s8 }
 0x7bd   : > { %4178 = vrot.lane.b32.xlu0 %v10892_v31, %s8001_s8 }
 0x7c0   : > { %4209 = vrot.lane.b32.xlu1 %v10894_v38, %s8002_s0 }
 0x7c1   : > { %4207 = vrot.lane.b32.xlu0 %v10892_v31, %s8002_s0 }
 0x7c4   : > { %4153 = vrot.lane.b32.xlu1 %v10898_v45, %s8000_s6 }
 0x7c5   : > { %4236 = vrot.lane.b32.xlu0 %v10892_v31, %s8003_s16 }
 0x7c8   : > { %4155 = vrot.lane.b32.xlu1 %v10906_v42, %s8000_s6 }
 0x7c9   : > { %4238 = vrot.lane.b32.xlu0 %v10894_v38, %s8003_s16 }
 0x7cc   : > { %4184 = vrot.lane.b32.xlu1 %v10906_v42, %s8001_s8 }
 0x7cd   : > { %4182 = vrot.lane.b32.xlu0 %v10898_v45, %s8001_s8 }
 0x7d0   : > { %4213 = vrot.lane.b32.xlu1 %v10906_v42, %s8002_s0 }
 0x7d1   : > { %4211 = vrot.lane.b32.xlu0 %v10898_v45, %s8002_s0 }
 0x7d4   : > { %4157 = vrot.lane.b32.xlu1 %v10912_v52, %s8000_s6 }
 0x7d5   : > { %4240 = vrot.lane.b32.xlu0 %v10898_v45, %s8003_s16 }
 0x7d8   : > { %4159 = vrot.lane.b32.xlu1 %v10914_v25, %s8000_s6 }
 0x7d9   : > { %4242 = vrot.lane.b32.xlu0 %v10906_v42, %s8003_s16 }
 0x7dc   : > { %4188 = vrot.lane.b32.xlu1 %v10914_v25, %s8001_s8 }
 0x7dd   : > { %4186 = vrot.lane.b32.xlu0 %v10912_v52, %s8001_s8 }
 0x7e0   : > { %4217 = vrot.lane.b32.xlu1 %v10914_v25, %s8002_s0 }
 0x7e1   : > { %4215 = vrot.lane.b32.xlu0 %v10912_v52, %s8002_s0 }
 0x7e2   : > { %v4007_v59 = vpop.permute.xlu1 %4006 }
 0x7e3   : > { %4029 = vst.msk [vmem:[#allocation2 + $0x7] sm:$0xff] %vm2735_vm1, %v4007_v59  ;;  %v4005_v49 = vpop.permute.xlu0 %4004 }
 0x7e4   : > { %4028 = vst.msk [vmem:[#allocation2 - $0x1] sm:$0xfe] %vm11954_vm2, %v4005_v49  ;;  %4246 = vrot.lane.b32.xlu1 %v10914_v25, %s8003_s16  ;;  %vm12047_vm2 = vcmask 523655  }
 0x7e5   : > { %4244 = vrot.lane.b32.xlu0 %v10912_v52, %s8003_s16 }
 0x7e6   : > { %v4037_v3 = vpop.permute.xlu1 %4036 }
 0x7e7   : > { %4060 = vst.msk [vmem:[#allocation2 - $0x2] sm:$0xfc] %vm11953_vm3, %v4037_v3  ;;  %v4009_v36 = vpop.permute.xlu0 %4008  ;;  %vm12046_vm3 = vcmask 518528  }
 0x7e8   : > { %4030 = vst.msk [vmem:[#allocation2 + $0xf] sm:$0xff] %vm2735_vm1, %v4009_v36 }
 0x7ea   : > { %v4041_v14 = vpop.permute.xlu1 %4040 }
 0x7eb   : > { %4062 = vst.msk [vmem:[#allocation2 + $0xe] sm:$0xff] %vm2802_vm4, %v4041_v14  ;;  %v4039_v58 = vpop.permute.xlu0 %4038 }
 0x7ec   : > { %4061 = vst.msk [vmem:[#allocation2 + $0x6] sm:$0xff] %vm2802_vm4, %v4039_v58 }
 0x7ee   : > { %v4071_v35 = vpop.permute.xlu1 %4070 }
 0x7ef   : > { %4093 = vst.msk [vmem:[#allocation2 + $0x5] sm:$0xff] %vm2869_vm5, %v4071_v35  ;;  %v4069_v63 = vpop.permute.xlu0 %4068 }
 0x7f0   : > { %4092 = vst.msk [vmem:[#allocation2 - $0x3] sm:$0xf8] %vm11952_vm6, %v4069_v63  ;;  %vm12045_vm6 = vcmask 392454  }
 0x7f2   : > { %v4101_v40 = vpop.permute.xlu1 %4100 }
 0x7f3   : > { %4124 = vst.msk [vmem:[#allocation2 - $0x4] sm:$0xf0] %vm11951_vm7, %v4101_v40  ;;  %v4073_v47 = vpop.permute.xlu0 %4072  ;;  %vm12044_vm7 = vcmask 261253  }
 0x7f4   : > { %4094 = vst.msk [vmem:[#allocation2 + $0xd] sm:$0xff] %vm2869_vm5, %v4073_v47 }
 0x7f6   : > { %v4011_v56 = vpop.permute.xlu1 %4010 }
 0x7f7   : > { %4031 = vst.msk [vmem:[#allocation2 + $0x17] sm:$0xff] %vm2735_vm1, %v4011_v56  ;;  %v4103_v48 = vpop.permute.xlu0 %4102 }
 0x7f8   : > { %4125 = vst.msk [vmem:[#allocation2 + $0x4] sm:$0xff] %vm2936_vm8, %v4103_v48 }
 0x7fa   : > { %v4013_v31 = vpop.permute.xlu1 %4012 }
 0x7fb   : > { %4032 = vst.msk [vmem:[#allocation2 + $0x1f] sm:$0xff] %vm2735_vm1, %v4013_v31  ;;  %v4105_v38 = vpop.permute.xlu0 %4104 }
 0x7fc   : > { %4126 = vst.msk [vmem:[#allocation2 + $0xc] sm:$0xff] %vm2936_vm8, %v4105_v38  ;;  %v6668_v38 = vld [vmem:[%s929_s21] ss:$0 sm:$0xff] }
 0x7fe   : > { %v4045_v5 = vpop.permute.xlu1 %4044 }
 0x7ff   : > { %4064 = vst.msk [vmem:[#allocation2 + $0x1e] sm:$0xff] %vm2802_vm4, %v4045_v5  ;;  %v4043_v39 = vpop.permute.xlu0 %4042  ;;  %v4262_v19 = vld [vmem:[#allocation2] sm:$0xff] }
 0x800   : > { %4063 = vst.msk [vmem:[#allocation2 + $0x16] sm:$0xff] %vm2802_vm4, %v4043_v39  ;;  %7005 = vmatprep.mubr.msk.f32.mxu1 %vm3282_vm9, %v4262_v19 }
 0x802   : > { %v4077_v43 = vpop.permute.xlu1 %4076 }
 0x803   : > { %4096 = vst.msk [vmem:[#allocation2 + $0x1d] sm:$0xff] %vm2869_vm5, %v4077_v43  ;;  %v4075_v4 = vpop.permute.xlu0 %4074  ;;  %v4263_v45 = vld [vmem:[#allocation2 + $0x8] sm:$0xff] }
 0x804   : > { %4095 = vst.msk [vmem:[#allocation2 + $0x15] sm:$0xff] %vm2869_vm5, %v4075_v4  ;;  %7006 = vmatmul.mubr.msk.f32.vlgmr.msra.gmra.mrb[42].mxu1 %vm3282_vm9, %v4263_v45 }
 0x806   : > { %v4015_v41 = vpop.permute.xlu1 %4014 }
 0x807   : > { %4033 = vst.msk [vmem:[#allocation2 + $0x27] sm:$0xff] %vm2735_vm1, %v4015_v41  ;;  %v4107_v46 = vpop.permute.xlu0 %4106 }
 0x808   : > { %4127 = vst.msk [vmem:[#allocation2 + $0x14] sm:$0xff] %vm2936_vm8, %v4107_v46 }
 0x80a   : > { %v4017_v42 = vpop.permute.xlu1 %4016 }
 0x80b   : > { %4034 = vst.msk [vmem:[#allocation2 + $0x2f] sm:$0xff] %vm2735_vm1, %v4017_v42  ;;  %v4109_v60 = vpop.permute.xlu0 %4108 }
 0x80c   : > { %4128 = vst.msk [vmem:[#allocation2 + $0x1c] sm:$0xff] %vm2936_vm8, %v4109_v60 }
 0x80e   : > { %v4049_v17 = vpop.permute.xlu1 %4048 }
 0x80f   : > { %4066 = vst.msk [vmem:[#allocation2 + $0x2e] sm:$0xff] %vm2802_vm4, %v4049_v17  ;;  %v4047_v29 = vpop.permute.xlu0 %4046  ;;  %v4264_v52 = vld [vmem:[#allocation2 + $0x10] sm:$0xff] }
 0x810   : > { %4065 = vst.msk [vmem:[#allocation2 + $0x26] sm:$0xff] %vm2802_vm4, %v4047_v29  ;;  %7008 = vmatprep.mubr.msk.f32.mxu1 %vm3282_vm9, %v4264_v52 }
 0x812   : > { %v4081_v25 = vpop.permute.xlu1 %4080 }
 0x813   : > { %4098 = vst.msk [vmem:[#allocation2 + $0x2d] sm:$0xff] %vm2869_vm5, %v4081_v25  ;;  %v4079_v54 = vpop.permute.xlu0 %4078  ;;  %v4265_v20 = vld [vmem:[#allocation2 + $0x18] sm:$0xff] }
 0x814   : > { %4097 = vst.msk [vmem:[#allocation2 + $0x25] sm:$0xff] %vm2869_vm5, %v4079_v54  ;;  %7009 = vmatmul.mubr.msk.f32.gmra.mrb[44].mxu1 %vm3282_vm9, %v4265_v20 }
 0x816   : > { %v4019_v28 = vpop.permute.xlu1 %4018 }
 0x817   : > { %4035 = vst.msk [vmem:[#allocation2 + $0x37] sm:$0x1] %vm12043_vm15, %v4019_v28  ;;  %v4111_v51 = vpop.permute.xlu0 %4110  ;;  %vm12055_vm15 = vcmask 654852  }
 0x818   : > { %4168 = vst.msk [vmem:[#allocation2 + $0x33] sm:$0xe0] %vm12044_vm7, %v4019_v28  ;;  %vm12048_vm7 = vcmask 650752  }
 0x819   : > { %4129 = vst.msk [vmem:[#allocation2 + $0x24] sm:$0xff] %vm2936_vm8, %v4111_v51 }
 0x81a   : > { %v4051_v13 = vpop.permute.xlu1 %4050 }
 0x81b   : > { %4067 = vst.msk [vmem:[#allocation2 + $0x36] sm:$0x3] %vm2817_vm12, %v4051_v13  ;;  %v4113_v8 = vpop.permute.xlu0 %4112 }
 0x81c   : > { %4197 = vst.msk [vmem:[#allocation2 + $0x32] sm:$0xc0] %vm12045_vm6, %v4051_v13  ;;  %vm12054_vm6 = vcmask 523651  }
 0x81d   : > { %4130 = vst.msk [vmem:[#allocation2 + $0x2c] sm:$0xff] %vm2936_vm8, %v4113_v8 }
 0x81e   : > { %v4083_v10 = vpop.permute.xlu1 %4082 }
 0x81f   : > { %4099 = vst.msk [vmem:[#allocation2 + $0x35] sm:$0x7] %vm12046_vm3, %v4083_v10  ;;  %v4148_v32 = vpop.permute.xlu0 %4147  ;;  %vm12053_vm3 = vcmask 392450  }
 0x820   : > { %4226 = vst.msk [vmem:[#allocation2 + $0x31] sm:$0x80] %vm12047_vm2, %v4083_v10  ;;  %v4266_v30 = vld [vmem:[#allocation2 + $0x20] sm:$0xff]  ;;  %vm12049_vm2 = vmmov 0  }
 0x821   : > { %4169 = vst.msk [vmem:[#allocation2 + $0x3b] sm:$0xff] %vm2735_vm1, %v4148_v32  ;;  %7011 = vmatprep.mubr.msk.f32.mxu1 %vm3282_vm9, %v4266_v30 }
 0x822   : > { %v4115_v12 = vpop.permute.xlu1 %4114 }
 0x823   : > { %4131 = vst.msk [vmem:[#allocation2 + $0x34] sm:$0xf] %vm12048_vm7, %v4115_v12  ;;  %v4177_v22 = vpop.permute.xlu0 %4176 }
 0x824   : > { %v4267_v61 = vld [vmem:[#allocation2 + $0x28] sm:$0xff]  ;;  %4198 = vst.msk [vmem:[#allocation2 + $0x3a] sm:$0xff] %vm2802_vm4, %v4177_v22 }
 0x825   : > { %7012 = vmatmul.mubr.msk.f32.gmra.mrb[46].mxu1 %vm3282_vm9, %v4267_v61 }
 0x826   : > { %v4150_v7 = vpop.permute.xlu1 %4149 }
 0x827   : > { %4170 = vst.msk [vmem:[#allocation2 + $0x43] sm:$0xff] %vm2735_vm1, %v4150_v7  ;;  %v4206_v50 = vpop.permute.xlu0 %4205 }
 0x828   : > { %4227 = vst.msk [vmem:[#allocation2 + $0x39] sm:$0xff] %vm2869_vm5, %v4206_v50 }
 0x82a   : > { %v4152_v1 = vpop.permute.xlu1 %4151  ;;  %v4268_v53 = vld [vmem:[#allocation2 + $0x30] sm:$0xff] }
 0x82b   : > { %4171 = vst.msk [vmem:[#allocation2 + $0x4b] sm:$0xff] %vm2735_vm1, %v4152_v1  ;;  %v4235_v24 = vpop.permute.xlu0 %4234  ;;  %7014 = vmatprep.mubr.msk.f32.mxu1 %vm3282_vm9, %v4268_v53 }
 0x82c   : > { %4255 = vst.msk [vmem:[#allocation2 + $0x38] sm:$0xff] %vm2936_vm8, %v4235_v24 }
 0x82e   : > { %v4181_v16 = vpop.permute.xlu1 %4180 }
 0x82f   : > { %4200 = vst.msk [vmem:[#allocation2 + $0x4a] sm:$0xff] %vm2802_vm4, %v4181_v16  ;;  %v4179_v57 = vpop.permute.xlu0 %4178 }
 0x830   : > { %4199 = vst.msk [vmem:[#allocation2 + $0x42] sm:$0xff] %vm2802_vm4, %v4179_v57 }
 0x832   : > { %v4210_v2 = vpop.permute.xlu1 %4209 }
 0x833   : > { %4229 = vst.msk [vmem:[#allocation2 + $0x49] sm:$0xff] %vm2869_vm5, %v4210_v2  ;;  %v4208_v21 = vpop.permute.xlu0 %4207  ;;  %v4269_v27 = vld [vmem:[#allocation2 + $0x38] sm:$0xff] }
 0x834   : > { %4228 = vst.msk [vmem:[#allocation2 + $0x41] sm:$0xff] %vm2869_vm5, %v4208_v21  ;;  %7015 = vmatmul.mubr.msk.f32.gmra.mrb[48].mxu1 %vm3282_vm9, %v4269_v27 }
 0x836   : > { %v4154_v26 = vpop.permute.xlu1 %4153 }
 0x837   : > { %4172 = vst.msk [vmem:[#allocation2 + $0x53] sm:$0xff] %vm2735_vm1, %v4154_v26  ;;  %v4237_v44 = vpop.permute.xlu0 %4236 }
 0x838   : > { %4256 = vst.msk [vmem:[#allocation2 + $0x40] sm:$0xff] %vm2936_vm8, %v4237_v44 }
 0x83a   : > { %v4156_v62 = vpop.permute.xlu1 %4155 }
 0x83b   : > { %4173 = vst.msk [vmem:[#allocation2 + $0x5b] sm:$0xff] %vm2735_vm1, %v4156_v62  ;;  %v4239_v18 = vpop.permute.xlu0 %4238 }
 0x83c   : > { %4257 = vst.msk [vmem:[#allocation2 + $0x48] sm:$0xff] %vm2936_vm8, %v4239_v18 }
 0x83e   : > { %v4185_v6 = vpop.permute.xlu1 %4184 }
 0x83f   : > { %4202 = vst.msk [vmem:[#allocation2 + $0x5a] sm:$0xff] %vm2802_vm4, %v4185_v6  ;;  %v4183_v37 = vpop.permute.xlu0 %4182  ;;  %v4270_v9 = vld [vmem:[#allocation2 + $0x40] sm:$0xff] }
 0x840   : > { %4201 = vst.msk [vmem:[#allocation2 + $0x52] sm:$0xff] %vm2802_vm4, %v4183_v37  ;;  %7017 = vmatprep.mubr.msk.f32.mxu1 %vm3282_vm9, %v4270_v9 }
 0x842   : > { %v4214_v55 = vpop.permute.xlu1 %4213 }
 0x843   : > { %4231 = vst.msk [vmem:[#allocation2 + $0x59] sm:$0xff] %vm2869_vm5, %v4214_v55  ;;  %v4212_v11 = vpop.permute.xlu0 %4211  ;;  %v4271_v33 = vld [vmem:[#allocation2 + $0x48] sm:$0xff] }
 0x844   : > { %4230 = vst.msk [vmem:[#allocation2 + $0x51] sm:$0xff] %vm2869_vm5, %v4212_v11  ;;  %7018 = vmatmul.mubr.msk.f32.gmra.mrb[50].mxu1 %vm3282_vm9, %v4271_v33 }
 0x846   : > { %v4158_v23 = vpop.permute.xlu1 %4157 }
 0x847   : > { %4174 = vst.msk [vmem:[#allocation2 + $0x63] sm:$0xff] %vm2735_vm1, %v4158_v23  ;;  %v4241_v59 = vpop.permute.xlu0 %4240 }
 0x848   : > { %4258 = vst.msk [vmem:[#allocation2 + $0x50] sm:$0xff] %vm2936_vm8, %v4241_v59 }
 0x84a   : > { %v4160_v49 = vpop.permute.xlu1 %4159 }
 0x84b   : > { %4175 = vst.msk [vmem:[#allocation2 + $0x6b] sm:$0x1f] %vm3047_vm0, %v4160_v49  ;;  %v4243_v3 = vpop.permute.xlu0 %4242 }
 0x84c   : > { %4259 = vst.msk [vmem:[#allocation2 + $0x58] sm:$0xff] %vm2936_vm8, %v4243_v3 }
 0x84e   : > { %v4189_v36 = vpop.permute.xlu1 %4188 }
 0x84f   : > { %4204 = vst.msk [vmem:[#allocation2 + $0x6a] sm:$0x3f] %vm3110_vm10, %v4189_v36  ;;  %v4187_v14 = vpop.permute.xlu0 %4186  ;;  %v4272_v58 = vld [vmem:[#allocation2 + $0x50] sm:$0xff] }
 0x850   : > { %4203 = vst.msk [vmem:[#allocation2 + $0x62] sm:$0xff] %vm2802_vm4, %v4187_v14  ;;  %7020 = vmatprep.mubr.msk.f32.mxu1 %vm3282_vm9, %v4272_v58 }
 0x852   : > { %v4218_v35 = vpop.permute.xlu1 %4217 }
 0x853   : > { %4233 = vst.msk [vmem:[#allocation2 + $0x69] sm:$0x7f] %vm3173_vm11, %v4218_v35  ;;  %v4216_v63 = vpop.permute.xlu0 %4215  ;;  %v4273_v40 = vld [vmem:[#allocation2 + $0x58] sm:$0xff] }
 0x854   : > { %4232 = vst.msk [vmem:[#allocation2 + $0x61] sm:$0xff] %vm2869_vm5, %v4216_v63  ;;  %7021 = vmatmul.mubr.msk.f32.gmra.mrb[52].mxu1 %vm3282_vm9, %v4273_v40 }
 0x856   : > { %v4247_v47 = vpop.permute.xlu1 %4246 }
 0x857   : > { %4261 = vst.msk [vmem:[#allocation2 + $0x68] sm:$0xff] %vm2936_vm8, %v4247_v47  ;;  %v4245_v56 = vpop.permute.xlu0 %4244 }
 0x858   : > { %4260 = vst.msk [vmem:[#allocation2 + $0x60] sm:$0xff] %vm2936_vm8, %v4245_v56 }
 0x85e   : > { %v4275_v48 = vld [vmem:[#allocation2 + $0x68] sm:$0xff] }
 0x85f   : > { %v4274_v31 = vld [vmem:[#allocation2 + $0x60] sm:$0xff] }
 0x860   : > { %7023 = vmatprep.mubr.msk.f32.mxu1 %vm3282_vm9, %v4274_v31 }
 0x861   : > { %7024 = vmatmul.mubr.msk.f32.gmra.mrb[54].mxu1 %vm3282_vm9, %v4275_v48 }
 0x862   : > { %7046 = vmatprep.mubr.msk.f32.mxu1 %vm12049_vm2, %v12027_v15 }
 0x8d7   : > { %v7007_v5 = vpop.f32.mrb[42].mxu1 }
 0x8d8   : > { %v4407_v39 = vadd.f32 %v7007_v5, %v6668_v38  ;;  %v4401_v19 = vpop.f32.mrb[43].mxu1 }
 0x8d9   : > { %v4402_v43 = vadd.f32 %v6668_v38, %v4401_v19 }
 0x8da   : > { %v4471_v4 = vsel %vm2347_vm13, %v4407_v39, 0.0 }
 0x8db   : > { %v4470_v45 = vsel %vm2347_vm13, %v4402_v43, 0.0 }
 0x8dc   : > { %v4472_v41 = vadd.f32 %v4471_v4, %v4470_v45 }
 0x8e7   : > { %v7010_v46 = vpop.f32.mrb[44].mxu1 }
 0x8e8   : > { %v4411_v42 = vpop.f32.mrb[45].mxu1  ;;  %v4417_v60 = vadd.f32 %v7010_v46, %v6668_v38 }
 0x8e9   : > { %v4412_v17 = vadd.f32 %v6668_v38, %v4411_v42 }
 0x8ea   : > { %v4475_v25 = vsel %vm2347_vm13, %v4417_v60, 0.0 }
 0x8eb   : > { %v4473_v29 = vsel %vm2347_vm13, %v4412_v17, 0.0 }
 0x8ec   : > { %v4474_v52 = vadd.f32 %v4473_v29, %v4472_v41 }
 0x8ee   : > { %v4476_v54 = vadd.f32 %v4475_v25, %v4474_v52 }
 0x8f8   : > { %v7013_v20 = vpop.f32.mrb[46].mxu1 }
 0x8f9   : > { %v4421_v28 = vpop.f32.mrb[47].mxu1  ;;  %v4427_v51 = vadd.f32 %v7013_v20, %v6668_v38 }
 0x8fa   : > { %v4422_v13 = vadd.f32 %v6668_v38, %v4421_v28 }
 0x8fb   : > { %v4479_v32 = vsel %vm2347_vm13, %v4427_v51, 0.0 }
 0x8fc   : > { %v4477_v8 = vsel %vm2347_vm13, %v4422_v13, 0.0 }
 0x8fd   : > { %v4478_v10 = vadd.f32 %v4477_v8, %v4476_v54 }
 0x8ff   : > { %v4480_v30 = vadd.f32 %v4479_v32, %v4478_v10 }
 0x907   : > { %v7016_v12 = vpop.f32.mrb[48].mxu1 }
 0x908   : > { %v4431_v22 = vpop.f32.mrb[49].mxu1  ;;  %v4437_v61 = vadd.f32 %v7016_v12, %v6668_v38 }
 0x909   : > { %v4432_v7 = vadd.f32 %v6668_v38, %v4431_v22 }
 0x90a   : > { %v4483_v53 = vsel %vm2347_vm13, %v4437_v61, 0.0 }
 0x90b   : > { %v4481_v50 = vsel %vm2347_vm13, %v4432_v7, 0.0 }
 0x90c   : > { %v4482_v1 = vadd.f32 %v4481_v50, %v4480_v30 }
 0x90e   : > { %v4484_v24 = vadd.f32 %v4483_v53, %v4482_v1 }
 0x917   : > { %v7019_v16 = vpop.f32.mrb[50].mxu1 }
 0x918   : > { %v4441_v57 = vpop.f32.mrb[51].mxu1  ;;  %v4447_v2 = vadd.f32 %v7019_v16, %v6668_v38 }
 0x919   : > { %v4442_v21 = vadd.f32 %v6668_v38, %v4441_v57 }
 0x91a   : > { %v4487_v44 = vsel %vm2347_vm13, %v4447_v2, 0.0 }
 0x91b   : > { %v4485_v27 = vsel %vm2347_vm13, %v4442_v21, 0.0 }
 0x91c   : > { %v4486_v26 = vadd.f32 %v4485_v27, %v4484_v24 }
 0x91e   : > { %v4488_v62 = vadd.f32 %v4487_v44, %v4486_v26 }
 0x927   : > { %v7022_v18 = vpop.f32.mrb[52].mxu1 }
 0x928   : > { %v4451_v6 = vpop.f32.mrb[53].mxu1  ;;  %v4457_v37 = vadd.f32 %v7022_v18, %v6668_v38 }
 0x929   : > { %v4452_v9 = vadd.f32 %v6668_v38, %v4451_v6 }
 0x92a   : > { %v4491_v33 = vsel %vm2347_vm13, %v4457_v37, 0.0 }
 0x92b   : > { %v4489_v55 = vsel %vm2347_vm13, %v4452_v9, 0.0 }
 0x92c   : > { %v4490_v11 = vadd.f32 %v4489_v55, %v4488_v62 }
 0x92e   : > { %v4492_v23 = vadd.f32 %v4491_v33, %v4490_v11 }
 0x934   : > { %v7025_v59 = vpop.f32.mrb[54].mxu1 }
 0x935   : > { %v4461_v49 = vpop.f32.mrb[55].mxu1  ;;  %v4467_v3 = vadd.f32 %v7025_v59, %v6668_v38 }
 0x936   : > { %v4462_v36 = vadd.f32 %v6668_v38, %v4461_v49 }
 0x937   : > { %v4495_v35 = vsel %vm2347_vm13, %v4467_v3, 0.0 }
 0x938   : > { %v4493_v14 = vsel %vm2347_vm13, %v4462_v36, 0.0 }
 0x939   : > { %v4494_v58 = vadd.f32 %v4493_v14, %v4492_v23 }
 0x93b   : > { %v4496_v63 = vadd.f32 %v4495_v35, %v4494_v58 }
 0x93d   : > { %v4497_v40 = vrot.slane %v4496_v63, 4 }
 0x93f   : > { %v4498_v47 = vadd.f32 %v4497_v40, %v4496_v63 }
 0x941   : > { %v4499_v56 = vrot.slane %v4498_v47, 2 }
 0x943   : > { %v4500_v48 = vadd.f32 %v4499_v56, %v4498_v47 }
 0x945   : > { %v4501_v31 = vrot.slane %v4500_v48, 1 }
 0x947   : > { %v4502_v5 = vadd.f32 %v4501_v31, %v4500_v48 }
 0x949   : > { %v4503_v19 = vmul.f32 0.008928572, %v4502_v5 }
 0x94b   : > { %v11135_v4 = vsub.f32 %v4402_v43, %v4503_v19  ;;  %v11137_v45 = vsub.f32 %v4407_v39, %v4503_v19  ;;  %v11139_v41 = vsub.f32 %v4412_v17, %v4503_v19  ;;  %v11141_v38 = vsub.f32 %v4417_v60, %v4503_v19 }
 0x94c   : > { %v11143_v46 = vsub.f32 %v4422_v13, %v4503_v19  ;;  %v11145_v42 = vsub.f32 %v4427_v51, %v4503_v19  ;;  %v11147_v29 = vsub.f32 %v4432_v7, %v4503_v19  ;;  %v11149_v52 = vsub.f32 %v4437_v61, %v4503_v19 }
 0x94d   : > { %v11151_v25 = vsub.f32 %v4442_v21, %v4503_v19  ;;  %v11153_v54 = vsub.f32 %v4447_v2, %v4503_v19  ;;  %v11155_v43 = vsub.f32 %v4452_v9, %v4503_v19  ;;  %v11157_v39 = vsub.f32 %v4457_v37, %v4503_v19 }
 0x94e   : > { %v11159_v17 = vsub.f32 %v4462_v36, %v4503_v19  ;;  %v11161_v60 = vsub.f32 %v4467_v3, %v4503_v19  ;;  %v4518_v20 = vmul.f32 %v11135_v4, %v11135_v4  ;;  %v4519_v28 = vmul.f32 %v11137_v45, %v11137_v45 }
 0x94f   : > { %v4520_v51 = vmul.f32 %v11139_v41, %v11139_v41  ;;  %v4521_v13 = vmul.f32 %v11141_v38, %v11141_v38  ;;  %v4522_v30 = vmul.f32 %v11143_v46, %v11143_v46  ;;  %v4523_v61 = vmul.f32 %v11145_v42, %v11145_v42 }
 0x950   : > { %v4532_v8 = vsel %vm2347_vm13, %v4518_v20, 0.0  ;;  %v4533_v10 = vsel %vm2347_vm13, %v4519_v28, 0.0  ;;  %v4524_v1 = vmul.f32 %v11147_v29, %v11147_v29  ;;  %v4525_v16 = vmul.f32 %v11149_v52, %v11149_v52 }
 0x951   : > { %v4534_v32 = vadd.f32 %v4533_v10, %v4532_v8  ;;  %v4535_v12 = vsel %vm2347_vm13, %v4520_v51, 0.0  ;;  %v4537_v7 = vsel %vm2347_vm13, %v4521_v13, 0.0  ;;  %v4539_v53 = vsel %vm2347_vm13, %v4522_v30, 0.0  ;;  %v4568_v51 = vld [vmem:[%s937_s19] sm:$0x1]  ;;  %v4889_v10 = vld [vmem:[%s11211_s5 + $0x8] sm:$0xff] }
 0x952   : > { %v4541_v57 = vsel %vm2347_vm13, %v4523_v61, 0.0  ;;  %v4526_v21 = vmul.f32 %v11151_v25, %v11151_v25  ;;  %v4543_v27 = vsel %vm2347_vm13, %v4524_v1, 0.0  ;;  %v4527_v44 = vmul.f32 %v11153_v54, %v11153_v54  ;;  %v4888_v8 = vld [vmem:[%s11211_s5] sm:$0xff]  ;;  %v4891_v61 = vld [vmem:[%s11211_s5 + $0x18] sm:$0xff]  ;;  %s12051_s19 = scalar_lea.vmem [#allocation19], %s8567_s22  ;;  %s8006_s22 = smov 80  }
 0x953   : > { %v4536_v22 = vadd.f32 %v4535_v12, %v4534_v32  ;;  %v4545_v62 = vsel %vm2347_vm13, %v4525_v16, 0.0  ;;  %v4528_v6 = vmul.f32 %v11155_v43, %v11155_v43  ;;  %v4529_v55 = vmul.f32 %v11157_v39, %v11157_v39  ;;  %v6683_v1 = vld [vmem:[%s12051_s19] ss:$0 sm:$0xff] }
 0x954   : > { %v4547_v37 = vsel %vm2347_vm13, %v4526_v21, 0.0  ;;  %v4549_v11 = vsel %vm2347_vm13, %v4527_v44, 0.0  ;;  %v4530_v23 = vmul.f32 %v11159_v17, %v11159_v17  ;;  %v4531_v3 = vmul.f32 %v11161_v60, %v11161_v60 }
 0x955   : > { %v4538_v50 = vadd.f32 %v4537_v7, %v4536_v22  ;;  %v4551_v59 = vsel %vm2347_vm13, %v4528_v6, 0.0  ;;  %v4553_v36 = vsel %vm2347_vm13, %v4529_v55, 0.0  ;;  %v8004_v13 = vmov 0.0|0.0   ;;  %v4890_v22 = vld [vmem:[%s11211_s5 + $0x10] sm:$0xff] }
 0x956   : > { %v4555_v58 = vsel %vm2347_vm13, %v4530_v23, 0.0  ;;  %v4557_v63 = vsel %vm2347_vm13, %v4531_v3, 0.0  ;;  %7125 = vmatprep.subr.bf16.mxu1 %v8004_v13  ;;  %v7126_v30 = vpack.c.bf16 %v4889_v10, %v4888_v8 }
 0x957   : > { %v4540_v24 = vadd.f32 %v4539_v53, %v4538_v50  ;;  %v7129_v50 = vpack.c.bf16 %v4891_v61, %v4890_v22 }
 0x958   : > { %7127 = vmatpush3.bf16.msra.mxu1 %v7126_v30 }
 0x959   : > { %v4542_v2 = vadd.f32 %v4541_v57, %v4540_v24  ;;  %7128 = vmatprep.subr.bf16.mxu1 %v8004_v13 }
 0x95b   : > { %v4544_v26 = vadd.f32 %v4543_v27, %v4542_v2 }
 0x95c   : > { %7130 = vmatpush3.bf16.msra.mxu1 %v7129_v50 }
 0x95d   : > { %v4546_v18 = vadd.f32 %v4545_v62, %v4544_v26  ;;  %7131 = vmatprep.subr.bf16.mxu1 %v8004_v13 }
 0x95f   : > { %v4548_v9 = vadd.f32 %v4547_v37, %v4546_v18 }
 0x961   : > { %v4550_v33 = vadd.f32 %v4549_v11, %v4548_v9  ;;  %v4892_v9 = vld [vmem:[%s11211_s5 + $0x20] sm:$0xff] }
 0x963   : > { %v4552_v49 = vadd.f32 %v4551_v59, %v4550_v33 }
 0x965   : > { %v4554_v14 = vadd.f32 %v4553_v36, %v4552_v49  ;;  %v4894_v36 = vld [vmem:[%s11211_s5 + $0x30] sm:$0xff] }
 0x967   : > { %v4556_v35 = vadd.f32 %v4555_v58, %v4554_v14  ;;  %v4895_v14 = vld [vmem:[%s11211_s5 + $0x38] sm:$0xff] }
 0x969   : > { %v4558_v40 = vadd.f32 %v4557_v63, %v4556_v35 }
 0x96b   : > { %v4559_v47 = vrot.slane %v4558_v40, 4 }
 0x96d   : > { %v4560_v56 = vadd.f32 %v4559_v47, %v4558_v40 }
 0x96f   : > { %v4561_v48 = vrot.slane %v4560_v56, 2 }
 0x971   : > { %v4562_v31 = vadd.f32 %v4561_v48, %v4560_v56 }
 0x973   : > { %v4563_v5 = vrot.slane %v4562_v31, 1 }
 0x975   : > { %v4564_v19 = vadd.f32 %v4563_v5, %v4562_v31  ;;  %v7135_v31 = vpack.c.bf16 %v4895_v14, %v4894_v36 }
 0x977   : > { %v4565_v20 = vmul.f32 0.008928572, %v4564_v19  ;;  %v4896_v19 = vld [vmem:[%s11211_s5 + $0x40] sm:$0xff] }
 0x979   : > { %v4566_v28 = vadd.f32 1e-05, %v4565_v20  ;;  %v4897_v20 = vld [vmem:[%s11211_s5 + $0x48] sm:$0xff] }
 0x97a   : > { %v7138_v8 = vpack.c.bf16 %v4897_v20, %v4896_v19 }
 0x97b   : > { %7489 = vrsqrt.f32 %v4566_v28 }
 0x985   : > { %v7490_v32 = vpop.eup %7489 }
 0x986   : > { %v4569_v12 = vmul.f32 %v7490_v32, %v4568_v51 }
 0x988   : > { %v4573_v7 = vrot.slane %v4569_v12, %v9769_v34 }
 0x98a   : > { %v4586_v53 = vmul.f32 %v4573_v7, %v11159_v17  ;;  %v4575_v24 = vmul.f32 %v4573_v7, %v11137_v45  ;;  %v4574_v16 = vmul.f32 %v4573_v7, %v11135_v4  ;;  %v4576_v57 = vmul.f32 %v4573_v7, %v11139_v41 }
 0x98b   : > { %v4577_v2 = vmul.f32 %v4573_v7, %v11141_v38  ;;  %v4578_v21 = vmul.f32 %v4573_v7, %v11143_v46  ;;  %v4579_v27 = vmul.f32 %v4573_v7, %v11145_v42  ;;  %v4580_v26 = vmul.f32 %v4573_v7, %v11147_v29  ;;  %v4893_v29 = vld [vmem:[%s11211_s5 + $0x28] sm:$0xff] }
 0x98c   : > { %v4607_v44 = vadd.f32 %v6683_v1, %v4586_v53  ;;  %v4596_v62 = vadd.f32 %v6683_v1, %v4575_v24  ;;  %v4595_v17 = vadd.f32 %v6683_v1, %v4574_v16  ;;  %v4597_v18 = vadd.f32 %v6683_v1, %v4576_v57 }
 0x98d   : > { %v4598_v4 = vadd.f32 %v6683_v1, %v4577_v2  ;;  %v4599_v45 = vadd.f32 %v6683_v1, %v4578_v21  ;;  %v4600_v41 = vadd.f32 %v6683_v1, %v4579_v27  ;;  %v4601_v6 = vadd.f32 %v6683_v1, %v4580_v26 }
 0x98e   : > { %v11231_v38 = vmax.f32 %v4607_v44, 0.0  ;;  %v4610_v46 = vmax.f32 %v4596_v62, 0.0  ;;  %v4609_v37 = vmax.f32 %v4595_v17, 0.0  ;;  %v4611_v42 = vmax.f32 %v4597_v18, 0.0 }
 0x98f   : > { %v4612_v55 = vmax.f32 %v4598_v4, 0.0  ;;  %v11235_v11 = vmax.f32 %v4599_v45, 0.0  ;;  %v11237_v33 = vmax.f32 %v4600_v41, 0.0  ;;  %v11239_v23 = vmax.f32 %v4601_v6, 0.0 }
 0x990   : > { %4754 = vst.msk [vmem:[#allocation2 + $0x5c] sm:$0xff] %vm2347_vm13, %v11231_v38  ;;  %4639 = vrot.lane.b32.xlu1 %v4610_v46, %s8000_s6  ;;  %4624 = vst.msk [vmem:[#allocation2 + $0x8] sm:$0xff] %vm2347_vm13, %v4610_v46  ;;  %4637 = vrot.lane.b32.xlu0 %v4609_v37, %s8000_s6  ;;  %v4581_v59 = vmul.f32 %v4573_v7, %v11149_v52  ;;  %v4582_v49 = vmul.f32 %v4573_v7, %v11151_v25 }
 0x991   : > { %4623 = vst.msk [vmem:[#allocation2] sm:$0xff] %vm2347_vm13, %v4609_v37  ;;  %4625 = vst.msk [vmem:[#allocation2 + $0x10] sm:$0xff] %vm2347_vm13, %v4611_v42  ;;  %v4583_v3 = vmul.f32 %v4573_v7, %v11153_v54  ;;  %v4584_v58 = vmul.f32 %v4573_v7, %v11155_v43  ;;  %v4585_v52 = vmul.f32 %v4573_v7, %v11157_v39 }
 0x992   : > { %4626 = vst.msk [vmem:[#allocation2 + $0x18] sm:$0xff] %vm2347_vm13, %v4612_v55  ;;  %4627 = vst.msk [vmem:[#allocation2 + $0x20] sm:$0xff] %vm2347_vm13, %v11235_v11  ;;  %v4587_v25 = vmul.f32 %v4573_v7, %v11161_v60  ;;  %v7132_v54 = vpack.c.bf16 %v4893_v29, %v4892_v9  ;;  %v4602_v35 = vadd.f32 %v6683_v1, %v4581_v59 }
 0x993   : > { %4628 = vst.msk [vmem:[#allocation2 + $0x28] sm:$0xff] %vm2347_vm13, %v11237_v33  ;;  %v4603_v63 = vadd.f32 %v6683_v1, %v4582_v49  ;;  %v4604_v40 = vadd.f32 %v6683_v1, %v4583_v3  ;;  %v4605_v47 = vadd.f32 %v6683_v1, %v4584_v58  ;;  %v4606_v56 = vadd.f32 %v6683_v1, %v4585_v52 }
 0x994   : > { %4629 = vst.msk [vmem:[#allocation2 + $0x30] sm:$0xf] %vm2969_vm14, %v11239_v23  ;;  %v4608_v48 = vadd.f32 %v6683_v1, %v4587_v25  ;;  %7133 = vmatpush3.bf16.msra.mxu1 %v7132_v54  ;;  %4667 = vrot.lane.b32.xlu1 %v4610_v46, %s8001_s8  ;;  %v4616_v43 = vmax.f32 %v4602_v35, 0.0 }
 0x995   : > { %4665 = vrot.lane.b32.xlu0 %v4609_v37, %s8001_s8  ;;  %v4617_v5 = vmax.f32 %v4603_v63, 0.0  ;;  %v4618_v39 = vmax.f32 %v4604_v40, 0.0  ;;  %v4619_v60 = vmax.f32 %v4605_v47, 0.0  ;;  %v4620_v28 = vmax.f32 %v4606_v56, 0.0  ;;  %7134 = vmatprep.subr.bf16.mxu1 %v8004_v13 }
 0x996   : > { %v4622_v51 = vmax.f32 %v4608_v48, 0.0  ;;  %4749 = vst.msk [vmem:[#allocation2 + $0x34] sm:$0xff] %vm2347_vm13, %v4616_v43 }
 0x997   : > { %4750 = vst.msk [vmem:[#allocation2 + $0x3c] sm:$0xff] %vm2347_vm13, %v4617_v5  ;;  %4751 = vst.msk [vmem:[#allocation2 + $0x44] sm:$0xff] %vm2347_vm13, %v4618_v39 }
 0x998   : > { %4752 = vst.msk [vmem:[#allocation2 + $0x4c] sm:$0xff] %vm2347_vm13, %v4619_v60  ;;  %4753 = vst.msk [vmem:[#allocation2 + $0x54] sm:$0xff] %vm2347_vm13, %v4620_v28  ;;  %7136 = vmatpush3.bf16.msra.mxu1 %v7135_v31  ;;  %4695 = vrot.lane.b32.xlu1 %v4610_v46, %s8002_s0 }
 0x999   : > { %4755 = vst.msk [vmem:[#allocation2 + $0x64] sm:$0xf] %vm2969_vm14, %v4622_v51  ;;  %4693 = vrot.lane.b32.xlu0 %v4609_v37, %s8002_s0  ;;  %7137 = vmatprep.subr.bf16.mxu1 %v8004_v13  ;;  %vm12052_vm14 = vcmask 261249  }
 0x99a   : > { %vm12056_vm7 = vmmov %vm12052_vm14 }
 0x99c   : > { %7139 = vmatpush3.bf16.msra.mxu1 %v7138_v8  ;;  %4723 = vrot.lane.b32.xlu1 %v4610_v46, %s8003_s16 }
 0x99d   : > { %4721 = vrot.lane.b32.xlu0 %v4609_v37, %s8003_s16 }
 0x9a0   : > { %4669 = vrot.lane.b32.xlu1 %v4611_v42, %s8001_s8 }
 0x9a1   : > { %4641 = vrot.lane.b32.xlu0 %v4611_v42, %s8000_s6 }
 0x9a4   : > { %4725 = vrot.lane.b32.xlu1 %v4611_v42, %s8003_s16 }
 0x9a5   : > { %4697 = vrot.lane.b32.xlu0 %v4611_v42, %s8002_s0 }
 0x9a8   : > { %4671 = vrot.lane.b32.xlu1 %v4612_v55, %s8001_s8 }
 0x9a9   : > { %4643 = vrot.lane.b32.xlu0 %v4612_v55, %s8000_s6 }
 0x9ac   : > { %4727 = vrot.lane.b32.xlu1 %v4612_v55, %s8003_s16 }
 0x9ad   : > { %4699 = vrot.lane.b32.xlu0 %v4612_v55, %s8002_s0 }
 0x9b0   : > { %4673 = vrot.lane.b32.xlu1 %v11235_v11, %s8001_s8 }
 0x9b1   : > { %4645 = vrot.lane.b32.xlu0 %v11235_v11, %s8000_s6 }
 0x9b4   : > { %4729 = vrot.lane.b32.xlu1 %v11235_v11, %s8003_s16 }
 0x9b5   : > { %4701 = vrot.lane.b32.xlu0 %v11235_v11, %s8002_s0 }
 0x9b8   : > { %4675 = vrot.lane.b32.xlu1 %v11237_v33, %s8001_s8 }
 0x9b9   : > { %4647 = vrot.lane.b32.xlu0 %v11237_v33, %s8000_s6 }
 0x9bc   : > { %4731 = vrot.lane.b32.xlu1 %v11237_v33, %s8003_s16 }
 0x9bd   : > { %4703 = vrot.lane.b32.xlu0 %v11237_v33, %s8002_s0 }
 0x9c0   : > { %4677 = vrot.lane.b32.xlu1 %v11239_v23, %s8001_s8 }
 0x9c1   : > { %4649 = vrot.lane.b32.xlu0 %v11239_v23, %s8000_s6 }
 0x9c4   : > { %4733 = vrot.lane.b32.xlu1 %v11239_v23, %s8003_s16 }
 0x9c5   : > { %4705 = vrot.lane.b32.xlu0 %v11239_v23, %s8002_s0 }
 0x9c8   : > { %4791 = vrot.lane.b32.xlu1 %v4616_v43, %s8001_s8 }
 0x9c9   : > { %4763 = vrot.lane.b32.xlu0 %v4616_v43, %s8000_s6 }
 0x9cc   : > { %4847 = vrot.lane.b32.xlu1 %v4616_v43, %s8003_s16 }
 0x9cd   : > { %4819 = vrot.lane.b32.xlu0 %v4616_v43, %s8002_s0 }
 0x9d0   : > { %4793 = vrot.lane.b32.xlu1 %v4617_v5, %s8001_s8 }
 0x9d1   : > { %4765 = vrot.lane.b32.xlu0 %v4617_v5, %s8000_s6 }
 0x9d4   : > { %4849 = vrot.lane.b32.xlu1 %v4617_v5, %s8003_s16 }
 0x9d5   : > { %4821 = vrot.lane.b32.xlu0 %v4617_v5, %s8002_s0 }
 0x9d8   : > { %4795 = vrot.lane.b32.xlu1 %v4618_v39, %s8001_s8 }
 0x9d9   : > { %4767 = vrot.lane.b32.xlu0 %v4618_v39, %s8000_s6 }
 0x9dc   : > { %4851 = vrot.lane.b32.xlu1 %v4618_v39, %s8003_s16 }
 0x9dd   : > { %4823 = vrot.lane.b32.xlu0 %v4618_v39, %s8002_s0 }
 0x9e0   : > { %4797 = vrot.lane.b32.xlu1 %v4619_v60, %s8001_s8 }
 0x9e1   : > { %4769 = vrot.lane.b32.xlu0 %v4619_v60, %s8000_s6 }
 0x9e4   : > { %4853 = vrot.lane.b32.xlu1 %v4619_v60, %s8003_s16 }
 0x9e5   : > { %4825 = vrot.lane.b32.xlu0 %v4619_v60, %s8002_s0 }
 0x9e8   : > { %4799 = vrot.lane.b32.xlu1 %v4620_v28, %s8001_s8 }
 0x9e9   : > { %4771 = vrot.lane.b32.xlu0 %v4620_v28, %s8000_s6 }
 0x9ec   : > { %4855 = vrot.lane.b32.xlu1 %v4620_v28, %s8003_s16 }
 0x9ed   : > { %4827 = vrot.lane.b32.xlu0 %v4620_v28, %s8002_s0 }
 0x9f0   : > { %4801 = vrot.lane.b32.xlu1 %v11231_v38, %s8001_s8 }
 0x9f1   : > { %4773 = vrot.lane.b32.xlu0 %v11231_v38, %s8000_s6 }
 0x9f4   : > { %4857 = vrot.lane.b32.xlu1 %v11231_v38, %s8003_s16 }
 0x9f5   : > { %4829 = vrot.lane.b32.xlu0 %v11231_v38, %s8002_s0 }
 0x9f8   : > { %4803 = vrot.lane.b32.xlu1 %v4622_v51, %s8001_s8 }
 0x9f9   : > { %4775 = vrot.lane.b32.xlu0 %v4622_v51, %s8000_s6 }
 0x9fc   : > { %4859 = vrot.lane.b32.xlu1 %v4622_v51, %s8003_s16 }
 0x9fd   : > { %4831 = vrot.lane.b32.xlu0 %v4622_v51, %s8002_s0 }
 0xa02   : > { %v4640_v13 = vpop.permute.xlu1 %4639  ;;  %v4638_v10 = vpop.permute.xlu0 %4637 }
 0xa03   : > { %4659 = vst.msk [vmem:[#allocation2 + $0x7] sm:$0xff] %vm2735_vm1, %v4640_v13 }
 0xa04   : > { %4658 = vst.msk [vmem:[#allocation2 - $0x1] sm:$0xfe] %vm12052_vm14, %v4638_v10  ;;  %vm12057_vm14 = vmmov %vm12053_vm3 }
 0xa06   : > { %v4668_v32 = vpop.permute.xlu1 %4667 }
 0xa07   : > { %v4666_v30 = vpop.permute.xlu0 %4665  ;;  %4687 = vst.msk [vmem:[#allocation2 + $0x6] sm:$0xff] %vm2802_vm4, %v4668_v32 }
 0xa08   : > { %4686 = vst.msk [vmem:[#allocation2 - $0x2] sm:$0xfc] %vm12053_vm3, %v4666_v30  ;;  %vm12058_vm3 = vmmov %vm12054_vm6 }
 0xa0a   : > { %v4696_v12 = vpop.permute.xlu1 %4695 }
 0xa0b   : > { %v4694_v22 = vpop.permute.xlu0 %4693  ;;  %4715 = vst.msk [vmem:[#allocation2 + $0x5] sm:$0xff] %vm2869_vm5, %v4696_v12 }
 0xa0c   : > { %4714 = vst.msk [vmem:[#allocation2 - $0x3] sm:$0xf8] %vm12054_vm6, %v4694_v22  ;;  %vm12059_vm6 = vmmov %vm12055_vm15 }
 0xa0e   : > { %v4724_v61 = vpop.permute.xlu1 %4723 }
 0xa0f   : > { %v4722_v7 = vpop.permute.xlu0 %4721  ;;  %4743 = vst.msk [vmem:[#allocation2 + $0x4] sm:$0xff] %vm2936_vm8, %v4724_v61 }
 0xa10   : > { %4742 = vst.msk [vmem:[#allocation2 - $0x4] sm:$0xf0] %vm12055_vm15, %v4722_v7 }
 0xa12   : > { %v4670_v50 = vpop.permute.xlu1 %4669 }
 0xa13   : > { %v4642_v1 = vpop.permute.xlu0 %4641 }
 0xa14   : > { %4660 = vst.msk [vmem:[#allocation2 + $0xf] sm:$0xff] %vm2735_vm1, %v4642_v1 }
 0xa15   : > { %4688 = vst.msk [vmem:[#allocation2 + $0xe] sm:$0xff] %vm2802_vm4, %v4670_v50 }
 0xa16   : > { %v4726_v53 = vpop.permute.xlu1 %4725 }
 0xa17   : > { %v4698_v24 = vpop.permute.xlu0 %4697  ;;  %v4875_v16 = vld [vmem:[#allocation2] sm:$0xff] }
 0xa18   : > { %4716 = vst.msk [vmem:[#allocation2 + $0xd] sm:$0xff] %vm2869_vm5, %v4698_v24  ;;  %7047 = vmatmul.mubr.msk.f32.vlgmr.msra.gmra.mrb[56].mxu1 %vm3282_vm9, %v4875_v16 }
 0xa19   : > { %4744 = vst.msk [vmem:[#allocation2 + $0xc] sm:$0xff] %vm2936_vm8, %v4726_v53  ;;  %7049 = vmatprep.mubr.msk.f32.mxu1 %vm12049_vm2, %v12027_v15  ;;  %v6684_v53 = vld [vmem:[%s12060_s26] ss:$0 sm:$0xff] }
 0xa1a   : > { %v4672_v57 = vpop.permute.xlu1 %4671 }
 0xa1b   : > { %v4644_v2 = vpop.permute.xlu0 %4643 }
 0xa1c   : > { %4661 = vst.msk [vmem:[#allocation2 + $0x17] sm:$0xff] %vm2735_vm1, %v4644_v2 }
 0xa1d   : > { %4689 = vst.msk [vmem:[#allocation2 + $0x16] sm:$0xff] %vm2802_vm4, %v4672_v57 }
 0xa1e   : > { %v4728_v21 = vpop.permute.xlu1 %4727 }
 0xa1f   : > { %v4700_v27 = vpop.permute.xlu0 %4699 }
 0xa20   : > { %4717 = vst.msk [vmem:[#allocation2 + $0x15] sm:$0xff] %vm2869_vm5, %v4700_v27  ;;  %v4876_v26 = vld [vmem:[#allocation2 + $0x8] sm:$0xff] }
 0xa21   : > { %4745 = vst.msk [vmem:[#allocation2 + $0x14] sm:$0xff] %vm2936_vm8, %v4728_v21  ;;  %7050 = vmatmul.mubr.msk.f32.gmra.mrb[58].mxu1 %vm3282_vm9, %v4876_v26 }
 0xa22   : > { %7052 = vmatprep.mubr.msk.f32.mxu1 %vm12049_vm2, %v12027_v15  ;;  %v4674_v44 = vpop.permute.xlu1 %4673 }
 0xa23   : > { %v4646_v62 = vpop.permute.xlu0 %4645 }
 0xa24   : > { %4662 = vst.msk [vmem:[#allocation2 + $0x1f] sm:$0xff] %vm2735_vm1, %v4646_v62 }
 0xa25   : > { %4690 = vst.msk [vmem:[#allocation2 + $0x1e] sm:$0xff] %vm2802_vm4, %v4674_v44 }
 0xa26   : > { %v4730_v17 = vpop.permute.xlu1 %4729 }
 0xa27   : > { %v4702_v18 = vpop.permute.xlu0 %4701 }
 0xa28   : > { %4718 = vst.msk [vmem:[#allocation2 + $0x1d] sm:$0xff] %vm2869_vm5, %v4702_v18  ;;  %v4877_v4 = vld [vmem:[#allocation2 + $0x10] sm:$0xff] }
 0xa29   : > { %4746 = vst.msk [vmem:[#allocation2 + $0x1c] sm:$0xff] %vm2936_vm8, %v4730_v17  ;;  %7053 = vmatmul.mubr.msk.f32.gmra.mrb[60].mxu1 %vm3282_vm9, %v4877_v4 }
 0xa2a   : > { %7055 = vmatprep.mubr.msk.f32.mxu1 %vm12049_vm2, %v12027_v15  ;;  %v4676_v45 = vpop.permute.xlu1 %4675 }
 0xa2b   : > { %v4648_v41 = vpop.permute.xlu0 %4647 }
 0xa2c   : > { %4663 = vst.msk [vmem:[#allocation2 + $0x27] sm:$0xff] %vm2735_vm1, %v4648_v41 }
 0xa2d   : > { %4691 = vst.msk [vmem:[#allocation2 + $0x26] sm:$0xff] %vm2802_vm4, %v4676_v45 }
 0xa2e   : > { %v4732_v6 = vpop.permute.xlu1 %4731 }
 0xa2f   : > { %v4704_v38 = vpop.permute.xlu0 %4703 }
 0xa30   : > { %4719 = vst.msk [vmem:[#allocation2 + $0x25] sm:$0xff] %vm2869_vm5, %v4704_v38  ;;  %v4878_v46 = vld [vmem:[#allocation2 + $0x18] sm:$0xff] }
 0xa31   : > { %4747 = vst.msk [vmem:[#allocation2 + $0x24] sm:$0xff] %vm2936_vm8, %v4732_v6  ;;  %7056 = vmatmul.mubr.msk.f32.gmra.mrb[62].mxu1 %vm3282_vm9, %v4878_v46 }
 0xa32   : > { %7058 = vmatprep.mubr.msk.f32.mxu1 %vm12049_vm2, %v12027_v15  ;;  %v4678_v37 = vpop.permute.xlu1 %4677 }
 0xa33   : > { %v4650_v42 = vpop.permute.xlu0 %4649 }
 0xa34   : > { %4664 = vst.msk [vmem:[#allocation2 + $0x2f] sm:$0x1f] %vm3047_vm0, %v4650_v42 }
 0xa35   : > { %4692 = vst.msk [vmem:[#allocation2 + $0x2e] sm:$0x3f] %vm3110_vm10, %v4678_v37 }
 0xa36   : > { %v4734_v9 = vpop.permute.xlu1 %4733 }
 0xa37   : > { %v4706_v29 = vpop.permute.xlu0 %4705 }
 0xa38   : > { %4720 = vst.msk [vmem:[#allocation2 + $0x2d] sm:$0x7f] %vm3173_vm11, %v4706_v29  ;;  %v4879_v55 = vld [vmem:[#allocation2 + $0x20] sm:$0xff] }
 0xa39   : > { %4748 = vst.msk [vmem:[#allocation2 + $0x2c] sm:$0xff] %vm2936_vm8, %v4734_v9  ;;  %7059 = vmatmul.mubr.msk.f32.gmra.mrb[64].mxu1 %vm3282_vm9, %v4879_v55 }
 0xa3a   : > { %7061 = vmatprep.mubr.msk.f32.mxu1 %vm12049_vm2, %v12027_v15  ;;  %v4792_v11 = vpop.permute.xlu1 %4791 }
 0xa3b   : > { %v4764_v33 = vpop.permute.xlu0 %4763 }
 0xa3c   : > { %4784 = vst.msk [vmem:[#allocation2 + $0x33] sm:$0xfe] %vm12056_vm7, %v4764_v33 }
 0xa3d   : > { %4812 = vst.msk [vmem:[#allocation2 + $0x32] sm:$0xfc] %vm12057_vm14, %v4792_v11 }
 0xa3e   : > { %v4848_v23 = vpop.permute.xlu1 %4847 }
 0xa3f   : > { %v4820_v59 = vpop.permute.xlu0 %4819 }
 0xa40   : > { %4840 = vst.msk [vmem:[#allocation2 + $0x31] sm:$0xf8] %vm12058_vm3, %v4820_v59  ;;  %v4880_v49 = vld [vmem:[#allocation2 + $0x28] sm:$0xff] }
 0xa41   : > { %4868 = vst.msk [vmem:[#allocation2 + $0x30] sm:$0xf0] %vm12059_vm6, %v4848_v23  ;;  %7062 = vmatmul.mubr.msk.f32.gmra.mrb[66].mxu1 %vm3282_vm9, %v4880_v49 }
 0xa42   : > { %7064 = vmatprep.mubr.msk.f32.mxu1 %vm12049_vm2, %v12027_v15  ;;  %v4794_v3 = vpop.permute.xlu1 %4793 }
 0xa43   : > { %v4766_v36 = vpop.permute.xlu0 %4765 }
 0xa44   : > { %4785 = vst.msk [vmem:[#allocation2 + $0x3b] sm:$0xff] %vm2735_vm1, %v4766_v36 }
 0xa45   : > { %4813 = vst.msk [vmem:[#allocation2 + $0x3a] sm:$0xff] %vm2802_vm4, %v4794_v3 }
 0xa46   : > { %v4850_v14 = vpop.permute.xlu1 %4849 }
 0xa47   : > { %v4822_v58 = vpop.permute.xlu0 %4821 }
 0xa48   : > { %4841 = vst.msk [vmem:[#allocation2 + $0x39] sm:$0xff] %vm2869_vm5, %v4822_v58  ;;  %v4881_v52 = vld [vmem:[#allocation2 + $0x30] sm:$0xff] }
 0xa49   : > { %4869 = vst.msk [vmem:[#allocation2 + $0x38] sm:$0xff] %vm2936_vm8, %v4850_v14  ;;  %7065 = vmatmul.mubr.msk.f32.gmra.mrb[68].mxu1 %vm3282_vm9, %v4881_v52 }
 0xa4a   : > { %7067 = vmatprep.mubr.msk.f32.mxu1 %vm12049_vm2, %v12027_v15  ;;  %v4796_v25 = vpop.permute.xlu1 %4795 }
 0xa4b   : > { %v4768_v54 = vpop.permute.xlu0 %4767 }
 0xa4c   : > { %4786 = vst.msk [vmem:[#allocation2 + $0x43] sm:$0xff] %vm2735_vm1, %v4768_v54 }
 0xa4d   : > { %4814 = vst.msk [vmem:[#allocation2 + $0x42] sm:$0xff] %vm2802_vm4, %v4796_v25 }
 0xa4e   : > { %v4852_v35 = vpop.permute.xlu1 %4851 }
 0xa4f   : > { %v4824_v63 = vpop.permute.xlu0 %4823 }
 0xa50   : > { %4842 = vst.msk [vmem:[#allocation2 + $0x41] sm:$0xff] %vm2869_vm5, %v4824_v63  ;;  %v4882_v40 = vld [vmem:[#allocation2 + $0x38] sm:$0xff] }
 0xa51   : > { %4870 = vst.msk [vmem:[#allocation2 + $0x40] sm:$0xff] %vm2936_vm8, %v4852_v35  ;;  %7068 = vmatmul.mubr.msk.f32.gmra.mrb[70].mxu1 %vm3282_vm9, %v4882_v40 }
 0xa52   : > { %7070 = vmatprep.mubr.msk.f32.mxu1 %vm12049_vm2, %v12027_v15  ;;  %v4798_v47 = vpop.permute.xlu1 %4797 }
 0xa53   : > { %v4770_v56 = vpop.permute.xlu0 %4769 }
 0xa54   : > { %4787 = vst.msk [vmem:[#allocation2 + $0x4b] sm:$0xff] %vm2735_vm1, %v4770_v56 }
 0xa55   : > { %4815 = vst.msk [vmem:[#allocation2 + $0x4a] sm:$0xff] %vm2802_vm4, %v4798_v47 }
 0xa56   : > { %v4854_v48 = vpop.permute.xlu1 %4853 }
 0xa57   : > { %v4826_v31 = vpop.permute.xlu0 %4825 }
 0xa58   : > { %4843 = vst.msk [vmem:[#allocation2 + $0x49] sm:$0xff] %vm2869_vm5, %v4826_v31  ;;  %v4883_v43 = vld [vmem:[#allocation2 + $0x40] sm:$0xff] }
 0xa59   : > { %4871 = vst.msk [vmem:[#allocation2 + $0x48] sm:$0xff] %vm2936_vm8, %v4854_v48  ;;  %7071 = vmatmul.mubr.msk.f32.gmra.mrb[72].mxu1 %vm3282_vm9, %v4883_v43 }
 0xa5a   : > { %7073 = vmatprep.mubr.msk.f32.mxu1 %vm12049_vm2, %v12027_v15  ;;  %v4800_v5 = vpop.permute.xlu1 %4799 }
 0xa5b   : > { %v4772_v39 = vpop.permute.xlu0 %4771 }
 0xa5c   : > { %4788 = vst.msk [vmem:[#allocation2 + $0x53] sm:$0xff] %vm2735_vm1, %v4772_v39 }
 0xa5d   : > { %4816 = vst.msk [vmem:[#allocation2 + $0x52] sm:$0xff] %vm2802_vm4, %v4800_v5 }
 0xa5e   : > { %v4856_v19 = vpop.permute.xlu1 %4855 }
 0xa5f   : > { %v4828_v20 = vpop.permute.xlu0 %4827 }
 0xa60   : > { %4844 = vst.msk [vmem:[#allocation2 + $0x51] sm:$0xff] %vm2869_vm5, %v4828_v20  ;;  %v4884_v60 = vld [vmem:[#allocation2 + $0x48] sm:$0xff] }
 0xa61   : > { %4872 = vst.msk [vmem:[#allocation2 + $0x50] sm:$0xff] %vm2936_vm8, %v4856_v19  ;;  %7074 = vmatmul.mubr.msk.f32.gmra.mrb[74].mxu1 %vm3282_vm9, %v4884_v60 }
 0xa62   : > { %7076 = vmatprep.mubr.msk.f32.mxu1 %vm12049_vm2, %v12027_v15  ;;  %v4802_v28 = vpop.permute.xlu1 %4801 }
 0xa63   : > { %v4774_v51 = vpop.permute.xlu0 %4773 }
 0xa64   : > { %4789 = vst.msk [vmem:[#allocation2 + $0x5b] sm:$0xff] %vm2735_vm1, %v4774_v51  ;;  %vm5288_vm1 = vcmask 517504  }
 0xa65   : > { %4817 = vst.msk [vmem:[#allocation2 + $0x5a] sm:$0xff] %vm2802_vm4, %v4802_v28  ;;  %vm5306_vm4 = vcmask 648704  }
 0xa66   : > { %v4858_v8 = vpop.permute.xlu1 %4857 }
 0xa67   : > { %v4830_v13 = vpop.permute.xlu0 %4829 }
 0xa68   : > { %4845 = vst.msk [vmem:[#allocation2 + $0x59] sm:$0xff] %vm2869_vm5, %v4830_v13  ;;  %v4885_v10 = vld [vmem:[#allocation2 + $0x50] sm:$0xff]  ;;  %vm5324_vm5 = vcmask 779904  }
 0xa69   : > { %4873 = vst.msk [vmem:[#allocation2 + $0x58] sm:$0xff] %vm2936_vm8, %v4858_v8  ;;  %7077 = vmatmul.mubr.msk.f32.gmra.mrb[76].mxu1 %vm3282_vm9, %v4885_v10 }
 0xa6a   : > { %7079 = vmatprep.mubr.msk.f32.mxu1 %vm12049_vm2, %v12027_v15  ;;  %v4804_v32 = vpop.permute.xlu1 %4803 }
 0xa6b   : > { %v4776_v30 = vpop.permute.xlu0 %4775 }
 0xa6c   : > { %4790 = vst.msk [vmem:[#allocation2 + $0x63] sm:$0x1f] %vm3047_vm0, %v4776_v30  ;;  %vm5235_vm0 = vcmask 123904  }
 0xa6d   : > { %4818 = vst.msk [vmem:[#allocation2 + $0x62] sm:$0x3f] %vm3110_vm10, %v4804_v32  ;;  %vm5887_vm10 = vcmask 261120  }
 0xa6e   : > { %v4860_v12 = vpop.permute.xlu1 %4859 }
 0xa6f   : > { %v4832_v22 = vpop.permute.xlu0 %4831 }
 0xa70   : > { %4846 = vst.msk [vmem:[#allocation2 + $0x61] sm:$0x7f] %vm3173_vm11, %v4832_v22  ;;  %v4886_v61 = vld [vmem:[#allocation2 + $0x58] sm:$0xff] }
 0xa71   : > { %4874 = vst.msk [vmem:[#allocation2 + $0x60] sm:$0xff] %vm2936_vm8, %v4860_v12  ;;  %7080 = vmatmul.mubr.msk.f32.gmra.mrb[78].mxu1 %vm3282_vm9, %v4886_v61  ;;  %vm5342_vm8 = vcmask 911104  }
 0xa72   : > { %7082 = vmatprep.mubr.msk.f32.mxu1 %vm12049_vm2, %v12027_v15 }
 0xa78   : > { %v4887_v7 = vld [vmem:[#allocation2 + $0x60] sm:$0xff] }
 0xa79   : > { %7083 = vmatmul.mubr.msk.f32.gmra.mrb[80].mxu1 %vm3282_vm9, %v4887_v7  ;;  %vm5360_vm9 = vcmask 1042304  }
 0xaeb   : > { %v5010_v50 = vpop.f32.mrb[56].mxu1 }
 0xaec   : > { %v7048_v1 = vpop.f32.mrb[57].mxu1  ;;  %v11438_v24 = vadd.f32 %v6684_v53, %v5010_v50 }
 0xaee   : > { %v5074_v21 = vsel %vm2347_vm13, %v11438_v24, 0.0 }
 0xaf4   : > { %v5015_v16 = vpop.f32.mrb[58].mxu1 }
 0xaf5   : > { %v11440_v57 = vadd.f32 %v6684_v53, %v5015_v16  ;;  %v7051_v2 = vpop.f32.mrb[59].mxu1 }
 0xaf7   : > { %v5075_v27 = vsel %vm2347_vm13, %v11440_v57, 0.0 }
 0xaf8   : > { %v5076_v15 = vadd.f32 %v5075_v27, %v5074_v21 }
 0xafc   : > { %v5020_v26 = vpop.f32.mrb[60].mxu1 }
 0xafd   : > { %v11446_v44 = vadd.f32 %v6684_v53, %v5020_v26  ;;  %v7054_v62 = vpop.f32.mrb[61].mxu1 }
 0xaff   : > { %v5077_v17 = vsel %vm2347_vm13, %v11446_v44, 0.0 }
 0xb00   : > { %v5078_v18 = vadd.f32 %v5077_v17, %v5076_v15  ;;  %v5637_v17 = vld [vmem:[%s8621_s20 + $0x8] sm:$0xff] }
 0xb04   : > { %v5025_v4 = vpop.f32.mrb[62].mxu1 }
 0xb05   : > { %v11450_v45 = vadd.f32 %v6684_v53, %v5025_v4  ;;  %v7057_v41 = vpop.f32.mrb[63].mxu1  ;;  %v5636_v4 = vld [vmem:[%s8621_s20] sm:$0xff] }
 0xb07   : > { %v5079_v6 = vsel %vm2347_vm13, %v11450_v45, 0.0 }
 0xb08   : > { %v5080_v38 = vadd.f32 %v5079_v6, %v5078_v18  ;;  %v5641_v18 = vld [vmem:[%s8621_s20 + $0x28] sm:$0xff] }
 0xb09   : > { %v7140_v6 = vpack.c.bf16 %v5641_v18, %v5637_v17  ;;  %v5655_v18 = vld [vmem:[%s8621_s20 + $0x98] sm:$0xff] }
 0xb0b   : > { %7141 = vmatprep.subr.bf16.mxu0 %v7140_v6 }
 0xb0c   : > { %v5030_v46 = vpop.f32.mrb[64].mxu1 }
 0xb0d   : > { %v11454_v37 = vadd.f32 %v6684_v53, %v5030_v46  ;;  %v7060_v42 = vpop.f32.mrb[65].mxu1  ;;  %v5645_v46 = vld [vmem:[%s8621_s20 + $0x48] sm:$0xff] }
 0xb0f   : > { %v5081_v9 = vsel %vm2347_vm13, %v11454_v37, 0.0 }
 0xb10   : > { %v5082_v29 = vadd.f32 %v5081_v9, %v5080_v38  ;;  %v5640_v38 = vld [vmem:[%s8621_s20 + $0x20] sm:$0xff] }
 0xb11   : > { %v7142_v42 = vpack.c.bf16 %v5640_v38, %v5636_v4  ;;  %v5659_v4 = vld [vmem:[%s8621_s20 + $0xb8] sm:$0xff]  ;;  %v5669_v38 = vld [vmem:[%s8621_s20 + $0x108] sm:$0xff] }
 0xb13   : > { %7143 = vmatpush1.bf16.msra.mxu0 %v7142_v42 }
 0xb14   : > { %v5035_v55 = vpop.f32.mrb[66].mxu1 }
 0xb15   : > { %v5036_v11 = vadd.f32 %v6684_v53, %v5035_v55  ;;  %v7063_v33 = vpop.f32.mrb[67].mxu1 }
 0xb17   : > { %v5083_v23 = vsel %vm2347_vm13, %v5036_v11, 0.0 }
 0xb18   : > { %v5084_v59 = vadd.f32 %v5083_v23, %v5082_v29 }
 0xb1c   : > { %v5040_v49 = vpop.f32.mrb[68].mxu1 }
 0xb1d   : > { %v5041_v3 = vadd.f32 %v6684_v53, %v5040_v49  ;;  %v7066_v36 = vpop.f32.mrb[69].mxu1 }
 0xb1f   : > { %v5085_v14 = vsel %vm2347_vm13, %v5041_v3, 0.0 }
 0xb20   : > { %v5086_v58 = vadd.f32 %v5085_v14, %v5084_v59 }
 0xb24   : > { %v5045_v52 = vpop.f32.mrb[70].mxu1 }
 0xb25   : > { %v5046_v25 = vadd.f32 %v6684_v53, %v5045_v52  ;;  %v7069_v54 = vpop.f32.mrb[71].mxu1 }
 0xb27   : > { %v5087_v35 = vsel %vm2347_vm13, %v5046_v25, 0.0 }
 0xb28   : > { %v5088_v63 = vadd.f32 %v5087_v35, %v5086_v58  ;;  %v5644_v35 = vld [vmem:[%s8621_s20 + $0x40] sm:$0xff] }
 0xb2c   : > { %v5050_v40 = vpop.f32.mrb[72].mxu1 }
 0xb2d   : > { %v5051_v47 = vadd.f32 %v6684_v53, %v5050_v40  ;;  %v7072_v56 = vpop.f32.mrb[73].mxu1  ;;  %v5648_v40 = vld [vmem:[%s8621_s20 + $0x60] sm:$0xff] }
 0xb2e   : > { %v5657_v56 = vld [vmem:[%s8621_s20 + $0xa8] sm:$0xff] }
 0xb2f   : > { %v5089_v48 = vsel %vm2347_vm13, %v5051_v47, 0.0 }
 0xb30   : > { %v5090_v31 = vadd.f32 %v5089_v48, %v5088_v63 }
 0xb34   : > { %v5055_v43 = vpop.f32.mrb[74].mxu1 }
 0xb35   : > { %v5056_v5 = vadd.f32 %v6684_v53, %v5055_v43  ;;  %v7075_v39 = vpop.f32.mrb[75].mxu1  ;;  %v5652_v43 = vld [vmem:[%s8621_s20 + $0x80] sm:$0xff] }
 0xb37   : > { %v5091_v19 = vsel %vm2347_vm13, %v5056_v5, 0.0 }
 0xb38   : > { %v5092_v20 = vadd.f32 %v5091_v19, %v5090_v31  ;;  %v5661_v19 = vld [vmem:[%s8621_s20 + $0xc8] sm:$0xff] }
 0xb3c   : > { %v5060_v60 = vpop.f32.mrb[76].mxu1 }
 0xb3d   : > { %v5061_v28 = vadd.f32 %v6684_v53, %v5060_v60  ;;  %v7078_v51 = vpop.f32.mrb[77].mxu1  ;;  %v5643_v60 = vld [vmem:[%s8621_s20 + $0x38] sm:$0xff] }
 0xb3f   : > { %v5093_v8 = vsel %vm2347_vm13, %v5061_v28, 0.0 }
 0xb40   : > { %v5094_v13 = vadd.f32 %v5093_v8, %v5092_v20  ;;  %v5639_v20 = vld [vmem:[%s8621_s20 + $0x18] sm:$0xff]  ;;  %v7146_v8 = vpack.c.bf16 %v5648_v40, %v5644_v35  ;;  %v5668_v40 = vld [vmem:[%s8621_s20 + $0x100] sm:$0xff] }
 0xb44   : > { %v5065_v10 = vpop.f32.mrb[78].mxu1 }
 0xb45   : > { %v5066_v32 = vadd.f32 %v6684_v53, %v5065_v10  ;;  %v7081_v30 = vpop.f32.mrb[79].mxu1  ;;  %v5665_v10 = vld [vmem:[%s8621_s20 + $0xe8] sm:$0xff] }
 0xb46   : > { %v5642_v30 = vld [vmem:[%s8621_s20 + $0x30] sm:$0xff] }
 0xb47   : > { %v5095_v12 = vsel %vm2347_vm13, %v5066_v32, 0.0 }
 0xb48   : > { %v5096_v22 = vadd.f32 %v5095_v12, %v5094_v13 }
 0xb4c   : > { %v5070_v61 = vpop.f32.mrb[80].mxu1 }
 0xb4d   : > { %v5071_v7 = vadd.f32 %v6684_v53, %v5070_v61  ;;  %v7084_v50 = vpop.f32.mrb[81].mxu1  ;;  %v5649_v53 = vld [vmem:[%s8621_s20 + $0x68] sm:$0xff]  ;;  %v5651_v61 = vld [vmem:[%s8621_s20 + $0x78] sm:$0xff] }
 0xb4e   : > { %v7144_v9 = vpack.c.bf16 %v5649_v53, %v5645_v46  ;;  %v5673_v46 = vld [vmem:[%s8621_s20 + $0x128] sm:$0xff] }
 0xb4f   : > { %v5097_v1 = vsel %vm2347_vm13, %v5071_v7, 0.0 }
 0xb50   : > { %v5098_v16 = vadd.f32 %v5097_v1, %v5096_v22  ;;  %7145 = vmatprep.subr.bf16.mxu0 %v7144_v9  ;;  %v5647_v22 = vld [vmem:[%s8621_s20 + $0x58] sm:$0xff] }
 0xb51   : > { %7147 = vmatpush1.bf16.msra.mxu0 %v7146_v8  ;;  %v7248_v53 = vpack.c.bf16 %v5651_v61, %v5647_v22  ;;  %v5676_v8 = vld [vmem:[%s8621_s20 + $0x140] sm:$0xff] }
 0xb52   : > { %v5099_v2 = vrot.slane %v5098_v16, 4 }
 0xb54   : > { %v5100_v21 = vadd.f32 %v5099_v2, %v5098_v16  ;;  %v5660_v16 = vld [vmem:[%s8621_s20 + $0xc0] sm:$0xff]  ;;  %v7244_v2 = vpack.c.bf16 %v5643_v60, %v5639_v20 }
 0xb56   : > { %v5101_v27 = vrot.slane %v5100_v21, 2  ;;  %7245 = vmatprep.subr.bf16.mxu1 %v7244_v2  ;;  %v5684_v2 = vld [vmem:[%s8621_s20 + $0x180] sm:$0xff] }
 0xb58   : > { %v5102_v15 = vadd.f32 %v5101_v27, %v5100_v21  ;;  %v5646_v21 = vld [vmem:[%s8621_s20 + $0x50] sm:$0xff] }
 0xb59   : > { %v5650_v27 = vld [vmem:[%s8621_s20 + $0x70] sm:$0xff] }
 0xb5a   : > { %v5103_v26 = vrot.slane %v5102_v15, 1  ;;  %v7250_v9 = vpack.c.bf16 %v5650_v27, %v5646_v21  ;;  %v5688_v21 = vld [vmem:[%s8621_s20 + $0x1a0] sm:$0xff] }
 0xb5c   : > { %v5104_v62 = vadd.f32 %v5103_v26, %v5102_v15  ;;  %v7152_v26 = vpack.c.bf16 %v5665_v10, %v5661_v19 }
 0xb5e   : > { %v5105_v41 = vmul.f32 0.009615385, %v5104_v62  ;;  %v5664_v62 = vld [vmem:[%s8621_s20 + $0xe0] sm:$0xff] }
 0xb60   : > { %v11473_v29 = vsub.f32 %v11438_v24, %v5105_v41  ;;  %v11476_v55 = vsub.f32 %v11440_v57, %v5105_v41  ;;  %v11479_v33 = vsub.f32 %v11446_v44, %v5105_v41  ;;  %v11482_v23 = vsub.f32 %v11450_v45, %v5105_v41 }
 0xb61   : > { %v11485_v59 = vsub.f32 %v11454_v37, %v5105_v41  ;;  %v11487_v49 = vsub.f32 %v5036_v11, %v5105_v41  ;;  %v11489_v36 = vsub.f32 %v5041_v3, %v5105_v41  ;;  %v11491_v24 = vsub.f32 %v5046_v25, %v5105_v41 }
 0xb62   : > { %v11493_v57 = vsub.f32 %v5051_v47, %v5105_v41  ;;  %v11495_v44 = vsub.f32 %v5056_v5, %v5105_v41  ;;  %v11497_v45 = vsub.f32 %v5061_v28, %v5105_v41  ;;  %v11499_v14 = vsub.f32 %v5066_v32, %v5105_v41  ;;  %v5653_v47 = vld [vmem:[%s8621_s20 + $0x88] sm:$0xff]  ;;  %v5656_v5 = vld [vmem:[%s8621_s20 + $0xa0] sm:$0xff]  ;;  %v5638_v32 = vld [vmem:[%s8621_s20 + $0x10] sm:$0xff] }
 0xb63   : > { %v11501_v37 = vsub.f32 %v5071_v7, %v5105_v41  ;;  %v5119_v11 = vmul.f32 %v11473_v29, %v11473_v29  ;;  %v5120_v3 = vmul.f32 %v11476_v55, %v11476_v55  ;;  %v5121_v58 = vmul.f32 %v11479_v33, %v11479_v33 }
 0xb64   : > { %v5122_v52 = vmul.f32 %v11482_v23, %v11482_v23  ;;  %v5123_v48 = vmul.f32 %v11485_v59, %v11485_v59  ;;  %v5124_v28 = vmul.f32 %v11487_v49, %v11487_v49  ;;  %v7148_v13 = vpack.c.bf16 %v5657_v56, %v5653_v47  ;;  %v5672_v47 = vld [vmem:[%s8621_s20 + $0x120] sm:$0xff] }
 0xb65   : > { %v5132_v25 = vsel %vm2347_vm13, %v5119_v11, 0.0  ;;  %v5133_v54 = vsel %vm2347_vm13, %v5120_v3, 0.0  ;;  %v5135_v31 = vsel %vm2347_vm13, %v5121_v58, 0.0  ;;  %v5125_v7 = vmul.f32 %v11489_v36, %v11489_v36 }
 0xb66   : > { %v5134_v63 = vadd.f32 %v5133_v54, %v5132_v25  ;;  %v5137_v51 = vsel %vm2347_vm13, %v5122_v52, 0.0  ;;  %v5139_v50 = vsel %vm2347_vm13, %v5123_v48, 0.0  ;;  %v7150_v1 = vpack.c.bf16 %v5656_v5, %v5652_v43  ;;  %7149 = vmatprep.subr.bf16.mxu0 %v7148_v13  ;;  %v5654_v25 = vld [vmem:[%s8621_s20 + $0x90] sm:$0xff]  ;;  %v5681_v43 = vld [vmem:[%s8621_s20 + $0x168] sm:$0xff]  ;;  %v5680_v13 = vld [vmem:[%s8621_s20 + $0x160] sm:$0xff] }
 0xb67   : > { %v7246_v17 = vpack.c.bf16 %v5642_v30, %v5638_v32  ;;  %v5126_v41 = vmul.f32 %v11491_v24, %v11491_v24  ;;  %v5141_v6 = vsel %vm2347_vm13, %v5124_v28, 0.0  ;;  %v5127_v11 = vmul.f32 %v11493_v57, %v11493_v57  ;;  %v5658_v54 = vld [vmem:[%s8621_s20 + $0xb0] sm:$0xff]  ;;  %v5685_v30 = vld [vmem:[%s8621_s20 + $0x188] sm:$0xff] }
 0xb68   : > { %v5136_v39 = vadd.f32 %v5135_v31, %v5134_v63  ;;  %v5143_v3 = vsel %vm2347_vm13, %v5125_v7, 0.0  ;;  %7151 = vmatpush1.bf16.msra.mxu0 %v7150_v1  ;;  %v7154_v58 = vpack.c.bf16 %v5664_v62, %v5660_v16  ;;  %v7252_v52 = vpack.c.bf16 %v5659_v4, %v5655_v18  ;;  %v5677_v31 = vld [vmem:[%s8621_s20 + $0x148] sm:$0xff] }
 0xb69   : > { %7247 = vmatpush1.bf16.msra.mxu1 %v7246_v17  ;;  %7153 = vmatprep.subr.bf16.mxu0 %v7152_v26  ;;  %v7156_v63 = vpack.c.bf16 %v5673_v46, %v5669_v38  ;;  %v5128_v56 = vmul.f32 %v11495_v44, %v11495_v44  ;;  %v5145_v48 = vsel %vm2347_vm13, %v5126_v41, 0.0  ;;  %v5129_v19 = vmul.f32 %v11497_v45, %v11497_v45  ;;  %v5697_v26 = vld [vmem:[%s8621_s20 + $0x1e8] sm:$0xff]  ;;  %v5696_v38 = vld [vmem:[%s8621_s20 + $0x1e0] sm:$0xff] }
 0xb6a   : > { %v5138_v12 = vadd.f32 %v5137_v51, %v5136_v39  ;;  %7249 = vmatprep.subr.bf16.mxu1 %v7248_v53  ;;  %v7254_v39 = vpack.c.bf16 %v5658_v54, %v5654_v25  ;;  %v5147_v20 = vsel %vm2347_vm13, %v5127_v11, 0.0  ;;  %v7158_v60 = vpack.c.bf16 %v5672_v47, %v5668_v40  ;;  %v5166_v54 = vld [vmem:[%s12061_s11] sm:$0x1] }
 0xb6b   : > { %v7160_v51 = vpack.c.bf16 %v5681_v43, %v5677_v31  ;;  %v5130_v10 = vmul.f32 %v11499_v14, %v11499_v14  ;;  %v5149_v32 = vsel %vm2347_vm13, %v5128_v56, 0.0  ;;  %v5131_v61 = vmul.f32 %v11501_v37, %v11501_v37 }
 0xb6c   : > { %v5140_v15 = vadd.f32 %v5139_v50, %v5138_v12  ;;  %7155 = vmatpush1.bf16.msra.mxu0 %v7154_v58  ;;  %v5689_v12 = vld [vmem:[%s8621_s20 + $0x1a8] sm:$0xff]  ;;  %v5151_v7 = vsel %vm2347_vm13, %v5129_v19, 0.0  ;;  %v7162_v50 = vpack.c.bf16 %v5680_v13, %v5676_v8  ;;  %v7166_v18 = vpack.c.bf16 %v5688_v21, %v5684_v2 }
 0xb6d   : > { %7251 = vmatpush1.bf16.msra.mxu1 %v7250_v9  ;;  %7157 = vmatprep.subr.bf16.mxu0 %v7156_v63  ;;  %v7164_v16 = vpack.c.bf16 %v5689_v12, %v5685_v30  ;;  %v5153_v27 = vsel %vm2347_vm13, %v5130_v10, 0.0  ;;  %v5155_v17 = vsel %vm2347_vm13, %v5131_v61, 0.0  ;;  %v8005_v47 = vmov 1983009808  }
 0xb6e   : > { %v5142_v42 = vadd.f32 %v5141_v6, %v5140_v15  ;;  %7253 = vmatprep.subr.bf16.mxu1 %v7252_v52  ;;  %v5693_v15 = vld [vmem:[%s8621_s20 + $0x1c8] sm:$0xff]  ;;  %v5692_v6 = vld [vmem:[%s8621_s20 + $0x1c0] sm:$0xff]  ;;  %v11583_v56 = vunpack.c.l.s4 %v8005_v47 }
 0xb6f   : > { %v7168_v41 = vpack.c.bf16 %v5697_v26, %v5693_v15  ;;  %v7170_v53 = vpack.c.bf16 %v5696_v38, %v5692_v6  ;;  %v5662_v6 = vld [vmem:[%s8621_s20 + $0xd0] sm:$0xff] }
 0xb70   : > { %v5144_v35 = vadd.f32 %v5143_v3, %v5142_v42  ;;  %7159 = vmatpush1.bf16.msra.mxu0 %v7158_v60  ;;  %v5666_v38 = vld [vmem:[%s8621_s20 + $0xf0] sm:$0xff] }
 0xb71   : > { %7255 = vmatpush1.bf16.msra.mxu1 %v7254_v39  ;;  %7161 = vmatprep.subr.bf16.mxu0 %v7160_v51  ;;  %v6698_v39 = vld [vmem:[%s12062_s29] ss:$0 sm:$0xff] }
 0xb72   : > { %v5146_v5 = vadd.f32 %v5145_v48, %v5144_v35 }
 0xb74   : > { %v5148_v28 = vadd.f32 %v5147_v20, %v5146_v5  ;;  %7163 = vmatpush1.bf16.msra.mxu0 %v7162_v50 }
 0xb75   : > { %7165 = vmatprep.subr.bf16.mxu0 %v7164_v16 }
 0xb76   : > { %v5150_v22 = vadd.f32 %v5149_v32, %v5148_v28 }
 0xb78   : > { %v5152_v1 = vadd.f32 %v5151_v7, %v5150_v22  ;;  %7167 = vmatpush1.bf16.msra.mxu0 %v7166_v18  ;;  %v5701_v18 = vld [vmem:[%s8621_s20 + $0x208] sm:$0xff] }
 0xb79   : > { %7169 = vmatprep.subr.bf16.mxu0 %v7168_v41  ;;  %v5705_v41 = vld [vmem:[%s8621_s20 + $0x228] sm:$0xff] }
 0xb7a   : > { %v5154_v62 = vadd.f32 %v5153_v27, %v5152_v1 }
 0xb7c   : > { %v5156_v4 = vadd.f32 %v5155_v17, %v5154_v62  ;;  %7171 = vmatpush1.bf16.msra.mxu0 %v7170_v53  ;;  %v5663_v62 = vld [vmem:[%s8621_s20 + $0xd8] sm:$0xff]  ;;  %v7172_v53 = vpack.c.bf16 %v5705_v41, %v5701_v18 }
 0xb7d   : > { %v5667_v17 = vld [vmem:[%s8621_s20 + $0xf8] sm:$0xff] }
 0xb7e   : > { %v5157_v46 = vrot.slane %v5156_v4, 4  ;;  %7173 = vmatprep.subr.bf16.mxu0 %v7172_v53 }
 0xb80   : > { %v5158_v42 = vadd.f32 %v5157_v46, %v5156_v4  ;;  %v7256_v4 = vpack.c.bf16 %v5667_v17, %v5663_v62  ;;  %v5245_v46 = vunpack.c.0.s8 %v11583_v56 }
 0xb82   : > { %v5159_v9 = vrot.slane %v5158_v42, 2  ;;  %7257 = vmatprep.subr.bf16.mxu1 %v7256_v4 }
 0xb84   : > { %v5160_v11 = vadd.f32 %v5159_v9, %v5158_v42  ;;  %v7258_v42 = vpack.c.bf16 %v5666_v38, %v5662_v6  ;;  %v5700_v9 = vld [vmem:[%s8621_s20 + $0x200] sm:$0xff] }
 0xb86   : > { %v5161_v3 = vrot.slane %v5160_v11, 1  ;;  %7259 = vmatpush1.bf16.msra.mxu1 %v7258_v42 }
 0xb88   : > { %v5162_v58 = vadd.f32 %v5161_v3, %v5160_v11  ;;  %v5704_v11 = vld [vmem:[%s8621_s20 + $0x220] sm:$0xff] }
 0xb89   : > { %v7174_v3 = vpack.c.bf16 %v5704_v11, %v5700_v9 }
 0xb8a   : > { %v5163_v52 = vmul.f32 0.009615385, %v5162_v58  ;;  %v5671_v58 = vld [vmem:[%s8621_s20 + $0x118] sm:$0xff] }
 0xb8b   : > { %7175 = vmatpush1.bf16.msra.mxu0 %v7174_v3 }
 0xb8c   : > { %v5164_v25 = vadd.f32 1e-05, %v5163_v52  ;;  %v5675_v52 = vld [vmem:[%s8621_s20 + $0x138] sm:$0xff] }
 0xb8e   : > { %7491 = vrsqrt.f32 %v5164_v25  ;;  %v5670_v25 = vld [vmem:[%s8621_s20 + $0x110] sm:$0xff] }
 0xb98   : > { %v7492_v35 = vpop.eup %7491 }
 0xb99   : > { %v5167_v63 = vmul.f32 %v7492_v35, %v5166_v54  ;;  %v7260_v54 = vpack.c.bf16 %v5675_v52, %v5671_v58  ;;  %v5674_v35 = vld [vmem:[%s8621_s20 + $0x130] sm:$0xff] }
 0xb9b   : > { %v5171_v40 = vrot.slane %v5167_v63, %v9769_v34  ;;  %v11627_v63 = vsub.s32 %v5245_v46, %v9764_v0  ;;  %7261 = vmatprep.subr.bf16.mxu1 %v7260_v54 }
 0xb9d   : > { %v5172_v48 = vmul.f32 %v5171_v40, %v11473_v29  ;;  %v5173_v31 = vmul.f32 %v5171_v40, %v11476_v55  ;;  %v5174_v43 = vmul.f32 %v5171_v40, %v11479_v33  ;;  %v5175_v5 = vmul.f32 %v5171_v40, %v11482_v23 }
 0xb9e   : > { %v5176_v19 = vmul.f32 %v5171_v40, %v11485_v59  ;;  %v5177_v20 = vmul.f32 %v5171_v40, %v11487_v49  ;;  %v5178_v60 = vmul.f32 %v5171_v40, %v11489_v36  ;;  %v5179_v28 = vmul.f32 %v5171_v40, %v11491_v24 }
 0xb9f   : > { %v5180_v51 = vmul.f32 %v5171_v40, %v11493_v57  ;;  %v5181_v29 = vmul.f32 %v5171_v40, %v11495_v44  ;;  %v5182_v55 = vmul.f32 %v5171_v40, %v11497_v45  ;;  %v5183_v33 = vmul.f32 %v5171_v40, %v11499_v14 }
 0xba0   : > { %v5184_v23 = vmul.f32 %v5171_v40, %v11501_v37  ;;  %v5192_v8 = vadd.f32 %v6698_v39, %v5172_v48  ;;  %v5193_v13 = vadd.f32 %v6698_v39, %v5173_v31  ;;  %v5194_v10 = vadd.f32 %v6698_v39, %v5174_v43 }
 0xba1   : > { %v5195_v59 = vadd.f32 %v6698_v39, %v5175_v5  ;;  %v5196_v32 = vadd.f32 %v6698_v39, %v5176_v19  ;;  %v5197_v49 = vadd.f32 %v6698_v39, %v5177_v20  ;;  %v5198_v30 = vadd.f32 %v6698_v39, %v5178_v60 }
 0xba2   : > { %v5199_v36 = vadd.f32 %v6698_v39, %v5179_v28  ;;  %v5200_v12 = vadd.f32 %v6698_v39, %v5180_v51  ;;  %v5201_v24 = vadd.f32 %v6698_v39, %v5181_v29  ;;  %v5202_v22 = vadd.f32 %v6698_v39, %v5182_v55 }
 0xba3   : > { %v5203_v57 = vadd.f32 %v6698_v39, %v5183_v33  ;;  %v5204_v61 = vadd.f32 %v6698_v39, %v5184_v23  ;;  %v5205_v44 = vmax.f32 %v5192_v8, 0.0  ;;  %v5206_v7 = vmax.f32 %v5193_v13, 0.0 }
 0xba4   : > { %v5207_v45 = vmax.f32 %v5194_v10, 0.0  ;;  %v5208_v50 = vmax.f32 %v5195_v59, 0.0  ;;  %v5209_v14 = vmax.f32 %v5196_v32, 0.0  ;;  %v5210_v1 = vmax.f32 %v5197_v49, 0.0 }
 0xba5   : > { %v5211_v37 = vmax.f32 %v5198_v30, 0.0  ;;  %v5212_v16 = vmax.f32 %v5199_v36, 0.0  ;;  %v5213_v2 = vmax.f32 %v5200_v12, 0.0  ;;  %v5214_v21 = vmax.f32 %v5201_v24, 0.0  ;;  %5218 = vst.msk [vmem:[#allocation4] sm:$0xff] %vm2347_vm13, %v5205_v44  ;;  %5219 = vst.msk [vmem:[#allocation4 + $0x8] sm:$0xff] %vm2347_vm13, %v5206_v7 }
 0xba6   : > { %v5215_v27 = vmax.f32 %v5202_v22, 0.0  ;;  %v5216_v15 = vmax.f32 %v5203_v57, 0.0  ;;  %v5217_v26 = vmax.f32 %v5204_v61, 0.0  ;;  %5220 = vst.msk [vmem:[#allocation4 + $0x10] sm:$0xff] %vm2347_vm13, %v5207_v45  ;;  %5221 = vst.msk [vmem:[#allocation4 + $0x18] sm:$0xff] %vm2347_vm13, %v5208_v50  ;;  %v7262_v40 = vpack.c.bf16 %v5674_v35, %v5670_v25 }
 0xba7   : > { %5222 = vst.msk [vmem:[#allocation4 + $0x20] sm:$0xff] %vm2347_vm13, %v5209_v14  ;;  %5223 = vst.msk [vmem:[#allocation4 + $0x28] sm:$0xff] %vm2347_vm13, %v5210_v1 }
 0xba8   : > { %5224 = vst.msk [vmem:[#allocation4 + $0x30] sm:$0xff] %vm2347_vm13, %v5211_v37  ;;  %5225 = vst.msk [vmem:[#allocation4 + $0x38] sm:$0xff] %vm2347_vm13, %v5212_v16  ;;  %7263 = vmatpush1.bf16.msra.mxu1 %v7262_v40 }
 0xba9   : > { %5226 = vst.msk [vmem:[#allocation4 + $0x40] sm:$0xff] %vm2347_vm13, %v5213_v2  ;;  %5227 = vst.msk [vmem:[#allocation4 + $0x48] sm:$0xff] %vm2347_vm13, %v5214_v21 }
 0xbaa   : > { %5228 = vst.msk [vmem:[#allocation4 + $0x50] sm:$0xff] %vm2347_vm13, %v5215_v27  ;;  %5229 = vst.msk [vmem:[#allocation4 + $0x58] sm:$0xff] %vm2347_vm13, %v5216_v15 }
 0xbab   : > { %5230 = vst.msk [vmem:[#allocation4 + $0x60] sm:$0xff] %vm2347_vm13, %v5217_v26  ;;  %vm5253_vm13 = vcmask 255104  }
 0xbaf   : > { %v5238_v31 = vld [vmem:[#allocation4 + $0x2] ss:$52 sm:$0x3]  ;;  %v5240_v43 = vld [vmem:[#allocation4 + $0x3] ss:$52 sm:$0x3] }
 0xbb0   : > { %v5369_v47 = vld [vmem:[#allocation4 + $0x12] ss:$52 sm:$0x3]  ;;  %v5371_v56 = vld [vmem:[#allocation4 + $0x13] ss:$52 sm:$0x3]  ;;  %v5241_v5 = vmax.f32 %v5238_v31, %v5240_v43 }
 0xbb1   : > { %v5372_v48 = vmax.f32 %v5369_v47, %v5371_v56  ;;  %v5256_v39 = vld [vmem:[#allocation4 + $0x4] ss:$52 sm:$0x3]  ;;  %v5258_v19 = vld [vmem:[#allocation4 + $0x5] ss:$52 sm:$0x3] }
 0xbb2   : > { %v5259_v60 = vmax.f32 %v5256_v39, %v5258_v19  ;;  %v5494_v28 = vld [vmem:[#allocation4 + $0x22] ss:$52 sm:$0x3]  ;;  %v5496_v51 = vld [vmem:[#allocation4 + $0x23] ss:$52 sm:$0x3]  ;;  %v5249_v29 = vrot.slane %v5241_v5, %v11627_v63 }
 0xbb3   : > { %v5380_v20 = vrot.slane %v5372_v48, %v11627_v63  ;;  %v5497_v55 = vmax.f32 %v5494_v28, %v5496_v51  ;;  %v5511_v33 = vld [vmem:[#allocation4 + $0x24] ss:$52 sm:$0x3]  ;;  %v5513_v23 = vld [vmem:[#allocation4 + $0x25] ss:$52 sm:$0x3] }
 0xbb4   : > { %v5386_v8 = vld [vmem:[#allocation4 + $0x14] ss:$52 sm:$0x3]  ;;  %v5388_v13 = vld [vmem:[#allocation4 + $0x15] ss:$52 sm:$0x3]  ;;  %5250 = vrot.lane.b32.xlu0 %v5249_v29, %s8000_s6  ;;  %v5267_v10 = vrot.slane %v5259_v60, %v11627_v63  ;;  %v5514_v59 = vmax.f32 %v5511_v33, %v5513_v23 }
 0xbb5   : > { %5381 = vrot.lane.b32.xlu1 %v5380_v20, %s8000_s6  ;;  %v5505_v32 = vrot.slane %v5497_v55, %v11627_v63  ;;  %v5389_v49 = vmax.f32 %v5386_v8, %v5388_v13  ;;  %v5403_v30 = vld [vmem:[#allocation4 + $0x16] ss:$52 sm:$0x3]  ;;  %v5405_v36 = vld [vmem:[#allocation4 + $0x17] ss:$52 sm:$0x3] }
 0xbb6   : > { %v5273_v12 = vld [vmem:[#allocation4 + $0x6] ss:$52 sm:$0x3]  ;;  %v5275_v24 = vld [vmem:[#allocation4 + $0x7] ss:$52 sm:$0x3]  ;;  %v5522_v22 = vrot.slane %v5514_v59, %v11627_v63  ;;  %v5406_v57 = vmax.f32 %v5403_v30, %v5405_v36 }
 0xbb7   : > { %v5397_v61 = vrot.slane %v5389_v49, %v11627_v63  ;;  %v5276_v44 = vmax.f32 %v5273_v12, %v5275_v24  ;;  %v5291_v7 = vld [vmem:[#allocation4 + $0x8] ss:$52 sm:$0x3]  ;;  %v5293_v45 = vld [vmem:[#allocation4 + $0x9] ss:$52 sm:$0x3] }
 0xbb8   : > { %5506 = vrot.lane.b32.xlu0 %v5505_v32, %s8000_s6  ;;  %v5528_v50 = vld [vmem:[#allocation4 + $0x26] ss:$52 sm:$0x3]  ;;  %v5530_v14 = vld [vmem:[#allocation4 + $0x27] ss:$52 sm:$0x3]  ;;  %v5414_v1 = vrot.slane %v5406_v57, %v11627_v63  ;;  %v5294_v37 = vmax.f32 %v5291_v7, %v5293_v45 }
 0xbb9   : > { %5268 = vrot.lane.b32.xlu1 %v5267_v10, %s8001_s8  ;;  %v5284_v16 = vrot.slane %v5276_v44, %v11627_v63  ;;  %v5531_v2 = vmax.f32 %v5528_v50, %v5530_v14  ;;  %v5545_v21 = vld [vmem:[#allocation4 + $0x28] ss:$52 sm:$0x3]  ;;  %v5547_v27 = vld [vmem:[#allocation4 + $0x29] ss:$52 sm:$0x3] }
 0xbba   : > { %v5420_v15 = vld [vmem:[#allocation4 + $0x18] ss:$52 sm:$0x3]  ;;  %v5422_v26 = vld [vmem:[#allocation4 + $0x19] ss:$52 sm:$0x3]  ;;  %v5302_v62 = vrot.slane %v5294_v37, %v11627_v63  ;;  %v5548_v17 = vmax.f32 %v5545_v21, %v5547_v27 }
 0xbbb   : > { %v5539_v18 = vrot.slane %v5531_v2, %v11627_v63  ;;  %v5423_v4 = vmax.f32 %v5420_v15, %v5422_v26  ;;  %v5437_v41 = vld [vmem:[#allocation4 + $0x1a] ss:$52 sm:$0x3]  ;;  %v5439_v6 = vld [vmem:[#allocation4 + $0x1b] ss:$52 sm:$0x3] }
 0xbbc   : > { %5398 = vrot.lane.b32.xlu0 %v5397_v61, %s8001_s8  ;;  %v5309_v38 = vld [vmem:[#allocation4 + $0xa] ss:$52 sm:$0x3]  ;;  %v5311_v46 = vld [vmem:[#allocation4 + $0xb] ss:$52 sm:$0x3]  ;;  %v5556_v3 = vrot.slane %v5548_v17, %v11627_v63  ;;  %v5440_v58 = vmax.f32 %v5437_v41, %v5439_v6 }
 0xbbd   : > { %5523 = vrot.lane.b32.xlu1 %v5522_v22, %s8001_s8  ;;  %v11649_v53 = vld [vmem:[#allocation4 + $0xc] ss:$52 sm:$0x3]  ;;  %v5329_v42 = vld [vmem:[#allocation4 + $0xd] ss:$52 sm:$0x3]  ;;  %v5431_v47 = vrot.slane %v5423_v4, %v11627_v63  ;;  %v5312_v56 = vmax.f32 %v5309_v38, %v5311_v46 }
 0xbbe   : > { %v5363_v9 = vld [vmem:[#allocation4 + $0x10] ss:$52 sm:$0x3]  ;;  %v5365_v11 = vld [vmem:[#allocation4 + $0x11] ss:$52 sm:$0x3]  ;;  %v5448_v23 = vrot.slane %v5440_v58, %v11627_v63  ;;  %v5330_v8 = vmax.f32 %v11649_v53, %v5329_v42 }
 0xbbf   : > { %v11652_v52 = vld [vmem:[#allocation4 + $0x2a] ss:$52 sm:$0x3]  ;;  %v11654_v25 = vld [vmem:[#allocation4 + $0x2b] ss:$52 sm:$0x3]  ;;  %v5366_v54 = vmax.f32 %v5363_v9, %v5365_v11  ;;  %v5320_v12 = vrot.slane %v5312_v56, %v11627_v63 }
 0xbc0   : > { %5285 = vrot.lane.b32.xlu0 %v5284_v16, %s8002_s0  ;;  %v5231_v35 = vld [vmem:[#allocation4] ss:$52 sm:$0x3]  ;;  %v5233_v40 = vld [vmem:[#allocation4 + $0x1] ss:$52 sm:$0x3]  ;;  %v5565_v24 = vmax.f32 %v11652_v52, %v11654_v25  ;;  %v5338_v15 = vrot.slane %v5330_v8, %v11627_v63 }
 0xbc1   : > { %5415 = vrot.lane.b32.xlu1 %v5414_v1, %s8002_s0  ;;  %v5234_v48 = vmax.f32 %v5231_v35, %v5233_v40  ;;  %v5488_v31 = vld [vmem:[#allocation4 + $0x20] ss:$52 sm:$0x3]  ;;  %v5490_v43 = vld [vmem:[#allocation4 + $0x21] ss:$52 sm:$0x3] }
 0xbc2   : > { %5367 = vst.msk [vmem:[#allocation5 + $0x2] sm:$0x3] %vm5235_vm0, %v5366_v54  ;;  %v5491_v5 = vmax.f32 %v5488_v31, %v5490_v43  ;;  %v5709_v39 = vld [vmem:[%s8621_s20 + $0x248] sm:$0xff]  ;;  %v5679_v20 = vld [vmem:[%s8621_s20 + $0x158] sm:$0xff]  ;;  %v5708_v55 = vld [vmem:[%s8621_s20 + $0x240] sm:$0xff]  ;;  %v5573_v38 = vrot.slane %v5565_v24, %v11627_v63  ;;  %s8008_s8 = smov 112  }
 0xbc3   : > { %v5713_v19 = vld [vmem:[%s8621_s20 + $0x268] sm:$0xff]  ;;  %v11663_v60 = vld [vmem:[#allocation4 + $0x2c] ss:$52 sm:$0x3]  ;;  %5236 = vst.msk [vmem:[#allocation5] sm:$0x3] %vm5235_vm0, %v5234_v48 }
 0xbc4   : > { %5540 = vrot.lane.b32.xlu0 %v5539_v18, %s8002_s0  ;;  %v11665_v28 = vld [vmem:[#allocation4 + $0x2d] ss:$52 sm:$0x3]  ;;  %v7176_v51 = vpack.c.bf16 %v5713_v19, %v5709_v39  ;;  %v11673_v13 = vld [vmem:[#allocation4 + $0x1c] ss:$52 sm:$0x3] }
 0xbc5   : > { %5303 = vrot.lane.b32.xlu1 %v5302_v62, %s8003_s16  ;;  %v5683_v29 = vld [vmem:[%s8621_s20 + $0x178] sm:$0xff]  ;;  %v5712_v33 = vld [vmem:[%s8621_s20 + $0x260] sm:$0xff]  ;;  %v11675_v10 = vld [vmem:[#allocation4 + $0x1d] ss:$52 sm:$0x3]  ;;  %v5582_v26 = vmax.f32 %v11663_v60, %v11665_v28 }
 0xbc6   : > { %5492 = vst.msk [vmem:[#allocation5 + $0x4] sm:$0x3] %vm5235_vm0, %v5491_v5  ;;  %v7264_v59 = vpack.c.bf16 %v5683_v29, %v5679_v20  ;;  %v7178_v32 = vpack.c.bf16 %v5712_v33, %v5708_v55  ;;  %v5678_v49 = vld [vmem:[%s8621_s20 + $0x150] sm:$0xff]  ;;  %v5687_v36 = vld [vmem:[%s8621_s20 + $0x198] sm:$0xff]  ;;  %7177 = vmatprep.subr.bf16.mxu0 %v7176_v51  ;;  %v5717_v45 = vld [vmem:[%s8621_s20 + $0x288] sm:$0xff]  ;;  %v5457_v46 = vmax.f32 %v11673_v13, %v11675_v10 }
 0xbc7   : > { %v5682_v30 = vld [vmem:[%s8621_s20 + $0x170] sm:$0xff]  ;;  %v5691_v57 = vld [vmem:[%s8621_s20 + $0x1b8] sm:$0xff]  ;;  %v5721_v50 = vld [vmem:[%s8621_s20 + $0x2a8] sm:$0xff] }
 0xbc8   : > { %5432 = vrot.lane.b32.xlu0 %v5431_v47, %s8003_s16  ;;  %v7266_v22 = vpack.c.bf16 %v5682_v30, %v5678_v49  ;;  %v5686_v61 = vld [vmem:[%s8621_s20 + $0x190] sm:$0xff]  ;;  %7265 = vmatprep.subr.bf16.mxu1 %v7264_v59  ;;  %v7268_v7 = vpack.c.bf16 %v5691_v57, %v5687_v36  ;;  %v5716_v14 = vld [vmem:[%s8621_s20 + $0x280] sm:$0xff]  ;;  %v7180_v16 = vpack.c.bf16 %v5721_v50, %v5717_v45  ;;  %v5695_v21 = vld [vmem:[%s8621_s20 + $0x1d8] sm:$0xff] }
 0xbc9   : > { %5557 = vrot.lane.b32.xlu1 %v5556_v3, %s8003_s16  ;;  %v5690_v44 = vld [vmem:[%s8621_s20 + $0x1b0] sm:$0xff]  ;;  %7179 = vmatpush1.bf16.msra.mxu0 %v7178_v32  ;;  %v5720_v2 = vld [vmem:[%s8621_s20 + $0x2a0] sm:$0xff]  ;;  %v5699_v27 = vld [vmem:[%s8621_s20 + $0x1f8] sm:$0xff]  ;;  %v5590_v47 = vrot.slane %v5582_v26, %v11627_v63  ;;  %v5465_v19 = vrot.slane %v5457_v46, %v11627_v63 }
 0xbca   : > { %v5471_v1 = vld [vmem:[#allocation4 + $0x1e] ss:$52 sm:$0x3]  ;;  %v5473_v37 = vld [vmem:[#allocation4 + $0x1f] ss:$52 sm:$0x3]  ;;  %7267 = vmatpush1.bf16.msra.mxu1 %v7266_v22  ;;  %v7270_v18 = vpack.c.bf16 %v5690_v44, %v5686_v61  ;;  %v7182_v4 = vpack.c.bf16 %v5720_v2, %v5716_v14  ;;  %7181 = vmatprep.subr.bf16.mxu0 %v7180_v16  ;;  %v7272_v53 = vpack.c.bf16 %v5699_v27, %v5695_v21 }
 0xbcb   : > { %v5345_v62 = vld [vmem:[#allocation4 + $0xe] ss:$52 sm:$0x3]  ;;  %v5347_v17 = vld [vmem:[#allocation4 + $0xf] ss:$52 sm:$0x3]  ;;  %7269 = vmatprep.subr.bf16.mxu1 %v7268_v7  ;;  %v5474_v56 = vmax.f32 %v5471_v1, %v5473_v37 }
 0xbcc   : > { %5321 = vrot.lane.b32.xlu0 %v5320_v12, %s8006_s22  ;;  %v5694_v41 = vld [vmem:[%s8621_s20 + $0x1d0] sm:$0xff]  ;;  %v5725_v6 = vld [vmem:[%s8621_s20 + $0x2c8] sm:$0xff]  ;;  %v5703_v11 = vld [vmem:[%s8621_s20 + $0x218] sm:$0xff]  ;;  %v5348_v20 = vmax.f32 %v5345_v62, %v5347_v17 }
 0xbcd   : > { %5449 = vrot.lane.b32.xlu1 %v5448_v23, %s8006_s22  ;;  %v5698_v42 = vld [vmem:[%s8621_s20 + $0x1f0] sm:$0xff]  ;;  %v5729_v9 = vld [vmem:[%s8621_s20 + $0x2e8] sm:$0xff]  ;;  %v5707_v58 = vld [vmem:[%s8621_s20 + $0x238] sm:$0xff]  ;;  %7183 = vmatpush1.bf16.msra.mxu0 %v7182_v4  ;;  %v5482_v10 = vrot.slane %v5474_v56, %v11627_v63 }
 0xbce   : > { %v7184_v3 = vpack.c.bf16 %v5729_v9, %v5725_v6  ;;  %v5724_v52 = vld [vmem:[%s8621_s20 + $0x2c0] sm:$0xff]  ;;  %v5619_v54 = vld [vmem:[#allocation4 + $0x32] ss:$52 sm:$0x3]  ;;  %7271 = vmatpush1.bf16.msra.mxu1 %v7270_v18  ;;  %v7274_v31 = vpack.c.bf16 %v5698_v42, %v5694_v41  ;;  %v5702_v43 = vld [vmem:[%s8621_s20 + $0x210] sm:$0xff]  ;;  %v7276_v60 = vpack.c.bf16 %v5707_v58, %v5703_v11  ;;  %v5356_v12 = vrot.slane %v5348_v20, %v11627_v63 }
 0xbcf   : > { %v5728_v25 = vld [vmem:[%s8621_s20 + $0x2e0] sm:$0xff]  ;;  %v5621_v35 = vld [vmem:[#allocation4 + $0x33] ss:$52 sm:$0x3]  ;;  %v5706_v5 = vld [vmem:[%s8621_s20 + $0x230] sm:$0xff]  ;;  %7273 = vmatprep.subr.bf16.mxu1 %v7272_v53 }
 0xbd0   : > { %5574 = vrot.lane.b32.xlu0 %v5573_v38, %s8006_s22  ;;  %v7186_v40 = vpack.c.bf16 %v5728_v25, %v5724_v52  ;;  %v5596_v48 = vld [vmem:[#allocation4 + $0x2e] ss:$52 sm:$0x3]  ;;  %7185 = vmatprep.subr.bf16.mxu0 %v7184_v3  ;;  %v5733_v39 = vld [vmem:[%s8621_s20 + $0x308] sm:$0xff]  ;;  %v5622_v59 = vmax.f32 %v5619_v54, %v5621_v35  ;;  %v7278_v32 = vpack.c.bf16 %v5706_v5, %v5702_v43  ;;  %v5710_v49 = vld [vmem:[%s8621_s20 + $0x250] sm:$0xff] }
 0xbd1   : > { %5339 = vrot.lane.b32.xlu1 %v5338_v15, %s8007_s13  ;;  %v5737_v28 = vld [vmem:[%s8621_s20 + $0x328] sm:$0xff]  ;;  %v5732_v51 = vld [vmem:[%s8621_s20 + $0x300] sm:$0xff]  ;;  %v5711_v33 = vld [vmem:[%s8621_s20 + $0x258] sm:$0xff] }
 0xbd2   : > { %v5736_v29 = vld [vmem:[%s8621_s20 + $0x320] sm:$0xff]  ;;  %v5715_v23 = vld [vmem:[%s8621_s20 + $0x278] sm:$0xff]  ;;  %v7188_v8 = vpack.c.bf16 %v5737_v28, %v5733_v39  ;;  %7187 = vmatpush1.bf16.msra.mxu0 %v7186_v40  ;;  %7275 = vmatpush1.bf16.msra.mxu1 %v7274_v31  ;;  %v5741_v30 = vld [vmem:[%s8621_s20 + $0x348] sm:$0xff]  ;;  %v5630_v16 = vrot.slane %v5622_v59, %v11627_v63 }
 0xbd3   : > { %v5598_v55 = vld [vmem:[#allocation4 + $0x2f] ss:$52 sm:$0x3]  ;;  %v7190_v13 = vpack.c.bf16 %v5736_v29, %v5732_v51  ;;  %v5745_v36 = vld [vmem:[%s8621_s20 + $0x368] sm:$0xff]  ;;  %7277 = vmatprep.subr.bf16.mxu1 %v7276_v60  ;;  %v7280_v22 = vpack.c.bf16 %v5715_v23, %v5711_v33  ;;  %v5714_v57 = vld [vmem:[%s8621_s20 + $0x270] sm:$0xff] }
 0xbd4   : > { %5466 = vrot.lane.b32.xlu0 %v5465_v19, %s8007_s13  ;;  %7189 = vmatprep.subr.bf16.mxu0 %v7188_v8  ;;  %v5599_v24 = vmax.f32 %v5596_v48, %v5598_v55  ;;  %v7192_v61 = vpack.c.bf16 %v5745_v36, %v5741_v30  ;;  %v5740_v44 = vld [vmem:[%s8621_s20 + $0x340] sm:$0xff]  ;;  %v5719_v45 = vld [vmem:[%s8621_s20 + $0x298] sm:$0xff]  ;;  %v5749_v37 = vld [vmem:[%s8621_s20 + $0x388] sm:$0xff]  ;;  %v7282_v2 = vpack.c.bf16 %v5714_v57, %v5710_v49 }
 0xbd5   : > { %5591 = vrot.lane.b32.xlu1 %v5590_v47, %s8007_s13  ;;  %v5744_v7 = vld [vmem:[%s8621_s20 + $0x360] sm:$0xff]  ;;  %v5723_v50 = vld [vmem:[%s8621_s20 + $0x2b8] sm:$0xff]  ;;  %v5753_v27 = vld [vmem:[%s8621_s20 + $0x3a8] sm:$0xff] }
 0xbd6   : > { %7191 = vmatpush1.bf16.msra.mxu0 %v7190_v13  ;;  %v7194_v14 = vpack.c.bf16 %v5744_v7, %v5740_v44  ;;  %v5613_v1 = vld [vmem:[#allocation4 + $0x30] ss:$52 sm:$0x3]  ;;  %7279 = vmatpush1.bf16.msra.mxu1 %v7278_v32  ;;  %v5615_v21 = vld [vmem:[#allocation4 + $0x31] ss:$52 sm:$0x3]  ;;  %v5607_v26 = vrot.slane %v5599_v24, %v11627_v63  ;;  %v7284_v62 = vpack.c.bf16 %v5723_v50, %v5719_v45 }
 0xbd7   : > { %7193 = vmatprep.subr.bf16.mxu0 %v7192_v61  ;;  %v5748_v15 = vld [vmem:[%s8621_s20 + $0x380] sm:$0xff]  ;;  %7281 = vmatprep.subr.bf16.mxu1 %v7280_v22  ;;  %v5718_v17 = vld [vmem:[%s8621_s20 + $0x290] sm:$0xff]  ;;  %v5616_v4 = vmax.f32 %v5613_v1, %v5615_v21  ;;  %v7196_v41 = vpack.c.bf16 %v5753_v27, %v5749_v37  ;;  %v5727_v38 = vld [vmem:[%s8621_s20 + $0x2d8] sm:$0xff] }
 0xbd8   : > { %5357 = vrot.lane.b32.xlu0 %v5356_v12, %s8008_s8  ;;  %v5722_v18 = vld [vmem:[%s8621_s20 + $0x2b0] sm:$0xff]  ;;  %v5752_v6 = vld [vmem:[%s8621_s20 + $0x3a0] sm:$0xff]  ;;  %v5731_v46 = vld [vmem:[%s8621_s20 + $0x2f8] sm:$0xff] }
 0xbd9   : > { %5483 = vrot.lane.b32.xlu1 %v5482_v10, %s8008_s8  ;;  %5617 = vst.msk [vmem:[#allocation5 + $0x6] sm:$0x3] %vm5235_vm0, %v5616_v4  ;;  %v7198_v53 = vpack.c.bf16 %v5752_v6, %v5748_v15  ;;  %v5757_v42 = vld [vmem:[%s8621_s20 + $0x3c8] sm:$0xff]  ;;  %v7286_v11 = vpack.c.bf16 %v5722_v18, %v5718_v17  ;;  %v5756_v58 = vld [vmem:[%s8621_s20 + $0x3c0] sm:$0xff]  ;;  %v7288_v52 = vpack.c.bf16 %v5731_v46, %v5727_v38  ;;  %v5726_v25 = vld [vmem:[%s8621_s20 + $0x2d0] sm:$0xff] }
 0xbda   : > { %7195 = vmatpush1.bf16.msra.mxu0 %v7194_v14  ;;  %v5761_v9 = vld [vmem:[%s8621_s20 + $0x3e8] sm:$0xff]  ;;  %7283 = vmatpush1.bf16.msra.mxu1 %v7282_v2  ;;  %v5730_v54 = vld [vmem:[%s8621_s20 + $0x2f0] sm:$0xff]  ;;  %v5760_v35 = vld [vmem:[%s8621_s20 + $0x3e0] sm:$0xff] }
 0xbdb   : > { %7197 = vmatprep.subr.bf16.mxu0 %v7196_v41  ;;  %v7200_v3 = vpack.c.bf16 %v5761_v9, %v5757_v42  ;;  %7285 = vmatprep.subr.bf16.mxu1 %v7284_v62  ;;  %v5735_v40 = vld [vmem:[%s8621_s20 + $0x318] sm:$0xff]  ;;  %v5765_v56 = vld [vmem:[%s8621_s20 + $0x408] sm:$0xff]  ;;  %v7202_v48 = vpack.c.bf16 %v5760_v35, %v5756_v58  ;;  %v7290_v43 = vpack.c.bf16 %v5730_v54, %v5726_v25  ;;  %v5734_v19 = vld [vmem:[%s8621_s20 + $0x310] sm:$0xff] }
 0xbdc   : > { %5608 = vrot.lane.b32.xlu0 %v5607_v26, %s8008_s8  ;;  %v5739_v47 = vld [vmem:[%s8621_s20 + $0x338] sm:$0xff]  ;;  %v5769_v31 = vld [vmem:[%s8621_s20 + $0x428] sm:$0xff]  ;;  %v5738_v20 = vld [vmem:[%s8621_s20 + $0x330] sm:$0xff] }
 0xbdd   : > { %5631 = vrot.lane.b32.xlu1 %v5630_v16, %s8000_s6  ;;  %v7204_v5 = vpack.c.bf16 %v5769_v31, %v5765_v56  ;;  %v7292_v39 = vpack.c.bf16 %v5739_v47, %v5735_v40  ;;  %v5743_v60 = vld [vmem:[%s8621_s20 + $0x358] sm:$0xff]  ;;  %v7294_v51 = vpack.c.bf16 %v5738_v20, %v5734_v19  ;;  %v5742_v55 = vld [vmem:[%s8621_s20 + $0x350] sm:$0xff]  ;;  %v5764_v42 = vld [vmem:[%s8621_s20 + $0x400] sm:$0xff]  ;;  %s12063_s6 = sld [smem:[#allocation66_spill]] }
 0xbde   : > { %7199 = vmatpush1.bf16.msra.mxu0 %v7198_v53  ;;  %7287 = vmatpush1.bf16.msra.mxu1 %v7286_v11  ;;  %v5747_v28 = vld [vmem:[%s8621_s20 + $0x378] sm:$0xff]  ;;  %v5746_v33 = vld [vmem:[%s8621_s20 + $0x370] sm:$0xff]  ;;  %v5768_v9 = vld [vmem:[%s8621_s20 + $0x420] sm:$0xff] }
 0xbdf   : > { %7201 = vmatprep.subr.bf16.mxu0 %v7200_v3  ;;  %7289 = vmatprep.subr.bf16.mxu1 %v7288_v52  ;;  %v7296_v29 = vpack.c.bf16 %v5747_v28, %v5743_v60  ;;  %v5751_v23 = vld [vmem:[%s8621_s20 + $0x398] sm:$0xff]  ;;  %v7298_v13 = vpack.c.bf16 %v5746_v33, %v5742_v55  ;;  %v5750_v59 = vld [vmem:[%s8621_s20 + $0x390] sm:$0xff]  ;;  %v5773_v58 = vld [vmem:[%s8621_s20 + $0x448] sm:$0xff]  ;;  %v7206_v54 = vpack.c.bf16 %v5768_v9, %v5764_v42 }
 0xbe0   : > { %v5755_v8 = vld [vmem:[%s8621_s20 + $0x3b8] sm:$0xff]  ;;  %v5754_v32 = vld [vmem:[%s8621_s20 + $0x3b0] sm:$0xff]  ;;  %v5777_v52 = vld [vmem:[%s8621_s20 + $0x468] sm:$0xff] }
 0xbe1   : > { %v7300_v10 = vpack.c.bf16 %v5755_v8, %v5751_v23  ;;  %v5759_v49 = vld [vmem:[%s8621_s20 + $0x3d8] sm:$0xff]  ;;  %v7302_v36 = vpack.c.bf16 %v5754_v32, %v5750_v59  ;;  %v5758_v24 = vld [vmem:[%s8621_s20 + $0x3d0] sm:$0xff]  ;;  %v7208_v40 = vpack.c.bf16 %v5777_v52, %v5773_v58  ;;  %v5772_v47 = vld [vmem:[%s8621_s20 + $0x440] sm:$0xff] }
 0xbe2   : > { %7203 = vmatpush1.bf16.msra.mxu0 %v7202_v48  ;;  %7291 = vmatpush1.bf16.msra.mxu1 %v7290_v43  ;;  %v5763_v30 = vld [vmem:[%s8621_s20 + $0x3f8] sm:$0xff]  ;;  %v5762_v22 = vld [vmem:[%s8621_s20 + $0x3f0] sm:$0xff]  ;;  %v5776_v56 = vld [vmem:[%s8621_s20 + $0x460] sm:$0xff] }
 0xbe3   : > { %7205 = vmatprep.subr.bf16.mxu0 %v7204_v5  ;;  %7293 = vmatprep.subr.bf16.mxu1 %v7292_v39  ;;  %v7304_v12 = vpack.c.bf16 %v5763_v30, %v5759_v49  ;;  %v7306_v57 = vpack.c.bf16 %v5762_v22, %v5758_v24  ;;  %v5781_v31 = vld [vmem:[%s8621_s20 + $0x488] sm:$0xff]  ;;  %v7210_v5 = vpack.c.bf16 %v5776_v56, %v5772_v47  ;;  %v5780_v19 = vld [vmem:[%s8621_s20 + $0x480] sm:$0xff]  ;;  %v5767_v42 = vld [vmem:[%s8621_s20 + $0x418] sm:$0xff]  ;;  %s1147_s0 = scalar_lea.vmem %s12063_s6, %s6596_s9 }
 0xbe4   : > { %v5785_v43 = vld [vmem:[%s8621_s20 + $0x4a8] sm:$0xff]  ;;  %v5784_v20 = vld [vmem:[%s8621_s20 + $0x4a0] sm:$0xff]  ;;  %v5771_v9 = vld [vmem:[%s8621_s20 + $0x438] sm:$0xff] }
 0xbe5   : > { %v7212_v39 = vpack.c.bf16 %v5785_v43, %v5781_v31  ;;  %v5789_v60 = vld [vmem:[%s8621_s20 + $0x4c8] sm:$0xff]  ;;  %v5788_v55 = vld [vmem:[%s8621_s20 + $0x4c0] sm:$0xff]  ;;  %v5766_v58 = vld [vmem:[%s8621_s20 + $0x410] sm:$0xff] }
 0xbe6   : > { %7295 = vmatpush1.bf16.msra.mxu1 %v7294_v51  ;;  %v5793_v28 = vld [vmem:[%s8621_s20 + $0x4e8] sm:$0xff]  ;;  %v7214_v51 = vpack.c.bf16 %v5784_v20, %v5780_v19  ;;  %v5792_v33 = vld [vmem:[%s8621_s20 + $0x4e0] sm:$0xff]  ;;  %v5770_v52 = vld [vmem:[%s8621_s20 + $0x430] sm:$0xff] }
 0xbe7   : > { %7297 = vmatprep.subr.bf16.mxu1 %v7296_v29  ;;  %v7216_v29 = vpack.c.bf16 %v5793_v28, %v5789_v60  ;;  %v5797_v23 = vld [vmem:[%s8621_s20 + $0x508] sm:$0xff]  ;;  %v5796_v59 = vld [vmem:[%s8621_s20 + $0x500] sm:$0xff]  ;;  %v5774_v56 = vld [vmem:[%s8621_s20 + $0x450] sm:$0xff] }
 0xbe8   : > { %v5801_v8 = vld [vmem:[%s8621_s20 + $0x528] sm:$0xff]  ;;  %v5800_v32 = vld [vmem:[%s8621_s20 + $0x520] sm:$0xff]  ;;  %v5778_v31 = vld [vmem:[%s8621_s20 + $0x470] sm:$0xff] }
 0xbe9   : > { %v5805_v49 = vld [vmem:[%s8621_s20 + $0x548] sm:$0xff]  ;;  %v5804_v24 = vld [vmem:[%s8621_s20 + $0x540] sm:$0xff]  ;;  %v5783_v43 = vld [vmem:[%s8621_s20 + $0x498] sm:$0xff] }
 0xbea   : > { %7299 = vmatpush1.bf16.msra.mxu1 %v7298_v13  ;;  %v7218_v13 = vpack.c.bf16 %v5792_v33, %v5788_v55  ;;  %v5809_v30 = vld [vmem:[%s8621_s20 + $0x568] sm:$0xff]  ;;  %v5808_v22 = vld [vmem:[%s8621_s20 + $0x560] sm:$0xff]  ;;  %v5782_v20 = vld [vmem:[%s8621_s20 + $0x490] sm:$0xff] }
 0xbeb   : > { %7301 = vmatprep.subr.bf16.mxu1 %v7300_v10  ;;  %v7220_v10 = vpack.c.bf16 %v5801_v8, %v5797_v23  ;;  %v5786_v60 = vld [vmem:[%s8621_s20 + $0x4b0] sm:$0xff]  ;;  %v5791_v28 = vld [vmem:[%s8621_s20 + $0x4d8] sm:$0xff] }
 0xbec   : > { %v5790_v33 = vld [vmem:[%s8621_s20 + $0x4d0] sm:$0xff]  ;;  %v5803_v8 = vld [vmem:[%s8621_s20 + $0x538] sm:$0xff] }
 0xbed   : > { %v5794_v23 = vld [vmem:[%s8621_s20 + $0x4f0] sm:$0xff] }
 0xbee   : > { %7303 = vmatpush1.bf16.msra.mxu1 %v7302_v36  ;;  %v7222_v36 = vpack.c.bf16 %v5800_v32, %v5796_v59  ;;  %v5798_v59 = vld [vmem:[%s8621_s20 + $0x510] sm:$0xff] }
 0xbef   : > { %7305 = vmatprep.subr.bf16.mxu1 %v7304_v12  ;;  %v7224_v12 = vpack.c.bf16 %v5809_v30, %v5805_v49  ;;  %v5802_v32 = vld [vmem:[%s8621_s20 + $0x530] sm:$0xff]  ;;  %v5807_v49 = vld [vmem:[%s8621_s20 + $0x558] sm:$0xff] }
 0xbf0   : > { %v5811_v30 = vld [vmem:[%s8621_s20 + $0x578] sm:$0xff] }
 0xbf2   : > { %7307 = vmatpush1.bf16.msra.mxu1 %v7306_v57  ;;  %v5813_v57 = vld [vmem:[%s8621_s20 + $0x588] sm:$0xff] }
 0xc26   : > { %v5251_v44 = vpop.permute.xlu0 %5250 }
 0xc27   : > { %v5382_v61 = vpop.permute.xlu1 %5381  ;;  %5254 = vst.msk [vmem:[#allocation5] sm:$0x3] %vm5253_vm13, %v5251_v44  ;;  %v7226_v44 = vpack.c.bf16 %v5808_v22, %v5804_v24  ;;  %v5806_v24 = vld [vmem:[%s8621_s20 + $0x550] sm:$0xff] }
 0xc28   : > { %5384 = vst.msk [vmem:[#allocation5 + $0x2] sm:$0x3] %vm5253_vm13, %v5382_v61  ;;  %v5817_v61 = vld [vmem:[%s8621_s20 + $0x5a8] sm:$0xff]  ;;  %v5810_v22 = vld [vmem:[%s8621_s20 + $0x570] sm:$0xff] }
 0xc2a   : > { %v5507_v45 = vpop.permute.xlu0 %5506 }
 0xc2b   : > { %v5269_v7 = vpop.permute.xlu1 %5268  ;;  %5509 = vst.msk [vmem:[#allocation5 + $0x4] sm:$0x3] %vm5253_vm13, %v5507_v45  ;;  %v5812_v45 = vld [vmem:[%s8621_s20 + $0x580] sm:$0xff] }
 0xc2c   : > { %5271 = vst.msk [vmem:[#allocation5] sm:$0x3] %vm2817_vm12, %v5269_v7  ;;  %v7228_v7 = vpack.c.bf16 %v5817_v61, %v5813_v57  ;;  %v5815_v57 = vld [vmem:[%s8621_s20 + $0x598] sm:$0xff] }
 0xc2d   : > { %v5819_v61 = vld [vmem:[%s8621_s20 + $0x5b8] sm:$0xff] }
 0xc2e   : > { %v5399_v14 = vpop.permute.xlu0 %5398 }
 0xc2f   : > { %v5524_v50 = vpop.permute.xlu1 %5523  ;;  %5401 = vst.msk [vmem:[#allocation5 + $0x2] sm:$0x3] %vm2817_vm12, %v5399_v14  ;;  %v5821_v14 = vld [vmem:[%s8621_s20 + $0x5c8] sm:$0xff] }
 0xc30   : > { %5526 = vst.msk [vmem:[#allocation5 + $0x4] sm:$0x3] %vm2817_vm12, %v5524_v50  ;;  %v5816_v50 = vld [vmem:[%s8621_s20 + $0x5a0] sm:$0xff] }
 0xc32   : > { %v5286_v37 = vpop.permute.xlu0 %5285 }
 0xc33   : > { %v5416_v1 = vpop.permute.xlu1 %5415  ;;  %5289 = vst.msk [vmem:[#allocation5] sm:$0x3] %vm5288_vm1, %v5286_v37  ;;  %v7230_v37 = vpack.c.bf16 %v5816_v50, %v5812_v45  ;;  %v5814_v45 = vld [vmem:[%s8621_s20 + $0x590] sm:$0xff] }
 0xc34   : > { %5418 = vst.msk [vmem:[#allocation5 + $0x2] sm:$0x3] %vm5288_vm1, %v5416_v1  ;;  %v5825_v1 = vld [vmem:[%s8621_s20 + $0x5e8] sm:$0xff]  ;;  %v5818_v50 = vld [vmem:[%s8621_s20 + $0x5b0] sm:$0xff] }
 0xc36   : > { %v5541_v2 = vpop.permute.xlu0 %5540 }
 0xc37   : > { %v5304_v16 = vpop.permute.xlu1 %5303  ;;  %5543 = vst.msk [vmem:[#allocation5 + $0x4] sm:$0x3] %vm5288_vm1, %v5541_v2  ;;  %v5820_v2 = vld [vmem:[%s8621_s20 + $0x5c0] sm:$0xff] }
 0xc38   : > { %5307 = vst.msk [vmem:[#allocation5] sm:$0x3] %vm5306_vm4, %v5304_v16  ;;  %v7232_v16 = vpack.c.bf16 %v5825_v1, %v5821_v14  ;;  %v5823_v14 = vld [vmem:[%s8621_s20 + $0x5d8] sm:$0xff] }
 0xc39   : > { %v5827_v1 = vld [vmem:[%s8621_s20 + $0x5f8] sm:$0xff] }
 0xc3a   : > { %v5433_v27 = vpop.permute.xlu0 %5432 }
 0xc3b   : > { %v5558_v21 = vpop.permute.xlu1 %5557  ;;  %5435 = vst.msk [vmem:[#allocation5 + $0x2] sm:$0x3] %vm5306_vm4, %v5433_v27  ;;  %v5829_v27 = vld [vmem:[%s8621_s20 + $0x608] sm:$0xff] }
 0xc3c   : > { %5560 = vst.msk [vmem:[#allocation5 + $0x4] sm:$0x3] %vm5306_vm4, %v5558_v21  ;;  %v5824_v21 = vld [vmem:[%s8621_s20 + $0x5e0] sm:$0xff] }
 0xc3e   : > { %v5322_v26 = vpop.permute.xlu0 %5321 }
 0xc3f   : > { %v5450_v15 = vpop.permute.xlu1 %5449  ;;  %5325 = vst.msk [vmem:[#allocation5] sm:$0x3] %vm5324_vm5, %v5322_v26  ;;  %v7234_v26 = vpack.c.bf16 %v5824_v21, %v5820_v2  ;;  %v5822_v2 = vld [vmem:[%s8621_s20 + $0x5d0] sm:$0xff] }
 0xc40   : > { %5452 = vst.msk [vmem:[#allocation5 + $0x2] sm:$0x3] %vm5324_vm5, %v5450_v15  ;;  %v5833_v15 = vld [vmem:[%s8621_s20 + $0x628] sm:$0xff]  ;;  %v5826_v21 = vld [vmem:[%s8621_s20 + $0x5f0] sm:$0xff] }
 0xc42   : > { %v5575_v17 = vpop.permute.xlu0 %5574 }
 0xc43   : > { %v5340_v62 = vpop.permute.xlu1 %5339  ;;  %5577 = vst.msk [vmem:[#allocation5 + $0x4] sm:$0x3] %vm5324_vm5, %v5575_v17  ;;  %v5828_v17 = vld [vmem:[%s8621_s20 + $0x600] sm:$0xff] }
 0xc44   : > { %5343 = vst.msk [vmem:[#allocation5] sm:$0x3] %vm5342_vm8, %v5340_v62  ;;  %v7236_v62 = vpack.c.bf16 %v5833_v15, %v5829_v27  ;;  %v5831_v27 = vld [vmem:[%s8621_s20 + $0x618] sm:$0xff] }
 0xc45   : > { %v5835_v15 = vld [vmem:[%s8621_s20 + $0x638] sm:$0xff] }
 0xc46   : > { %v5467_v4 = vpop.permute.xlu0 %5466 }
 0xc47   : > { %v5592_v18 = vpop.permute.xlu1 %5591  ;;  %5469 = vst.msk [vmem:[#allocation5 + $0x2] sm:$0x3] %vm5342_vm8, %v5467_v4  ;;  %v5837_v4 = vld [vmem:[%s8621_s20 + $0x648] sm:$0xff] }
 0xc48   : > { %5594 = vst.msk [vmem:[#allocation5 + $0x4] sm:$0x3] %vm5342_vm8, %v5592_v18  ;;  %v5832_v18 = vld [vmem:[%s8621_s20 + $0x620] sm:$0xff] }
 0xc4a   : > { %v5358_v6 = vpop.permute.xlu0 %5357 }
 0xc4b   : > { %v5484_v41 = vpop.permute.xlu1 %5483  ;;  %5361 = vst.msk [vmem:[#allocation5] sm:$0x3] %vm5360_vm9, %v5358_v6  ;;  %v7238_v6 = vpack.c.bf16 %v5832_v18, %v5828_v17  ;;  %v5830_v17 = vld [vmem:[%s8621_s20 + $0x610] sm:$0xff] }
 0xc4c   : > { %5486 = vst.msk [vmem:[#allocation5 + $0x2] sm:$0x3] %vm5360_vm9, %v5484_v41  ;;  %v5841_v41 = vld [vmem:[%s8621_s20 + $0x668] sm:$0xff]  ;;  %v5834_v18 = vld [vmem:[%s8621_s20 + $0x630] sm:$0xff] }
 0xc4e   : > { %v5609_v46 = vpop.permute.xlu0 %5608 }
 0xc4f   : > { %v5632_v38 = vpop.permute.xlu1 %5631  ;;  %5611 = vst.msk [vmem:[#allocation5 + $0x4] sm:$0x3] %vm5360_vm9, %v5609_v46  ;;  %v5836_v46 = vld [vmem:[%s8621_s20 + $0x640] sm:$0xff] }
 0xc50   : > { %5634 = vst.msk [vmem:[#allocation5 + $0x6] sm:$0x3] %vm5253_vm13, %v5632_v38  ;;  %v7240_v38 = vpack.c.bf16 %v5841_v41, %v5837_v4  ;;  %v5839_v4 = vld [vmem:[%s8621_s20 + $0x658] sm:$0xff] }
 0xc51   : > { %v5843_v41 = vld [vmem:[%s8621_s20 + $0x678] sm:$0xff] }
 0xc57   : > { %v5635_v53 = vld [vmem:[#allocation5] sm:$0xff] }
 0xc58   : > { %v5867_v11 = vcombine.high %v5635_v53, %v5635_v53  ;;  %v5874_v3 = vrot.slane %v5635_v53, %v11627_v63  ;;  %v5840_v53 = vld [vmem:[%s8621_s20 + $0x660] sm:$0xff] }
 0xc5a   : > { %v5882_v25 = vcombine.high %v5874_v3, %v5874_v3  ;;  %v11782_v35 = vrot.slane %v5867_v11, %v11627_v63  ;;  %v7242_v11 = vpack.c.bf16 %v5840_v53, %v5836_v46  ;;  %v5838_v46 = vld [vmem:[%s8621_s20 + $0x650] sm:$0xff] }
 0xc5b   : > { %v5842_v53 = vld [vmem:[%s8621_s20 + $0x670] sm:$0xff] }
 0xc5c   : > { %5954 = vmatprep.mubr.f32.mxu0 %v5882_v25  ;;  %6096 = vmatprep.mubr.f32.mxu1 %v5882_v25  ;;  %v11788_v48 = vcombine.high %v11782_v35, %v11782_v35  ;;  %v5775_v25 = vld [vmem:[%s8621_s20 + $0x458] sm:$0xff] }
 0xc5d   : > { %5955 = vmatmul.mubr.f32.vlgmr.msra.gmra.mrb[50].mxu0 %v5874_v3  ;;  %6097 = vmatmul.mubr.f32.vlgmr.msra.gmra.mrb[82].mxu1 %v5874_v3  ;;  %v7308_v3 = vpack.c.bf16 %v5771_v9, %v5767_v42  ;;  %v7346_v42 = vpack.c.bf16 %v5842_v53, %v5838_v46 }
 0xc5e   : > { %7207 = vmatpush1.bf16.msra.mxu0 %v7206_v54  ;;  %6699 = vmatprep.mubr.msk.f32.mxu0 %vm5887_vm10, %v11788_v48  ;;  %v5779_v54 = vld [vmem:[%s8621_s20 + $0x478] sm:$0xff] }
 0xc5f   : > { %7209 = vmatprep.subr.bf16.mxu0 %v7208_v40  ;;  %v7310_v40 = vpack.c.bf16 %v5770_v52, %v5766_v58  ;;  %v7312_v47 = vpack.c.bf16 %v5779_v54, %v5775_v25  ;;  %v5844_v58 = vld [vmem:[%s8624_s3] sm:$0xf] }
 0xc60   : > { %v5849_v52 = vrot.slane %v5844_v58, %v9769_v34 }
 0xc62   : > { %7211 = vmatpush1.bf16.msra.mxu0 %v7210_v5  ;;  %v5787_v5 = vld [vmem:[%s8621_s20 + $0x4b8] sm:$0xff] }
 0xc63   : > { %7213 = vmatprep.subr.bf16.mxu0 %v7212_v39  ;;  %v7314_v39 = vpack.c.bf16 %v5778_v31, %v5774_v56  ;;  %v7316_v19 = vpack.c.bf16 %v5787_v5, %v5783_v43 }
 0xc66   : > { %7215 = vmatpush1.bf16.msra.mxu0 %v7214_v51  ;;  %v5795_v51 = vld [vmem:[%s8621_s20 + $0x4f8] sm:$0xff] }
 0xc67   : > { %7217 = vmatprep.subr.bf16.mxu0 %v7216_v29  ;;  %v7318_v29 = vpack.c.bf16 %v5786_v60, %v5782_v20  ;;  %v7320_v55 = vpack.c.bf16 %v5795_v51, %v5791_v28 }
 0xc6a   : > { %7219 = vmatpush1.bf16.msra.mxu0 %v7218_v13  ;;  %v7322_v13 = vpack.c.bf16 %v5794_v23, %v5790_v33 }
 0xc6b   : > { %7221 = vmatprep.subr.bf16.mxu0 %v7220_v10 }
 0xc6e   : > { %7223 = vmatpush1.bf16.msra.mxu0 %v7222_v36  ;;  %v7326_v36 = vpack.c.bf16 %v5802_v32, %v5798_v59 }
 0xc6f   : > { %7225 = vmatprep.subr.bf16.mxu0 %v7224_v12  ;;  %v7328_v12 = vpack.c.bf16 %v5811_v30, %v5807_v49 }
 0xc72   : > { %7227 = vmatpush1.bf16.msra.mxu0 %v7226_v44  ;;  %v7330_v44 = vpack.c.bf16 %v5810_v22, %v5806_v24 }
 0xc73   : > { %7229 = vmatprep.subr.bf16.mxu0 %v7228_v7  ;;  %v7332_v7 = vpack.c.bf16 %v5819_v61, %v5815_v57 }
 0xc76   : > { %7231 = vmatpush1.bf16.msra.mxu0 %v7230_v37  ;;  %v7334_v37 = vpack.c.bf16 %v5818_v50, %v5814_v45 }
 0xc77   : > { %7233 = vmatprep.subr.bf16.mxu0 %v7232_v16  ;;  %v7336_v16 = vpack.c.bf16 %v5827_v1, %v5823_v14 }
 0xc7a   : > { %7235 = vmatpush1.bf16.msra.mxu0 %v7234_v26  ;;  %v7338_v26 = vpack.c.bf16 %v5826_v21, %v5822_v2 }
 0xc7b   : > { %7237 = vmatprep.subr.bf16.mxu0 %v7236_v62  ;;  %v7340_v62 = vpack.c.bf16 %v5835_v15, %v5831_v27 }
 0xc7e   : > { %7239 = vmatpush1.bf16.msra.mxu0 %v7238_v6  ;;  %v7342_v6 = vpack.c.bf16 %v5834_v18, %v5830_v17 }
 0xc7f   : > { %7241 = vmatprep.subr.bf16.mxu0 %v7240_v38  ;;  %v7344_v38 = vpack.c.bf16 %v5843_v41, %v5839_v4 }
 0xc82   : > { %7243 = vmatpush1.bf16.msra.mxu0 %v7242_v11 }
 0xc83   : > { %7309 = vmatprep.subr.bf16.mxu0 %v7308_v3  ;;  %v5852_v3 = vsub.s32 1, %v9764_v0 }
 0xc85   : > { %6026 = vmatmul.mubr.f32.vlgmr.msra.gmra.mrb[50].mxu0 %v11782_v35  ;;  %v5853_v25 = vrot.slane %v5844_v58, %v5852_v3 }
 0xc86   : > { %7311 = vmatpush1.bf16.msra.mxu0 %v7310_v40  ;;  %6700 = vmatprep.mubr.msk.f32.mxu0 %vm5887_vm10, %v11788_v48  ;;  %v5799_v48 = vld [vmem:[%s8621_s20 + $0x518] sm:$0xff] }
 0xc87   : > { %7313 = vmatprep.subr.bf16.mxu0 %v7312_v47  ;;  %v7324_v10 = vpack.c.bf16 %v5803_v8, %v5799_v48 }
 0xc8a   : > { %7315 = vmatpush1.bf16.msra.mxu0 %v7314_v39  ;;  %v5856_v39 = vsub.s32 2, %v9764_v0 }
 0xc8b   : > { %7317 = vmatprep.subr.bf16.mxu0 %v7316_v19 }
 0xc8c   : > { %v5857_v19 = vrot.slane %v5844_v58, %v5856_v39 }
 0xc8e   : > { %7319 = vmatpush1.bf16.msra.mxu0 %v7318_v29 }
 0xc8f   : > { %7321 = vmatprep.subr.bf16.mxu0 %v7320_v55 }
 0xc92   : > { %7323 = vmatpush1.bf16.msra.mxu0 %v7322_v13 }
 0xc93   : > { %7325 = vmatprep.subr.bf16.mxu0 %v7324_v10 }
 0xc96   : > { %7327 = vmatpush1.bf16.msra.mxu0 %v7326_v36 }
 0xc97   : > { %7329 = vmatprep.subr.bf16.mxu0 %v7328_v12 }
 0xc9a   : > { %7331 = vmatpush1.bf16.msra.mxu0 %v7330_v44 }
 0xc9b   : > { %7333 = vmatprep.subr.bf16.mxu0 %v7332_v7 }
 0xc9e   : > { %7335 = vmatpush1.bf16.msra.mxu0 %v7334_v37 }
 0xc9f   : > { %7337 = vmatprep.subr.bf16.mxu0 %v7336_v16 }
 0xca2   : > { %7339 = vmatpush1.bf16.msra.mxu0 %v7338_v26 }
 0xca3   : > { %7341 = vmatprep.subr.bf16.mxu0 %v7340_v62 }
 0xca6   : > { %7343 = vmatpush1.bf16.msra.mxu0 %v7342_v6 }
 0xca7   : > { %7345 = vmatprep.subr.bf16.mxu0 %v7344_v38 }
 0xcaa   : > { %7347 = vmatpush1.bf16.msra.mxu0 %v7346_v42 }
 0xcad   : > { %6168 = vmatmul.mubr.f32.vlgmr.msra.gmra.mrb[52].mxu0 %v11782_v35  ;;  %v5860_v35 = vsub.s32 3, %v9764_v0 }
 0xcaf   : > { %v5861_v20 = vrot.slane %v5844_v58, %v5860_v35 }
 0xd30   : > { %v6098_v9 = vpop.f32.mrb[82].mxu1 }
 0xd31   : > { %v6100_v11 = vpop.f32.mrb[83].mxu1  ;;  %v6099_v60 = vadd.f32 %v6098_v9, %v5857_v19 }
 0xd32   : > { %v6101_v28 = vadd.f32 %v6100_v11, %v5861_v20 }
 0xd58   : > { %v6027_v54 = vpop.f32.mrb[50].mxu0 }
 0xd59   : > { %v7350_v40 = vadd.f32 %v6027_v54, %v5849_v52  ;;  %v6029_v47 = vpop.f32.mrb[51].mxu0 }
 0xd5a   : > { %v7351_v56 = vadd.f32 %v6029_v47, %v5853_v25 }
 0xd5b   : > { %v6174_v31 = vmax.f32 %v7350_v40, 0.0 }
 0xd5c   : > { %v6175_v43 = vmax.f32 %v7351_v56, 0.0 }
 0xd5e   : > { %v6182_v5 = vcombine.low %v6174_v31, %v6175_v43 }
 0xd60   : > { %v6190_v8 = vrot.slane %v6182_v5, %v11627_v63 }
 0xd80   : > { %v6169_v51 = vpop.f32.mrb[52].mxu0 }
 0xd81   : > { %v6170_v29 = vadd.f32 %v6169_v51, %v6099_v60  ;;  %v6171_v34 = vpop.f32.mrb[53].mxu0 }
 0xd82   : > { %v6172_v55 = vadd.f32 %v6171_v34, %v6101_v28 }
 0xd83   : > { %v6176_v33 = vmax.f32 %v6170_v29, 0.0 }
 0xd84   : > { %v6177_v23 = vmax.f32 %v6172_v55, 0.0 }
 0xd86   : > { %v6183_v48 = vcombine.low %v6176_v33, %v6177_v23 }
 0xd88   : > { %v6197_v13 = vrot.slane %v6183_v48, %v11627_v63 }
 0xd8a   : > { %v6198_v0 = vcombine.low %v6190_v8, %v6197_v13 }
 0xd8c   : > { %6200 = vst [vmem:[%s1147_s0] sm:$0xff] %v6198_v0 }
 0xd8d PF: > { %s12064_s21 = sld [smem:[#allocation38_spill]]  ;;  %s12065_s16 = sld [smem:[#allocation36_spill]] }
 0xd8e   : > { %s12066_s20 = sld [smem:[#allocation39_spill]]  ;;  %s12067_s0 = smov %s7967_s30 }
 0xd93   : > { %p50_p6 = scmp.ge.s32.totalorder %s12064_s21, 4   ;;  %s12068_s30 = smov %s12065_s16 }
 0xd95   :  { %52 = sbr.rel (!%p50_p6) target bundleno = 31 (0x1f), region = 388 }
 0xd9c   :  { %6222 = vsyncpa [#allocation7], 1 }
 0xd9d   :  { %6224 = vsyncpa [#allocation7 + $0x1], 1 }
 0xd9e   :  { %6225 = vsyncpa [#allocation9], 1 }
 0xd9f   :  { %6227 = vsyncpa [#allocation9 + $0x1], 1 }
 0xda0   :  { %6228 = vsyncpa [#allocation12], 1 }
 0xda1   :  { %6230 = vsyncpa [#allocation12 + $0x1], 1 }
 0xda2   :  { %6231 = vsyncpa [#allocation15], 1 }
 0xda3   :  { %6233 = vsyncpa [#allocation15 + $0x1], 1 }
 0xda4   :  { %6234 = vsyncpa [#allocation18], 1 }
 0xda5   :  { %6236 = vsyncpa [#allocation18 + $0x1], 1 }
 0xda6   :  { %6237 = vsyncpa [#allocation21], 1 }
 0xda7   :  { %6239 = vsyncpa [#allocation21 + $0x1], 1 }
 0xda8   :  { %6240 = vsyncpa [#allocation24], 1 }
 0xda9   :  { %6242 = vsyncpa [#allocation24 + $0x1], 1 }
 0xdaa   :  { %6243 = vsyncpa [#allocation27], 1 }
 0xdab   :  { %6245 = vsyncpa [#allocation27 + $0x1], 1 }

</bundles_post_ra>
